<compile_context>
chip_gen: v7x
topology: tpu7x:2x2x1
jax: 0.10.0
libtpu: 0.0.40
codegen_flags: <defaults>
</compile_context>

<pallas_src>
import functools

import jax
import jax.numpy as jnp
from jax.experimental import pallas as pl
from jax.experimental.pallas import tpu as pltpu

BN_EPS = 1e-5
LANE = 128
VMEM_LIMIT = 48 * 1024 * 1024   # within v7x's 64 MiB physical, above defaults


def _round_up(x, m):
    return ((x + m - 1) // m) * m


# ----------------------------------------------------------------------------
# Shared conv core: 3x3 conv as 9 shifted MXU matmuls over a halo-padded
# (H+2, W+2, Cin_p) frame ref, f32 accumulation.
# ----------------------------------------------------------------------------
def _accumulate_taps(frame_ref, w_ref, H, W, cout):
    cin = frame_ref.shape[-1]
    acc = jnp.zeros((H * W, cout), jnp.float32)
    for dh in range(3):
        for dw in range(3):
            xs = frame_ref[dh:dh + H, dw:dw + W, :].reshape(H * W, cin)
            acc = acc + jnp.dot(xs, w_ref[dh, dw, :, :],
                                preferred_element_type=jnp.float32)
    return acc


def _finalize_conv(y, y_ref, sum_ref, ssq_ref):
    y_ref[...] = y.astype(y_ref.dtype)
    sum_ref[...] = jnp.sum(y, axis=0, keepdims=True)       # per-sample partials
    ssq_ref[...] = jnp.sum(y * y, axis=0, keepdims=True)


# ----------------------------------------------------------------------------
# K1: plain 3x3 conv + bias, fused per-sample BN statistics.
#     Grid = (N,), one padded image per step, "parallel".
# ----------------------------------------------------------------------------
def conv3x3_kernel(x_ref, w_ref, b_ref, y_ref, sum_ref, ssq_ref, *, H, W):
    # x_ref : (H+2, W+2, Cin_p) bf16 (batch dim squeezed)
    # w_ref : (3, 3, Cin_p, Cout_p) bf16 ; b_ref: (1, Cout_p) f32
    y = _accumulate_taps(x_ref, w_ref, H, W, y_ref.shape[-1]) + b_ref[...]
    _finalize_conv(y, y_ref, sum_ref, ssq_ref)


def conv3x3_bn_stats(x_pad, w_k, b_row, *, H, W):
    N = x_pad.shape[0]
    cin_p = x_pad.shape[-1]
    cout_p = w_k.shape[-1]
    HW = H * W
    kernel = functools.partial(conv3x3_kernel, H=H, W=W)
    return pl.pallas_call(
        kernel,
        out_shape=(jax.ShapeDtypeStruct((N, HW, cout_p), jnp.bfloat16),
                   jax.ShapeDtypeStruct((N, 1, cout_p), jnp.float32),
                   jax.ShapeDtypeStruct((N, 1, cout_p), jnp.float32)),
        grid_spec=pltpu.PrefetchScalarGridSpec(
            num_scalar_prefetch=0,
            grid=(N,),
            in_specs=[pl.BlockSpec((None, H + 2, W + 2, cin_p),
                                   lambda n: (n, 0, 0, 0)),
                      pl.BlockSpec((3, 3, cin_p, cout_p),
                                   lambda n: (0, 0, 0, 0)),
                      pl.BlockSpec((1, cout_p), lambda n: (0, 0))],
            out_specs=(pl.BlockSpec((None, HW, cout_p), lambda n: (n, 0, 0)),
                       pl.BlockSpec((None, 1, cout_p), lambda n: (n, 0, 0)),
                       pl.BlockSpec((None, 1, cout_p), lambda n: (n, 0, 0)))),
        compiler_params=pltpu.CompilerParams(
            dimension_semantics=("parallel",),
            vmem_limit_bytes=VMEM_LIMIT),
    )(x_pad, w_k, b_row)


# ----------------------------------------------------------------------------
# K2: fused [folded-BN1 + SiLU + embedding add + halo mask] -> 3x3 conv + bias,
#     fused per-sample BN2 statistics.  Consumes the RAW conv1 output frame
#     (halo-padded with zeros); the pre-activation is applied in-register and
#     the halo is re-zeroed with an iota mask before the matmuls.
# ----------------------------------------------------------------------------
def preact_conv3x3_kernel(x_ref, scale_ref, shift_ref, emb_ref, w_ref, b_ref,
                          y_ref, sum_ref, ssq_ref, zf_ref, *, H, W):
    # x_ref : (H+2, W+2, Cp) bf16 raw conv1 output, zero halo
    # scale/shift: (1, Cp) f32 folded BN1 ; emb: (1, Cp) f32 per-sample
    # zf_ref: (H+2, W+2, Cp) bf16 VMEM scratch for the activated frame
    cp = x_ref.shape[-1]
    Hp, Wp = H + 2, W + 2
    scale = scale_ref[...].reshape(1, 1, cp)
    shift = shift_ref[...].reshape(1, 1, cp)
    emb = emb_ref[...].reshape(1, 1, cp)

    v = x_ref[...].astype(jnp.float32) * scale + shift
    v = v * jax.nn.sigmoid(v) + emb                         # silu(bn(y1)) + emb
    # conv "SAME" padding needs zeros in the halo ring of the *activated* input
    row = jax.lax.broadcasted_iota(jnp.int32, (Hp, Wp, cp), 0)
    col = jax.lax.broadcasted_iota(jnp.int32, (Hp, Wp, cp), 1)
    interior = (row >= 1) & (row <= H) & (col >= 1) & (col <= W)
    zf_ref[...] = jnp.where(interior, v, 0.0).astype(zf_ref.dtype)

    y = _accumulate_taps(zf_ref, w_ref, H, W, y_ref.shape[-1]) + b_ref[...]
    _finalize_conv(y, y_ref, sum_ref, ssq_ref)


def preact_conv3x3_bn_stats(y1_pad, scale, shift, emb, w_k, b_row, *, H, W):
    N = y1_pad.shape[0]
    cp = y1_pad.shape[-1]
    cout_p = w_k.shape[-1]
    HW = H * W
    kernel = functools.partial(preact_conv3x3_kernel, H=H, W=W)
    return pl.pallas_call(
        kernel,
        out_shape=(jax.ShapeDtypeStruct((N, HW, cout_p), jnp.bfloat16),
                   jax.ShapeDtypeStruct((N, 1, cout_p), jnp.float32),
                   jax.ShapeDtypeStruct((N, 1, cout_p), jnp.float32)),
        grid_spec=pltpu.PrefetchScalarGridSpec(
            num_scalar_prefetch=0,
            grid=(N,),
            in_specs=[pl.BlockSpec((None, H + 2, W + 2, cp),
                                   lambda n: (n, 0, 0, 0)),
                      pl.BlockSpec((1, cp), lambda n: (0, 0)),
                      pl.BlockSpec((1, cp), lambda n: (0, 0)),
                      pl.BlockSpec((None, 1, cp), lambda n: (n, 0, 0)),
                      pl.BlockSpec((3, 3, cp, cout_p),
                                   lambda n: (0, 0, 0, 0)),
                      pl.BlockSpec((1, cout_p), lambda n: (0, 0))],
            out_specs=(pl.BlockSpec((None, HW, cout_p), lambda n: (n, 0, 0)),
                       pl.BlockSpec((None, 1, cout_p), lambda n: (n, 0, 0)),
                       pl.BlockSpec((None, 1, cout_p), lambda n: (n, 0, 0))),
            scratch_shapes=[pltpu.VMEM((H + 2, W + 2, cp), jnp.bfloat16)]),
        compiler_params=pltpu.CompilerParams(
            dimension_semantics=("parallel",),
            vmem_limit_bytes=VMEM_LIMIT),
    )(y1_pad, scale, shift, emb, w_k, b_row)


# ----------------------------------------------------------------------------
# K3: folded BatchNorm (y*scale + shift) + SiLU — final output pass only.
#     Pure elementwise VPU work, lane-dense blocks, fully parallel grid.
# ----------------------------------------------------------------------------
def bn_silu_kernel(y_ref, scale_ref, shift_ref, o_ref):
    z = y_ref[...].astype(jnp.float32) * scale_ref[...] + shift_ref[...]
    o_ref[...] = (z * jax.nn.sigmoid(z)).astype(o_ref.dtype)


def _elementwise_tile(m, cap=2048):
    if m <= cap:
        return m
    for t in range(cap, 0, -1):
        if m % t == 0 and t % 8 == 0:
            return t
    return m   # full per-sample block (exempt from the (8,128) rule)


def bn_silu(y, scale, shift, out_dtype=jnp.float32):
    # y: (N, M, Cp) bf16 ; scale/shift: (1, Cp) f32
    N, M, Cp = y.shape
    tm = _elementwise_tile(M)
    grid = (N, M // tm)
    y_spec = pl.BlockSpec((None, tm, Cp), lambda n, i: (n, i, 0))
    vec_spec = pl.BlockSpec((1, Cp), lambda n, i: (0, 0))
    return pl.pallas_call(
        bn_silu_kernel,
        out_shape=jax.ShapeDtypeStruct((N, M, Cp), out_dtype),
        grid_spec=pltpu.PrefetchScalarGridSpec(
            num_scalar_prefetch=0,
            grid=grid,
            in_specs=[y_spec, vec_spec, vec_spec],
            out_specs=pl.BlockSpec((None, tm, Cp), lambda n, i: (n, i, 0))),
        compiler_params=pltpu.CompilerParams(
            dimension_semantics=("parallel", "parallel"),
            vmem_limit_bytes=VMEM_LIMIT),
    )(y, scale, shift)


# ----------------------------------------------------------------------------
# Wrapper glue: layout conversion, channel/spatial padding, BN folding.
# ----------------------------------------------------------------------------
def _pad_vec(v, n):
    return jnp.pad(v, (0, n - v.shape[0])).reshape(1, n).astype(jnp.float32)


def _pack_conv_weight(w_oihw, cin_p, cout_p):
    cout, cin, _, _ = w_oihw.shape
    w = jnp.transpose(w_oihw, (2, 3, 1, 0))            # (3, 3, Cin, Cout)
    w = jnp.pad(w, ((0, 0), (0, 0), (0, cin_p - cin), (0, cout_p - cout)))
    return w.astype(jnp.bfloat16)


def _bn_scale_shift(s, ss, gamma, beta, count, cout_p):
    # s, ss: (N, 1, Cp) per-sample partial sums from the conv kernels.
    total = jnp.sum(s, axis=0).reshape(1, cout_p)
    total_sq = jnp.sum(ss, axis=0).reshape(1, cout_p)
    mean = total / count
    var = jnp.maximum(total_sq / count - mean * mean, 0.0)  # clamp cancellation
    scale = _pad_vec(gamma, cout_p) * jax.lax.rsqrt(var + BN_EPS)
    shift = _pad_vec(beta, cout_p) - mean * scale
    return scale, shift


@jax.jit
def conv_block_forward(x_nchw, t_emb, params):
    N, Cin, H, W = x_nchw.shape
    Cout = params["conv1_w"].shape[0]
    cin_p = _round_up(Cin, LANE)
    cout_p = _round_up(Cout, LANE)
    HW = H * W

    # NCHW -> NHWC, lane-pad channels, spatial halo pad, cast to bf16.
    x = jnp.transpose(x_nchw, (0, 2, 3, 1))
    x = jnp.pad(x, ((0, 0), (1, 1), (1, 1), (0, cin_p - Cin))).astype(jnp.bfloat16)

    # conv1 + fused per-sample BN1 statistics
    y1, s1, ss1 = conv3x3_bn_stats(
        x, _pack_conv_weight(params["conv1_w"], cin_p, cout_p),
        _pad_vec(params["conv1_b"], cout_p), H=H, W=W)
    scale1, shift1 = _bn_scale_shift(s1, ss1, params["bn1_g"], params["bn1_b"],
                                     N * HW, cout_p)

    # time-embedding adapter + SiLU: tiny (N,E)@(E,Cout) -> plain jnp.
    e = t_emb @ params["lin_w"].T + params["lin_b"]
    e = e * jax.nn.sigmoid(e)
    emb = jnp.pad(e, ((0, 0), (0, cout_p - Cout))).reshape(N, 1, cout_p)
    emb = emb.astype(jnp.float32)

    # halo-pad the RAW conv1 output; BN1+SiLU+emb are applied inside the
    # fused conv2 kernel (no z1 intermediate ever hits HBM).
    y1p = jnp.pad(y1.reshape(N, H, W, cout_p), ((0, 0), (1, 1), (1, 1), (0, 0)))

    # fused BN1+SiLU+emb -> conv2 + fused per-sample BN2 statistics
    y2, s2, ss2 = preact_conv3x3_bn_stats(
        y1p, scale1, shift1, emb,
        _pack_conv_weight(params["conv2_w"], cout_p, cout_p),
        _pad_vec(params["conv2_b"], cout_p), H=H, W=W)
    scale2, shift2 = _bn_scale_shift(s2, ss2, params["bn2_g"], params["bn2_b"],
                                     N * HW, cout_p)

    # BN2 + SiLU (final output)
    z2 = bn_silu(y2, scale2, shift2, out_dtype=jnp.float32)

    out = z2.reshape(N, H, W, cout_p)[..., :Cout]
    return jnp.transpose(out, (0, 3, 1, 2))             # NHWC -> NCHW


# ----------------------------------------------------------------------------
# Deterministic parameter construction (mirrors ConvBlock.__init__ shapes)
# ----------------------------------------------------------------------------
def make_params(key, input_channels, output_channels, embedding_dim,
                upsample=False):
    cin1 = 2 * input_channels if upsample else input_channels
    ks = jax.random.split(key, 10)
    f32 = jnp.float32
    return {
        "conv1_w": 0.1 * jax.random.normal(ks[0], (output_channels, cin1, 3, 3), f32),
        "conv1_b": 0.1 * jax.random.normal(ks[1], (output_channels,), f32),
        "conv2_w": 0.1 * jax.random.normal(ks[2], (output_channels, output_channels, 3, 3), f32),
        "conv2_b": 0.1 * jax.random.normal(ks[3], (output_channels,), f32),
        "lin_w":   0.1 * jax.random.normal(ks[4], (output_channels, embedding_dim), f32),
        "lin_b":   0.1 * jax.random.normal(ks[5], (output_channels,), f32),
        "bn1_g":   1.0 + 0.1 * jax.random.normal(ks[6], (output_channels,), f32),
        "bn1_b":   0.1 * jax.random.normal(ks[7], (output_channels,), f32),
        "bn2_g":   1.0 + 0.1 * jax.random.normal(ks[8], (output_channels,), f32),
        "bn2_b":   0.1 * jax.random.normal(ks[9], (output_channels,), f32),
    }


# ----------------------------------------------------------------------------
# Pure-JAX f32 reference (NCHW, PyTorch training-mode semantics)
# ----------------------------------------------------------------------------
def reference_forward(x_nchw, t_emb, params):
    def conv(x, w, b):
        y = jax.lax.conv_general_dilated(
            x, w, (1, 1), "SAME", dimension_numbers=("NCHW", "OIHW", "NCHW"))
        return y + b.reshape(1, -1, 1, 1)

    def bn(x, g, be):
        mean = x.mean(axis=(0, 2, 3), keepdims=True)
        var = x.var(axis=(0, 2, 3), keepdims=True)   # biased (training BN)
        return ((x - mean) * jax.lax.rsqrt(var + BN_EPS)
                * g.reshape(1, -1, 1, 1) + be.reshape(1, -1, 1, 1))

    silu = lambda v: v * jax.nn.sigmoid(v)
    h = silu(bn(conv(x_nchw, params["conv1_w"], params["conv1_b"]),
                params["bn1_g"], params["bn1_b"]))
    emb = silu(t_emb @ params["lin_w"].T + params["lin_b"])
    h = h + emb[:, :, None, None]
    h = silu(bn(conv(h, params["conv2_w"], params["conv2_b"]),
                params["bn2_g"], params["bn2_b"]))
    return h


if __name__ == "__main__":
    key = jax.random.PRNGKey(0)
    k_x, k_t, k_p = jax.random.split(key, 3)

    # Small shapes consistent with the module (upsample=False path).
    N, Cin, H, W = 2, 4, 16, 16
    Cout, Edim = 8, 32

    x = jax.random.normal(k_x, (N, Cin, H, W), jnp.float32)
    t_embedding = jax.random.normal(k_t, (N, Edim), jnp.float32)
    params = make_params(k_p, Cin, Cout, Edim, upsample=False)

    out = jax.block_until_ready(conv_block_forward(x, t_embedding, params))
    ref = reference_forward(x, t_embedding, params)

    assert out.shape == (N, Cout, H, W), out.shape
    # bf16 MXU inputs + bf16 intermediates => compare vs. the f32 reference at
    # bf16-level tolerance.
    max_abs = float(jnp.max(jnp.abs(out - ref)))
    rel_l2 = float(jnp.linalg.norm(out - ref) /
                   (jnp.linalg.norm(ref) + 1e-12))
    assert max_abs < 0.08 and rel_l2 < 0.03, (max_abs, rel_l2)

    print("KERNEL_OK")
</pallas_src>

<mosaic_0001>
module attributes {stable_mosaic.version = 11 : i64} {
  func.func @conv3x3_kernel(%arg0: i32, %arg1: memref<1x18x18x128xbf16, #tpu.memory_space<vmem>>, %arg2: memref<3x3x128x128xbf16, #tpu.memory_space<vmem>>, %arg3: memref<1x128xf32, #tpu.memory_space<vmem>>, %arg4: memref<1x256x128xbf16, #tpu.memory_space<vmem>>, %arg5: memref<1x1x128xf32, #tpu.memory_space<vmem>>, %arg6: memref<1x1x128xf32, #tpu.memory_space<vmem>>) attributes {dimension_semantics = [#tpu.dimension_semantics<parallel>], iteration_bounds = array<i64: 2>, scalar_prefetch = 0 : i64, scratch_operands = 0 : i64, tpu.core_type = #tpu.core_type<tc>, window_params = [{transform_indices = @transform_0, window_bounds = array<i64: 1, 18, 18, 128>}, {pipeline_mode = #tpu.pipeline_mode<synchronous>, transform_indices = @transform_1, window_bounds = array<i64: 3, 3, 128, 128>}, {pipeline_mode = #tpu.pipeline_mode<synchronous>, transform_indices = @transform_2, window_bounds = array<i64: 1, 128>}, {transform_indices = @transform_3, window_bounds = array<i64: 1, 256, 128>}, {transform_indices = @transform_4, window_bounds = array<i64: 1, 1, 128>}, {transform_indices = @transform_5, window_bounds = array<i64: 1, 1, 128>}]} {
    %cst = arith.constant 0.000000e+00 : f32
    %0 = vector.broadcast %cst : f32 to vector<256x128xf32>
    %c0 = arith.constant 0 : index
    %c0_0 = arith.constant 0 : index
    %c0_1 = arith.constant 0 : index
    %c0_2 = arith.constant 0 : index
    %1 = vector.load %arg1[%c0, %c0_0, %c0_1, %c0_2] : memref<1x18x18x128xbf16, #tpu.memory_space<vmem>>, vector<1x16x16x128xbf16>
    %2 = vector.shape_cast %1 : vector<1x16x16x128xbf16> to vector<16x16x128xbf16>
    %3 = vector.shape_cast %2 : vector<16x16x128xbf16> to vector<256x128xbf16>
    %c0_3 = arith.constant 0 : index
    %c0_4 = arith.constant 0 : index
    %c0_5 = arith.constant 0 : index
    %c0_6 = arith.constant 0 : index
    %4 = vector.load %arg2[%c0_3, %c0_4, %c0_5, %c0_6] : memref<3x3x128x128xbf16, #tpu.memory_space<vmem>>, vector<1x1x128x128xbf16>
    %5 = vector.shape_cast %4 : vector<1x1x128x128xbf16> to vector<128x128xbf16>
    %cst_7 = arith.constant dense<0.000000e+00> : vector<256x128xf32>
    %6 = tpu.matmul %3, %5, %cst_7 {dimension_numbers = #tpu.dot_dimension_numbers<[1], [0], [0], [1], [0, 0, 1, 1], [], []>} : vector<256x128xbf16>, vector<128x128xbf16>, vector<256x128xf32> -> vector<256x128xf32>
    %7 = arith.addf %0, %6 : vector<256x128xf32>
    %c0_8 = arith.constant 0 : index
    %c0_9 = arith.constant 0 : index
    %c1 = arith.constant 1 : index
    %c0_10 = arith.constant 0 : index
    %8 = vector.load %arg1[%c0_8, %c0_9, %c1, %c0_10] : memref<1x18x18x128xbf16, #tpu.memory_space<vmem>>, vector<1x16x16x128xbf16>
    %9 = vector.shape_cast %8 : vector<1x16x16x128xbf16> to vector<16x16x128xbf16>
    %10 = vector.shape_cast %9 : vector<16x16x128xbf16> to vector<256x128xbf16>
    %c0_11 = arith.constant 0 : index
    %c1_12 = arith.constant 1 : index
    %c0_13 = arith.constant 0 : index
    %c0_14 = arith.constant 0 : index
    %11 = vector.load %arg2[%c0_11, %c1_12, %c0_13, %c0_14] : memref<3x3x128x128xbf16, #tpu.memory_space<vmem>>, vector<1x1x128x128xbf16>
    %12 = vector.shape_cast %11 : vector<1x1x128x128xbf16> to vector<128x128xbf16>
    %cst_15 = arith.constant dense<0.000000e+00> : vector<256x128xf32>
    %13 = tpu.matmul %10, %12, %cst_15 {dimension_numbers = #tpu.dot_dimension_numbers<[1], [0], [0], [1], [0, 0, 1, 1], [], []>} : vector<256x128xbf16>, vector<128x128xbf16>, vector<256x128xf32> -> vector<256x128xf32>
    %14 = arith.addf %7, %13 : vector<256x128xf32>
    %c0_16 = arith.constant 0 : index
    %c0_17 = arith.constant 0 : index
    %c2 = arith.constant 2 : index
    %c0_18 = arith.constant 0 : index
    %15 = vector.load %arg1[%c0_16, %c0_17, %c2, %c0_18] : memref<1x18x18x128xbf16, #tpu.memory_space<vmem>>, vector<1x16x16x128xbf16>
    %16 = vector.shape_cast %15 : vector<1x16x16x128xbf16> to vector<16x16x128xbf16>
    %17 = vector.shape_cast %16 : vector<16x16x128xbf16> to vector<256x128xbf16>
    %c0_19 = arith.constant 0 : index
    %c2_20 = arith.constant 2 : index
    %c0_21 = arith.constant 0 : index
    %c0_22 = arith.constant 0 : index
    %18 = vector.load %arg2[%c0_19, %c2_20, %c0_21, %c0_22] : memref<3x3x128x128xbf16, #tpu.memory_space<vmem>>, vector<1x1x128x128xbf16>
    %19 = vector.shape_cast %18 : vector<1x1x128x128xbf16> to vector<128x128xbf16>
    %cst_23 = arith.constant dense<0.000000e+00> : vector<256x128xf32>
    %20 = tpu.matmul %17, %19, %cst_23 {dimension_numbers = #tpu.dot_dimension_numbers<[1], [0], [0], [1], [0, 0, 1, 1], [], []>} : vector<256x128xbf16>, vector<128x128xbf16>, vector<256x128xf32> -> vector<256x128xf32>
    %21 = arith.addf %14, %20 : vector<256x128xf32>
    %c0_24 = arith.constant 0 : index
    %c1_25 = arith.constant 1 : index
    %c0_26 = arith.constant 0 : index
    %c0_27 = arith.constant 0 : index
    %22 = vector.load %arg1[%c0_24, %c1_25, %c0_26, %c0_27] : memref<1x18x18x128xbf16, #tpu.memory_space<vmem>>, vector<1x16x16x128xbf16>
    %23 = vector.shape_cast %22 : vector<1x16x16x128xbf16> to vector<16x16x128xbf16>
    %24 = vector.shape_cast %23 : vector<16x16x128xbf16> to vector<256x128xbf16>
    %c1_28 = arith.constant 1 : index
    %c0_29 = arith.constant 0 : index
    %c0_30 = arith.constant 0 : index
    %c0_31 = arith.constant 0 : index
    %25 = vector.load %arg2[%c1_28, %c0_29, %c0_30, %c0_31] : memref<3x3x128x128xbf16, #tpu.memory_space<vmem>>, vector<1x1x128x128xbf16>
    %26 = vector.shape_cast %25 : vector<1x1x128x128xbf16> to vector<128x128xbf16>
    %cst_32 = arith.constant dense<0.000000e+00> : vector<256x128xf32>
    %27 = tpu.matmul %24, %26, %cst_32 {dimension_numbers = #tpu.dot_dimension_numbers<[1], [0], [0], [1], [0, 0, 1, 1], [], []>} : vector<256x128xbf16>, vector<128x128xbf16>, vector<256x128xf32> -> vector<256x128xf32>
    %28 = arith.addf %21, %27 : vector<256x128xf32>
    %c0_33 = arith.constant 0 : index
    %c1_34 = arith.constant 1 : index
    %c1_35 = arith.constant 1 : index
    %c0_36 = arith.constant 0 : index
    %29 = vector.load %arg1[%c0_33, %c1_34, %c1_35, %c0_36] : memref<1x18x18x128xbf16, #tpu.memory_space<vmem>>, vector<1x16x16x128xbf16>
    %30 = vector.shape_cast %29 : vector<1x16x16x128xbf16> to vector<16x16x128xbf16>
    %31 = vector.shape_cast %30 : vector<16x16x128xbf16> to vector<256x128xbf16>
    %c1_37 = arith.constant 1 : index
    %c1_38 = arith.constant 1 : index
    %c0_39 = arith.constant 0 : index
    %c0_40 = arith.constant 0 : index
    %32 = vector.load %arg2[%c1_37, %c1_38, %c0_39, %c0_40] : memref<3x3x128x128xbf16, #tpu.memory_space<vmem>>, vector<1x1x128x128xbf16>
    %33 = vector.shape_cast %32 : vector<1x1x128x128xbf16> to vector<128x128xbf16>
    %cst_41 = arith.constant dense<0.000000e+00> : vector<256x128xf32>
    %34 = tpu.matmul %31, %33, %cst_41 {dimension_numbers = #tpu.dot_dimension_numbers<[1], [0], [0], [1], [0, 0, 1, 1], [], []>} : vector<256x128xbf16>, vector<128x128xbf16>, vector<256x128xf32> -> vector<256x128xf32>
    %35 = arith.addf %28, %34 : vector<256x128xf32>
    %c0_42 = arith.constant 0 : index
    %c1_43 = arith.constant 1 : index
    %c2_44 = arith.constant 2 : index
    %c0_45 = arith.constant 0 : index
    %36 = vector.load %arg1[%c0_42, %c1_43, %c2_44, %c0_45] : memref<1x18x18x128xbf16, #tpu.memory_space<vmem>>, vector<1x16x16x128xbf16>
    %37 = vector.shape_cast %36 : vector<1x16x16x128xbf16> to vector<16x16x128xbf16>
    %38 = vector.shape_cast %37 : vector<16x16x128xbf16> to vector<256x128xbf16>
    %c1_46 = arith.constant 1 : index
    %c2_47 = arith.constant 2 : index
    %c0_48 = arith.constant 0 : index
    %c0_49 = arith.constant 0 : index
    %39 = vector.load %arg2[%c1_46, %c2_47, %c0_48, %c0_49] : memref<3x3x128x128xbf16, #tpu.memory_space<vmem>>, vector<1x1x128x128xbf16>
    %40 = vector.shape_cast %39 : vector<1x1x128x128xbf16> to vector<128x128xbf16>
    %cst_50 = arith.constant dense<0.000000e+00> : vector<256x128xf32>
    %41 = tpu.matmul %38, %40, %cst_50 {dimension_numbers = #tpu.dot_dimension_numbers<[1], [0], [0], [1], [0, 0, 1, 1], [], []>} : vector<256x128xbf16>, vector<128x128xbf16>, vector<256x128xf32> -> vector<256x128xf32>
    %42 = arith.addf %35, %41 : vector<256x128xf32>
    %c0_51 = arith.constant 0 : index
    %c2_52 = arith.constant 2 : index
    %c0_53 = arith.constant 0 : index
    %c0_54 = arith.constant 0 : index
    %43 = vector.load %arg1[%c0_51, %c2_52, %c0_53, %c0_54] : memref<1x18x18x128xbf16, #tpu.memory_space<vmem>>, vector<1x16x16x128xbf16>
    %44 = vector.shape_cast %43 : vector<1x16x16x128xbf16> to vector<16x16x128xbf16>
    %45 = vector.shape_cast %44 : vector<16x16x128xbf16> to vector<256x128xbf16>
    %c2_55 = arith.constant 2 : index
    %c0_56 = arith.constant 0 : index
    %c0_57 = arith.constant 0 : index
    %c0_58 = arith.constant 0 : index
    %46 = vector.load %arg2[%c2_55, %c0_56, %c0_57, %c0_58] : memref<3x3x128x128xbf16, #tpu.memory_space<vmem>>, vector<1x1x128x128xbf16>
    %47 = vector.shape_cast %46 : vector<1x1x128x128xbf16> to vector<128x128xbf16>
    %cst_59 = arith.constant dense<0.000000e+00> : vector<256x128xf32>
    %48 = tpu.matmul %45, %47, %cst_59 {dimension_numbers = #tpu.dot_dimension_numbers<[1], [0], [0], [1], [0, 0, 1, 1], [], []>} : vector<256x128xbf16>, vector<128x128xbf16>, vector<256x128xf32> -> vector<256x128xf32>
    %49 = arith.addf %42, %48 : vector<256x128xf32>
    %c0_60 = arith.constant 0 : index
    %c2_61 = arith.constant 2 : index
    %c1_62 = arith.constant 1 : index
    %c0_63 = arith.constant 0 : index
    %50 = vector.load %arg1[%c0_60, %c2_61, %c1_62, %c0_63] : memref<1x18x18x128xbf16, #tpu.memory_space<vmem>>, vector<1x16x16x128xbf16>
    %51 = vector.shape_cast %50 : vector<1x16x16x128xbf16> to vector<16x16x128xbf16>
    %52 = vector.shape_cast %51 : vector<16x16x128xbf16> to vector<256x128xbf16>
    %c2_64 = arith.constant 2 : index
    %c1_65 = arith.constant 1 : index
    %c0_66 = arith.constant 0 : index
    %c0_67 = arith.constant 0 : index
    %53 = vector.load %arg2[%c2_64, %c1_65, %c0_66, %c0_67] : memref<3x3x128x128xbf16, #tpu.memory_space<vmem>>, vector<1x1x128x128xbf16>
    %54 = vector.shape_cast %53 : vector<1x1x128x128xbf16> to vector<128x128xbf16>
    %cst_68 = arith.constant dense<0.000000e+00> : vector<256x128xf32>
    %55 = tpu.matmul %52, %54, %cst_68 {dimension_numbers = #tpu.dot_dimension_numbers<[1], [0], [0], [1], [0, 0, 1, 1], [], []>} : vector<256x128xbf16>, vector<128x128xbf16>, vector<256x128xf32> -> vector<256x128xf32>
    %56 = arith.addf %49, %55 : vector<256x128xf32>
    %c0_69 = arith.constant 0 : index
    %c2_70 = arith.constant 2 : index
    %c2_71 = arith.constant 2 : index
    %c0_72 = arith.constant 0 : index
    %57 = vector.load %arg1[%c0_69, %c2_70, %c2_71, %c0_72] : memref<1x18x18x128xbf16, #tpu.memory_space<vmem>>, vector<1x16x16x128xbf16>
    %58 = vector.shape_cast %57 : vector<1x16x16x128xbf16> to vector<16x16x128xbf16>
    %59 = vector.shape_cast %58 : vector<16x16x128xbf16> to vector<256x128xbf16>
    %c2_73 = arith.constant 2 : index
    %c2_74 = arith.constant 2 : index
    %c0_75 = arith.constant 0 : index
    %c0_76 = arith.constant 0 : index
    %60 = vector.load %arg2[%c2_73, %c2_74, %c0_75, %c0_76] : memref<3x3x128x128xbf16, #tpu.memory_space<vmem>>, vector<1x1x128x128xbf16>
    %61 = vector.shape_cast %60 : vector<1x1x128x128xbf16> to vector<128x128xbf16>
    %cst_77 = arith.constant dense<0.000000e+00> : vector<256x128xf32>
    %62 = tpu.matmul %59, %61, %cst_77 {dimension_numbers = #tpu.dot_dimension_numbers<[1], [0], [0], [1], [0, 0, 1, 1], [], []>} : vector<256x128xbf16>, vector<128x128xbf16>, vector<256x128xf32> -> vector<256x128xf32>
    %63 = arith.addf %56, %62 : vector<256x128xf32>
    %c0_78 = arith.constant 0 : index
    %c0_79 = arith.constant 0 : index
    %64 = vector.load %arg3[%c0_78, %c0_79] : memref<1x128xf32, #tpu.memory_space<vmem>>, vector<1x128xf32>
    %65 = vector.broadcast %64 : vector<1x128xf32> to vector<256x128xf32>
    %66 = arith.addf %63, %65 : vector<256x128xf32>
    %67 = arith.truncf %66 : vector<256x128xf32> to vector<256x128xbf16>
    %c0_80 = arith.constant 0 : index
    %c0_81 = arith.constant 0 : index
    %c0_82 = arith.constant 0 : index
    %68 = vector.load %arg4[%c0_80, %c0_81, %c0_82] : memref<1x256x128xbf16, #tpu.memory_space<vmem>>, vector<1x256x128xbf16>
    %69 = vector.shape_cast %68 : vector<1x256x128xbf16> to vector<256x128xbf16>
    %70 = vector.shape_cast %67 : vector<256x128xbf16> to vector<1x256x128xbf16>
    tpu.vector_store %arg4[%c0_80, %c0_81, %c0_82], %70 {strides = array<i32>} : memref<1x256x128xbf16, #tpu.memory_space<vmem>>, vector<1x256x128xbf16>,
    %cst_83 = arith.constant dense<0.000000e+00> : vector<128xf32>
    %71 = vector.multi_reduction <add>, %66, %cst_83 [0] : vector<256x128xf32> to vector<128xf32>
    %72 = vector.shape_cast %71 : vector<128xf32> to vector<1x128xf32>
    %c0_84 = arith.constant 0 : index
    %c0_85 = arith.constant 0 : index
    %c0_86 = arith.constant 0 : index
    %73 = vector.load %arg5[%c0_84, %c0_85, %c0_86] : memref<1x1x128xf32, #tpu.memory_space<vmem>>, vector<1x1x128xf32>
    %74 = vector.shape_cast %73 : vector<1x1x128xf32> to vector<1x128xf32>
    %75 = vector.shape_cast %72 : vector<1x128xf32> to vector<1x1x128xf32>
    tpu.vector_store %arg5[%c0_84, %c0_85, %c0_86], %75 {strides = array<i32>} : memref<1x1x128xf32, #tpu.memory_space<vmem>>, vector<1x1x128xf32>,
    %76 = arith.mulf %66, %66 : vector<256x128xf32>
    %cst_87 = arith.constant dense<0.000000e+00> : vector<128xf32>
    %77 = vector.multi_reduction <add>, %76, %cst_87 [0] : vector<256x128xf32> to vector<128xf32>
    %78 = vector.shape_cast %77 : vector<128xf32> to vector<1x128xf32>
    %c0_88 = arith.constant 0 : index
    %c0_89 = arith.constant 0 : index
    %c0_90 = arith.constant 0 : index
    %79 = vector.load %arg6[%c0_88, %c0_89, %c0_90] : memref<1x1x128xf32, #tpu.memory_space<vmem>>, vector<1x1x128xf32>
    %80 = vector.shape_cast %79 : vector<1x1x128xf32> to vector<1x128xf32>
    %81 = vector.shape_cast %78 : vector<1x128xf32> to vector<1x1x128xf32>
    tpu.vector_store %arg6[%c0_88, %c0_89, %c0_90], %81 {strides = array<i32>} : memref<1x1x128xf32, #tpu.memory_space<vmem>>, vector<1x1x128xf32>,
    return
  }
  func.func @transform_0(%arg0: i32) -> (i32, i32, i32, i32) {
    %c0_i32 = arith.constant 0 : i32
    %c0_i32_0 = arith.constant 0 : i32
    %c0_i32_1 = arith.constant 0 : i32
    %c0_i32_2 = arith.constant 0 : i32
    return %arg0, %c0_i32, %c0_i32_0, %c0_i32_1 : i32, i32, i32, i32
  }
  func.func @transform_1(%arg0: i32) -> (i32, i32, i32, i32) {
    %c0_i32 = arith.constant 0 : i32
    %c0_i32_0 = arith.constant 0 : i32
    %c0_i32_1 = arith.constant 0 : i32
    %c0_i32_2 = arith.constant 0 : i32
    %c0_i32_3 = arith.constant 0 : i32
    return %c0_i32, %c0_i32_0, %c0_i32_1, %c0_i32_2 : i32, i32, i32, i32
  }
  func.func @transform_2(%arg0: i32) -> (i32, i32) {
    %c0_i32 = arith.constant 0 : i32
    %c0_i32_0 = arith.constant 0 : i32
    %c0_i32_1 = arith.constant 0 : i32
    return %c0_i32, %c0_i32_0 : i32, i32
  }
  func.func @transform_3(%arg0: i32) -> (i32, i32, i32) {
    %c0_i32 = arith.constant 0 : i32
    %c0_i32_0 = arith.constant 0 : i32
    %c0_i32_1 = arith.constant 0 : i32
    return %arg0, %c0_i32, %c0_i32_0 : i32, i32, i32
  }
  func.func @transform_4(%arg0: i32) -> (i32, i32, i32) {
    %c0_i32 = arith.constant 0 : i32
    %c0_i32_0 = arith.constant 0 : i32
    %c0_i32_1 = arith.constant 0 : i32
    return %arg0, %c0_i32, %c0_i32_0 : i32, i32, i32
  }
  func.func @transform_5(%arg0: i32) -> (i32, i32, i32) {
    %c0_i32 = arith.constant 0 : i32
    %c0_i32_0 = arith.constant 0 : i32
    %c0_i32_1 = arith.constant 0 : i32
    return %arg0, %c0_i32, %c0_i32_0 : i32, i32, i32
  }
}

module attributes {stable_mosaic.version = 11 : i64} {
  func.func @bn_silu_kernel(%arg0: i32, %arg1: i32, %arg2: memref<1x256x128xbf16, #tpu.memory_space<vmem>>, %arg3: memref<1x128xf32, #tpu.memory_space<vmem>>, %arg4: memref<1x128xf32, #tpu.memory_space<vmem>>, %arg5: memref<1x256x128xf32, #tpu.memory_space<vmem>>) attributes {dimension_semantics = [#tpu.dimension_semantics<parallel>, #tpu.dimension_semantics<parallel>], iteration_bounds = array<i64: 2, 1>, scalar_prefetch = 0 : i64, scratch_operands = 0 : i64, tpu.core_type = #tpu.core_type<tc>, window_params = [{transform_indices = @transform_0, window_bounds = array<i64: 1, 256, 128>}, {pipeline_mode = #tpu.pipeline_mode<synchronous>, transform_indices = @transform_1, window_bounds = array<i64: 1, 128>}, {pipeline_mode = #tpu.pipeline_mode<synchronous>, transform_indices = @transform_2, window_bounds = array<i64: 1, 128>}, {transform_indices = @transform_3, window_bounds = array<i64: 1, 256, 128>}]} {
    %c0 = arith.constant 0 : index
    %c0_0 = arith.constant 0 : index
    %c0_1 = arith.constant 0 : index
    %0 = vector.load %arg2[%c0, %c0_0, %c0_1] : memref<1x256x128xbf16, #tpu.memory_space<vmem>>, vector<1x256x128xbf16>
    %1 = vector.shape_cast %0 : vector<1x256x128xbf16> to vector<256x128xbf16>
    %2 = arith.extf %1 : vector<256x128xbf16> to vector<256x128xf32>
    %c0_2 = arith.constant 0 : index
    %c0_3 = arith.constant 0 : index
    %3 = vector.load %arg3[%c0_2, %c0_3] : memref<1x128xf32, #tpu.memory_space<vmem>>, vector<1x128xf32>
    %4 = vector.broadcast %3 : vector<1x128xf32> to vector<256x128xf32>
    %5 = arith.mulf %2, %4 : vector<256x128xf32>
    %c0_4 = arith.constant 0 : index
    %c0_5 = arith.constant 0 : index
    %6 = vector.load %arg4[%c0_4, %c0_5] : memref<1x128xf32, #tpu.memory_space<vmem>>, vector<1x128xf32>
    %7 = vector.broadcast %6 : vector<1x128xf32> to vector<256x128xf32>
    %8 = arith.addf %5, %7 : vector<256x128xf32>
    %9 = arith.negf %8 : vector<256x128xf32>
    %10 = math.exp %9 : vector<256x128xf32>
    %cst = arith.constant 1.000000e+00 : f32
    %11 = vector.broadcast %cst : f32 to vector<256x128xf32>
    %12 = arith.addf %11, %10 : vector<256x128xf32>
    %13 = arith.divf %11, %12 : vector<256x128xf32>
    %14 = arith.mulf %8, %13 : vector<256x128xf32>
    %c0_6 = arith.constant 0 : index
    %c0_7 = arith.constant 0 : index
    %c0_8 = arith.constant 0 : index
    %15 = vector.load %arg5[%c0_6, %c0_7, %c0_8] : memref<1x256x128xf32, #tpu.memory_space<vmem>>, vector<1x256x128xf32>
    %16 = vector.shape_cast %15 : vector<1x256x128xf32> to vector<256x128xf32>
    %17 = vector.shape_cast %14 : vector<256x128xf32> to vector<1x256x128xf32>
    tpu.vector_store %arg5[%c0_6, %c0_7, %c0_8], %17 {strides = array<i32>} : memref<1x256x128xf32, #tpu.memory_space<vmem>>, vector<1x256x128xf32>,
    return
  }
  func.func @transform_0(%arg0: i32, %arg1: i32) -> (i32, i32, i32) {
    %c0_i32 = arith.constant 0 : i32
    %c0_i32_0 = arith.constant 0 : i32
    return %arg0, %arg1, %c0_i32 : i32, i32, i32
  }
  func.func @transform_1(%arg0: i32, %arg1: i32) -> (i32, i32) {
    %c0_i32 = arith.constant 0 : i32
    %c0_i32_0 = arith.constant 0 : i32
    %c0_i32_1 = arith.constant 0 : i32
    return %c0_i32, %c0_i32_0 : i32, i32
  }
  func.func @transform_2(%arg0: i32, %arg1: i32) -> (i32, i32) {
    %c0_i32 = arith.constant 0 : i32
    %c0_i32_0 = arith.constant 0 : i32
    %c0_i32_1 = arith.constant 0 : i32
    return %c0_i32, %c0_i32_0 : i32, i32
  }
  func.func @transform_3(%arg0: i32, %arg1: i32) -> (i32, i32, i32) {
    %c0_i32 = arith.constant 0 : i32
    %c0_i32_0 = arith.constant 0 : i32
    return %arg0, %arg1, %c0_i32 : i32, i32, i32
  }
}

module attributes {stable_mosaic.version = 11 : i64} {
  func.func @preact_conv3x3_kernel(%arg0: i32, %arg1: memref<1x18x18x128xbf16, #tpu.memory_space<vmem>>, %arg2: memref<1x128xf32, #tpu.memory_space<vmem>>, %arg3: memref<1x128xf32, #tpu.memory_space<vmem>>, %arg4: memref<1x1x128xf32, #tpu.memory_space<vmem>>, %arg5: memref<3x3x128x128xbf16, #tpu.memory_space<vmem>>, %arg6: memref<1x128xf32, #tpu.memory_space<vmem>>, %arg7: memref<1x256x128xbf16, #tpu.memory_space<vmem>>, %arg8: memref<1x1x128xf32, #tpu.memory_space<vmem>>, %arg9: memref<1x1x128xf32, #tpu.memory_space<vmem>>, %arg10: memref<18x18x128xbf16, #tpu.memory_space<vmem>>) attributes {dimension_semantics = [#tpu.dimension_semantics<parallel>], iteration_bounds = array<i64: 2>, scalar_prefetch = 0 : i64, scratch_operands = 1 : i64, tpu.core_type = #tpu.core_type<tc>, window_params = [{transform_indices = @transform_0, window_bounds = array<i64: 1, 18, 18, 128>}, {pipeline_mode = #tpu.pipeline_mode<synchronous>, transform_indices = @transform_1, window_bounds = array<i64: 1, 128>}, {pipeline_mode = #tpu.pipeline_mode<synchronous>, transform_indices = @transform_2, window_bounds = array<i64: 1, 128>}, {transform_indices = @transform_3, window_bounds = array<i64: 1, 1, 128>}, {pipeline_mode = #tpu.pipeline_mode<synchronous>, transform_indices = @transform_4, window_bounds = array<i64: 3, 3, 128, 128>}, {pipeline_mode = #tpu.pipeline_mode<synchronous>, transform_indices = @transform_5, window_bounds = array<i64: 1, 128>}, {transform_indices = @transform_6, window_bounds = array<i64: 1, 256, 128>}, {transform_indices = @transform_7, window_bounds = array<i64: 1, 1, 128>}, {transform_indices = @transform_8, window_bounds = array<i64: 1, 1, 128>}]} {
    %c0 = arith.constant 0 : index
    %c0_0 = arith.constant 0 : index
    %0 = vector.load %arg2[%c0, %c0_0] : memref<1x128xf32, #tpu.memory_space<vmem>>, vector<1x128xf32>
    %1 = vector.shape_cast %0 : vector<1x128xf32> to vector<1x1x128xf32>
    %c0_1 = arith.constant 0 : index
    %c0_2 = arith.constant 0 : index
    %2 = vector.load %arg3[%c0_1, %c0_2] : memref<1x128xf32, #tpu.memory_space<vmem>>, vector<1x128xf32>
    %3 = vector.shape_cast %2 : vector<1x128xf32> to vector<1x1x128xf32>
    %c0_3 = arith.constant 0 : index
    %c0_4 = arith.constant 0 : index
    %c0_5 = arith.constant 0 : index
    %4 = vector.load %arg4[%c0_3, %c0_4, %c0_5] : memref<1x1x128xf32, #tpu.memory_space<vmem>>, vector<1x1x128xf32>
    %5 = vector.shape_cast %4 : vector<1x1x128xf32> to vector<1x128xf32>
    %6 = vector.shape_cast %5 : vector<1x128xf32> to vector<1x1x128xf32>
    %c0_6 = arith.constant 0 : index
    %c0_7 = arith.constant 0 : index
    %c0_8 = arith.constant 0 : index
    %c0_9 = arith.constant 0 : index
    %7 = vector.load %arg1[%c0_6, %c0_7, %c0_8, %c0_9] : memref<1x18x18x128xbf16, #tpu.memory_space<vmem>>, vector<1x18x18x128xbf16>
    %8 = vector.shape_cast %7 : vector<1x18x18x128xbf16> to vector<18x18x128xbf16>
    %9 = arith.extf %8 : vector<18x18x128xbf16> to vector<18x18x128xf32>
    %10 = vector.broadcast %1 : vector<1x1x128xf32> to vector<18x18x128xf32>
    %11 = arith.mulf %9, %10 : vector<18x18x128xf32>
    %12 = vector.broadcast %3 : vector<1x1x128xf32> to vector<18x18x128xf32>
    %13 = arith.addf %11, %12 : vector<18x18x128xf32>
    %14 = arith.negf %13 : vector<18x18x128xf32>
    %15 = math.exp %14 : vector<18x18x128xf32>
    %cst = arith.constant 1.000000e+00 : f32
    %16 = vector.broadcast %cst : f32 to vector<18x18x128xf32>
    %17 = arith.addf %16, %15 : vector<18x18x128xf32>
    %18 = arith.divf %16, %17 : vector<18x18x128xf32>
    %19 = arith.mulf %13, %18 : vector<18x18x128xf32>
    %20 = vector.broadcast %6 : vector<1x1x128xf32> to vector<18x18x128xf32>
    %21 = arith.addf %19, %20 : vector<18x18x128xf32>
    %22 = tpu.iota {dimensions = array<i32: 0>} : vector<18x18x128xi32>
    %23 = tpu.iota {dimensions = array<i32: 1>} : vector<18x18x128xi32>
    %c1_i32 = arith.constant 1 : i32
    %24 = vector.broadcast %c1_i32 : i32 to vector<18x18x128xi32>
    %25 = arith.cmpi sge, %22, %24 : vector<18x18x128xi32>
    %c16_i32 = arith.constant 16 : i32
    %26 = vector.broadcast %c16_i32 : i32 to vector<18x18x128xi32>
    %27 = arith.cmpi sle, %22, %26 : vector<18x18x128xi32>
    %28 = arith.andi %25, %27 : vector<18x18x128xi1>
    %c1_i32_10 = arith.constant 1 : i32
    %29 = vector.broadcast %c1_i32_10 : i32 to vector<18x18x128xi32>
    %30 = arith.cmpi sge, %23, %29 : vector<18x18x128xi32>
    %31 = arith.andi %28, %30 : vector<18x18x128xi1>
    %c16_i32_11 = arith.constant 16 : i32
    %32 = vector.broadcast %c16_i32_11 : i32 to vector<18x18x128xi32>
    %33 = arith.cmpi sle, %23, %32 : vector<18x18x128xi32>
    %34 = arith.andi %31, %33 : vector<18x18x128xi1>
    %cst_12 = arith.constant 0.000000e+00 : f32
    %35 = vector.broadcast %cst_12 : f32 to vector<18x18x128xf32>
    %36 = arith.select %34, %21, %35 : vector<18x18x128xi1>, vector<18x18x128xf32>
    %37 = arith.truncf %36 : vector<18x18x128xf32> to vector<18x18x128xbf16>
    %c0_13 = arith.constant 0 : index
    %c0_14 = arith.constant 0 : index
    %c0_15 = arith.constant 0 : index
    %38 = vector.load %arg10[%c0_13, %c0_14, %c0_15] : memref<18x18x128xbf16, #tpu.memory_space<vmem>>, vector<18x18x128xbf16>
    tpu.vector_store %arg10[%c0_13, %c0_14, %c0_15], %37 {strides = array<i32>} : memref<18x18x128xbf16, #tpu.memory_space<vmem>>, vector<18x18x128xbf16>,
    %cst_16 = arith.constant 0.000000e+00 : f32
    %39 = vector.broadcast %cst_16 : f32 to vector<256x128xf32>
    %c0_17 = arith.constant 0 : index
    %c0_18 = arith.constant 0 : index
    %c0_19 = arith.constant 0 : index
    %40 = vector.load %arg10[%c0_17, %c0_18, %c0_19] : memref<18x18x128xbf16, #tpu.memory_space<vmem>>, vector<16x16x128xbf16>
    %41 = vector.shape_cast %40 : vector<16x16x128xbf16> to vector<256x128xbf16>
    %c0_20 = arith.constant 0 : index
    %c0_21 = arith.constant 0 : index
    %c0_22 = arith.constant 0 : index
    %c0_23 = arith.constant 0 : index
    %42 = vector.load %arg5[%c0_20, %c0_21, %c0_22, %c0_23] : memref<3x3x128x128xbf16, #tpu.memory_space<vmem>>, vector<1x1x128x128xbf16>
    %43 = vector.shape_cast %42 : vector<1x1x128x128xbf16> to vector<128x128xbf16>
    %cst_24 = arith.constant dense<0.000000e+00> : vector<256x128xf32>
    %44 = tpu.matmul %41, %43, %cst_24 {dimension_numbers = #tpu.dot_dimension_numbers<[1], [0], [0], [1], [0, 0, 1, 1], [], []>} : vector<256x128xbf16>, vector<128x128xbf16>, vector<256x128xf32> -> vector<256x128xf32>
    %45 = arith.addf %39, %44 : vector<256x128xf32>
    %c0_25 = arith.constant 0 : index
    %c1 = arith.constant 1 : index
    %c0_26 = arith.constant 0 : index
    %46 = vector.load %arg10[%c0_25, %c1, %c0_26] : memref<18x18x128xbf16, #tpu.memory_space<vmem>>, vector<16x16x128xbf16>
    %47 = vector.shape_cast %46 : vector<16x16x128xbf16> to vector<256x128xbf16>
    %c0_27 = arith.constant 0 : index
    %c1_28 = arith.constant 1 : index
    %c0_29 = arith.constant 0 : index
    %c0_30 = arith.constant 0 : index
    %48 = vector.load %arg5[%c0_27, %c1_28, %c0_29, %c0_30] : memref<3x3x128x128xbf16, #tpu.memory_space<vmem>>, vector<1x1x128x128xbf16>
    %49 = vector.shape_cast %48 : vector<1x1x128x128xbf16> to vector<128x128xbf16>
    %cst_31 = arith.constant dense<0.000000e+00> : vector<256x128xf32>
    %50 = tpu.matmul %47, %49, %cst_31 {dimension_numbers = #tpu.dot_dimension_numbers<[1], [0], [0], [1], [0, 0, 1, 1], [], []>} : vector<256x128xbf16>, vector<128x128xbf16>, vector<256x128xf32> -> vector<256x128xf32>
    %51 = arith.addf %45, %50 : vector<256x128xf32>
    %c0_32 = arith.constant 0 : index
    %c2 = arith.constant 2 : index
    %c0_33 = arith.constant 0 : index
    %52 = vector.load %arg10[%c0_32, %c2, %c0_33] : memref<18x18x128xbf16, #tpu.memory_space<vmem>>, vector<16x16x128xbf16>
    %53 = vector.shape_cast %52 : vector<16x16x128xbf16> to vector<256x128xbf16>
    %c0_34 = arith.constant 0 : index
    %c2_35 = arith.constant 2 : index
    %c0_36 = arith.constant 0 : index
    %c0_37 = arith.constant 0 : index
    %54 = vector.load %arg5[%c0_34, %c2_35, %c0_36, %c0_37] : memref<3x3x128x128xbf16, #tpu.memory_space<vmem>>, vector<1x1x128x128xbf16>
    %55 = vector.shape_cast %54 : vector<1x1x128x128xbf16> to vector<128x128xbf16>
    %cst_38 = arith.constant dense<0.000000e+00> : vector<256x128xf32>
    %56 = tpu.matmul %53, %55, %cst_38 {dimension_numbers = #tpu.dot_dimension_numbers<[1], [0], [0], [1], [0, 0, 1, 1], [], []>} : vector<256x128xbf16>, vector<128x128xbf16>, vector<256x128xf32> -> vector<256x128xf32>
    %57 = arith.addf %51, %56 : vector<256x128xf32>
    %c1_39 = arith.constant 1 : index
    %c0_40 = arith.constant 0 : index
    %c0_41 = arith.constant 0 : index
    %58 = vector.load %arg10[%c1_39, %c0_40, %c0_41] : memref<18x18x128xbf16, #tpu.memory_space<vmem>>, vector<16x16x128xbf16>
    %59 = vector.shape_cast %58 : vector<16x16x128xbf16> to vector<256x128xbf16>
    %c1_42 = arith.constant 1 : index
    %c0_43 = arith.constant 0 : index
    %c0_44 = arith.constant 0 : index
    %c0_45 = arith.constant 0 : index
    %60 = vector.load %arg5[%c1_42, %c0_43, %c0_44, %c0_45] : memref<3x3x128x128xbf16, #tpu.memory_space<vmem>>, vector<1x1x128x128xbf16>
    %61 = vector.shape_cast %60 : vector<1x1x128x128xbf16> to vector<128x128xbf16>
    %cst_46 = arith.constant dense<0.000000e+00> : vector<256x128xf32>
    %62 = tpu.matmul %59, %61, %cst_46 {dimension_numbers = #tpu.dot_dimension_numbers<[1], [0], [0], [1], [0, 0, 1, 1], [], []>} : vector<256x128xbf16>, vector<128x128xbf16>, vector<256x128xf32> -> vector<256x128xf32>
    %63 = arith.addf %57, %62 : vector<256x128xf32>
    %c1_47 = arith.constant 1 : index
    %c1_48 = arith.constant 1 : index
    %c0_49 = arith.constant 0 : index
    %64 = vector.load %arg10[%c1_47, %c1_48, %c0_49] : memref<18x18x128xbf16, #tpu.memory_space<vmem>>, vector<16x16x128xbf16>
    %65 = vector.shape_cast %64 : vector<16x16x128xbf16> to vector<256x128xbf16>
    %c1_50 = arith.constant 1 : index
    %c1_51 = arith.constant 1 : index
    %c0_52 = arith.constant 0 : index
    %c0_53 = arith.constant 0 : index
    %66 = vector.load %arg5[%c1_50, %c1_51, %c0_52, %c0_53] : memref<3x3x128x128xbf16, #tpu.memory_space<vmem>>, vector<1x1x128x128xbf16>
    %67 = vector.shape_cast %66 : vector<1x1x128x128xbf16> to vector<128x128xbf16>
    %cst_54 = arith.constant dense<0.000000e+00> : vector<256x128xf32>
    %68 = tpu.matmul %65, %67, %cst_54 {dimension_numbers = #tpu.dot_dimension_numbers<[1], [0], [0], [1], [0, 0, 1, 1], [], []>} : vector<256x128xbf16>, vector<128x128xbf16>, vector<256x128xf32> -> vector<256x128xf32>
    %69 = arith.addf %63, %68 : vector<256x128xf32>
    %c1_55 = arith.constant 1 : index
    %c2_56 = arith.constant 2 : index
    %c0_57 = arith.constant 0 : index
    %70 = vector.load %arg10[%c1_55, %c2_56, %c0_57] : memref<18x18x128xbf16, #tpu.memory_space<vmem>>, vector<16x16x128xbf16>
    %71 = vector.shape_cast %70 : vector<16x16x128xbf16> to vector<256x128xbf16>
    %c1_58 = arith.constant 1 : index
    %c2_59 = arith.constant 2 : index
    %c0_60 = arith.constant 0 : index
    %c0_61 = arith.constant 0 : index
    %72 = vector.load %arg5[%c1_58, %c2_59, %c0_60, %c0_61] : memref<3x3x128x128xbf16, #tpu.memory_space<vmem>>, vector<1x1x128x128xbf16>
    %73 = vector.shape_cast %72 : vector<1x1x128x128xbf16> to vector<128x128xbf16>
    %cst_62 = arith.constant dense<0.000000e+00> : vector<256x128xf32>
    %74 = tpu.matmul %71, %73, %cst_62 {dimension_numbers = #tpu.dot_dimension_numbers<[1], [0], [0], [1], [0, 0, 1, 1], [], []>} : vector<256x128xbf16>, vector<128x128xbf16>, vector<256x128xf32> -> vector<256x128xf32>
    %75 = arith.addf %69, %74 : vector<256x128xf32>
    %c2_63 = arith.constant 2 : index
    %c0_64 = arith.constant 0 : index
    %c0_65 = arith.constant 0 : index
    %76 = vector.load %arg10[%c2_63, %c0_64, %c0_65] : memref<18x18x128xbf16, #tpu.memory_space<vmem>>, vector<16x16x128xbf16>
    %77 = vector.shape_cast %76 : vector<16x16x128xbf16> to vector<256x128xbf16>
    %c2_66 = arith.constant 2 : index
    %c0_67 = arith.constant 0 : index
    %c0_68 = arith.constant 0 : index
    %c0_69 = arith.constant 0 : index
    %78 = vector.load %arg5[%c2_66, %c0_67, %c0_68, %c0_69] : memref<3x3x128x128xbf16, #tpu.memory_space<vmem>>, vector<1x1x128x128xbf16>
    %79 = vector.shape_cast %78 : vector<1x1x128x128xbf16> to vector<128x128xbf16>
    %cst_70 = arith.constant dense<0.000000e+00> : vector<256x128xf32>
    %80 = tpu.matmul %77, %79, %cst_70 {dimension_numbers = #tpu.dot_dimension_numbers<[1], [0], [0], [1], [0, 0, 1, 1], [], []>} : vector<256x128xbf16>, vector<128x128xbf16>, vector<256x128xf32> -> vector<256x128xf32>
    %81 = arith.addf %75, %80 : vector<256x128xf32>
    %c2_71 = arith.constant 2 : index
    %c1_72 = arith.constant 1 : index
    %c0_73 = arith.constant 0 : index
    %82 = vector.load %arg10[%c2_71, %c1_72, %c0_73] : memref<18x18x128xbf16, #tpu.memory_space<vmem>>, vector<16x16x128xbf16>
    %83 = vector.shape_cast %82 : vector<16x16x128xbf16> to vector<256x128xbf16>
    %c2_74 = arith.constant 2 : index
    %c1_75 = arith.constant 1 : index
    %c0_76 = arith.constant 0 : index
    %c0_77 = arith.constant 0 : index
    %84 = vector.load %arg5[%c2_74, %c1_75, %c0_76, %c0_77] : memref<3x3x128x128xbf16, #tpu.memory_space<vmem>>, vector<1x1x128x128xbf16>
    %85 = vector.shape_cast %84 : vector<1x1x128x128xbf16> to vector<128x128xbf16>
    %cst_78 = arith.constant dense<0.000000e+00> : vector<256x128xf32>
    %86 = tpu.matmul %83, %85, %cst_78 {dimension_numbers = #tpu.dot_dimension_numbers<[1], [0], [0], [1], [0, 0, 1, 1], [], []>} : vector<256x128xbf16>, vector<128x128xbf16>, vector<256x128xf32> -> vector<256x128xf32>
    %87 = arith.addf %81, %86 : vector<256x128xf32>
    %c2_79 = arith.constant 2 : index
    %c2_80 = arith.constant 2 : index
    %c0_81 = arith.constant 0 : index
    %88 = vector.load %arg10[%c2_79, %c2_80, %c0_81] : memref<18x18x128xbf16, #tpu.memory_space<vmem>>, vector<16x16x128xbf16>
    %89 = vector.shape_cast %88 : vector<16x16x128xbf16> to vector<256x128xbf16>
    %c2_82 = arith.constant 2 : index
    %c2_83 = arith.constant 2 : index
    %c0_84 = arith.constant 0 : index
    %c0_85 = arith.constant 0 : index
    %90 = vector.load %arg5[%c2_82, %c2_83, %c0_84, %c0_85] : memref<3x3x128x128xbf16, #tpu.memory_space<vmem>>, vector<1x1x128x128xbf16>
    %91 = vector.shape_cast %90 : vector<1x1x128x128xbf16> to vector<128x128xbf16>
    %cst_86 = arith.constant dense<0.000000e+00> : vector<256x128xf32>
    %92 = tpu.matmul %89, %91, %cst_86 {dimension_numbers = #tpu.dot_dimension_numbers<[1], [0], [0], [1], [0, 0, 1, 1], [], []>} : vector<256x128xbf16>, vector<128x128xbf16>, vector<256x128xf32> -> vector<256x128xf32>
    %93 = arith.addf %87, %92 : vector<256x128xf32>
    %c0_87 = arith.constant 0 : index
    %c0_88 = arith.constant 0 : index
    %94 = vector.load %arg6[%c0_87, %c0_88] : memref<1x128xf32, #tpu.memory_space<vmem>>, vector<1x128xf32>
    %95 = vector.broadcast %94 : vector<1x128xf32> to vector<256x128xf32>
    %96 = arith.addf %93, %95 : vector<256x128xf32>
    %97 = arith.truncf %96 : vector<256x128xf32> to vector<256x128xbf16>
    %c0_89 = arith.constant 0 : index
    %c0_90 = arith.constant 0 : index
    %c0_91 = arith.constant 0 : index
    %98 = vector.load %arg7[%c0_89, %c0_90, %c0_91] : memref<1x256x128xbf16, #tpu.memory_space<vmem>>, vector<1x256x128xbf16>
    %99 = vector.shape_cast %98 : vector<1x256x128xbf16> to vector<256x128xbf16>
    %100 = vector.shape_cast %97 : vector<256x128xbf16> to vector<1x256x128xbf16>
    tpu.vector_store %arg7[%c0_89, %c0_90, %c0_91], %100 {strides = array<i32>} : memref<1x256x128xbf16, #tpu.memory_space<vmem>>, vector<1x256x128xbf16>,
    %cst_92 = arith.constant dense<0.000000e+00> : vector<128xf32>
    %101 = vector.multi_reduction <add>, %96, %cst_92 [0] : vector<256x128xf32> to vector<128xf32>
    %102 = vector.shape_cast %101 : vector<128xf32> to vector<1x128xf32>
    %c0_93 = arith.constant 0 : index
    %c0_94 = arith.constant 0 : index
    %c0_95 = arith.constant 0 : index
    %103 = vector.load %arg8[%c0_93, %c0_94, %c0_95] : memref<1x1x128xf32, #tpu.memory_space<vmem>>, vector<1x1x128xf32>
    %104 = vector.shape_cast %103 : vector<1x1x128xf32> to vector<1x128xf32>
    %105 = vector.shape_cast %102 : vector<1x128xf32> to vector<1x1x128xf32>
    tpu.vector_store %arg8[%c0_93, %c0_94, %c0_95], %105 {strides = array<i32>} : memref<1x1x128xf32, #tpu.memory_space<vmem>>, vector<1x1x128xf32>,
    %106 = arith.mulf %96, %96 : vector<256x128xf32>
    %cst_96 = arith.constant dense<0.000000e+00> : vector<128xf32>
    %107 = vector.multi_reduction <add>, %106, %cst_96 [0] : vector<256x128xf32> to vector<128xf32>
    %108 = vector.shape_cast %107 : vector<128xf32> to vector<1x128xf32>
    %c0_97 = arith.constant 0 : index
    %c0_98 = arith.constant 0 : index
    %c0_99 = arith.constant 0 : index
    %109 = vector.load %arg9[%c0_97, %c0_98, %c0_99] : memref<1x1x128xf32, #tpu.memory_space<vmem>>, vector<1x1x128xf32>
    %110 = vector.shape_cast %109 : vector<1x1x128xf32> to vector<1x128xf32>
    %111 = vector.shape_cast %108 : vector<1x128xf32> to vector<1x1x128xf32>
    tpu.vector_store %arg9[%c0_97, %c0_98, %c0_99], %111 {strides = array<i32>} : memref<1x1x128xf32, #tpu.memory_space<vmem>>, vector<1x1x128xf32>,
    return
  }
  func.func @transform_0(%arg0: i32) -> (i32, i32, i32, i32) {
    %c0_i32 = arith.constant 0 : i32
    %c0_i32_0 = arith.constant 0 : i32
    %c0_i32_1 = arith.constant 0 : i32
    %c0_i32_2 = arith.constant 0 : i32
    return %arg0, %c0_i32, %c0_i32_0, %c0_i32_1 : i32, i32, i32, i32
  }
  func.func @transform_1(%arg0: i32) -> (i32, i32) {
    %c0_i32 = arith.constant 0 : i32
    %c0_i32_0 = arith.constant 0 : i32
    %c0_i32_1 = arith.constant 0 : i32
    return %c0_i32, %c0_i32_0 : i32, i32
  }
  func.func @transform_2(%arg0: i32) -> (i32, i32) {
    %c0_i32 = arith.constant 0 : i32
    %c0_i32_0 = arith.constant 0 : i32
    %c0_i32_1 = arith.constant 0 : i32
    return %c0_i32, %c0_i32_0 : i32, i32
  }
  func.func @transform_3(%arg0: i32) -> (i32, i32, i32) {
    %c0_i32 = arith.constant 0 : i32
    %c0_i32_0 = arith.constant 0 : i32
    %c0_i32_1 = arith.constant 0 : i32
    return %arg0, %c0_i32, %c0_i32_0 : i32, i32, i32
  }
  func.func @transform_4(%arg0: i32) -> (i32, i32, i32, i32) {
    %c0_i32 = arith.constant 0 : i32
    %c0_i32_0 = arith.constant 0 : i32
    %c0_i32_1 = arith.constant 0 : i32
    %c0_i32_2 = arith.constant 0 : i32
    %c0_i32_3 = arith.constant 0 : i32
    return %c0_i32, %c0_i32_0, %c0_i32_1, %c0_i32_2 : i32, i32, i32, i32
  }
  func.func @transform_5(%arg0: i32) -> (i32, i32) {
    %c0_i32 = arith.constant 0 : i32
    %c0_i32_0 = arith.constant 0 : i32
    %c0_i32_1 = arith.constant 0 : i32
    return %c0_i32, %c0_i32_0 : i32, i32
  }
  func.func @transform_6(%arg0: i32) -> (i32, i32, i32) {
    %c0_i32 = arith.constant 0 : i32
    %c0_i32_0 = arith.constant 0 : i32
    %c0_i32_1 = arith.constant 0 : i32
    return %arg0, %c0_i32, %c0_i32_0 : i32, i32, i32
  }
  func.func @transform_7(%arg0: i32) -> (i32, i32, i32) {
    %c0_i32 = arith.constant 0 : i32
    %c0_i32_0 = arith.constant 0 : i32
    %c0_i32_1 = arith.constant 0 : i32
    return %arg0, %c0_i32, %c0_i32_0 : i32, i32, i32
  }
  func.func @transform_8(%arg0: i32) -> (i32, i32, i32) {
    %c0_i32 = arith.constant 0 : i32
    %c0_i32_0 = arith.constant 0 : i32
    %c0_i32_1 = arith.constant 0 : i32
    return %arg0, %c0_i32, %c0_i32_0 : i32, i32, i32
  }
}

</mosaic_0001>

<bundles_post_ra>
// kernel: conv_block_forward.5
= control target key start
LH: loop header
LB: loop body
LE: loop exit
PB: predicated region body
PF: predicated region fallthrough
CT: control target
= control target key end

     0   :  { %s1017_s12 = smov 0   ;;  %s1019_s13 = smov 0   ;;  %s1311_s0 = inlined_call_operand.vmem [shape: bf16[2,256,128], index: 0, kind: input, shape index: {}]   ;;  %s1312_s1 = inlined_call_operand.vmem [shape: f32[1,128], index: 1, kind: input, shape index: {}]   ;;  %s1313_s2 = inlined_call_operand.vmem [shape: f32[1,128], index: 2, kind: input, shape index: {}]   ;;  %s1314_s3 = inlined_call_operand.vmem [shape: f32[2,256,128], index: 3, kind: output, shape index: {}]  }
   0x1   :  { %s1021_s14 = smov 0  }
   0x2 LB: > { %s25_s15 = sadd.s32 1, %s991_s13  ;;  %p699_p0 = scmp.ge.s32.totalorder %s995_s14, 1  ;;  %s995_s14 = sphi %s1021_s14, %s13_s14   ;;  %s991_s13 = sphi %s1019_s13, %s1316_s13   ;;  %s987_s12 = sphi %s1017_s12, %s1315_s12  }
   0x3   : > { %p27_p1 = scmp.ge.s32.totalorder %s25_s15, 2  ;;  %p158_p2 = scmp.lt.s32.totalorder %s995_s14, 3 }
   0x5   : > { %s1318_s15 = smov (%p27_p1, %s25_s15), 0  ;;  %p159_p3 = pnand %p699_p0, %p158_p2 }
   0x6   : > { %p191_p4 = scmp.lt.s32.totalorder (!%p159_p3), %s987_s12, 1  ;;  %v1046_v0 = vld [vmem:[%s1312_s1] ss:$0 sm:$0xff] (!%p159_p3) }
   0x7   : > { %162 = sbr.rel (%p159_p3) target bundleno = 110 (0x6e), region = 32  ;;  %v1055_v9 = vld [vmem:[%s1313_s2] ss:$0 sm:$0xff] (!%p159_p3) }
   0xe   : > { %s1320_s12 = smov (!%p191_p4, %s987_s12), 1 }
   0xf   : > { %s740_s16 = sshll.u32 %s1320_s12, 7  ;;  %s741_s24 = sshll.u32 %s1320_s12, 8 }
  0x10   : > { %s1041_s19 = scalar_lea.vmem %s1311_s0, %s740_s16  ;;  %s1172_s27 = scalar_lea.vmem %s1314_s3, %s741_s24 }
  0x11   : > { %v743_v1 = vld [vmem:[%s1041_s19] sm:$0xff]   ;;  %v806_v2 = vld [vmem:[%s1041_s19 + $0x8] sm:$0xff]   ;;  %v807_v3 = vld [vmem:[%s1041_s19 + $0x10] sm:$0xff]  }
  0x12   : > { %v744_v4 = vunpack.c.l.bf16 %v743_v1  ;;  %v745_v5 = vunpack.c.h.bf16 %v743_v1  ;;  %v748_v6 = vunpack.c.l.bf16 %v806_v2  ;;  %v749_v7 = vunpack.c.h.bf16 %v806_v2  ;;  %v808_v8 = vld [vmem:[%s1041_s19 + $0x18] sm:$0xff]   ;;  %v809_v22 = vld [vmem:[%s1041_s19 + $0x20] sm:$0xff]   ;;  %v810_v31 = vld [vmem:[%s1041_s19 + $0x28] sm:$0xff]  }
  0x13   : > { %v752_v10 = vunpack.c.l.bf16 %v807_v3  ;;  %v753_v11 = vunpack.c.h.bf16 %v807_v3  ;;  %v756_v12 = vunpack.c.l.bf16 %v808_v8  ;;  %v757_v13 = vunpack.c.h.bf16 %v808_v8  ;;  %v811_v32 = vld [vmem:[%s1041_s19 + $0x30] sm:$0xff]   ;;  %v812_v53 = vld [vmem:[%s1041_s19 + $0x38] sm:$0xff]   ;;  %v813_v62 = vld [vmem:[%s1041_s19 + $0x40] sm:$0xff]  }
  0x14   : > { %v281_v14 = vmul.f32 %v744_v4, %v1046_v0  ;;  %v282_v15 = vmul.f32 %v745_v5, %v1046_v0  ;;  %v283_v16 = vmul.f32 %v748_v6, %v1046_v0  ;;  %v284_v17 = vmul.f32 %v749_v7, %v1046_v0  ;;  %v814_v5 = vld [vmem:[%s1041_s19 + $0x48] sm:$0xff]  }
  0x15   : > { %v285_v18 = vmul.f32 %v752_v10, %v1046_v0  ;;  %v286_v19 = vmul.f32 %v753_v11, %v1046_v0  ;;  %v287_v20 = vmul.f32 %v756_v12, %v1046_v0  ;;  %v288_v21 = vmul.f32 %v757_v13, %v1046_v0 }
  0x16   : > { %v1067_v23 = vadd.f32 %v1055_v9, %v281_v14  ;;  %v1070_v24 = vadd.f32 %v1055_v9, %v282_v15  ;;  %v1073_v25 = vadd.f32 %v1055_v9, %v283_v16  ;;  %v1076_v26 = vadd.f32 %v1055_v9, %v284_v17 }
  0x17   : > { %v1079_v27 = vadd.f32 %v1055_v9, %v285_v18  ;;  %v1082_v28 = vadd.f32 %v1055_v9, %v286_v19  ;;  %v1085_v29 = vadd.f32 %v1055_v9, %v287_v20  ;;  %v1088_v30 = vadd.f32 %v1055_v9, %v288_v21 }
  0x18   : > { %v706_v33 = vmul.f32 -1.442695, %v1067_v23  ;;  %v707_v34 = vmul.f32 -1.442695, %v1070_v24  ;;  %v708_v35 = vmul.f32 -1.442695, %v1073_v25  ;;  %v760_v36 = vunpack.c.l.bf16 %v809_v22 }
  0x19   : > { %v709_v37 = vmul.f32 -1.442695, %v1076_v26  ;;  %v710_v38 = vmul.f32 -1.442695, %v1079_v27  ;;  %v711_v39 = vmul.f32 -1.442695, %v1082_v28  ;;  %v761_v40 = vunpack.c.h.bf16 %v809_v22 }
  0x1a   : > { %845 = vpow2.f32 %v706_v33  ;;  %v712_v41 = vmul.f32 -1.442695, %v1085_v29  ;;  %v713_v42 = vmul.f32 -1.442695, %v1088_v30  ;;  %v289_v43 = vmul.f32 %v760_v36, %v1046_v0 }
  0x1b   : > { %847 = vpow2.f32 %v707_v34  ;;  %v290_v44 = vmul.f32 %v761_v40, %v1046_v0  ;;  %v764_v45 = vunpack.c.l.bf16 %v810_v31  ;;  %v765_v46 = vunpack.c.h.bf16 %v810_v31 }
  0x1c   : > { %849 = vpow2.f32 %v708_v35  ;;  %v1103_v47 = vadd.f32 %v1055_v9, %v289_v43  ;;  %v768_v48 = vunpack.c.l.bf16 %v811_v32  ;;  %v769_v49 = vunpack.c.h.bf16 %v811_v32  ;;  %v815_v35 = vld [vmem:[%s1041_s19 + $0x50] sm:$0xff]  }
  0x1d   : > { %851 = vpow2.f32 %v709_v37  ;;  %v1106_v50 = vadd.f32 %v1055_v9, %v290_v44  ;;  %v291_v51 = vmul.f32 %v764_v45, %v1046_v0  ;;  %v292_v52 = vmul.f32 %v765_v46, %v1046_v0 }
  0x1e   : > { %853 = vpow2.f32 %v710_v38  ;;  %v714_v54 = vmul.f32 -1.442695, %v1103_v47  ;;  %v293_v55 = vmul.f32 %v768_v48, %v1046_v0  ;;  %v294_v60 = vmul.f32 %v769_v49, %v1046_v0  ;;  %v816_v49 = vld [vmem:[%s1041_s19 + $0x58] sm:$0xff]  }
  0x1f   : > { %855 = vpow2.f32 %v711_v39  ;;  %v715_v56 = vmul.f32 -1.442695, %v1106_v50  ;;  %v1115_v57 = vadd.f32 %v1055_v9, %v291_v51  ;;  %v1118_v58 = vadd.f32 %v1055_v9, %v292_v52 }
  0x20   : > { %857 = vpow2.f32 %v712_v41  ;;  %v1121_v59 = vadd.f32 %v1055_v9, %v293_v55  ;;  %v772_v61 = vunpack.c.l.bf16 %v812_v53  ;;  %v773_v2 = vunpack.c.h.bf16 %v812_v53 }
  0x21   : > { %859 = vpow2.f32 %v713_v42  ;;  %v716_v63 = vmul.f32 -1.442695, %v1115_v57  ;;  %v717_v1 = vmul.f32 -1.442695, %v1118_v58  ;;  %v776_v7 = vunpack.c.l.bf16 %v813_v62 }
  0x22   : > { %861 = vpow2.f32 %v714_v54  ;;  %v718_v3 = vmul.f32 -1.442695, %v1121_v59  ;;  %v295_v4 = vmul.f32 %v772_v61, %v1046_v0  ;;  %v296_v6 = vmul.f32 %v773_v2, %v1046_v0 }
  0x23   : > { %863 = vpow2.f32 %v715_v56  ;;  %v1132_v10 = vadd.f32 %v1055_v9, %v294_v60  ;;  %v777_v11 = vunpack.c.h.bf16 %v813_v62  ;;  %v297_v14 = vmul.f32 %v776_v7, %v1046_v0 }
  0x24   : > { %v846_v8 = vpop.eup %845  ;;  %865 = vpow2.f32 %v716_v63  ;;  %v780_v15 = vunpack.c.l.bf16 %v814_v5  ;;  %v1136_v18 = vadd.f32 %v1055_v9, %v295_v4  ;;  %v781_v19 = vunpack.c.h.bf16 %v814_v5 }
  0x25   : > { %v848_v12 = vpop.eup %847  ;;  %v448_v13 = vadd.f32 1.0, %v846_v8  ;;  %867 = vpow2.f32 %v717_v1  ;;  %v1139_v22 = vadd.f32 %v1055_v9, %v296_v6  ;;  %v1142_v33 = vmul.f32 -1.442695, %v1132_v10 }
  0x26   : > { %v850_v16 = vpop.eup %849  ;;  %v449_v17 = vadd.f32 1.0, %v848_v12  ;;  %869 = vpow2.f32 %v718_v3  ;;  %v298_v34 = vmul.f32 %v777_v11, %v1046_v0  ;;  %v1147_v38 = vadd.f32 %v1055_v9, %v297_v14 }
  0x27   : > { %v852_v20 = vpop.eup %851  ;;  %871 = vrcp.f32 %v448_v13  ;;  %v450_v21 = vadd.f32 1.0, %v850_v16  ;;  %v299_v39 = vmul.f32 %v780_v15, %v1046_v0  ;;  %v720_v42 = vmul.f32 -1.442695, %v1136_v18  ;;  %v817_v13 = vld [vmem:[%s1041_s19 + $0x60] sm:$0xff]  }
  0x28   : > { %v854_v31 = vpop.eup %853  ;;  %873 = vrcp.f32 %v449_v17  ;;  %v451_v32 = vadd.f32 1.0, %v852_v20  ;;  %v300_v43 = vmul.f32 %v781_v19, %v1046_v0  ;;  %v721_v46 = vmul.f32 -1.442695, %v1139_v22 }
  0x29   : > { %v856_v36 = vpop.eup %855  ;;  %875 = vrcp.f32 %v450_v21  ;;  %v452_v37 = vadd.f32 1.0, %v854_v31  ;;  %v784_v48 = vunpack.c.l.bf16 %v815_v35  ;;  %v1155_v53 = vadd.f32 %v1055_v9, %v298_v34 }
  0x2a   : > { %v858_v40 = vpop.eup %857  ;;  %877 = vrcp.f32 %v451_v32  ;;  %v453_v41 = vadd.f32 1.0, %v856_v36  ;;  %v785_v54 = vunpack.c.h.bf16 %v815_v35  ;;  %v722_v60 = vmul.f32 -1.442695, %v1147_v38 }
  0x2b   : > { %v860_v44 = vpop.eup %859  ;;  %879 = vrcp.f32 %v452_v37  ;;  %v454_v45 = vadd.f32 1.0, %v858_v40  ;;  %v1159_v61 = vadd.f32 %v1055_v9, %v299_v39  ;;  %v1163_v1 = vadd.f32 %v1055_v9, %v300_v43 }
  0x2c   : > { %v862_v51 = vpop.eup %861  ;;  %881 = vrcp.f32 %v453_v41  ;;  %v455_v52 = vadd.f32 1.0, %v860_v44  ;;  %v788_v2 = vunpack.c.l.bf16 %v816_v49  ;;  %v301_v5 = vmul.f32 %v784_v48, %v1046_v0 }
  0x2d   : > { %v864_v55 = vpop.eup %863  ;;  %883 = vrcp.f32 %v454_v45  ;;  %v456_v56 = vadd.f32 1.0, %v862_v51  ;;  %v789_v6 = vunpack.c.h.bf16 %v816_v49  ;;  %v723_v11 = vmul.f32 -1.442695, %v1155_v53 }
  0x2e   : > { %v866_v62 = vpop.eup %865  ;;  %885 = vrcp.f32 %v455_v52  ;;  %v457_v63 = vadd.f32 1.0, %v864_v55  ;;  %v302_v12 = vmul.f32 %v785_v54, %v1046_v0  ;;  %v724_v16 = vmul.f32 -1.442695, %v1159_v61 }
  0x2f   : > { %v868_v3 = vpop.eup %867  ;;  %887 = vrcp.f32 %v456_v56  ;;  %v458_v4 = vadd.f32 1.0, %v866_v62  ;;  %v303_v17 = vmul.f32 %v788_v2, %v1046_v0  ;;  %v725_v21 = vmul.f32 -1.442695, %v1163_v1 }
  0x30   : > { %v870_v7 = vpop.eup %869  ;;  %889 = vrcp.f32 %v457_v63  ;;  %v459_v8 = vadd.f32 1.0, %v868_v3  ;;  %v304_v31 = vmul.f32 %v789_v6, %v1046_v0  ;;  %v1181_v35 = vadd.f32 %v1055_v9, %v301_v5  ;;  %v818_v3 = vld [vmem:[%s1041_s19 + $0x68] sm:$0xff]  }
  0x31   : > { %v872_v14 = vpop.eup %871  ;;  %891 = vrcp.f32 %v458_v4  ;;  %v460_v15 = vadd.f32 1.0, %v870_v7  ;;  %v792_v36 = vunpack.c.l.bf16 %v817_v13  ;;  %v793_v40 = vunpack.c.h.bf16 %v817_v13 }
  0x32   : > { %v874_v19 = vpop.eup %873  ;;  %v544_v20 = vmul.f32 %v872_v14, %v1067_v23  ;;  %893 = vrcp.f32 %v459_v8  ;;  %v1187_v23 = vadd.f32 %v1055_v9, %v302_v12  ;;  %v1192_v43 = vadd.f32 %v1055_v9, %v303_v17 }
  0x33   : > { %v876_v32 = vpop.eup %875  ;;  %v545_v34 = vmul.f32 %v874_v19, %v1070_v24  ;;  %895 = vrcp.f32 %v460_v15  ;;  %v305_v44 = vmul.f32 %v792_v36, %v1046_v0  ;;  %v306_v48 = vmul.f32 %v793_v40, %v1046_v0  ;;  %v820_v15 = vld [vmem:[%s1041_s19 + $0x78] sm:$0xff]  }
  0x34   : > { %v878_v37 = vpop.eup %877  ;;  %576 = vst [vmem:[%s1172_s27] sm:$0xff] %v544_v20  ;;  %v546_v39 = vmul.f32 %v876_v32, %v1073_v25  ;;  %897 = vpow2.f32 %v1142_v33  ;;  %v1198_v33 = vadd.f32 %v1055_v9, %v304_v31  ;;  %v728_v56 = vmul.f32 -1.442695, %v1192_v43 }
  0x35   : > { %v880_v41 = vpop.eup %879  ;;  %577 = vst [vmem:[%s1172_s27 + $0x8] sm:$0xff] %v545_v34  ;;  %v547_v24 = vmul.f32 %v878_v37, %v1076_v26  ;;  %899 = vpow2.f32 %v720_v42  ;;  %v726_v42 = vmul.f32 -1.442695, %v1181_v35  ;;  %v1205_v51 = vadd.f32 %v1055_v9, %v305_v44 }
  0x36   : > { %v882_v45 = vpop.eup %881  ;;  %578 = vst [vmem:[%s1172_s27 + $0x10] sm:$0xff] %v546_v39  ;;  %v548_v25 = vmul.f32 %v880_v41, %v1079_v27  ;;  %901 = vpow2.f32 %v721_v46  ;;  %v727_v46 = vmul.f32 -1.442695, %v1187_v23  ;;  %v1211_v54 = vadd.f32 %v1055_v9, %v306_v48 }
  0x37   : > { %v884_v49 = vpop.eup %883  ;;  %579 = vst [vmem:[%s1172_s27 + $0x18] sm:$0xff] %v547_v24  ;;  %v549_v26 = vmul.f32 %v882_v45, %v1082_v28  ;;  %903 = vpow2.f32 %v722_v60  ;;  %v729_v62 = vmul.f32 -1.442695, %v1198_v33  ;;  %v796_v12 = vunpack.c.l.bf16 %v818_v3 }
  0x38   : > { %v886_v52 = vpop.eup %885  ;;  %580 = vst [vmem:[%s1172_s27 + $0x20] sm:$0xff] %v548_v25  ;;  %v550_v27 = vmul.f32 %v884_v49, %v1085_v29  ;;  %905 = vpow2.f32 %v723_v11  ;;  %v797_v14 = vunpack.c.h.bf16 %v818_v3  ;;  %v804_v34 = vunpack.c.l.bf16 %v820_v15 }
  0x39   : > { %v888_v28 = vpop.eup %887  ;;  %581 = vst [vmem:[%s1172_s27 + $0x28] sm:$0xff] %v549_v26  ;;  %v551_v55 = vmul.f32 %v886_v52, %v1088_v30  ;;  %907 = vpow2.f32 %v724_v16  ;;  %v730_v30 = vmul.f32 -1.442695, %v1205_v51  ;;  %v307_v32 = vmul.f32 %v796_v12, %v1046_v0 }
  0x3a   : > { %v890_v60 = vpop.eup %889  ;;  %582 = vst [vmem:[%s1172_s27 + $0x30] sm:$0xff] %v550_v27  ;;  %v552_v29 = vmul.f32 %v888_v28, %v1103_v47  ;;  %909 = vpow2.f32 %v725_v21  ;;  %v731_v47 = vmul.f32 -1.442695, %v1211_v54  ;;  %v308_v39 = vmul.f32 %v797_v14, %v1046_v0 }
  0x3b   : > { %v892_v63 = vpop.eup %891  ;;  %583 = vst [vmem:[%s1172_s27 + $0x38] sm:$0xff] %v551_v55  ;;  %v553_v2 = vmul.f32 %v890_v60, %v1106_v50  ;;  %911 = vpow2.f32 %v726_v42  ;;  %v819_v50 = vld [vmem:[%s1041_s19 + $0x70] sm:$0xff]   ;;  %v805_v40 = vunpack.c.h.bf16 %v820_v15  ;;  %v1239_v42 = vadd.f32 %v1055_v9, %v307_v32 }
  0x3c   : > { %v894_v4 = vpop.eup %893  ;;  %584 = vst [vmem:[%s1172_s27 + $0x40] sm:$0xff] %v552_v29  ;;  %v554_v5 = vmul.f32 %v892_v63, %v1115_v57  ;;  %913 = vpow2.f32 %v727_v46  ;;  %v800_v19 = vunpack.c.l.bf16 %v819_v50  ;;  %v801_v21 = vunpack.c.h.bf16 %v819_v50 }
  0x3d   : > { %v896_v6 = vpop.eup %895  ;;  %585 = vst [vmem:[%s1172_s27 + $0x48] sm:$0xff] %v553_v2  ;;  %v555_v7 = vmul.f32 %v894_v4, %v1118_v58  ;;  %915 = vpow2.f32 %v728_v56  ;;  %v311_v52 = vmul.f32 %v804_v34, %v1046_v0  ;;  %v1243_v28 = vadd.f32 %v1055_v9, %v308_v39 }
  0x3e   : > { %v898_v8 = vpop.eup %897  ;;  %586 = vst [vmem:[%s1172_s27 + $0x50] sm:$0xff] %v554_v5  ;;  %v556_v11 = vmul.f32 %v896_v6, %v1121_v59  ;;  %917 = vpow2.f32 %v729_v62  ;;  %v309_v44 = vmul.f32 %v800_v19, %v1046_v0  ;;  %v310_v48 = vmul.f32 %v801_v21, %v1046_v0 }
  0x3f   : > { %v900_v13 = vpop.eup %899  ;;  %587 = vst [vmem:[%s1172_s27 + $0x58] sm:$0xff] %v555_v7  ;;  %v461_v57 = vadd.f32 1.0, %v898_v8  ;;  %919 = vpow2.f32 %v730_v30  ;;  %v312_v55 = vmul.f32 %v805_v40, %v1046_v0  ;;  %v732_v4 = vmul.f32 -1.442695, %v1239_v42 }
  0x40   : > { %v902_v16 = vpop.eup %901  ;;  %588 = vst [vmem:[%s1172_s27 + $0x60] sm:$0xff] %v556_v11  ;;  %v462_v17 = vadd.f32 1.0, %v900_v13  ;;  %921 = vpow2.f32 %v731_v47  ;;  %v1247_v29 = vadd.f32 %v1055_v9, %v309_v44  ;;  %v1250_v2 = vadd.f32 %v1055_v9, %v310_v48 }
  0x41   : > { %v904_v58 = vpop.eup %903  ;;  %923 = vrcp.f32 %v461_v57  ;;  %v463_v20 = vadd.f32 1.0, %v902_v16  ;;  %v1254_v0 = vadd.f32 %v1055_v9, %v311_v52  ;;  %v733_v6 = vmul.f32 -1.442695, %v1243_v28 }
  0x42   : > { %v906_v31 = vpop.eup %905  ;;  %925 = vrcp.f32 %v462_v17  ;;  %v464_v59 = vadd.f32 1.0, %v904_v58  ;;  %v1258_v7 = vadd.f32 %v1055_v9, %v312_v55  ;;  %v734_v11 = vmul.f32 -1.442695, %v1247_v29 }
  0x43   : > { %v908_v36 = vpop.eup %907  ;;  %927 = vrcp.f32 %v463_v20  ;;  %v465_v37 = vadd.f32 1.0, %v906_v31  ;;  %v735_v57 = vmul.f32 -1.442695, %v1250_v2  ;;  %v736_v9 = vmul.f32 -1.442695, %v1254_v0 }
  0x44   : > { %v910_v41 = vpop.eup %909  ;;  %929 = vrcp.f32 %v464_v59  ;;  %v466_v24 = vadd.f32 1.0, %v908_v36 }
  0x45   : > { %v912_v45 = vpop.eup %911  ;;  %931 = vrcp.f32 %v465_v37  ;;  %v467_v25 = vadd.f32 1.0, %v910_v41 }
  0x46   : > { %v914_v49 = vpop.eup %913  ;;  %933 = vrcp.f32 %v466_v24  ;;  %v468_v26 = vadd.f32 1.0, %v912_v45 }
  0x47   : > { %v916_v27 = vpop.eup %915  ;;  %935 = vrcp.f32 %v467_v25  ;;  %v469_v46 = vadd.f32 1.0, %v914_v49 }
  0x48   : > { %v918_v56 = vpop.eup %917  ;;  %937 = vrcp.f32 %v468_v26  ;;  %v470_v60 = vadd.f32 1.0, %v916_v27 }
  0x49   : > { %v920_v62 = vpop.eup %919  ;;  %939 = vrcp.f32 %v469_v46  ;;  %v471_v63 = vadd.f32 1.0, %v918_v56 }
  0x4a   : > { %v922_v30 = vpop.eup %921  ;;  %941 = vrcp.f32 %v470_v60  ;;  %v472_v3 = vadd.f32 1.0, %v920_v62 }
  0x4b   : > { %v924_v5 = vpop.eup %923  ;;  %943 = vrcp.f32 %v471_v63  ;;  %v473_v47 = vadd.f32 1.0, %v922_v30 }
  0x4c   : > { %v926_v50 = vpop.eup %925  ;;  %v557_v8 = vmul.f32 %v924_v5, %v1132_v10  ;;  %945 = vrcp.f32 %v472_v3 }
  0x4d   : > { %v928_v12 = vpop.eup %927  ;;  %v558_v13 = vmul.f32 %v926_v50, %v1136_v18  ;;  %947 = vrcp.f32 %v473_v47  ;;  %v737_v18 = vmul.f32 -1.442695, %v1258_v7 }
  0x4e   : > { %v930_v14 = vpop.eup %929  ;;  %589 = vst [vmem:[%s1172_s27 + $0x68] sm:$0xff] %v557_v8  ;;  %v559_v15 = vmul.f32 %v928_v12, %v1139_v22  ;;  %949 = vpow2.f32 %v732_v4 }
  0x4f   : > { %v932_v10 = vpop.eup %931  ;;  %590 = vst [vmem:[%s1172_s27 + $0x70] sm:$0xff] %v558_v13  ;;  %v560_v16 = vmul.f32 %v930_v14, %v1147_v38  ;;  %951 = vpow2.f32 %v733_v6 }
  0x50   : > { %v934_v17 = vpop.eup %933  ;;  %591 = vst [vmem:[%s1172_s27 + $0x78] sm:$0xff] %v559_v15  ;;  %v561_v19 = vmul.f32 %v932_v10, %v1155_v53  ;;  %953 = vpow2.f32 %v734_v11 }
  0x51   : > { %v936_v58 = vpop.eup %935  ;;  %592 = vst [vmem:[%s1172_s27 + $0x80] sm:$0xff] %v560_v16  ;;  %v562_v22 = vmul.f32 %v934_v17, %v1159_v61  ;;  %955 = vpow2.f32 %v735_v57 }
  0x52   : > { %v938_v20 = vpop.eup %937  ;;  %593 = vst [vmem:[%s1172_s27 + $0x88] sm:$0xff] %v561_v19  ;;  %v563_v38 = vmul.f32 %v936_v58, %v1163_v1  ;;  %957 = vpow2.f32 %v736_v9 }
  0x53   : > { %v940_v21 = vpop.eup %939  ;;  %594 = vst [vmem:[%s1172_s27 + $0x90] sm:$0xff] %v562_v22  ;;  %v564_v31 = vmul.f32 %v938_v20, %v1181_v35  ;;  %959 = vpow2.f32 %v737_v18 }
  0x54   : > { %v942_v53 = vpop.eup %941  ;;  %595 = vst [vmem:[%s1172_s27 + $0x98] sm:$0xff] %v563_v38  ;;  %v565_v59 = vmul.f32 %v940_v21, %v1187_v23 }
  0x55   : > { %v944_v61 = vpop.eup %943  ;;  %596 = vst [vmem:[%s1172_s27 + $0xa0] sm:$0xff] %v564_v31  ;;  %v566_v32 = vmul.f32 %v942_v53, %v1192_v43 }
  0x56   : > { %v946_v34 = vpop.eup %945  ;;  %597 = vst [vmem:[%s1172_s27 + $0xa8] sm:$0xff] %v565_v59  ;;  %v567_v1 = vmul.f32 %v944_v61, %v1198_v33 }
  0x57   : > { %v948_v36 = vpop.eup %947  ;;  %598 = vst [vmem:[%s1172_s27 + $0xb0] sm:$0xff] %v566_v32  ;;  %v568_v37 = vmul.f32 %v946_v34, %v1205_v51 }
  0x58   : > { %v950_v35 = vpop.eup %949  ;;  %599 = vst [vmem:[%s1172_s27 + $0xb8] sm:$0xff] %v567_v1  ;;  %v569_v39 = vmul.f32 %v948_v36, %v1211_v54 }
  0x59   : > { %v952_v40 = vpop.eup %951  ;;  %600 = vst [vmem:[%s1172_s27 + $0xc0] sm:$0xff] %v568_v37  ;;  %v474_v23 = vadd.f32 1.0, %v950_v35 }
  0x5a   : > { %v954_v41 = vpop.eup %953  ;;  %601 = vst [vmem:[%s1172_s27 + $0xc8] sm:$0xff] %v569_v39  ;;  %v475_v24 = vadd.f32 1.0, %v952_v40 }
  0x5b   : > { %v956_v44 = vpop.eup %955  ;;  %961 = vrcp.f32 %v474_v23  ;;  %v476_v43 = vadd.f32 1.0, %v954_v41 }
  0x5c   : > { %v958_v45 = vpop.eup %957  ;;  %963 = vrcp.f32 %v475_v24  ;;  %v477_v33 = vadd.f32 1.0, %v956_v44 }
  0x5d   : > { %v960_v25 = vpop.eup %959  ;;  %965 = vrcp.f32 %v476_v43  ;;  %v478_v51 = vadd.f32 1.0, %v958_v45 }
  0x5e   : > { %967 = vrcp.f32 %v477_v33  ;;  %v479_v54 = vadd.f32 1.0, %v960_v25 }
  0x5f   : > { %969 = vrcp.f32 %v478_v51 }
  0x60   : > { %971 = vrcp.f32 %v479_v54 }
  0x65   : > { %v962_v48 = vpop.eup %961 }
  0x66   : > { %v964_v49 = vpop.eup %963  ;;  %v570_v26 = vmul.f32 %v962_v48, %v1239_v42 }
  0x67   : > { %v966_v52 = vpop.eup %965  ;;  %v571_v27 = vmul.f32 %v964_v49, %v1243_v28 }
  0x68   : > { %v968_v46 = vpop.eup %967  ;;  %602 = vst [vmem:[%s1172_s27 + $0xd0] sm:$0xff] %v570_v26  ;;  %v572_v55 = vmul.f32 %v966_v52, %v1247_v29 }
  0x69   : > { %v970_v56 = vpop.eup %969  ;;  %603 = vst [vmem:[%s1172_s27 + $0xd8] sm:$0xff] %v571_v27  ;;  %v573_v60 = vmul.f32 %v968_v46, %v1250_v2 }
  0x6a   : > { %v972_v62 = vpop.eup %971  ;;  %604 = vst [vmem:[%s1172_s27 + $0xe0] sm:$0xff] %v572_v55  ;;  %v574_v63 = vmul.f32 %v970_v56, %v1254_v0 }
  0x6b   : > { %605 = vst [vmem:[%s1172_s27 + $0xe8] sm:$0xff] %v573_v60  ;;  %v575_v30 = vmul.f32 %v972_v62, %v1258_v7 }
  0x6c   : > { %606 = vst [vmem:[%s1172_s27 + $0xf0] sm:$0xff] %v574_v63 }
  0x6d   : > { %607 = vst [vmem:[%s1172_s27 + $0xf8] sm:$0xff] %v575_v30 }
  0x6e PF: > { %s13_s14 = sadd.s32 1, %s995_s14   ;;  %s1315_s12 = smov %s991_s13 }
  0x6f   : > { %p10_p5 = scmp.ge.s32.totalorder %s13_s14, 4   ;;  %s1316_s13 = smov %s1318_s15 }
  0x71   :  { %12 = sbr.rel (!%p10_p5) target bundleno = 2 (0x2), region = 62 }

// kernel: conv_block_forward.3
= control target key start
LH: loop header
LB: loop body
LE: loop exit
PB: predicated region body
PF: predicated region fallthrough
CT: control target
= control target key end

     0   :  { %s7376_s18 = smov 0   ;;  %s9239_s0 = inlined_call_operand.vmem [shape: bf16[2,18,18,128], index: 0, kind: input, shape index: {}]   ;;  %s9240_s1 = inlined_call_operand.vmem [shape: bf16[3,3,128,128], index: 1, kind: input, shape index: {}]   ;;  %s9241_s2 = inlined_call_operand.vmem [shape: f32[1,128], index: 2, kind: input, shape index: {}]   ;;  %s9242_s3 = inlined_call_operand.vmem [shape: bf16[2,256,128], index: 3, kind: output, shape index: {0}]   ;;  %s9243_s4 = inlined_call_operand.vmem [shape: f32[2,1,128], index: 4, kind: output, shape index: {1}]   ;;  %s9244_s5 = inlined_call_operand.vmem [shape: f32[2,1,128], index: 5, kind: output, shape index: {2}]  }
   0x1 LB: > { %s5464_s19 = sadd.s32 4294967295, %s7344_s18   ;;  %p5468_p0 = scmp.ge.s32.totalorder %s7344_s18, 1  ;;  %s7344_s18 = sphi %s7376_s18, %s16_s18  }
   0x2   : > { %p192_p1 = scmp.lt.s32.totalorder %s7344_s18, 3 }
   0x4   : > { %p193_p2 = pnand %p5468_p0, %p192_p1 }
   0x6   : > { %196 = sbr.rel (%p193_p2) target bundleno = 605 (0x25d), region = 32 }
   0xd   : > { %v7148_v0 = vld [vmem:[%s9240_s1 + $0x40] sm:$0xff]   ;;  %p226_p3 = scmp.lt.s32.totalorder %s5464_s19, 1  ;;  %v7150_v2 = vld [vmem:[%s9240_s1 + $0x48] sm:$0xff]   ;;  %v7152_v4 = vld [vmem:[%s9240_s1 + $0x50] sm:$0xff]   ;;  %vm307_vm0 = vsmask.f32 3328 }
   0xe   : > { %v7149_v1 = vld [vmem:[%s9240_s1 + $0x100] sm:$0xff]   ;;  %6435 = vmatprep.subr.bf16.mxu1 %v7148_v0  ;;  %v7151_v3 = vld [vmem:[%s9240_s1 + $0x108] sm:$0xff]   ;;  %v7153_v5 = vld [vmem:[%s9240_s1 + $0x110] sm:$0xff]   ;;  %vm308_vm1 = vsmask.f32 7440  ;;  %vm1337_vm3 = vcmask 1042432  }
   0xf   : > { %6627 = vmatprep.subr.bf16.mxu0 %v7149_v1  ;;  %6436 = vmatpush3.bf16.msra.mxu1 %v7148_v0  ;;  %s9312_s19 = smov (!%p226_p3, %s5464_s19), 1  ;;  %v7154_v6 = vld [vmem:[%s9240_s1 + $0x58] sm:$0xff]   ;;  %v7156_v8 = vld [vmem:[%s9240_s1 + $0x60] sm:$0xff]   ;;  %v7158_v10 = vld [vmem:[%s9240_s1 + $0x68] sm:$0xff]   ;;  %vm1338_vm4 = vcmask 1046532  }
  0x10   : > { %6628 = vmatpush3.bf16.msra.mxu0 %v7149_v1  ;;  %6437 = vmatprep.subr.bf16.mxu1 %v7150_v2  ;;  %v7155_v7 = vld [vmem:[%s9240_s1 + $0x118] sm:$0xff]   ;;  %s7139_s11 = smul.u32 216, %s9312_s19  ;;  %v7157_v9 = vld [vmem:[%s9240_s1 + $0x120] sm:$0xff]   ;;  %v7159_v11 = vld [vmem:[%s9240_s1 + $0x128] sm:$0xff]   ;;  %s6091_s30 = sshll.u32 %s9312_s19, 7 }
  0x11   : > { %6629 = vmatprep.subr.bf16.mxu0 %v7151_v3  ;;  %v7160_v25 = vld [vmem:[%s9240_s1 + $0x70] sm:$0xff]   ;;  %v7162_v36 = vld [vmem:[%s9240_s1 + $0x78] sm:$0xff]   ;;  %vm7452_vm2 = vmor %vm307_vm0, %vm308_vm1  ;;  %s9174_s8 = scalar_lea.vmem %s9242_s3, %s6091_s30  ;;  %s241_s14 = scalar_lea.vmem %s9244_s5, %s9312_s19 }
  0x12   : > { %s7420_s20 = scalar_lea.vmem %s9239_s0, %s7139_s11  ;;  %v7161_v30 = vld [vmem:[%s9240_s1 + $0x130] sm:$0xff]   ;;  %v7163_v51 = vld [vmem:[%s9240_s1 + $0x138] sm:$0xff]   ;;  %vm7698_vm5 = vmor %vm1337_vm3, %vm1338_vm4  ;;  %s238_s11 = scalar_lea.vmem %s9243_s4, %s9312_s19 }
  0x13   : > { %6438 = vmatpush3.bf16.msra.mxu1 %v7150_v2  ;;  %v243_v12 = vld [vmem:[%s7420_s20] sm:$0xf]  ;;  %v244_v13 = vld [vmem:[%s7420_s20 + $0x4] sm:$0xf]  ;;  %v291_v14 = vld [vmem:[%s7420_s20 + $0x8] sm:$0x1] }
  0x14   : > { %6630 = vmatpush3.bf16.msra.mxu0 %v7151_v3  ;;  %6439 = vmatprep.subr.bf16.mxu1 %v7152_v4  ;;  %v311_v15 = vshrl.u32 %v243_v12, 16  ;;  %v314_v16 = vshll.u32 %v243_v12, 16  ;;  %v320_v17 = vshll.u32 %v244_v13, 16  ;;  %v324_v18 = vshrl.u32 %v244_v13, 16  ;;  %v5664_v20 = vld [vmem:[%s7420_s20 + $0xc] sm:$0xf] }
  0x15   : > { %6631 = vmatprep.subr.bf16.mxu0 %v7153_v5  ;;  %v330_v19 = vshll.u32 %v291_v14, 16  ;;  %v7433_v23 = vld [vmem:[%s7420_s20 + $0x10] sm:$0xf]  ;;  %v7436_v24 = vld [vmem:[%s7420_s20 + $0x14] sm:$0x1]  ;;  %v2210_v29 = vshrl.u32 %v5664_v20, 16 }
  0x16   : > { %v313_v21 = vrot.slane %v311_v15, 4  ;;  %v316_v22 = vrot.slane %v314_v16, 5  ;;  %v322_v26 = vrot.slane %v320_v17, 5  ;;  %v326_v27 = vrot.slane %v324_v18, 4  ;;  %v245_v35 = vld [vmem:[%s7420_s20 + $0xc] sm:$0xf] }
  0x17   : > { %6440 = vmatpush3.bf16.msra.mxu1 %v7152_v4  ;;  %v332_v28 = vrot.slane %v330_v19, 5  ;;  %v2213_v32 = vshll.u32 %v5664_v20, 16  ;;  %v2219_v33 = vshll.u32 %v7433_v23, 16  ;;  %v2223_v34 = vshrl.u32 %v7433_v23, 16  ;;  %v246_v42 = vld [vmem:[%s7420_s20 + $0x10] sm:$0xf] }
  0x18   : > { %6632 = vmatpush3.bf16.msra.mxu0 %v7153_v5  ;;  %6441 = vmatprep.subr.bf16.mxu1 %v7154_v6  ;;  %v317_v31 = vor.u32 %v316_v22, %v313_v21  ;;  %v327_v38 = vor.u32 %v326_v27, %v322_v26  ;;  %v2212_v39 = vrot.slane %v2210_v29, 4  ;;  %v2229_v40 = vshll.u32 %v7436_v24, 16  ;;  %v292_v55 = vld [vmem:[%s7420_s20 + $0x14] sm:$0x1]  ;;  %v5667_v57 = vld [vmem:[%s7420_s20 + $0x18] sm:$0xf] }
  0x19   : > { %6633 = vmatprep.subr.bf16.mxu0 %v7155_v7  ;;  %v2984_v41 = vrot.slane %v7436_v24, 5  ;;  %v2215_v44 = vrot.slane %v2213_v32, 5  ;;  %v2221_v45 = vrot.slane %v2219_v33, 5  ;;  %v2225_v46 = vrot.slane %v2223_v34, 4  ;;  %v7469_v62 = vld [vmem:[%s7420_s20 + $0x1c] sm:$0xf] }
  0x1a   : > { %v318_v43 = vrot.slane %v317_v31, 4  ;;  %v328_v47 = vrot.slane %v327_v38, 4  ;;  %v2231_v48 = vrot.slane %v2229_v40, 5  ;;  %v335_v49 = vshrl.u32 %v245_v35, 16  ;;  %v7164_v3 = vld [vmem:[%s9240_s1] sm:$0xff]  }
  0x1b   : > { %6442 = vmatpush3.bf16.msra.mxu1 %v7154_v6  ;;  %v338_v50 = vshll.u32 %v245_v35, 16  ;;  %v2216_v53 = vor.u32 %v2215_v44, %v2212_v39  ;;  %v2226_v54 = vor.u32 %v2225_v46, %v2221_v45  ;;  %v344_v56 = vshll.u32 %v246_v42, 16  ;;  %v7477_v4 = vld [vmem:[%s9240_s1 + $0x140] sm:$0xff]   ;;  %v247_v21 = vld [vmem:[%s7420_s20 + $0x18] sm:$0xf]  ;;  %v7167_v46 = vld [vmem:[%s9240_s1 + $0x8] sm:$0xff]  }
  0x1c   : > { %6634 = vmatpush3.bf16.msra.mxu0 %v7155_v7  ;;  %6443 = vmatprep.subr.bf16.mxu1 %v7156_v8  ;;  %v323_v52 = vsel %vm7452_vm2, %v318_v43, %v322_v26  ;;  %v333_v58 = vsel %vm7452_vm2, %v328_v47, %v332_v28  ;;  %v337_v59 = vrot.slane %v335_v49, 4  ;;  %v348_v61 = vshrl.u32 %v246_v42, 16  ;;  %v248_v28 = vld [vmem:[%s7420_s20 + $0x1c] sm:$0xf]  ;;  %v293_v33 = vld [vmem:[%s7420_s20 + $0x20] sm:$0x1] }
  0x1d   : > { %6635 = vmatprep.subr.bf16.mxu0 %v7157_v9  ;;  %v340_v60 = vrot.slane %v338_v50, 5  ;;  %v5488_v63 = vcombine.low %v323_v52, %v333_v58  ;;  %v2217_v0 = vrot.slane %v2216_v53, 4  ;;  %v2227_v1 = vrot.slane %v2226_v54, 4  ;;  %v5670_v39 = vld [vmem:[%s7420_s20 + $0x24] sm:$0xf] }
  0x1e   : > { %v346_v2 = vrot.slane %v344_v56, 5  ;;  %v350_v6 = vrot.slane %v348_v61, 4  ;;  %v354_v7 = vshll.u32 %v292_v55, 16  ;;  %v2237_v12 = vshll.u32 %v5667_v57, 16  ;;  %v249_v52 = vld [vmem:[%s7420_s20 + $0x24] sm:$0xf] }
  0x1f   : > { %6444 = vmatpush3.bf16.msra.mxu1 %v7156_v8  ;;  %v341_v5 = vor.u32 %v340_v60, %v337_v59  ;;  %v7480_v8 = vld [vmem:[%s7420_s20 + $0x20] sm:$0x1]  ;;  %6451 = vmatprep.mubr.bf16.mxu1 %v5488_v63  ;;  %v2243_v19 = vshll.u32 %v7469_v62, 16  ;;  %v2247_v20 = vshrl.u32 %v7469_v62, 16  ;;  %v2988_v27 = vrot.slane %v7469_v62, 5  ;;  %v7166_v63 = vld [vmem:[%s9240_s1 + $0x148] sm:$0xff]  }
  0x20   : > { %6636 = vmatpush3.bf16.msra.mxu0 %v7157_v9  ;;  %6445 = vmatprep.subr.bf16.mxu1 %v7158_v10  ;;  %v2222_v9 = vsel %vm7452_vm2, %v2217_v0, %v2221_v45  ;;  %v351_v15 = vor.u32 %v350_v6, %v346_v2  ;;  %v356_v16 = vrot.slane %v354_v7, 5  ;;  %v2239_v18 = vrot.slane %v2237_v12, 5  ;;  %v7505_v45 = vld [vmem:[%s7420_s20 + $0x28] sm:$0xf] }
  0x21   : > { %6637 = vmatprep.subr.bf16.mxu0 %v7159_v11  ;;  %v342_v14 = vrot.slane %v341_v5, 4  ;;  %v2253_v26 = vshll.u32 %v7480_v8, 16  ;;  %v2249_v31 = vrot.slane %v2247_v20, 4  ;;  %v2991_v32 = vrot.slane %v7480_v8, 5  ;;  %v250_v5 = vld [vmem:[%s7420_s20 + $0x28] sm:$0xf] }
  0x22   : > { %v359_v38 = vshrl.u32 %v247_v21, 16  ;;  %v362_v44 = vshll.u32 %v247_v21, 16  ;;  %v372_v49 = vshrl.u32 %v248_v28, 16  ;;  %v378_v50 = vshll.u32 %v293_v33, 16  ;;  %v7536_v33 = vld [vmem:[%s7420_s20 + $0x34] sm:$0xf] }
  0x23   : > { %6446 = vmatpush3.bf16.msra.mxu1 %v7158_v10  ;;  %v2232_v10 = vsel %vm7452_vm2, %v2227_v1, %v2231_v48  ;;  %v347_v22 = vsel %vm7452_vm2, %v342_v14, %v346_v2  ;;  %v2255_v35 = vrot.slane %v2253_v26, 5  ;;  %v368_v48 = vshll.u32 %v248_v28, 16 }
  0x24   : > { %6638 = vmatpush3.bf16.msra.mxu0 %v7159_v11  ;;  %6447 = vmatprep.subr.bf16.mxu1 %v7160_v25  ;;  %v2234_v11 = vshrl.u32 %v5667_v57, 16  ;;  %v5728_v13 = vcombine.low %v2222_v9, %v2232_v10  ;;  %v361_v47 = vrot.slane %v359_v38, 4  ;;  %v364_v55 = vrot.slane %v362_v44, 5 }
  0x25   : > { %6639 = vmatprep.subr.bf16.mxu0 %v7161_v30  ;;  %v2258_v56 = vshrl.u32 %v5670_v39, 16  ;;  %v370_v57 = vrot.slane %v368_v48, 5  ;;  %v374_v58 = vrot.slane %v372_v49, 4  ;;  %v380_v59 = vrot.slane %v378_v50, 5  ;;  %v7169_v48 = vld [vmem:[%s9240_s1 + $0x158] sm:$0xff]  }
  0x26   : > { %v2236_v17 = vrot.slane %v2234_v11, 4  ;;  %6643 = vmatprep.mubr.bf16.mxu0 %v5728_v13  ;;  %v2261_v60 = vshll.u32 %v5670_v39, 16  ;;  %v365_v0 = vor.u32 %v364_v55, %v361_v47  ;;  %v2267_v2 = vshll.u32 %v7505_v45, 16  ;;  %v294_v11 = vld [vmem:[%s7420_s20 + $0x2c] sm:$0x1] }
  0x27   : > { %6448 = vmatpush3.bf16.msra.mxu1 %v7160_v25  ;;  %v352_v25 = vrot.slane %v351_v15, 4  ;;  %v2260_v1 = vrot.slane %v2258_v56, 4  ;;  %v375_v7 = vor.u32 %v374_v58, %v370_v57  ;;  %v2271_v10 = vshrl.u32 %v7505_v45, 16 }
  0x28   : > { %6640 = vmatpush3.bf16.msra.mxu0 %v7161_v30  ;;  %6449 = vmatprep.subr.bf16.mxu1 %v7162_v36  ;;  %v2240_v29 = vor.u32 %v2239_v18, %v2236_v17  ;;  %v2245_v30 = vrot.slane %v2243_v19, 5  ;;  %v2263_v9 = vrot.slane %v2261_v60, 5  ;;  %v366_v12 = vrot.slane %v365_v0, 4  ;;  %v7176_v60 = vld [vmem:[%s9240_s1 + $0x20] sm:$0xff]  }
  0x29   : > { %6641 = vmatprep.subr.bf16.mxu0 %v7163_v51  ;;  %v357_v34 = vsel %vm7452_vm2, %v352_v25, %v356_v16  ;;  %v2269_v13 = vrot.slane %v2267_v2, 5  ;;  %v383_v15 = vshrl.u32 %v249_v52, 16  ;;  %v5673_v16 = vld [vmem:[%s7420_s20 + $0x30] sm:$0xf]  ;;  %v376_v17 = vrot.slane %v375_v7, 4 }
  0x2a   : > { %v5489_v40 = vcombine.low %v347_v22, %v357_v34  ;;  %v2241_v42 = vrot.slane %v2240_v29, 4  ;;  %v2250_v43 = vor.u32 %v2249_v31, %v2245_v30  ;;  %v2264_v18 = vor.u32 %v2263_v9, %v2260_v1  ;;  %v7173_v34 = vld [vmem:[%s9240_s1 + $0x18] sm:$0xff]  }
  0x2b   : > { %6450 = vmatpush3.bf16.msra.mxu1 %v7162_v36  ;;  %v7501_v36 = vrot.slane %v2988_v27, 4  ;;  %v2273_v19 = vrot.slane %v2271_v10, 4  ;;  %v386_v20 = vshll.u32 %v249_v52, 16  ;;  %v371_v21 = vsel %vm7452_vm2, %v366_v12, %v370_v57  ;;  %v295_v2 = vld [vmem:[%s7420_s20 + $0x38] sm:$0x1] }
  0x2c   : > { %6642 = vmatpush3.bf16.msra.mxu0 %v7163_v51  ;;  %6483 = vmatprep.subr.bf16.mxu1 %v7164_v3  ;;  %v7511_v51 = vld [vmem:[%s7420_s20 + $0x2c] sm:$0x1]  ;;  %v2246_v53 = vsel %vm7452_vm2, %v2241_v42, %v2245_v30  ;;  %v2251_v54 = vrot.slane %v2250_v43, 4  ;;  %v385_v25 = vrot.slane %v383_v15, 4  ;;  %v392_v26 = vshll.u32 %v250_v5, 16 }
  0x2d   : > { %6675 = vmatprep.subr.bf16.mxu0 %v7477_v4  ;;  %v2277_v14 = vshll.u32 %v7511_v51, 16  ;;  %v381_v28 = vsel %vm7452_vm2, %v376_v17, %v380_v59  ;;  %v2265_v29 = vrot.slane %v2264_v18, 4  ;;  %v2274_v30 = vor.u32 %v2273_v19, %v2269_v13  ;;  %v252_v59 = vld [vmem:[%s7420_s20 + $0x34] sm:$0xf]  ;;  %v5676_v9 = vld [vmem:[%s7420_s20 + $0x3c] sm:$0xf] }
  0x2e   : > { %6452 = vmatmul.mubr.bf16.vlgmr.msra.gmra.mrb[0].mxu1 %v5489_v40  ;;  %v2256_v61 = vsel %vm7452_vm2, %v2251_v54, %v2255_v35  ;;  %v388_v31 = vrot.slane %v386_v20, 5  ;;  %v5490_v35 = vcombine.low %v371_v21, %v381_v28  ;;  %v394_v38 = vrot.slane %v392_v26, 5  ;;  %v251_v54 = vld [vmem:[%s7420_s20 + $0x30] sm:$0xf]  ;;  %v7570_v19 = vld [vmem:[%s7420_s20 + $0x40] sm:$0xf] }
  0x2f   : > { %6484 = vmatpush3.bf16.msra.mxu1 %v7164_v3  ;;  %v7170_v3 = vld [vmem:[%s9240_s1 + $0x10] sm:$0xff]   ;;  %v5729_v6 = vcombine.low %v2246_v53, %v2256_v61  ;;  %v2279_v22 = vrot.slane %v2277_v14, 5  ;;  %v396_v39 = vshrl.u32 %v250_v5, 16  ;;  %v402_v40 = vshll.u32 %v294_v11, 16  ;;  %v7178_v14 = vld [vmem:[%s9240_s1 + $0x28] sm:$0xff]   ;;  %v7171_v20 = vld [vmem:[%s9240_s1 + $0x160] sm:$0xff]  }
  0x30   : > { %6485 = vmatprep.subr.bf16.mxu1 %v7167_v46  ;;  %v2270_v42 = vsel %vm7452_vm2, %v2265_v29, %v2269_v13  ;;  %v2275_v43 = vrot.slane %v2274_v30, 4  ;;  %v389_v44 = vor.u32 %v388_v31, %v385_v25  ;;  %v2282_v47 = vshrl.u32 %v5673_v16, 16  ;;  %6455 = vmatprep.mubr.bf16.mxu1 %v5490_v35  ;;  %v7578_v28 = vld [vmem:[%s7420_s20 + $0x44] sm:$0x1]  ;;  %v7180_v35 = vld [vmem:[%s9240_s1 + $0x30] sm:$0xff]  }
  0x31   : > { %6644 = vmatmul.mubr.bf16.vlgmr.msra.gmra.mrb[0].mxu0 %v5729_v6  ;;  %v398_v49 = vrot.slane %v396_v39, 4  ;;  %v404_v50 = vrot.slane %v402_v40, 5  ;;  %v2285_v52 = vshll.u32 %v5673_v16, 16  ;;  %v2291_v53 = vshll.u32 %v7536_v33, 16 }
  0x32   : > { %6676 = vmatpush3.bf16.msra.mxu0 %v7477_v4  ;;  %v7168_v4 = vld [vmem:[%s9240_s1 + $0x150] sm:$0xff]   ;;  %v2280_v55 = vsel %vm7452_vm2, %v2275_v43, %v2279_v22  ;;  %v390_v56 = vrot.slane %v389_v44, 4  ;;  %v2284_v57 = vrot.slane %v2282_v47, 4  ;;  %v2295_v58 = vshrl.u32 %v7536_v33, 16 }
  0x33   : > { %6486 = vmatpush3.bf16.msra.mxu1 %v7167_v46  ;;  %6677 = vmatprep.subr.bf16.mxu0 %v7166_v63  ;;  %v7547_v46 = vld [vmem:[%s7420_s20 + $0x38] sm:$0x1]  ;;  %v5730_v61 = vcombine.low %v2270_v42, %v2280_v55  ;;  %v2287_v0 = vrot.slane %v2285_v52, 5  ;;  %v2293_v1 = vrot.slane %v2291_v53, 5  ;;  %v407_v7 = vshrl.u32 %v251_v54, 16 }
  0x34   : > { %6487 = vmatprep.subr.bf16.mxu1 %v7170_v3  ;;  %v395_v5 = vsel %vm7452_vm2, %v390_v56, %v394_v38  ;;  %v2301_v6 = vshll.u32 %v7547_v46, 16  ;;  %v410_v12 = vshll.u32 %v251_v54, 16  ;;  %v416_v13 = vshll.u32 %v252_v59, 16  ;;  %v254_v55 = vld [vmem:[%s7420_s20 + $0x40] sm:$0xf] }
  0x35   : > { %6647 = vmatprep.mubr.bf16.mxu0 %v5730_v61  ;;  %v2288_v11 = vor.u32 %v2287_v0, %v2284_v57  ;;  %v409_v17 = vrot.slane %v407_v7, 4  ;;  %v420_v18 = vshrl.u32 %v252_v59, 16  ;;  %v2306_v40 = vshrl.u32 %v5676_v9, 16 }
  0x36   : > { %6678 = vmatpush3.bf16.msra.mxu0 %v7166_v63  ;;  %v399_v63 = vor.u32 %v398_v49, %v394_v38  ;;  %v2303_v16 = vrot.slane %v2301_v6, 5  ;;  %v412_v25 = vrot.slane %v410_v12, 5  ;;  %v418_v26 = vrot.slane %v416_v13, 5 }
  0x37   : > { %6488 = vmatpush3.bf16.msra.mxu1 %v7170_v3  ;;  %6679 = vmatprep.subr.bf16.mxu0 %v7168_v4  ;;  %v2297_v3 = vrot.slane %v2295_v58, 4  ;;  %v2289_v22 = vrot.slane %v2288_v11, 4  ;;  %v422_v31 = vrot.slane %v420_v18, 4  ;;  %v2309_v42 = vshll.u32 %v5676_v9, 16  ;;  %v5679_v9 = vld [vmem:[%s7420_s20 + $0x48] sm:$0xf] }
  0x38   : > { %6489 = vmatprep.subr.bf16.mxu1 %v7173_v34  ;;  %v400_v10 = vrot.slane %v399_v63, 4  ;;  %v413_v39 = vor.u32 %v412_v25, %v409_v17  ;;  %v2315_v49 = vshll.u32 %v7570_v19, 16  ;;  %v2308_v53 = vrot.slane %v2306_v40, 4  ;;  %v296_v63 = vld [vmem:[%s7420_s20 + $0x44] sm:$0x1] }
  0x39   : > { %v2298_v15 = vor.u32 %v2297_v3, %v2293_v1  ;;  %v2294_v38 = vsel %vm7452_vm2, %v2289_v22, %v2293_v1  ;;  %v423_v44 = vor.u32 %v422_v31, %v418_v26  ;;  %v2311_v54 = vrot.slane %v2309_v42, 5  ;;  %v7611_v22 = vld [vmem:[%s7420_s20 + $0x50] sm:$0x1]  ;;  %v7175_v31 = vld [vmem:[%s9240_s1 + $0x178] sm:$0xff]  }
  0x3a   : > { %6680 = vmatpush3.bf16.msra.mxu0 %v7168_v4  ;;  %v405_v21 = vsel %vm7452_vm2, %v400_v10, %v404_v50  ;;  %v426_v4 = vshll.u32 %v295_v2, 16  ;;  %v414_v52 = vrot.slane %v413_v39, 4  ;;  %v2317_v57 = vrot.slane %v2315_v49, 5  ;;  %v7182_v2 = vld [vmem:[%s9240_s1 + $0x38] sm:$0xff]  }
  0x3b   : > { %6490 = vmatpush3.bf16.msra.mxu1 %v7173_v34  ;;  %6681 = vmatprep.subr.bf16.mxu0 %v7169_v48  ;;  %v5491_v29 = vcombine.low %v395_v5, %v405_v21  ;;  %v2299_v30 = vrot.slane %v2298_v15, 4  ;;  %v253_v34 = vld [vmem:[%s7420_s20 + $0x3c] sm:$0xf]  ;;  %v424_v56 = vrot.slane %v423_v44, 4  ;;  %v2319_v58 = vshrl.u32 %v7570_v19, 16  ;;  %v7174_v15 = vld [vmem:[%s9240_s1 + $0x170] sm:$0xff]  }
  0x3c   : > { %6491 = vmatprep.subr.bf16.mxu1 %v7176_v60  ;;  %v428_v47 = vrot.slane %v426_v4, 5  ;;  %v2325_v59 = vshll.u32 %v7578_v28, 16  ;;  %v2312_v61 = vor.u32 %v2311_v54, %v2308_v53  ;;  %v431_v0 = vshrl.u32 %v253_v34, 16  ;;  %v7622_v4 = vld [vmem:[%s9240_s1 + $0x80] sm:$0xff]   ;;  %v256_v53 = vld [vmem:[%s7420_s20 + $0x4c] sm:$0xf] }
  0x3d   : > { %6456 = vmatmul.mubr.bf16.gmra.mrb[4].mxu1 %v5491_v29  ;;  %v2304_v43 = vsel %vm7452_vm2, %v2299_v30, %v2303_v16  ;;  %v434_v1 = vshll.u32 %v253_v34, 16  ;;  %v2321_v3 = vrot.slane %v2319_v58, 4  ;;  %v440_v7 = vshll.u32 %v254_v55, 16  ;;  %v255_v30 = vld [vmem:[%s7420_s20 + $0x48] sm:$0xf] }
  0x3e   : > { %6682 = vmatpush3.bf16.msra.mxu0 %v7169_v48  ;;  %v5731_v50 = vcombine.low %v2294_v38, %v2304_v43  ;;  %v7172_v48 = vld [vmem:[%s9240_s1 + $0x168] sm:$0xff]   ;;  %v429_v5 = vsel %vm7452_vm2, %v424_v56, %v428_v47  ;;  %v2327_v6 = vrot.slane %v2325_v59, 5  ;;  %v2313_v11 = vrot.slane %v2312_v61, 4  ;;  %v297_v54 = vld [vmem:[%s7420_s20 + $0x50] sm:$0x1] }
  0x3f   : > { %6492 = vmatpush3.bf16.msra.mxu1 %v7176_v60  ;;  %6683 = vmatprep.subr.bf16.mxu0 %v7171_v20  ;;  %v419_v60 = vsel %vm7452_vm2, %v414_v52, %v418_v26  ;;  %v433_v12 = vrot.slane %v431_v0, 4  ;;  %v436_v13 = vrot.slane %v434_v1, 5  ;;  %v2322_v16 = vor.u32 %v2321_v3, %v2317_v57  ;;  %v5682_v58 = vld [vmem:[%s7420_s20 + $0x54] sm:$0xf]  ;;  %v7636_v0 = vld [vmem:[%s7420_s20 + $0x58] sm:$0xf] }
  0x40   : > { %6493 = vmatprep.subr.bf16.mxu1 %v7178_v14  ;;  %6648 = vmatmul.mubr.bf16.gmra.mrb[4].mxu0 %v5731_v50  ;;  %v5492_v10 = vcombine.low %v419_v60, %v429_v5  ;;  %v442_v17 = vrot.slane %v440_v7, 5  ;;  %v444_v18 = vshrl.u32 %v254_v55, 16  ;;  %v450_v21 = vshll.u32 %v296_v63, 16 }
  0x41   : > { %v437_v25 = vor.u32 %v436_v13, %v433_v12  ;;  %v2330_v26 = vshrl.u32 %v5679_v9, 16  ;;  %v2333_v29 = vshll.u32 %v5679_v9, 16  ;;  %v2323_v34 = vrot.slane %v2322_v16, 4 }
  0x42   : > { %6684 = vmatpush3.bf16.msra.mxu0 %v7171_v20  ;;  %6459 = vmatprep.mubr.bf16.mxu1 %v5492_v10  ;;  %v2318_v20 = vsel %vm7452_vm2, %v2313_v11, %v2317_v57  ;;  %v452_v38 = vrot.slane %v450_v21, 5  ;;  %v2349_v52 = vshll.u32 %v7611_v22, 16  ;;  %v455_v61 = vshrl.u32 %v255_v30, 16 }
  0x43   : > { %6494 = vmatpush3.bf16.msra.mxu1 %v7178_v14  ;;  %v7605_v14 = vld [vmem:[%s7420_s20 + $0x4c] sm:$0xf]  ;;  %6685 = vmatprep.subr.bf16.mxu0 %v7172_v48  ;;  %v438_v40 = vrot.slane %v437_v25, 4  ;;  %v2332_v42 = vrot.slane %v2330_v26, 4  ;;  %v2335_v43 = vrot.slane %v2333_v29, 5  ;;  %v2328_v47 = vsel %vm7452_vm2, %v2323_v34, %v2327_v6  ;;  %v7641_v6 = vld [vmem:[%s9240_s1 + $0x180] sm:$0xff]  }
  0x44   : > { %6495 = vmatprep.subr.bf16.mxu1 %v7180_v35  ;;  %v2339_v39 = vshll.u32 %v7605_v14, 16  ;;  %v2343_v44 = vshrl.u32 %v7605_v14, 16  ;;  %v5732_v55 = vcombine.low %v2318_v20, %v2328_v47  ;;  %v2351_v60 = vrot.slane %v2349_v52, 5  ;;  %v7648_v20 = vld [vmem:[%s7420_s20 + $0x5c] sm:$0x1] }
  0x45   : > { %v2336_v56 = vor.u32 %v2335_v43, %v2332_v42  ;;  %v458_v63 = vshll.u32 %v255_v30, 16  ;;  %v468_v3 = vshrl.u32 %v256_v53, 16  ;;  %v457_v9 = vrot.slane %v455_v61, 4  ;;  %v258_v43 = vld [vmem:[%s7420_s20 + $0x58] sm:$0xf] }
  0x46   : > { %6686 = vmatpush3.bf16.msra.mxu0 %v7172_v48  ;;  %v2341_v50 = vrot.slane %v2339_v39, 5  ;;  %v443_v48 = vsel %vm7452_vm2, %v438_v40, %v442_v17  ;;  %v2345_v57 = vrot.slane %v2343_v44, 4  ;;  %6651 = vmatprep.mubr.bf16.mxu0 %v5732_v55  ;;  %v474_v11 = vshll.u32 %v297_v54, 16  ;;  %v5685_v52 = vld [vmem:[%s7420_s20 + $0x60] sm:$0xf] }
  0x47   : > { %6496 = vmatpush3.bf16.msra.mxu1 %v7180_v35  ;;  %v446_v35 = vrot.slane %v444_v18, 4  ;;  %6687 = vmatprep.subr.bf16.mxu0 %v7174_v15  ;;  %v2337_v1 = vrot.slane %v2336_v56, 4  ;;  %v460_v10 = vrot.slane %v458_v63, 5  ;;  %v470_v18 = vrot.slane %v468_v3, 4 }
  0x48   : > { %6497 = vmatprep.subr.bf16.mxu1 %v7182_v2  ;;  %v2346_v5 = vor.u32 %v2345_v57, %v2341_v50  ;;  %v476_v21 = vrot.slane %v474_v11, 5  ;;  %v2354_v25 = vshrl.u32 %v5682_v58, 16  ;;  %v2357_v29 = vshll.u32 %v5682_v58, 16 }
  0x49   : > { %v447_v49 = vor.u32 %v446_v35, %v442_v17  ;;  %v2342_v13 = vsel %vm7452_vm2, %v2337_v1, %v2341_v50  ;;  %v461_v17 = vor.u32 %v460_v10, %v457_v9  ;;  %v2363_v30 = vshll.u32 %v7636_v0, 16  ;;  %v257_v35 = vld [vmem:[%s7420_s20 + $0x54] sm:$0xf]  ;;  %v298_v50 = vld [vmem:[%s7420_s20 + $0x5c] sm:$0x1] }
  0x4a   : > { %6688 = vmatpush3.bf16.msra.mxu0 %v7174_v15  ;;  %v2347_v15 = vrot.slane %v2346_v5, 4  ;;  %v2367_v34 = vshrl.u32 %v7636_v0, 16  ;;  %v2356_v42 = vrot.slane %v2354_v25, 4  ;;  %v479_v55 = vshrl.u32 %v257_v35, 16  ;;  %v7676_v25 = vld [vmem:[%s7420_s20 + $0x60] sm:$0xf] }
  0x4b   : > { %6498 = vmatpush3.bf16.msra.mxu1 %v7182_v2  ;;  %v448_v59 = vrot.slane %v447_v49, 4  ;;  %v464_v2 = vshll.u32 %v256_v53, 16  ;;  %6689 = vmatprep.subr.bf16.mxu0 %v7175_v31  ;;  %v462_v39 = vrot.slane %v461_v17, 4  ;;  %v2365_v44 = vrot.slane %v2363_v30, 5  ;;  %v7672_v17 = vld [vmem:[%s7420_s20 + $0x68] sm:$0x1] }
  0x4c   : > { %6531 = vmatprep.subr.bf16.mxu1 %v7622_v4  ;;  %v2352_v26 = vsel %vm7452_vm2, %v2347_v15, %v2351_v60  ;;  %v2369_v47 = vrot.slane %v2367_v34, 4  ;;  %v2373_v49 = vshll.u32 %v7648_v20, 16  ;;  %v7663_v60 = vld [vmem:[%s7420_s20 + $0x64] sm:$0xf]  ;;  %v481_v63 = vrot.slane %v479_v55, 4 }
  0x4d   : > { %v453_v7 = vsel %vm7452_vm2, %v448_v59, %v452_v38  ;;  %v466_v16 = vrot.slane %v464_v2, 5  ;;  %v5733_v38 = vcombine.low %v2342_v13, %v2352_v26  ;;  %v488_v59 = vshll.u32 %v258_v43, 16 }
  0x4e   : > { %v5493_v12 = vcombine.low %v443_v48, %v453_v7  ;;  %6690 = vmatpush3.bf16.msra.mxu0 %v7175_v31  ;;  %v2359_v31 = vrot.slane %v2357_v29, 5  ;;  %v482_v48 = vshll.u32 %v257_v35, 16  ;;  %v2370_v57 = vor.u32 %v2369_v47, %v2365_v44  ;;  %v7679_v35 = vld [vmem:[%s7420_s20 + $0x64] sm:$0xf] }
  0x4f   : > { %6723 = vmatprep.subr.bf16.mxu0 %v7641_v6  ;;  %v471_v40 = vor.u32 %v470_v18, %v466_v16  ;;  %6652 = vmatmul.mubr.bf16.gmra.mrb[8].mxu0 %v5733_v38  ;;  %v467_v53 = vsel %vm7452_vm2, %v462_v39, %v466_v16  ;;  %v2375_v58 = vrot.slane %v2373_v49, 5  ;;  %v492_v5 = vshrl.u32 %v258_v43, 16  ;;  %v299_v43 = vld [vmem:[%s7420_s20 + $0x68] sm:$0x1] }
  0x50   : > { %6460 = vmatmul.mubr.bf16.gmra.mrb[8].mxu1 %v5493_v12  ;;  %v2360_v56 = vor.u32 %v2359_v31, %v2356_v42  ;;  %v484_v1 = vrot.slane %v482_v48, 5  ;;  %v2371_v7 = vrot.slane %v2370_v57, 4  ;;  %v490_v9 = vrot.slane %v488_v59, 5 }
  0x51   : > { %v472_v54 = vrot.slane %v471_v40, 4  ;;  %v494_v11 = vrot.slane %v492_v5, 4  ;;  %v498_v12 = vshll.u32 %v298_v50, 16  ;;  %v2378_v13 = vshrl.u32 %v5685_v52, 16  ;;  %v5752_v50 = vld [vmem:[%s7420_s20 + $0xc] sm:$0xe] }
  0x52   : > { %v2361_v3 = vrot.slane %v2360_v56, 4  ;;  %v485_v10 = vor.u32 %v484_v1, %v481_v63  ;;  %v2376_v16 = vsel %vm7452_vm2, %v2371_v7, %v2375_v58  ;;  %v2381_v18 = vshll.u32 %v5685_v52, 16  ;;  %v7694_v5 = vld [vmem:[%s7420_s20 + $0x6c] sm:$0xf] }
  0x53   : > { %v477_v61 = vsel %vm7452_vm2, %v472_v54, %v476_v21  ;;  %v2387_v21 = vshll.u32 %v7663_v60, 16  ;;  %v495_v30 = vor.u32 %v494_v11, %v490_v9  ;;  %v500_v34 = vrot.slane %v498_v12, 5 }
  0x54   : > { %v5494_v2 = vcombine.low %v467_v53, %v477_v61  ;;  %v2366_v15 = vsel %vm7452_vm2, %v2361_v3, %v2365_v44  ;;  %v486_v29 = vrot.slane %v485_v10, 4  ;;  %v2380_v38 = vrot.slane %v2378_v13, 4 }
  0x55   : > { %v5734_v26 = vcombine.low %v2366_v15, %v2376_v16  ;;  %v2383_v39 = vrot.slane %v2381_v18, 5  ;;  %v2389_v40 = vrot.slane %v2387_v21, 5  ;;  %v2391_v42 = vshrl.u32 %v7663_v60, 16  ;;  %v7706_v21 = vld [vmem:[%s7420_s20 + $0x70] sm:$0xf] }
  0x56   : > { %6463 = vmatprep.mubr.bf16.mxu1 %v5494_v2  ;;  %v491_v31 = vsel %vm7452_vm2, %v486_v29, %v490_v9  ;;  %v496_v44 = vrot.slane %v495_v30, 4  ;;  %v2397_v47 = vshll.u32 %v7672_v17, 16  ;;  %v503_v49 = vshrl.u32 %v7676_v25, 16  ;;  %v7266_v9 = vld [vmem:[%s7420_s20 + $0xb4] sm:$0xff]  }
  0x57   : > { %6655 = vmatprep.mubr.bf16.mxu0 %v5734_v26  ;;  %v2384_v52 = vor.u32 %v2383_v39, %v2380_v38  ;;  %v2393_v53 = vrot.slane %v2391_v42, 4  ;;  %v506_v54 = vshll.u32 %v7676_v25, 16  ;;  %v512_v55 = vshll.u32 %v7679_v35, 16 }
  0x58   : > { %v501_v48 = vsel %vm7452_vm2, %v496_v44, %v500_v34  ;;  %v2399_v56 = vrot.slane %v2397_v47, 5  ;;  %v505_v57 = vrot.slane %v503_v49, 4  ;;  %v516_v58 = vshrl.u32 %v7679_v35, 16  ;;  %v7717_v47 = vld [vmem:[%s7420_s20 + $0x78] sm:$0xf] }
  0x59   : > { %v5495_v59 = vcombine.low %v491_v31, %v501_v48  ;;  %v2385_v61 = vrot.slane %v2384_v52, 4  ;;  %v2394_v63 = vor.u32 %v2393_v53, %v2389_v40  ;;  %v508_v1 = vrot.slane %v506_v54, 5  ;;  %v7728_v54 = vld [vmem:[%s7420_s20 + $0x7c] sm:$0xf] }
  0x5a   : > { %v514_v2 = vrot.slane %v512_v55, 5  ;;  %v518_v3 = vrot.slane %v516_v58, 4  ;;  %v522_v7 = vshll.u32 %v299_v43, 16  ;;  %v5768_v10 = vrot.slane %v5752_v50, 9  ;;  %v301_v58 = vld [vmem:[%s7420_s20 + $0x80] sm:$0x1] }
  0x5b   : > { %6464 = vmatmul.mubr.bf16.gmra.mrb[12].mxu1 %v5495_v59  ;;  %v2390_v11 = vsel %vm7452_vm2, %v2385_v61, %v2389_v40  ;;  %v2395_v12 = vrot.slane %v2394_v63, 4  ;;  %v509_v13 = vor.u32 %v508_v1, %v505_v57  ;;  %v2981_v15 = vrot.slane %v7433_v23, 5  ;;  %v300_v40 = vld [vmem:[%s7420_s20 + $0x74] sm:$0x1]  ;;  %v5753_v23 = vld [vmem:[%s7420_s20 + $0x18] sm:$0xe] }
  0x5c   : > { %v519_v16 = vor.u32 %v518_v3, %v514_v2  ;;  %v524_v18 = vrot.slane %v522_v7, 5  ;;  %v527_v26 = vshrl.u32 %v7694_v5, 16  ;;  %v530_v29 = vshll.u32 %v7694_v5, 16 }
  0x5d   : > { %v2400_v30 = vsel %vm7452_vm2, %v2395_v12, %v2399_v56  ;;  %v510_v34 = vrot.slane %v509_v13, 4  ;;  %v2982_v38 = vsel %vm7698_vm5, %v5768_v10, %v2981_v15  ;;  %v2983_v39 = vrot.slane %v2981_v15, 4  ;;  %v5754_v13 = vld [vmem:[%s7420_s20 + $0x24] sm:$0xe] }
  0x5e   : > { %v5735_v42 = vcombine.low %v2390_v11, %v2400_v30  ;;  %v520_v43 = vrot.slane %v519_v16, 4  ;;  %v529_v31 = vrot.slane %v527_v26, 4  ;;  %v532_v44 = vrot.slane %v530_v29, 5  ;;  %v7750_v16 = vld [vmem:[%s7420_s20 + $0x84] sm:$0xf]  ;;  %v7179_v29 = vld [vmem:[%s9240_s1 + $0x188] sm:$0xff]  }
  0x5f   : > { %v515_v49 = vsel %vm7452_vm2, %v510_v34, %v514_v2  ;;  %v2985_v50 = vsel %vm7698_vm5, %v2983_v39, %v2984_v41  ;;  %v536_v52 = vshll.u32 %v7706_v21, 16  ;;  %v540_v53 = vshrl.u32 %v7706_v21, 16 }
  0x60   : > { %6656 = vmatmul.mubr.bf16.gmra.mrb[12].mxu0 %v5735_v42  ;;  %v525_v55 = vsel %vm7452_vm2, %v520_v43, %v524_v18  ;;  %v5800_v48 = vcombine.low %v2982_v38, %v2985_v50  ;;  %v533_v56 = vor.u32 %v532_v44, %v529_v31  ;;  %v546_v57 = vshll.u32 %v300_v40, 16  ;;  %v7758_v40 = vld [vmem:[%s7420_s20 + $0x88] sm:$0xf]  ;;  %v302_v31 = vld [vmem:[%s7420_s20 + $0x8c] sm:$0x1] }
  0x61   : > { %v5496_v59 = vcombine.low %v515_v49, %v525_v55  ;;  %v538_v24 = vrot.slane %v536_v52, 5  ;;  %v542_v61 = vrot.slane %v540_v53, 4  ;;  %v5769_v63 = vrot.slane %v5753_v23, 9 }
  0x62   : > { %6691 = vmatprep.mubr.bf16.mxu0 %v5800_v48  ;;  %v534_v41 = vrot.slane %v533_v56, 4  ;;  %v548_v1 = vrot.slane %v546_v57, 5  ;;  %v2992_v2 = vsel %vm7698_vm5, %v7501_v36, %v2991_v32  ;;  %v551_v3 = vshrl.u32 %v7717_v47, 16 }
  0x63   : > { %6467 = vmatprep.mubr.bf16.mxu1 %v5496_v59  ;;  %v543_v7 = vor.u32 %v542_v61, %v538_v24  ;;  %v2989_v10 = vsel %vm7698_vm5, %v5769_v63, %v2988_v27  ;;  %v554_v11 = vshll.u32 %v7717_v47, 16  ;;  %v560_v12 = vshll.u32 %v7728_v54, 16 }
  0x64   : > { %v539_v8 = vsel %vm7452_vm2, %v534_v41, %v538_v24  ;;  %v5801_v15 = vcombine.low %v2989_v10, %v2992_v2  ;;  %v553_v32 = vrot.slane %v551_v3, 4  ;;  %v564_v36 = vshrl.u32 %v7728_v54, 16  ;;  %v7779_v2 = vld [vmem:[%s7420_s20 + $0x90] sm:$0xf]  ;;  %v7782_v3 = vld [vmem:[%s7420_s20 + $0x94] sm:$0xf] }
  0x65   : > { %v544_v62 = vrot.slane %v543_v7, 4  ;;  %v556_v18 = vrot.slane %v554_v11, 5  ;;  %v562_v26 = vrot.slane %v560_v12, 5  ;;  %v570_v27 = vshll.u32 %v301_v58, 16 }
  0x66   : > { %v566_v30 = vrot.slane %v564_v36, 4  ;;  %v5770_v34 = vrot.slane %v5754_v13, 9  ;;  %v2995_v38 = vrot.slane %v7505_v45, 5  ;;  %v2998_v39 = vrot.slane %v7511_v51, 5  ;;  %v5755_v45 = vld [vmem:[%s7420_s20 + $0x30] sm:$0xe] }
  0x67   : > { %v549_v23 = vsel %vm7452_vm2, %v544_v62, %v548_v1  ;;  %v557_v42 = vor.u32 %v556_v18, %v553_v32  ;;  %v572_v43 = vrot.slane %v570_v27, 5  ;;  %v575_v44 = vshrl.u32 %v7750_v16, 16  ;;  %v303_v62 = vld [vmem:[%s7420_s20 + $0x98] sm:$0x1] }
  0x68   : > { %v5497_v49 = vcombine.low %v539_v8, %v549_v23  ;;  %6692 = vmatmul.mubr.bf16.vlgmr.msra.gmra.mrb[0].mxu0 %v5801_v15  ;;  %v567_v50 = vor.u32 %v566_v30, %v562_v26  ;;  %v2996_v52 = vsel %vm7698_vm5, %v5770_v34, %v2995_v38  ;;  %v2997_v53 = vrot.slane %v2995_v38, 4  ;;  %v7183_v30 = vld [vmem:[%s9240_s1 + $0x198] sm:$0xff]  }
  0x69   : > { %6724 = vmatpush3.bf16.msra.mxu0 %v7641_v6  ;;  %v558_v51 = vrot.slane %v557_v42, 4  ;;  %v577_v55 = vrot.slane %v575_v44, 4  ;;  %v578_v48 = vshll.u32 %v7750_v16, 16  ;;  %v584_v56 = vshll.u32 %v7758_v40, 16  ;;  %v7181_v6 = vld [vmem:[%s9240_s1 + $0x190] sm:$0xff]  }
  0x6a   : > { %6468 = vmatmul.mubr.bf16.gmra.mrb[16].mxu1 %v5497_v49  ;;  %v568_v57 = vrot.slane %v567_v50, 4  ;;  %v2999_v58 = vsel %vm7698_vm5, %v2997_v53, %v2998_v39  ;;  %v588_v59 = vshrl.u32 %v7758_v40, 16  ;;  %v594_v24 = vshll.u32 %v302_v31, 16  ;;  %6725 = vmatprep.subr.bf16.mxu0 %v7179_v29  ;;  %v5756_v38 = vld [vmem:[%s7420_s20 + $0x3c] sm:$0xe] }
  0x6b   : > { %v563_v61 = vsel %vm7452_vm2, %v558_v51, %v562_v26  ;;  %v5802_v63 = vcombine.low %v2996_v52, %v2999_v58  ;;  %v580_v41 = vrot.slane %v578_v48, 5  ;;  %v586_v1 = vrot.slane %v584_v56, 5  ;;  %v7800_v31 = vld [vmem:[%s7420_s20 + $0x9c] sm:$0xf]  ;;  %v7809_v48 = vld [vmem:[%s7420_s20 + $0xa0] sm:$0xf] }
  0x6c   : > { %v573_v7 = vsel %vm7452_vm2, %v568_v57, %v572_v43  ;;  %v590_v10 = vrot.slane %v588_v59, 4  ;;  %v596_v11 = vrot.slane %v594_v24, 5  ;;  %v5771_v12 = vrot.slane %v5755_v45, 9  ;;  %v7187_v56 = vld [vmem:[%s9240_s1 + $0x1a0] sm:$0xff]  }
  0x6d   : > { %v5498_v13 = vcombine.low %v563_v61, %v573_v7  ;;  %6695 = vmatprep.mubr.bf16.mxu0 %v5802_v63  ;;  %v581_v8 = vor.u32 %v580_v41, %v577_v55  ;;  %v3002_v15 = vrot.slane %v7536_v33, 5  ;;  %v3005_v32 = vrot.slane %v7547_v46, 5  ;;  %6726 = vmatpush3.bf16.msra.mxu0 %v7179_v29  ;;  %v304_v61 = vld [vmem:[%s7420_s20 + $0xa4] sm:$0x1] }
  0x6e   : > { %v591_v36 = vor.u32 %v590_v10, %v586_v1  ;;  %v599_v18 = vshrl.u32 %v7779_v2, 16  ;;  %v602_v26 = vshll.u32 %v7779_v2, 16  ;;  %v608_v27 = vshll.u32 %v7782_v3, 16  ;;  %6727 = vmatprep.subr.bf16.mxu0 %v7181_v6 }
  0x6f   : > { %6471 = vmatprep.mubr.bf16.mxu1 %v5498_v13  ;;  %v582_v34 = vrot.slane %v581_v8, 4  ;;  %v3003_v33 = vsel %vm7698_vm5, %v5771_v12, %v3002_v15  ;;  %v3004_v46 = vrot.slane %v3002_v15, 4  ;;  %v612_v29 = vshrl.u32 %v7782_v3, 16  ;;  %v5757_v15 = vld [vmem:[%s7420_s20 + $0x48] sm:$0xe] }
  0x70   : > { %v592_v39 = vrot.slane %v591_v36, 4  ;;  %v601_v23 = vrot.slane %v599_v18, 4  ;;  %v604_v42 = vrot.slane %v602_v26, 5  ;;  %v610_v43 = vrot.slane %v608_v27, 5  ;;  %v7834_v27 = vld [vmem:[%s7420_s20 + $0xa8] sm:$0xf] }
  0x71   : > { %v587_v44 = vsel %vm7452_vm2, %v582_v34, %v586_v1  ;;  %v3006_v49 = vsel %vm7698_vm5, %v3004_v46, %v3005_v32  ;;  %v614_v50 = vrot.slane %v612_v29, 4  ;;  %v618_v52 = vshll.u32 %v303_v62, 16  ;;  %6728 = vmatpush3.bf16.msra.mxu0 %v7181_v6  ;;  %v7191_v32 = vld [vmem:[%s9240_s1 + $0x1a8] sm:$0xff]  }
  0x72   : > { %v597_v53 = vsel %vm7452_vm2, %v592_v39, %v596_v11  ;;  %v5803_v45 = vcombine.low %v3003_v33, %v3006_v49  ;;  %v605_v51 = vor.u32 %v604_v42, %v601_v23  ;;  %v5772_v55 = vrot.slane %v5756_v38, 9  ;;  %6729 = vmatprep.subr.bf16.mxu0 %v7183_v30  ;;  %v7837_v29 = vld [vmem:[%s7420_s20 + $0xac] sm:$0xf] }
  0x73   : > { %v5499_v57 = vcombine.low %v587_v44, %v597_v53  ;;  %v615_v58 = vor.u32 %v614_v50, %v610_v43  ;;  %v620_v59 = vrot.slane %v618_v52, 5  ;;  %v3009_v24 = vrot.slane %v7570_v19, 5  ;;  %v5758_v53 = vld [vmem:[%s7420_s20 + $0x54] sm:$0xe] }
  0x74   : > { %6696 = vmatmul.mubr.bf16.gmra.mrb[4].mxu0 %v5803_v45  ;;  %v606_v6 = vrot.slane %v605_v51, 4  ;;  %v3012_v63 = vrot.slane %v7578_v28, 5  ;;  %v623_v41 = vshrl.u32 %v7800_v31, 16  ;;  %v626_v1 = vshll.u32 %v7800_v31, 16  ;;  %v7195_v45 = vld [vmem:[%s9240_s1 + $0x1b0] sm:$0xff]  }
  0x75   : > { %6472 = vmatmul.mubr.bf16.gmra.mrb[20].mxu1 %v5499_v57  ;;  %v616_v7 = vrot.slane %v615_v58, 4  ;;  %v3010_v10 = vsel %vm7698_vm5, %v5772_v55, %v3009_v24  ;;  %v3011_v11 = vrot.slane %v3009_v24, 4  ;;  %v632_v12 = vshll.u32 %v7809_v48, 16  ;;  %6730 = vmatpush3.bf16.msra.mxu0 %v7183_v30 }
  0x76   : > { %v611_v19 = vsel %vm7452_vm2, %v606_v6, %v610_v43  ;;  %v625_v13 = vrot.slane %v623_v41, 4  ;;  %v628_v28 = vrot.slane %v626_v1, 5  ;;  %v636_v8 = vshrl.u32 %v7809_v48, 16  ;;  %6731 = vmatprep.subr.bf16.mxu0 %v7187_v56  ;;  %v305_v43 = vld [vmem:[%s7420_s20 + $0xb0] sm:$0x1] }
  0x77   : > { %v621_v36 = vsel %vm7452_vm2, %v616_v7, %v620_v59  ;;  %v3013_v62 = vsel %vm7698_vm5, %v3011_v11, %v3012_v63  ;;  %v634_v18 = vrot.slane %v632_v12, 5  ;;  %v642_v26 = vshll.u32 %v304_v61, 16  ;;  %v7857_v41 = vld [vmem:[%s7420_s20 + $0xb4] sm:$0xf]  ;;  %v7862_v12 = vld [vmem:[%s7420_s20 + $0xb8] sm:$0xf] }
  0x78   : > { %v5500_v30 = vcombine.low %v611_v19, %v621_v36  ;;  %v5804_v34 = vcombine.low %v3010_v10, %v3013_v62  ;;  %v629_v33 = vor.u32 %v628_v28, %v625_v13  ;;  %v638_v46 = vrot.slane %v636_v8, 4  ;;  %v306_v19 = vld [vmem:[%s7420_s20 + $0xbc] sm:$0x1] }
  0x79   : > { %v644_v38 = vrot.slane %v642_v26, 5  ;;  %v5773_v39 = vrot.slane %v5757_v15, 9  ;;  %v3016_v23 = vrot.slane %v7605_v14, 5  ;;  %v3019_v42 = vrot.slane %v7611_v22, 5  ;;  %6732 = vmatpush3.bf16.msra.mxu0 %v7187_v56  ;;  %v7199_v13 = vld [vmem:[%s9240_s1 + $0x1b8] sm:$0xff]  }
  0x7a   : > { %6475 = vmatprep.mubr.bf16.mxu1 %v5500_v30  ;;  %6699 = vmatprep.mubr.bf16.mxu0 %v5804_v34  ;;  %v630_v44 = vrot.slane %v629_v33, 4  ;;  %v639_v49 = vor.u32 %v638_v46, %v634_v18  ;;  %v647_v50 = vshrl.u32 %v7834_v27, 16  ;;  %v650_v52 = vshll.u32 %v7834_v27, 16  ;;  %v5759_v30 = vld [vmem:[%s7420_s20 + $0x60] sm:$0xe] }
  0x7b   : > { %v3017_v14 = vsel %vm7698_vm5, %v5773_v39, %v3016_v23  ;;  %v3018_v22 = vrot.slane %v3016_v23, 4  ;;  %v656_v51 = vshll.u32 %v7837_v29, 16  ;;  %v660_v55 = vshrl.u32 %v7837_v29, 16  ;;  %6733 = vmatprep.subr.bf16.mxu0 %v7191_v32  ;;  %v5689_v39 = vld [vmem:[%s7420_s20 + $0x70] sm:$0xf] }
  0x7c   : > { %v635_v56 = vsel %vm7452_vm2, %v630_v44, %v634_v18  ;;  %v640_v57 = vrot.slane %v639_v49, 4  ;;  %v649_v58 = vrot.slane %v647_v50, 4  ;;  %v652_v59 = vrot.slane %v650_v52, 5  ;;  %v7884_v44 = vld [vmem:[%s9240_s1 + $0x1c0] sm:$0xff]  }
  0x7d   : > { %v3020_v24 = vsel %vm7698_vm5, %v3018_v22, %v3019_v42  ;;  %v658_v61 = vrot.slane %v656_v51, 5  ;;  %v662_v6 = vrot.slane %v660_v55, 4  ;;  %v666_v63 = vshll.u32 %v305_v43, 16  ;;  %6734 = vmatpush3.bf16.msra.mxu0 %v7191_v32  ;;  %v5760_v43 = vld [vmem:[%s7420_s20 + $0x6c] sm:$0xe] }
  0x7e   : > { %v645_v1 = vsel %vm7452_vm2, %v640_v57, %v644_v38  ;;  %v5805_v7 = vcombine.low %v3017_v14, %v3020_v24  ;;  %v653_v10 = vor.u32 %v652_v59, %v649_v58  ;;  %v5774_v11 = vrot.slane %v5758_v53, 9  ;;  %6735 = vmatprep.subr.bf16.mxu0 %v7195_v45  ;;  %v5690_v55 = vld [vmem:[%s7420_s20 + $0x74] sm:$0x1]  ;;  %v5761_v24 = vld [vmem:[%s7420_s20 + $0x78] sm:$0xe] }
  0x7f   : > { %v5501_v28 = vcombine.low %v635_v56, %v645_v1  ;;  %v663_v8 = vor.u32 %v662_v6, %v658_v61  ;;  %v668_v15 = vrot.slane %v666_v63, 5  ;;  %v3023_v32 = vrot.slane %v7636_v0, 5 }
  0x80   : > { %6700 = vmatmul.mubr.bf16.gmra.mrb[8].mxu0 %v5805_v7  ;;  %v654_v36 = vrot.slane %v653_v10, 4  ;;  %v3026_v62 = vrot.slane %v7648_v20, 5  ;;  %v671_v18 = vshrl.u32 %v7857_v41, 16  ;;  %v674_v26 = vshll.u32 %v7857_v41, 16 }
  0x81   : > { %6476 = vmatmul.mubr.bf16.gmra.mrb[24].mxu1 %v5501_v28  ;;  %v664_v34 = vrot.slane %v663_v8, 4  ;;  %v3024_v33 = vsel %vm7698_vm5, %v5774_v11, %v3023_v32  ;;  %v3025_v46 = vrot.slane %v3023_v32, 4  ;;  %v680_v38 = vshll.u32 %v7862_v12, 16  ;;  %6736 = vmatpush3.bf16.msra.mxu0 %v7195_v45  ;;  %v7897_v11 = vld [vmem:[%s7420_s20 + $0x7c] sm:$0xf] }
  0x82   : > { %v659_v0 = vsel %vm7452_vm2, %v654_v36, %v658_v61  ;;  %v673_v20 = vrot.slane %v671_v18, 4  ;;  %v676_v23 = vrot.slane %v674_v26, 5  ;;  %v684_v42 = vshrl.u32 %v7862_v12, 16  ;;  %6737 = vmatprep.subr.bf16.mxu0 %v7199_v13  ;;  %v7268_v36 = vld [vmem:[%s7420_s20] sm:$0xf] }
  0x83   : > { %v669_v49 = vsel %vm7452_vm2, %v664_v34, %v668_v15  ;;  %v3027_v50 = vsel %vm7698_vm5, %v3025_v46, %v3026_v62  ;;  %v682_v52 = vrot.slane %v680_v38, 5  ;;  %v690_v53 = vshll.u32 %v306_v19, 16  ;;  %v5695_v15 = vld [vmem:[%s7420_s20 + $0x88] sm:$0xf]  ;;  %v7912_v62 = vld [vmem:[%s7420_s20 + $0x4] sm:$0xf] }
  0x84   : > { %v5502_v45 = vcombine.low %v659_v0, %v669_v49  ;;  %v5806_v14 = vcombine.low %v3024_v33, %v3027_v50  ;;  %v677_v22 = vor.u32 %v676_v23, %v673_v20  ;;  %v686_v51 = vrot.slane %v684_v42, 4  ;;  %v5696_v26 = vld [vmem:[%s7420_s20 + $0x8c] sm:$0x1]  ;;  %v5699_v23 = vld [vmem:[%s7420_s20 + $0x98] sm:$0x1] }
  0x85   : > { %v692_v56 = vrot.slane %v690_v53, 5  ;;  %v5775_v57 = vrot.slane %v5759_v30, 9  ;;  %v3030_v58 = vrot.slane %v7663_v60, 5  ;;  %v3033_v59 = vrot.slane %v7672_v17, 5  ;;  %6738 = vmatpush3.bf16.msra.mxu0 %v7199_v13  ;;  %v7900_v17 = vld [vmem:[%s7420_s20 + $0x80] sm:$0x1] }
  0x86   : > { %6479 = vmatprep.mubr.bf16.mxu1 %v5502_v45  ;;  %6703 = vmatprep.mubr.bf16.mxu0 %v5806_v14  ;;  %v678_v61 = vrot.slane %v677_v22, 4  ;;  %v687_v6 = vor.u32 %v686_v51, %v682_v52  ;;  %v5776_v63 = vrot.slane %v5760_v43, 9  ;;  %v3037_v1 = vrot.slane %v5689_v39, 5  ;;  %v5762_v30 = vld [vmem:[%s7420_s20 + $0x84] sm:$0xe] }
  0x87   : > { %v3031_v7 = vsel %vm7698_vm5, %v5775_v57, %v3030_v58  ;;  %v3032_v10 = vrot.slane %v3030_v58, 4  ;;  %v3040_v60 = vrot.slane %v5690_v55, 5  ;;  %6771 = vmatprep.subr.bf16.mxu0 %v7884_v44  ;;  %v5512_v18 = vcombine.low %v7268_v36, %v7912_v62  ;;  %v5698_v39 = vld [vmem:[%s7420_s20 + $0x94] sm:$0xf]  ;;  %v5763_v42 = vld [vmem:[%s7420_s20 + $0x90] sm:$0xe] }
  0x88   : > { %v683_v19 = vsel %vm7452_vm2, %v678_v61, %v682_v52  ;;  %v688_v13 = vrot.slane %v687_v6, 4  ;;  %v3038_v28 = vsel %vm7698_vm5, %v5776_v63, %v3037_v1  ;;  %v3039_v8 = vrot.slane %v3037_v1, 4  ;;  %v5764_v50 = vld [vmem:[%s7420_s20 + $0x9c] sm:$0xe]  ;;  %v5701_v14 = vld [vmem:[%s7420_s20 + $0xa0] sm:$0xf] }
  0x89   : > { %v3034_v32 = vsel %vm7698_vm5, %v3032_v10, %v3033_v59  ;;  %v5777_v38 = vrot.slane %v5761_v24, 9  ;;  %v3044_v43 = vrot.slane %v7897_v11, 5  ;;  %v3047_v49 = vrot.slane %v7900_v17, 5  ;;  %v5702_v22 = vld [vmem:[%s7420_s20 + $0xa4] sm:$0x1] }
  0x8a   : > { %v693_v34 = vsel %vm7452_vm2, %v688_v13, %v692_v56  ;;  %v5807_v33 = vcombine.low %v3031_v7, %v3034_v32  ;;  %v3041_v46 = vsel %vm7698_vm5, %v3039_v8, %v3040_v60  ;;  %v5778_v52 = vrot.slane %v5762_v30, 9  ;;  %v5704_v59 = vld [vmem:[%s7420_s20 + $0xac] sm:$0xf]  ;;  %v7936_v61 = vld [vmem:[%s7420_s20 + $0x10] sm:$0xf] }
  0x8b   : > { %v5503_v0 = vcombine.low %v683_v19, %v693_v34  ;;  %v5808_v20 = vcombine.low %v3038_v28, %v3041_v46  ;;  %v3051_v53 = vrot.slane %v5695_v15, 5  ;;  %v3054_v45 = vrot.slane %v5696_v26, 5  ;;  %v7270_v24 = vld [vmem:[%s7420_s20 + $0xc] sm:$0xf]  ;;  %v7272_v8 = vld [vmem:[%s7420_s20 + $0x18] sm:$0xf] }
  0x8c   : > { %6704 = vmatmul.mubr.bf16.gmra.mrb[12].mxu0 %v5807_v33  ;;  %v3045_v51 = vsel %vm7698_vm5, %v5777_v38, %v3044_v43  ;;  %v3046_v55 = vrot.slane %v3044_v43, 4  ;;  %v3058_v58 = vrot.slane %v5698_v39, 5  ;;  %v5513_v6 = vcombine.low %v7270_v24, %v7936_v61  ;;  %v7190_v19 = vld [vmem:[%s9240_s1 + $0x88] sm:$0xff]   ;;  %v7948_v15 = vld [vmem:[%s7420_s20 + $0x1c] sm:$0xf] }
  0x8d   : > { %6480 = vmatmul.mubr.bf16.gmra.mrb[28].mxu1 %v5503_v0  ;;  %6707 = vmatprep.mubr.bf16.mxu0 %v5808_v20  ;;  %v3052_v56 = vsel %vm7698_vm5, %v5778_v52, %v3051_v53  ;;  %v3053_v57 = vrot.slane %v3051_v53, 4  ;;  %v5779_v1 = vrot.slane %v5763_v42, 9  ;;  %v3061_v7 = vrot.slane %v5699_v23, 5  ;;  %v5705_v30 = vld [vmem:[%s7420_s20 + $0xb0] sm:$0x1] }
  0x8e   : > { %6499 = vmatprep.mubr.bf16.mxu1 %v5512_v18  ;;  %v3048_v63 = vsel %vm7698_vm5, %v3046_v55, %v3047_v49  ;;  %v3060_v13 = vrot.slane %v3058_v58, 4  ;;  %v5780_v28 = vrot.slane %v5764_v50, 9  ;;  %v5514_v32 = vcombine.low %v7272_v8, %v7948_v15  ;;  %v5765_v34 = vld [vmem:[%s7420_s20 + $0xa8] sm:$0xe]  ;;  %v5707_v33 = vld [vmem:[%s7420_s20 + $0xb8] sm:$0xf] }
  0x8f   : > { %v5809_v10 = vcombine.low %v3045_v51, %v3048_v63  ;;  %v3055_v60 = vsel %vm7698_vm5, %v3053_v57, %v3054_v45  ;;  %v3065_v18 = vrot.slane %v5701_v14, 5  ;;  %v3068_v26 = vrot.slane %v5702_v22, 5  ;;  %v5708_v20 = vld [vmem:[%s7420_s20 + $0xbc] sm:$0x1]  ;;  %v5766_v23 = vld [vmem:[%s7420_s20 + $0xb4] sm:$0xe] }
  0x90   : > { %v5810_v36 = vcombine.low %v3052_v56, %v3055_v60  ;;  %v3072_v38 = vrot.slane %v5704_v59, 5  ;;  %v3059_v39 = vsel %vm7698_vm5, %v5779_v1, %v3058_v58  ;;  %v3062_v0 = vsel %vm7698_vm5, %v3060_v13, %v3061_v7  ;;  %v7194_v50 = vld [vmem:[%s9240_s1 + $0x90] sm:$0xff]   ;;  %v5710_v53 = vld [vmem:[%s7420_s20 + $0xc4] sm:$0xf]  ;;  %v7971_v51 = vld [vmem:[%s7420_s20 + $0x28] sm:$0xf] }
  0x91   : > { %v3067_v46 = vrot.slane %v3065_v18, 4  ;;  %v3066_v42 = vsel %vm7698_vm5, %v5780_v28, %v3065_v18  ;;  %v3079_v49 = vrot.slane %v5707_v33, 5  ;;  %v5781_v52 = vrot.slane %v5765_v34, 9  ;;  %v7274_v22 = vld [vmem:[%s7420_s20 + $0x24] sm:$0xf]  ;;  %v7198_v1 = vld [vmem:[%s9240_s1 + $0x98] sm:$0xff]  }
  0x92   : > { %v5811_v45 = vcombine.low %v3059_v39, %v3062_v0  ;;  %v3074_v14 = vrot.slane %v3072_v38, 4  ;;  %v5515_v55 = vcombine.low %v7274_v22, %v7971_v51  ;;  %v7276_v57 = vld [vmem:[%s7420_s20 + $0x30] sm:$0xf]  ;;  %v7976_v58 = vld [vmem:[%s7420_s20 + $0x34] sm:$0xf]  ;;  %v5782_v24 = vrot.slane %v5766_v23, 9 }
  0x93   : > { %v3069_v43 = vsel %vm7698_vm5, %v3067_v46, %v3068_v26  ;;  %v5516_v59 = vcombine.low %v7276_v57, %v7976_v58  ;;  %v3082_v63 = vrot.slane %v5708_v20, 5  ;;  %v5767_v7 = vld [vmem:[%s7420_s20 + $0xc0] sm:$0xe]  ;;  %v3073_v60 = vsel %vm7698_vm5, %v5781_v52, %v3072_v38  ;;  %v5711_v8 = vld [vmem:[%s7420_s20 + $0xc8] sm:$0x1]  ;;  %v7201_v22 = vld [vmem:[%s7420_s20 + $0x18] sm:$0xff]  }
  0x94   : > { %6708 = vmatmul.mubr.bf16.gmra.mrb[16].mxu0 %v5809_v10  ;;  %v5812_v56 = vcombine.low %v3066_v42, %v3069_v43  ;;  %v3086_v10 = vrot.slane %v5710_v53, 5  ;;  %v3080_v13 = vsel %vm7698_vm5, %v5782_v24, %v3079_v49  ;;  %v5783_v18 = vrot.slane %v5767_v7, 9  ;;  %v7278_v26 = vld [vmem:[%s7420_s20 + $0x3c] sm:$0xf]  ;;  %v7280_v39 = vld [vmem:[%s7420_s20 + $0x48] sm:$0xf] }
  0x95   : > { %6500 = vmatmul.mubr.bf16.vlgmr.msra.gmra.mrb[0].mxu1 %v5513_v6  ;;  %6711 = vmatprep.mubr.bf16.mxu0 %v5810_v36  ;;  %v3081_v6 = vrot.slane %v3079_v49, 4  ;;  %v3089_v38 = vrot.slane %v5711_v8, 5  ;;  %v8002_v0 = vld [vmem:[%s7420_s20 + $0x4c] sm:$0xf]  ;;  %v7215_v49 = vld [vmem:[%s9240_s1 + $0xb0] sm:$0xff]   ;;  %v2439_v52 = vshrl.u32 %v7897_v11, 16 }
  0x96   : > { %6532 = vmatpush3.bf16.msra.mxu1 %v7622_v4  ;;  %6503 = vmatprep.mubr.bf16.mxu1 %v5514_v32  ;;  %v3075_v4 = vrot.slane %v5705_v30, 5  ;;  %v7203_v32 = vld [vmem:[%s9240_s1 + $0xa0] sm:$0xff]   ;;  %v3088_v46 = vrot.slane %v3086_v10, 4  ;;  %v5518_v20 = vcombine.low %v7280_v39, %v8002_v0  ;;  %v7209_v23 = vld [vmem:[%s9240_s1 + $0xa8] sm:$0xff]   ;;  %v3087_v42 = vsel %vm7698_vm5, %v5783_v18, %v3086_v10  ;;  %v7207_v18 = vld [vmem:[%s7420_s20 + $0x30] sm:$0xff]  }
  0x97   : > { %6533 = vmatprep.subr.bf16.mxu1 %v7190_v19  ;;  %v3083_v28 = vsel %vm7698_vm5, %v3081_v6, %v3082_v63  ;;  %v7997_v30 = vld [vmem:[%s7420_s20 + $0x40] sm:$0xf]  ;;  %v8030_v57 = vrot.slane %v2439_v52, 4  ;;  %v7204_v6 = vld [vmem:[%s7420_s20 + $0x24] sm:$0xff]   ;;  %v1349_v7 = vrot.slane %v7936_v61, 5  ;;  %v2445_v8 = vshll.u32 %v7900_v17, 16 }
  0x98   : > { %v5517_v34 = vcombine.low %v7278_v26, %v7997_v30  ;;  %v5814_v33 = vcombine.low %v3080_v13, %v3083_v28  ;;  %v3090_v43 = vsel %vm7698_vm5, %v3088_v46, %v3089_v38  ;;  %v1289_v63 = vld [vmem:[%s7420_s20] sm:$0xe]  ;;  %v1290_v10 = vld [vmem:[%s7420_s20 + $0xc] sm:$0xe]  ;;  %v1356_v13 = vrot.slane %v7948_v15, 5 }
  0x99   : > { %v5815_v53 = vcombine.low %v3087_v42, %v3090_v43  ;;  %v1292_v61 = vld [vmem:[%s7420_s20 + $0x24] sm:$0xe]  ;;  %v5523_v15 = vcombine.low %v7750_v16, %v7758_v40  ;;  %v5524_v26 = vcombine.low %v7779_v2, %v7782_v3  ;;  %v5536_v17 = vrot.slane %v1289_v63, 9  ;;  %v7286_v38 = vld [vmem:[%s7420_s20 + $0x20] sm:$0x1]  ;;  %v7216_v2 = vld [vmem:[%s7420_s20 + $0x54] sm:$0xff]  }
  0x9a   : > { %6534 = vmatpush3.bf16.msra.mxu1 %v7190_v19  ;;  %v3076_v19 = vsel %vm7698_vm5, %v3074_v14, %v3075_v4  ;;  %v8019_v14 = vld [vmem:[%s7420_s20 + $0x58] sm:$0xf]  ;;  %v1358_v46 = vrot.slane %v1356_v13, 4  ;;  %v1359_v39 = vrot.slane %v7286_v38, 5  ;;  %v7287_v43 = vld [vmem:[%s7420_s20 + $0x2c] sm:$0x1] }
  0x9b   : > { %6535 = vmatprep.subr.bf16.mxu1 %v7194_v50  ;;  %v5813_v36 = vcombine.low %v3073_v60, %v3076_v19  ;;  %v8045_v60 = vld [vmem:[%s9240_s1 + $0xc0] sm:$0xff]   ;;  %v1291_v19 = vld [vmem:[%s7420_s20 + $0x18] sm:$0xe]  ;;  %v7290_v38 = vld [vmem:[%s7420_s20 + $0x50] sm:$0x1]  ;;  %v1391_v16 = vrot.slane %v8019_v14, 5 }
  0x9c   : > { %6712 = vmatmul.mubr.bf16.gmra.mrb[20].mxu0 %v5811_v45  ;;  %v7282_v45 = vld [vmem:[%s7420_s20 + $0x54] sm:$0xf]  ;;  %v8168_v40 = vld [vmem:[%s7420_s20 + $0x64] sm:$0xf] }
  0x9d   : > { %6504 = vmatmul.mubr.bf16.gmra.mrb[4].mxu1 %v5515_v55  ;;  %6715 = vmatprep.mubr.bf16.mxu0 %v5812_v56  ;;  %v5519_v4 = vcombine.low %v7282_v45, %v8019_v14  ;;  %v5520_v55 = vcombine.low %v7676_v25, %v7679_v35  ;;  %v7221_v56 = vld [vmem:[%s9240_s1 + $0xb8] sm:$0xff]   ;;  %v7285_v25 = vld [vmem:[%s7420_s20 + $0x14] sm:$0x1]  ;;  %v7219_v3 = vld [vmem:[%s7420_s20 + $0x60] sm:$0xff]  }
  0x9e   : > { %6507 = vmatprep.mubr.bf16.mxu1 %v5516_v59  ;;  %6536 = vmatpush3.bf16.msra.mxu1 %v7194_v50  ;;  %v2435_v50 = vshll.u32 %v7897_v11, 16  ;;  %v8033_v59 = vld [vmem:[%s7420_s20 + $0x8] sm:$0x1]  ;;  %v1352_v35 = vrot.slane %v7285_v25, 5 }
  0x9f   : > { %6537 = vmatprep.subr.bf16.mxu1 %v7198_v1  ;;  %v1345_v24 = vrot.slane %v8033_v59, 5 }
  0xa0   : > { %v8028_v11 = vrot.slane %v2435_v50, 5 }
  0xa2   : > { %6538 = vmatpush3.bf16.msra.mxu1 %v7198_v1  ;;  %v1342_v1 = vrot.slane %v7912_v62, 5  ;;  %v5521_v62 = vcombine.low %v7694_v5, %v7706_v21  ;;  %v5537_v21 = vrot.slane %v1290_v10, 9  ;;  %v5896_v10 = vld [vmem:[%s7420_s20 + $0x18] sm:$0xf] }
  0xa3   : > { %6539 = vmatprep.subr.bf16.mxu1 %v7203_v32 }
  0xa4   : > { %6716 = vmatmul.mubr.bf16.gmra.mrb[24].mxu0 %v5813_v36  ;;  %v5522_v36 = vcombine.low %v7717_v47, %v7728_v54  ;;  %v1344_v5 = vrot.slane %v1342_v1, 4  ;;  %v7211_v47 = vld [vmem:[%s9240_s1 + $0x1c8] sm:$0xff]   ;;  %v5538_v54 = vrot.slane %v1291_v19, 9  ;;  %v8088_v59 = vsel %vm7698_vm5, %v5536_v17, %v1342_v1  ;;  %v5897_v19 = vld [vmem:[%s7420_s20 + $0x1c] sm:$0xf] }
  0xa5   : > { %6508 = vmatmul.mubr.bf16.gmra.mrb[8].mxu1 %v5517_v34  ;;  %6719 = vmatprep.mubr.bf16.mxu0 %v5814_v33  ;;  %v1370_v34 = vrot.slane %v7976_v58, 5  ;;  %v1351_v33 = vrot.slane %v1349_v7, 4  ;;  %v5539_v58 = vrot.slane %v1292_v61, 9  ;;  %v1384_v1 = vrot.slane %v8002_v0, 5  ;;  %v7213_v0 = vld [vmem:[%s7420_s20 + $0x48] sm:$0xff]  }
  0xa6   : > { %6511 = vmatprep.mubr.bf16.mxu1 %v5518_v20  ;;  %6540 = vmatpush3.bf16.msra.mxu1 %v7203_v32  ;;  %v1363_v32 = vrot.slane %v7971_v51, 5  ;;  %v1293_v51 = vld [vmem:[%s7420_s20 + $0x30] sm:$0xe]  ;;  %v5525_v20 = vcombine.low %v7800_v31, %v7809_v48  ;;  %v8096_v25 = vsel %vm7698_vm5, %v1344_v5, %v1345_v24  ;;  %v8104_v63 = vsel %vm7698_vm5, %v5538_v54, %v1356_v13  ;;  %v1295_v13 = vld [vmem:[%s7420_s20 + $0x48] sm:$0xe] }
  0xa7   : > { %6541 = vmatprep.subr.bf16.mxu1 %v7209_v23  ;;  %v5540_v50 = vrot.slane %v1293_v51, 9  ;;  %v1372_v52 = vrot.slane %v1370_v34, 4  ;;  %v3849_v5 = vshrl.u32 %v5896_v10, 16  ;;  %v3862_v51 = vshrl.u32 %v5897_v19, 16  ;;  %v7222_v48 = vld [vmem:[%s7420_s20 + $0x6c] sm:$0xff]  }
  0xa8   : > { %v1365_v42 = vrot.slane %v1363_v32, 4  ;;  %v8116_v24 = vsel %vm7698_vm5, %v5539_v58, %v1363_v32  ;;  %v7289_v32 = vld [vmem:[%s7420_s20 + $0x44] sm:$0x1]  ;;  %v5542_v54 = vrot.slane %v1295_v13, 9  ;;  %v5900_v13 = vld [vmem:[%s7420_s20 + $0x28] sm:$0xf] }
  0xa9   : > { %v8126_v61 = vsel %vm7698_vm5, %v5540_v50, %v1370_v34  ;;  %v1380_v17 = vrot.slane %v7289_v32, 5  ;;  %v5898_v50 = vld [vmem:[%s7420_s20 + $0x20] sm:$0x1]  ;;  %v1297_v32 = vld [vmem:[%s7420_s20 + $0x60] sm:$0xe] }
  0xaa   : > { %6542 = vmatpush3.bf16.msra.mxu1 %v7209_v23  ;;  %v5526_v23 = vcombine.low %v7834_v27, %v7837_v29 }
  0xab   : > { %6543 = vmatprep.subr.bf16.mxu1 %v7215_v49 }
  0xac   : > { %6720 = vmatmul.mubr.bf16.gmra.mrb[28].mxu0 %v5815_v53  ;;  %v7288_v53 = vld [vmem:[%s7420_s20 + $0x38] sm:$0x1] }
  0xad   : > { %6512 = vmatmul.mubr.bf16.gmra.mrb[12].mxu1 %v5519_v4  ;;  %6739 = vmatprep.mubr.bf16.mxu0 %v7201_v22  ;;  %v1373_v45 = vrot.slane %v7288_v53, 5  ;;  %v1294_v4 = vld [vmem:[%s7420_s20 + $0x3c] sm:$0xe]  ;;  %v1377_v22 = vrot.slane %v7997_v30, 5  ;;  %v8092_v30 = vsel %vm7698_vm5, %v5537_v21, %v1349_v7  ;;  %v3852_v21 = vshll.u32 %v5896_v10, 16  ;;  %v7227_v53 = vld [vmem:[%s9240_s1 + $0x1e0] sm:$0xff]  }
  0xae   : > { %6515 = vmatprep.mubr.bf16.mxu1 %v5520_v55  ;;  %6544 = vmatpush3.bf16.msra.mxu1 %v7215_v49  ;;  %v1366_v49 = vrot.slane %v7287_v43, 5  ;;  %v8079_v55 = vrot.slane %v2445_v8, 5  ;;  %v7210_v7 = vld [vmem:[%s7420_s20 + $0x3c] sm:$0xff]   ;;  %v8112_v8 = vsel %vm7698_vm5, %v1358_v46, %v1359_v39  ;;  %v1386_v46 = vrot.slane %v1384_v1, 4  ;;  %v5902_v43 = vld [vmem:[%s7420_s20 + $0x30] sm:$0xf] }
  0xaf   : > { %6545 = vmatprep.subr.bf16.mxu1 %v7221_v56  ;;  %v1387_v39 = vrot.slane %v7290_v38, 5  ;;  %v3851_v10 = vrot.slane %v3849_v5, 4 }
  0xb0   : > { %9263 = vst [vmem:[#allocation2_spill] sm:$0xff] %v8079_v55 }
  0xb2   : > { %6546 = vmatpush3.bf16.msra.mxu1 %v7221_v56  ;;  %v7217_v56 = vld [vmem:[%s9240_s1 + $0x1d0] sm:$0xff]  }
  0xb3   : > { %6579 = vmatprep.subr.bf16.mxu1 %v8045_v60 }
  0xb4   : > { %6740 = vmatmul.mubr.bf16.vlgmr.msra.gmra.mrb[0].mxu0 %v7204_v6  ;;  %v8100_v6 = vsel %vm7698_vm5, %v1351_v33, %v1352_v35  ;;  %v8120_v35 = vsel %vm7698_vm5, %v1365_v42, %v1366_v49  ;;  %v3858_v33 = vshll.u32 %v5897_v19, 16  ;;  %v3854_v19 = vrot.slane %v3852_v21, 5  ;;  %v1298_v21 = vld [vmem:[%s7420_s20 + $0x6c] sm:$0xe] }
  0xb5   : > { %6516 = vmatmul.mubr.bf16.gmra.mrb[16].mxu1 %v5521_v62  ;;  %6772 = vmatpush3.bf16.msra.mxu0 %v7884_v44  ;;  %v5541_v62 = vrot.slane %v1294_v4, 9  ;;  %v5545_v58 = vrot.slane %v1298_v21, 9 }
  0xb6   : > { %6519 = vmatprep.mubr.bf16.mxu1 %v5522_v36  ;;  %6743 = vmatprep.mubr.bf16.mxu0 %v7207_v18  ;;  %v8130_v36 = vsel %vm7698_vm5, %v1372_v52, %v1373_v45  ;;  %v1379_v18 = vrot.slane %v1377_v22, 4  ;;  %v5899_v52 = vld [vmem:[%s7420_s20 + $0x24] sm:$0xf]  ;;  %v3886_v45 = vshrl.u32 %v5900_v13, 16 }
  0xb7   : > { %6773 = vmatprep.subr.bf16.mxu0 %v7211_v47  ;;  %v8147_v49 = vsel %vm7698_vm5, %v5541_v62, %v1377_v22  ;;  %v8164_v22 = vld [vmem:[%s7420_s20 + $0x54] sm:$0xe]  ;;  %v3864_v62 = vrot.slane %v3862_v51, 4  ;;  %v3873_v38 = vshrl.u32 %v5899_v52, 16  ;;  %v3876_v28 = vshll.u32 %v5899_v52, 16 }
  0xb8   : > { %v8161_v4 = vsel %vm7698_vm5, %v1379_v18, %v1380_v17  ;;  %v3868_v17 = vshll.u32 %v5898_v50, 16  ;;  %v5543_v5 = vrot.slane %v8164_v22, 9  ;;  %v7231_v50 = vld [vmem:[%s9240_s1 + $0x1e8] sm:$0xff]   ;;  %v1393_v52 = vrot.slane %v1391_v16, 4 }
  0xb9   : > { %6774 = vmatpush3.bf16.msra.mxu0 %v7211_v47  ;;  %v7223_v47 = vld [vmem:[%s9240_s1 + $0x1d8] sm:$0xff]   ;;  %v3855_v22 = vor.u32 %v3854_v19, %v3851_v10  ;;  %v3875_v34 = vrot.slane %v3873_v38, 4  ;;  %v3878_v44 = vrot.slane %v3876_v28, 5  ;;  %v7295_v10 = vld [vmem:[%s7420_s20 + $0x74] sm:$0x1]  ;;  %v3888_v28 = vrot.slane %v3886_v45, 4 }
  0xba   : > { %6775 = vmatprep.subr.bf16.mxu0 %v7217_v56  ;;  %v8202_v42 = vrot.slane %v3868_v17, 5  ;;  %v1408_v19 = vrot.slane %v7295_v10, 5  ;;  %v3897_v38 = vshrl.u32 %v5902_v43, 16  ;;  %v8227_v27 = vsel %vm7698_vm5, %v5543_v5, %v1391_v16 }
  0xbb   : > { %v3856_v21 = vrot.slane %v3855_v22, 4 }
  0xbc   : > { %6744 = vmatmul.mubr.bf16.gmra.mrb[4].mxu0 %v7210_v7  ;;  %v8174_v7 = vrot.slane %v3858_v33, 5  ;;  %v7293_v33 = vld [vmem:[%s7420_s20 + $0x70] sm:$0xf] }
  0xbd   : > { %6520 = vmatmul.mubr.bf16.gmra.mrb[20].mxu1 %v5523_v15  ;;  %6747 = vmatprep.mubr.bf16.mxu0 %v7213_v0  ;;  %v1398_v15 = vrot.slane %v8168_v40, 5  ;;  %v7292_v0 = vld [vmem:[%s7420_s20 + $0x5c] sm:$0x1]  ;;  %v1405_v51 = vrot.slane %v7293_v33, 5 }
  0xbe   : > { %6523 = vmatprep.mubr.bf16.mxu1 %v5524_v26  ;;  %6776 = vmatpush3.bf16.msra.mxu0 %v7217_v56  ;;  %v1394_v18 = vrot.slane %v7292_v0, 5  ;;  %v8183_v26 = vsel %vm7698_vm5, %v5542_v54, %v1384_v1  ;;  %v8187_v56 = vsel %vm7698_vm5, %v1386_v46, %v1387_v39  ;;  %v7294_v1 = vld [vmem:[%s7420_s20 + $0x68] sm:$0x1]  ;;  %v3882_v0 = vshll.u32 %v5900_v13, 16  ;;  %v7239_v40 = vld [vmem:[%s9240_s1 + $0x1f8] sm:$0xff]  }
  0xbf   : > { %6777 = vmatprep.subr.bf16.mxu0 %v7223_v47  ;;  %v1401_v54 = vrot.slane %v7294_v1, 5  ;;  %v5544_v46 = vrot.slane %v1297_v32, 9  ;;  %v1400_v39 = vrot.slane %v1398_v15, 4  ;;  %v3865_v33 = vor.u32 %v3864_v62, %v8174_v7  ;;  %v5903_v1 = vld [vmem:[%s7420_s20 + $0x34] sm:$0xf] }
  0xc0   : > { %v1407_v32 = vrot.slane %v1405_v51, 4  ;;  %v5901_v62 = vld [vmem:[%s7420_s20 + $0x2c] sm:$0x1]  ;;  %v8214_v17 = vrot.slane %v3882_v0, 5  ;;  %v3906_v13 = vshll.u32 %v5903_v1, 16  ;;  %v3910_v31 = vshrl.u32 %v5903_v1, 16 }
  0xc1   : > { %v3866_v10 = vrot.slane %v3865_v33, 4  ;;  %v8231_v29 = vsel %vm7698_vm5, %v1393_v52, %v1394_v18  ;;  %v8238_v45 = vsel %vm7698_vm5, %v5544_v46, %v1398_v15  ;;  %v8242_v14 = vsel %vm7698_vm5, %v1400_v39, %v1401_v54  ;;  %v1299_v18 = vld [vmem:[%s7420_s20 + $0x78] sm:$0xe] }
  0xc2   : > { %6778 = vmatpush3.bf16.msra.mxu0 %v7223_v47  ;;  %v8246_v16 = vsel %vm7698_vm5, %v5545_v58, %v1405_v51  ;;  %v8256_v15 = vsel %vm7698_vm5, %v1407_v32, %v1408_v19  ;;  %v3889_v5 = vor.u32 %v3888_v28, %v8214_v17  ;;  %v3899_v52 = vrot.slane %v3897_v38, 4  ;;  %v5905_v58 = vld [vmem:[%s7420_s20 + $0x3c] sm:$0xf]  ;;  %v5906_v51 = vld [vmem:[%s7420_s20 + $0x40] sm:$0xf] }
  0xc3   : > { %6779 = vmatprep.subr.bf16.mxu0 %v7227_v53  ;;  %v3861_v0 = vsel %vm7452_vm2, %v3856_v21, %v8174_v7  ;;  %v3871_v46 = vsel %vm7452_vm2, %v3866_v10, %v8202_v42  ;;  %v8267_v39 = vrot.slane %v3906_v13, 5  ;;  %v3912_v22 = vrot.slane %v3910_v31, 4  ;;  %v7297_v19 = vld [vmem:[%s7420_s20 + $0x80] sm:$0x1]  ;;  %v8426_v47 = vld [vmem:[%s7420_s20 + $0x68] sm:$0x1] }
  0xc4   : > { %6748 = vmatmul.mubr.bf16.gmra.mrb[8].mxu0 %v7216_v2  ;;  %v3900_v2 = vshll.u32 %v5902_v43, 16  ;;  %v3892_v43 = vshll.u32 %v5901_v62, 16  ;;  %v5546_v32 = vrot.slane %v1299_v18, 9  ;;  %v1300_v62 = vld [vmem:[%s7420_s20 + $0x84] sm:$0xe]  ;;  %v3921_v28 = vshrl.u32 %v5905_v58, 16 }
  0xc5   : > { %6524 = vmatmul.mubr.bf16.gmra.mrb[24].mxu1 %v5525_v20  ;;  %6751 = vmatprep.mubr.bf16.mxu0 %v7219_v3  ;;  %v7235_v20 = vld [vmem:[%s9240_s1 + $0x1f0] sm:$0xff]   ;;  %v7296_v3 = vld [vmem:[%s7420_s20 + $0x7c] sm:$0xf]  ;;  %v3924_v7 = vshll.u32 %v5905_v58, 16  ;;  %v3930_v38 = vshll.u32 %v5906_v51, 16  ;;  %v9264_v42 = vcombine.low %v7857_v41, %v7862_v12  ;;  %v8278_v13 = vrot.slane %v3889_v5, 4 }
  0xc6   : > { %6527 = vmatprep.mubr.bf16.mxu1 %v5526_v23  ;;  %6780 = vmatpush3.bf16.msra.mxu0 %v7227_v53  ;;  %v3879_v23 = vor.u32 %v3878_v44, %v3875_v34  ;;  %v7224_v53 = vld [vmem:[%s7420_s20 + $0x78] sm:$0xff]   ;;  %v1412_v44 = vrot.slane %v7296_v3, 5  ;;  %v3902_v54 = vrot.slane %v3900_v2, 5  ;;  %v8271_v1 = vrot.slane %v3892_v43, 5  ;;  %v8283_v21 = vld [vmem:[%s9240_s1 + $0x200] sm:$0xff]   ;;  %9272 = vst [vmem:[#allocation5_spill] sm:$0xff] %v8426_v47 }
  0xc7   : > { %6781 = vmatprep.subr.bf16.mxu0 %v7231_v50  ;;  %v5904_v34 = vld [vmem:[%s7420_s20 + $0x38] sm:$0x1]  ;;  %v3934_v2 = vshrl.u32 %v5906_v51, 16  ;;  %v7226_v43 = vld [vmem:[%s7420_s20 + $0x84] sm:$0xff]   ;;  %v3913_v12 = vor.u32 %v3912_v22, %v8267_v39  ;;  %v3926_v58 = vrot.slane %v3924_v7, 5  ;;  %v8305_v51 = vrot.slane %v3930_v38, 5 }
  0xc8   : > { %v8269_v33 = vrot.slane %v3879_v23, 4  ;;  %v1414_v10 = vrot.slane %v1412_v44, 4  ;;  %v3903_v31 = vor.u32 %v3902_v54, %v3899_v52  ;;  %v9265_v23 = vcombine.low %v8088_v59, %v8096_v25  ;;  %v7298_v18 = vld [vmem:[%s7420_s20 + $0x88] sm:$0xf]  ;;  %v5907_v5 = vld [vmem:[%s7420_s20 + $0x44] sm:$0x1] }
  0xc9   : > { %v1419_v3 = vrot.slane %v7298_v18, 5  ;;  %v8296_v59 = vcombine.low %v3861_v0, %v3871_v46  ;;  %v5908_v52 = vld [vmem:[%s7420_s20 + $0x48] sm:$0xf]  ;;  %v3923_v54 = vrot.slane %v3921_v28, 4  ;;  %v3936_v22 = vrot.slane %v3934_v2, 4 }
  0xca   : > { %6782 = vmatpush3.bf16.msra.mxu0 %v7231_v50  ;;  %v1415_v50 = vrot.slane %v7297_v19, 5  ;;  %v7228_v19 = vld [vmem:[%s7420_s20 + $0x90] sm:$0xff]   ;;  %v3885_v0 = vsel %vm7452_vm2, %v8269_v33, %v8214_v17  ;;  %v3904_v46 = vrot.slane %v3903_v31, 4  ;;  %v3895_v28 = vsel %vm7452_vm2, %v8278_v13, %v8271_v1  ;;  %v8327_v33 = vld [vmem:[%s7420_s20 + $0x58] sm:$0xf]  ;;  %v7229_v31 = vld [vmem:[%s9240_s1 + $0xc8] sm:$0xff]  }
  0xcb   : > { %6783 = vmatprep.subr.bf16.mxu0 %v7235_v20  ;;  %v3914_v38 = vrot.slane %v3913_v12, 4  ;;  %v1421_v2 = vrot.slane %v1419_v3, 4  ;;  %v5911_v17 = vld [vmem:[%s7420_s20 + $0x54] sm:$0xf]  ;;  %v3940_v1 = vshll.u32 %v5907_v5, 16  ;;  %v3945_v13 = vshrl.u32 %v5908_v52, 16 }
  0xcc   : > { %6752 = vmatmul.mubr.bf16.gmra.mrb[12].mxu0 %v7222_v48  ;;  %v3916_v48 = vshll.u32 %v5904_v34, 16  ;;  %v8323_v7 = vsel %vm7698_vm5, %v1414_v10, %v1415_v50  ;;  %v3948_v50 = vshll.u32 %v5908_v52, 16  ;;  %v3927_v10 = vor.u32 %v3926_v58, %v3923_v54  ;;  %v7230_v54 = vld [vmem:[%s7420_s20 + $0x9c] sm:$0xff]   ;;  %v7304_v41 = vld [vmem:[%s7420_s20 + $0xac] sm:$0xf] }
  0xcd   : > { %6528 = vmatmul.mubr.bf16.gmra.mrb[28].mxu1 %v9264_v42  ;;  %6755 = vmatprep.mubr.bf16.mxu0 %v7224_v53  ;;  %v5547_v53 = vrot.slane %v1300_v62, 9  ;;  %v7299_v42 = vld [vmem:[%s7420_s20 + $0x8c] sm:$0x1]  ;;  %v3978_v5 = vshll.u32 %v8327_v33, 16  ;;  %v9267_v52 = vcombine.low %v8104_v63, %v8112_v8  ;;  %v8363_v63 = vld [vmem:[%s7420_s20 + $0x50] sm:$0x1] }
  0xce   : > { %6547 = vmatprep.mubr.bf16.mxu1 %v9265_v23  ;;  %6784 = vmatpush3.bf16.msra.mxu0 %v7235_v20  ;;  %v8302_v20 = vsel %vm7698_vm5, %v5546_v32, %v1412_v44  ;;  %v3918_v62 = vrot.slane %v3916_v48, 5  ;;  %v1422_v23 = vrot.slane %v7299_v42, 5  ;;  %v1301_v44 = vld [vmem:[%s7420_s20 + $0x90] sm:$0xe]  ;;  %v8315_v32 = vld [vmem:[%s7420_s20 + $0x4c] sm:$0xf]  ;;  %v3937_v48 = vor.u32 %v3936_v22, %v8305_v51 }
  0xcf   : > { %6785 = vmatprep.subr.bf16.mxu0 %v7239_v40  ;;  %v3954_v12 = vshll.u32 %v8315_v32, 16  ;;  %v3958_v18 = vshrl.u32 %v8315_v32, 16  ;;  %v9266_v42 = vcombine.low %v8092_v30, %v8100_v6  ;;  %v7233_v30 = vld [vmem:[%s9240_s1 + $0xd0] sm:$0xff]   ;;  %v3909_v6 = vsel %vm7452_vm2, %v3904_v46, %v8267_v39  ;;  %v7232_v8 = vld [vmem:[%s7420_s20 + $0xa8] sm:$0xff]   ;;  %v8370_v39 = vld [vmem:[%s7420_s20 + $0x5c] sm:$0x1] }
  0xd0   : > { %v3919_v58 = vsel %vm7452_vm2, %v3914_v38, %v3918_v62  ;;  %v5548_v22 = vrot.slane %v1301_v44, 9  ;;  %v3950_v25 = vrot.slane %v3948_v50, 5  ;;  %9268 = vst [vmem:[#allocation3_spill] sm:$0xff] %v8370_v39  ;;  %v3928_v46 = vrot.slane %v3927_v10, 4 }
  0xd1   : > { %v3938_v62 = vrot.slane %v3937_v48, 4  ;;  %v8372_v38 = vrot.slane %v3954_v12, 5  ;;  %v8374_v34 = vrot.slane %v3978_v5, 5  ;;  %v8379_v50 = vcombine.low %v3885_v0, %v3895_v28  ;;  %v5914_v28 = vld [vmem:[%s7420_s20 + $0x60] sm:$0xf] }
  0xd2   : > { %6786 = vmatpush3.bf16.msra.mxu0 %v7239_v40  ;;  %v8335_v40 = vsel %vm7698_vm5, %v5547_v53, %v1419_v3  ;;  %v3969_v53 = vshrl.u32 %v5911_v17, 16  ;;  %v3972_v3 = vshll.u32 %v5911_v17, 16  ;;  %v7300_v17 = vld [vmem:[%s7420_s20 + $0x94] sm:$0xf]  ;;  %v8383_v48 = vcombine.low %v3909_v6, %v3919_v58 }
  0xd3   : > { %6819 = vmatprep.subr.bf16.mxu0 %v8283_v21  ;;  %v3964_v0 = vshll.u32 %v8363_v63, 16  ;;  %v3933_v6 = vsel %vm7452_vm2, %v3928_v46, %v8305_v51  ;;  %v9271_v46 = vcombine.low %v8126_v61, %v8130_v36 }
  0xd4   : > { %6756 = vmatmul.mubr.bf16.gmra.mrb[16].mxu0 %v7226_v43  ;;  %v3982_v43 = vshrl.u32 %v8327_v33, 16  ;;  %v3971_v44 = vrot.slane %v3969_v53, 4  ;;  %v7301_v53 = vld [vmem:[%s7420_s20 + $0x98] sm:$0x1] }
  0xd5   : > { %6548 = vmatmul.mubr.bf16.vlgmr.msra.gmra.mrb[0].mxu1 %v9266_v42  ;;  %6759 = vmatprep.mubr.bf16.mxu0 %v7228_v19  ;;  %v8366_v19 = vrot.slane %v3940_v1, 5  ;;  %v1426_v42 = vrot.slane %v7300_v17, 5  ;;  %v7302_v17 = vld [vmem:[%s7420_s20 + $0xa0] sm:$0xf]  ;;  %v3966_v36 = vrot.slane %v3964_v0, 5 }
  0xd6   : > { %6580 = vmatpush3.bf16.msra.mxu1 %v8045_v60  ;;  %6551 = vmatprep.mubr.bf16.mxu1 %v9267_v52  ;;  %v8360_v60 = vsel %vm7698_vm5, %v1421_v2, %v1422_v23  ;;  %v3947_v52 = vrot.slane %v3945_v13, 4  ;;  %v3960_v23 = vrot.slane %v3958_v18, 4  ;;  %v3974_v2 = vrot.slane %v3972_v3, 5  ;;  %v7237_v13 = vld [vmem:[%s9240_s1 + $0xd8] sm:$0xff]  }
  0xd7   : > { %6581 = vmatprep.subr.bf16.mxu1 %v7229_v31  ;;  %v3984_v1 = vrot.slane %v3982_v43, 4  ;;  %v1302_v18 = vld [vmem:[%s7420_s20 + $0x9c] sm:$0xe]  ;;  %v1429_v3 = vrot.slane %v7301_v53, 5  ;;  %v8396_v43 = vld [vmem:[%s7420_s20 + $0x64] sm:$0xf] }
  0xd8   : > { %v3951_v5 = vor.u32 %v3950_v25, %v3947_v52  ;;  %9269 = vst [vmem:[#allocation4_spill] sm:$0xff] %v8396_v43  ;;  %v3961_v58 = vor.u32 %v3960_v23, %v8372_v38  ;;  %v1433_v12 = vrot.slane %v7302_v17, 5  ;;  %v9270_v25 = vcombine.low %v8116_v24, %v8120_v35  ;;  %v7234_v23 = vld [vmem:[%s7420_s20 + $0xb4] sm:$0xff]   ;;  %v7240_v24 = vld [vmem:[%s9240_s1 + $0xe0] sm:$0xff]   ;;  %v5917_v17 = vld [vmem:[%s7420_s20 + $0x6c] sm:$0xf] }
  0xd9   : > { %v1428_v52 = vrot.slane %v1426_v42, 4  ;;  %v3975_v53 = vor.u32 %v3974_v2, %v3971_v44  ;;  %v3985_v51 = vor.u32 %v3984_v1, %v8374_v34  ;;  %v3993_v35 = vshrl.u32 %v5914_v28, 16  ;;  %v7303_v2 = vld [vmem:[%s7420_s20 + $0xa4] sm:$0x1] }
  0xda   : > { %6582 = vmatpush3.bf16.msra.mxu1 %v7229_v31  ;;  %v8390_v31 = vsel %vm7698_vm5, %v5548_v22, %v1426_v42  ;;  %v3988_v22 = vshll.u32 %v8370_v39, 16  ;;  %v4006_v42 = vshrl.u32 %v8396_v43, 16  ;;  %v3952_v61 = vrot.slane %v3951_v5, 4  ;;  %v8565_v39 = vld [vmem:[%s7420_s20 + $0x98] sm:$0x1] }
  0xdb   : > { %6583 = vmatprep.subr.bf16.mxu1 %v7233_v30  ;;  %v5549_v44 = vrot.slane %v1302_v18, 9  ;;  %v1436_v1 = vrot.slane %v7303_v2, 5  ;;  %v3976_v5 = vrot.slane %v3975_v53, 4  ;;  %v3986_v18 = vrot.slane %v3985_v51, 4  ;;  %9285 = vst [vmem:[#allocation14_spill] sm:$0xff] %v8565_v39 }
  0xdc   : > { %6760 = vmatmul.mubr.bf16.gmra.mrb[20].mxu0 %v7230_v54  ;;  %v3943_v54 = vsel %vm7452_vm2, %v3938_v62, %v8366_v19  ;;  %v4002_v19 = vshll.u32 %v8396_v43, 16  ;;  %v7236_v62 = vld [vmem:[%s7420_s20 + $0xc0] sm:$0xff]   ;;  %v3990_v10 = vrot.slane %v3988_v22, 5  ;;  %v8432_v43 = vsel %vm7698_vm5, %v1428_v52, %v1429_v3 }
  0xdd   : > { %6552 = vmatmul.mubr.bf16.gmra.mrb[4].mxu1 %v9270_v25  ;;  %6763 = vmatprep.mubr.bf16.mxu0 %v7232_v8  ;;  %v3996_v8 = vshll.u32 %v5914_v28, 16  ;;  %v3962_v25 = vrot.slane %v3961_v58, 4  ;;  %v1440_v28 = vrot.slane %v7304_v41, 5  ;;  %v8428_v55 = vcombine.low %v3933_v6, %v3943_v54  ;;  %v7242_v41 = vld [vmem:[%s9240_s1 + $0xe8] sm:$0xff]  }
  0xde   : > { %6555 = vmatprep.mubr.bf16.mxu1 %v9271_v46  ;;  %6584 = vmatpush3.bf16.msra.mxu1 %v7233_v30  ;;  %v1303_v30 = vld [vmem:[%s7420_s20 + $0xa8] sm:$0xe]  ;;  %v1435_v46 = vrot.slane %v1433_v12, 4  ;;  %v3995_v0 = vrot.slane %v3993_v35, 4  ;;  %v8434_v58 = vrot.slane %v4002_v19, 5  ;;  %v4008_v22 = vrot.slane %v4006_v42, 4 }
  0xdf   : > { %6585 = vmatprep.subr.bf16.mxu1 %v7237_v13  ;;  %v3998_v2 = vrot.slane %v3996_v8, 5  ;;  %v3957_v3 = vsel %vm7452_vm2, %v3952_v61, %v8372_v38  ;;  %v8444_v6 = vsel %vm7698_vm5, %v5549_v44, %v1433_v12  ;;  %v4017_v54 = vshrl.u32 %v5917_v17, 16  ;;  %v7305_v38 = vld [vmem:[%s7420_s20 + $0xb0] sm:$0x1]  ;;  %v1304_v19 = vld [vmem:[%s7420_s20 + $0xb4] sm:$0xe] }
  0xe0   : > { %v4020_v52 = vshll.u32 %v5917_v17, 16  ;;  %v3967_v53 = vsel %vm7452_vm2, %v3962_v25, %v3966_v36  ;;  %v8453_v51 = vsel %vm7698_vm5, %v1435_v46, %v1436_v1  ;;  %v5550_v35 = vrot.slane %v1303_v30, 9  ;;  %v8475_v30 = vld [vmem:[%s7420_s20 + $0x74] sm:$0x1]  ;;  %v7306_v25 = vld [vmem:[%s7420_s20 + $0xb8] sm:$0xf] }
  0xe1   : > { %v1443_v8 = vrot.slane %v7305_v38, 5  ;;  %v9274_v12 = vcombine.low %v8147_v49, %v8161_v4  ;;  %v3981_v42 = vsel %vm7452_vm2, %v3976_v5, %v8374_v34  ;;  %v3991_v61 = vsel %vm7452_vm2, %v3986_v18, %v3990_v10  ;;  %v7238_v4 = vld [vmem:[%s7420_s20 + $0xcc] sm:$0xff]   ;;  %9276 = vst [vmem:[#allocation7_spill] sm:$0xff] %v8475_v30  ;;  %v5923_v38 = vld [vmem:[%s7420_s20 + $0x84] sm:$0xf] }
  0xe2   : > { %6586 = vmatpush3.bf16.msra.mxu1 %v7237_v13  ;;  %v8447_v13 = vld [vmem:[%s7420_s20 + $0x70] sm:$0xf]  ;;  %v1442_v36 = vrot.slane %v1440_v28, 4  ;;  %v4012_v44 = vshll.u32 %v8426_v47, 16  ;;  %v9275_v49 = vcombine.low %v8183_v26, %v8187_v56  ;;  %v4009_v1 = vor.u32 %v4008_v22, %v8434_v58  ;;  %v8492_v22 = vld [vmem:[%s7420_s20 + $0x7c] sm:$0xf] }
  0xe3   : > { %6587 = vmatprep.subr.bf16.mxu1 %v7240_v24  ;;  %9273 = vst [vmem:[#allocation6_spill] sm:$0xff] %v8447_v13  ;;  %v4026_v34 = vshll.u32 %v8447_v13, 16  ;;  %v4030_v10 = vshrl.u32 %v8447_v13, 16  ;;  %v5551_v17 = vrot.slane %v1304_v19, 9  ;;  %v1447_v46 = vrot.slane %v7306_v25, 5  ;;  %9277 = vst [vmem:[#allocation8_spill] sm:$0xff] %v8492_v22 }
  0xe4   : > { %6764 = vmatmul.mubr.bf16.gmra.mrb[24].mxu0 %v7234_v23  ;;  %v7244_v23 = vld [vmem:[%s9240_s1 + $0xf0] sm:$0xff]   ;;  %v4019_v26 = vrot.slane %v4017_v54, 4  ;;  %v4022_v56 = vrot.slane %v4020_v52, 5  ;;  %v8483_v18 = vcombine.low %v3957_v3, %v3967_v53  ;;  %v8495_v19 = vcombine.low %v3981_v42, %v3991_v61  ;;  %v7307_v3 = vld [vmem:[%s7420_s20 + $0xbc] sm:$0x1] }
  0xe5   : > { %6556 = vmatmul.mubr.bf16.gmra.mrb[8].mxu1 %v9274_v12  ;;  %6767 = vmatprep.mubr.bf16.mxu0 %v7236_v62  ;;  %v3999_v62 = vor.u32 %v3998_v2, %v3995_v0  ;;  %v8489_v2 = vsel %vm7698_vm5, %v5550_v35, %v1440_v28  ;;  %v8499_v54 = vsel %vm7698_vm5, %v1442_v36, %v1443_v8  ;;  %v8501_v52 = vrot.slane %v4012_v44, 5  ;;  %v7246_v12 = vld [vmem:[%s9240_s1 + $0xf8] sm:$0xff]   ;;  %v8508_v28 = vld [vmem:[%s7420_s20 + $0x88] sm:$0xf] }
  0xe6   : > { %6559 = vmatprep.mubr.bf16.mxu1 %v9275_v49  ;;  %6588 = vmatpush3.bf16.msra.mxu1 %v7240_v24  ;;  %v5920_v24 = vld [vmem:[%s7420_s20 + $0x78] sm:$0xf]  ;;  %v1450_v53 = vrot.slane %v7307_v3, 5  ;;  %9278 = vst [vmem:[#allocation9_spill] sm:$0xff] %v8508_v28  ;;  %v8512_v42 = vrot.slane %v4009_v1, 4  ;;  %v8514_v61 = vrot.slane %v4026_v34, 5  ;;  %v8518_v36 = vsel %vm7698_vm5, %v5551_v17, %v1447_v46 }
  0xe7   : > { %6589 = vmatprep.subr.bf16.mxu1 %v7242_v41  ;;  %v8510_v35 = vrot.slane %v3999_v62, 4  ;;  %v4032_v8 = vrot.slane %v4030_v10, 4  ;;  %v1449_v44 = vrot.slane %v1447_v46, 4  ;;  %v4023_v49 = vor.u32 %v4022_v56, %v4019_v26  ;;  %v5926_v3 = vld [vmem:[%s7420_s20 + $0x90] sm:$0xf] }
  0xe8   : > { %v4036_v25 = vshll.u32 %v8475_v30, 16  ;;  %v4044_v0 = vshll.u32 %v5920_v24, 16  ;;  %v4050_v62 = vshll.u32 %v8492_v22, 16  ;;  %v4054_v1 = vshrl.u32 %v8492_v22, 16  ;;  %v8525_v34 = vld [vmem:[%s7420_s20 + $0x94] sm:$0xf] }
  0xe9   : > { %9279 = vst [vmem:[#allocation10_spill] sm:$0xff] %v8525_v34  ;;  %v9280_v10 = vcombine.low %v8227_v27, %v8231_v29  ;;  %v4065_v17 = vshrl.u32 %v5923_v38, 16  ;;  %v4068_v46 = vshll.u32 %v5923_v38, 16  ;;  %v4078_v26 = vshrl.u32 %v8508_v28, 16  ;;  %v5929_v38 = vld [vmem:[%s7420_s20 + $0x9c] sm:$0xf] }
  0xea   : > { %6590 = vmatpush3.bf16.msra.mxu1 %v7242_v41  ;;  %v4041_v41 = vshrl.u32 %v5920_v24, 16  ;;  %v9281_v56 = vcombine.low %v8238_v45, %v8242_v14  ;;  %v4033_v29 = vor.u32 %v4032_v8, %v8514_v61  ;;  %v4092_v24 = vshll.u32 %v5926_v3, 16  ;;  %v8547_v45 = vld [vmem:[%s7420_s20 + $0x80] sm:$0x1] }
  0xeb   : > { %6591 = vmatprep.subr.bf16.mxu1 %v7244_v23  ;;  %v8544_v5 = vrot.slane %v4036_v25, 5  ;;  %9282 = vst [vmem:[#allocation11_spill] sm:$0xff] %v8547_v45  ;;  %v4098_v14 = vshll.u32 %v8525_v34, 16  ;;  %v4046_v27 = vrot.slane %v4044_v0, 5  ;;  %v4056_v8 = vrot.slane %v4054_v1, 4 }
  0xec   : > { %6768 = vmatmul.mubr.bf16.gmra.mrb[28].mxu0 %v7238_v4  ;;  %v4074_v4 = vshll.u32 %v8508_v28, 16  ;;  %v8551_v28 = vrot.slane %v4050_v62, 5  ;;  %v8557_v22 = vld [vmem:[%s7420_s20 + $0xa0] sm:$0xf]  ;;  %v4067_v25 = vrot.slane %v4065_v17, 4  ;;  %v4070_v30 = vrot.slane %v4068_v46, 5 }
  0xed   : > { %6560 = vmatmul.mubr.bf16.gmra.mrb[12].mxu1 %v9280_v10  ;;  %6787 = vmatprep.mubr.bf16.mxu0 %v8296_v59  ;;  %v4089_v59 = vshrl.u32 %v5926_v3, 16  ;;  %v8542_v10 = vrot.slane %v4023_v49, 4  ;;  %v8554_v3 = vld [vmem:[%s7420_s20 + $0x8c] sm:$0x1]  ;;  %9284 = vst [vmem:[#allocation13_spill] sm:$0xff] %v8557_v22  ;;  %v4080_v47 = vrot.slane %v4078_v26, 4  ;;  %v8574_v62 = vsel %vm7698_vm5, %v1449_v44, %v1450_v53 }
  0xee   : > { %6563 = vmatprep.mubr.bf16.mxu1 %v9281_v56  ;;  %6592 = vmatpush3.bf16.msra.mxu1 %v7244_v23  ;;  %v4102_v23 = vshrl.u32 %v8525_v34, 16  ;;  %v4043_v56 = vrot.slane %v4041_v41, 4  ;;  %9283 = vst [vmem:[#allocation12_spill] sm:$0xff] %v8554_v3  ;;  %v7243_v49 = vld [vmem:[%s9240_s1 + $0x208] sm:$0xff]   ;;  %v8562_v13 = vrot.slane %v4074_v4, 5  ;;  %v4094_v34 = vrot.slane %v4092_v24, 5 }
  0xef   : > { %6593 = vmatprep.subr.bf16.mxu1 %v7246_v12  ;;  %v5932_v41 = vld [vmem:[%s7420_s20 + $0xa8] sm:$0xf]  ;;  %v4091_v1 = vrot.slane %v4089_v59, 4  ;;  %v8579_v17 = vld [vmem:[%s9240_s1 + $0x100] sm:$0xff]   ;;  %v8582_v46 = vrot.slane %v4098_v14, 5  ;;  %v4113_v26 = vshrl.u32 %v5929_v38, 16  ;;  %v9287_v24 = vcombine.low %v8246_v16, %v8256_v15 }
  0xf0   : > { %9286 = vst [vmem:[#allocation15_spill] sm:$0xff] %v8579_v17  ;;  %v4104_v4 = vrot.slane %v4102_v23, 4  ;;  %v4116_v0 = vshll.u32 %v5929_v38, 16  ;;  %v8585_v53 = vrot.slane %v4033_v29, 4  ;;  %v4122_v44 = vshll.u32 %v8557_v22, 16  ;;  %v7245_v16 = vld [vmem:[%s9240_s1 + $0x210] sm:$0xff]  }
  0xf1   : > { %v4126_v59 = vshrl.u32 %v8557_v22, 16  ;;  %v4047_v14 = vor.u32 %v4046_v27, %v4043_v56  ;;  %v4057_v38 = vor.u32 %v4056_v8, %v8551_v28  ;;  %v4071_v23 = vor.u32 %v4070_v30, %v4067_v25  ;;  %v8597_v29 = vld [vmem:[%s7420_s20 + $0xac] sm:$0xf]  ;;  %v8610_v25 = vld [vmem:[%s7420_s20 + $0xa4] sm:$0x1] }
  0xf2   : > { %6594 = vmatpush3.bf16.msra.mxu1 %v7246_v12  ;;  %v4060_v12 = vshll.u32 %v8547_v45, 16  ;;  %9288 = vst [vmem:[#allocation16_spill] sm:$0xff] %v8597_v29  ;;  %v4081_v15 = vor.u32 %v4080_v47, %v8562_v13  ;;  %v4137_v27 = vshrl.u32 %v5932_v41, 16  ;;  %v4140_v30 = vshll.u32 %v5932_v41, 16 }
  0xf3   : > { %6867 = vmatprep.subr.bf16.mxu1 %v8579_v17  ;;  %v9289_v17 = vcombine.low %v8302_v20, %v8323_v7  ;;  %v4095_v56 = vor.u32 %v4094_v34, %v4091_v1  ;;  %v4105_v8 = vor.u32 %v4104_v4, %v8582_v46  ;;  %v4115_v20 = vrot.slane %v4113_v26, 4 }
  0xf4   : > { %6788 = vmatmul.mubr.bf16.vlgmr.msra.gmra.mrb[0].mxu0 %v8379_v50  ;;  %v4084_v50 = vshll.u32 %v8554_v3, 16  ;;  %v4118_v7 = vrot.slane %v4116_v0, 5  ;;  %v4150_v22 = vshrl.u32 %v8597_v29, 16  ;;  %v4048_v47 = vrot.slane %v4047_v14, 4  ;;  %v7247_v0 = vld [vmem:[%s9240_s1 + $0x218] sm:$0xff]  }
  0xf5   : > { %6564 = vmatmul.mubr.bf16.gmra.mrb[16].mxu1 %v9287_v24  ;;  %6820 = vmatpush3.bf16.msra.mxu0 %v8283_v21  ;;  %v4108_v21 = vshll.u32 %v8565_v39, 16  ;;  %v4146_v24 = vshll.u32 %v8597_v29, 16  ;;  %v4058_v39 = vrot.slane %v4057_v38, 4  ;;  %v4062_v3 = vrot.slane %v4060_v12, 5 }
  0xf6   : > { %6567 = vmatprep.mubr.bf16.mxu1 %v9289_v17  ;;  %6791 = vmatprep.mubr.bf16.mxu0 %v8383_v48  ;;  %v8612_v17 = vrot.slane %v4122_v44, 5  ;;  %v4128_v48 = vrot.slane %v4126_v59, 4  ;;  %v4086_v41 = vrot.slane %v4084_v50, 5  ;;  %v4072_v34 = vrot.slane %v4071_v23, 4 }
  0xf7   : > { %6821 = vmatprep.subr.bf16.mxu0 %v7243_v49  ;;  %v4082_v1 = vrot.slane %v4081_v15, 4  ;;  %v4139_v4 = vrot.slane %v4137_v27, 4  ;;  %v4142_v45 = vrot.slane %v4140_v30, 5  ;;  %v4096_v26 = vrot.slane %v4095_v56, 4  ;;  %v8678_v27 = vld [vmem:[%s7420_s20 + $0xbc] sm:$0x1] }
  0xf8   : > { %v4110_v44 = vrot.slane %v4108_v21, 5  ;;  %v4119_v59 = vor.u32 %v4118_v7, %v4115_v20  ;;  %v4132_v29 = vshll.u32 %v8610_v25, 16  ;;  %v4129_v12 = vor.u32 %v4128_v48, %v8612_v17  ;;  %v8645_v21 = vld [vmem:[%s7420_s20 + $0xb0] sm:$0x1] }
  0xf9   : > { %6822 = vmatpush3.bf16.msra.mxu0 %v7243_v49  ;;  %v4106_v49 = vrot.slane %v4105_v8, 4  ;;  %v8622_v14 = vrot.slane %v4146_v24, 5  ;;  %v4152_v38 = vrot.slane %v4150_v22, 4  ;;  %v9290_v23 = vor.u32 %v8030_v57, %v8028_v11 }
  0xfa   : > { %6823 = vmatprep.subr.bf16.mxu0 %v7245_v16  ;;  %v9291_v15 = vcombine.low %v8335_v40, %v8360_v60  ;;  %v4039_v22 = vsel %vm7452_vm2, %v8585_v53, %v8544_v5  ;;  %v4053_v57 = vsel %vm7452_vm2, %v4048_v47, %v8551_v28  ;;  %v9292_v40 = vcombine.low %v8390_v31, %v8432_v43  ;;  %v7250_v31 = vld [vmem:[%s9240_s1 + $0x220] sm:$0xff]  }
  0xfb   : > { %v8627_v50 = vrot.slane %v9290_v23, 4  ;;  %v4063_v60 = vsel %vm7452_vm2, %v4058_v39, %v4062_v3  ;;  %v4143_v5 = vor.u32 %v4142_v45, %v4139_v4  ;;  %v4087_v28 = vsel %vm7452_vm2, %v4082_v1, %v4086_v41  ;;  %v5988_v41 = vld [vmem:[%s7420_s20 + $0x48] sm:$0xe] }
  0xfc   : > { %6792 = vmatmul.mubr.bf16.gmra.mrb[4].mxu0 %v8428_v55  ;;  %v4029_v55 = vsel %vm7452_vm2, %v8542_v10, %v8514_v61  ;;  %v5935_v61 = vld [vmem:[%s7420_s20 + $0xb4] sm:$0xf]  ;;  %v8657_v10 = vld [vmem:[%s7420_s20 + $0xb8] sm:$0xf]  ;;  %v4101_v39 = vsel %vm7452_vm2, %v4096_v26, %v8582_v46  ;;  %v8667_v43 = vrot.slane %v4119_v59, 4  ;;  %v8669_v3 = vrot.slane %v4132_v29, 5 }
  0xfd   : > { %6568 = vmatmul.mubr.bf16.gmra.mrb[20].mxu1 %v9291_v15  ;;  %6795 = vmatprep.mubr.bf16.mxu0 %v8483_v18  ;;  %v4077_v18 = vsel %vm7452_vm2, %v4072_v34, %v8562_v13  ;;  %v4111_v13 = vsel %vm7452_vm2, %v4106_v49, %v4110_v44  ;;  %v8673_v45 = vrot.slane %v4129_v12, 4  ;;  %v4153_v53 = vor.u32 %v4152_v38, %v8622_v14  ;;  %v5989_v26 = vld [vmem:[%s7420_s20 + $0x54] sm:$0xe] }
  0xfe   : > { %6571 = vmatprep.mubr.bf16.mxu1 %v9292_v40  ;;  %6824 = vmatpush3.bf16.msra.mxu0 %v7245_v16  ;;  %v4156_v16 = vshll.u32 %v8645_v21, 16  ;;  %v9293_v46 = vsel %vm7452_vm2, %v8512_v42, %v8501_v52  ;;  %v9294_v29 = vsel %vm7452_vm2, %v8510_v35, %v8434_v58  ;;  %v4161_v56 = vshrl.u32 %v5935_v61, 16 }
  0xff   : > { %6825 = vmatprep.subr.bf16.mxu0 %v7247_v0  ;;  %v5966_v30 = vcombine.low %v9294_v29, %v9293_v46  ;;  %v4164_v8 = vshll.u32 %v5935_v61, 16  ;;  %v4170_v20 = vshll.u32 %v8657_v10, 16  ;;  %v5582_v7 = vcombine.low %v8489_v2, %v8499_v54  ;;  %v7253_v2 = vld [vmem:[%s9240_s1 + $0x228] sm:$0xff]   ;;  %v5938_v54 = vld [vmem:[%s7420_s20 + $0xc0] sm:$0xf]  ;;  %v9298_v29 = vld [vmem:[#allocation5_spill] sm:$0xff] }
 0x100   : > { %v5583_v48 = vcombine.low %v8518_v36, %v8574_v62  ;;  %v5967_v24 = vcombine.low %v4029_v55, %v4039_v22  ;;  %v8695_v52 = vrot.slane %v4143_v5, 4  ;;  %v5968_v42 = vcombine.low %v4053_v57, %v4063_v60 }
 0x101   : > { %v8697_v58 = vcombine.low %v4077_v18, %v4087_v28  ;;  %v8699_v35 = vcombine.low %v4101_v39, %v4111_v13  ;;  %v4125_v47 = vsel %vm7452_vm2, %v8667_v43, %v8612_v17  ;;  %v4135_v34 = vsel %vm7452_vm2, %v8673_v45, %v8669_v3  ;;  %v5991_v28 = vld [vmem:[%s7420_s20 + $0x6c] sm:$0xe] }
 0x102   : > { %6826 = vmatpush3.bf16.msra.mxu0 %v7247_v0  ;;  %v8715_v1 = vrot.slane %v4153_v53, 4  ;;  %v8717_v4 = vrot.slane %v4156_v16, 5  ;;  %v4174_v0 = vshrl.u32 %v8657_v10, 16  ;;  %v9295_v44 = vcombine.low %v8444_v6, %v8453_v51  ;;  %v7256_v6 = vld [vmem:[%s9240_s1 + $0x230] sm:$0xff]   ;;  %v8739_v51 = vld [vmem:[%s7420_s20 + $0xc4] sm:$0xf] }
 0x103   : > { %6827 = vmatprep.subr.bf16.mxu0 %v7250_v31  ;;  %v8724_v59 = vrot.slane %v4161_v56, 4  ;;  %v8728_v49 = vrot.slane %v4170_v20, 5  ;;  %v4180_v12 = vshll.u32 %v8678_v27, 16  ;;  %v4149_v38 = vsel %vm7452_vm2, %v8695_v52, %v8622_v14  ;;  %v5990_v14 = vld [vmem:[%s7420_s20 + $0x60] sm:$0xe]  ;;  %v9296_v39 = vld [vmem:[#allocation3_spill] sm:$0xff] }
 0x104   : > { %6796 = vmatmul.mubr.bf16.gmra.mrb[8].mxu0 %v8495_v19  ;;  %v8726_v19 = vrot.slane %v4164_v8, 5  ;;  %v4185_v23 = vshrl.u32 %v5938_v54, 16  ;;  %v6004_v15 = vrot.slane %v5988_v41, 9  ;;  %v4648_v55 = vrot.slane %v8315_v32, 5  ;;  %v7248_v13 = vld [vmem:[%s7420_s20 + $0xc] sm:$0xff]   ;;  %v7259_v56 = vld [vmem:[%s9240_s1 + $0x238] sm:$0xff]  }
 0x105   : > { %6572 = vmatmul.mubr.bf16.gmra.mrb[24].mxu1 %v9295_v44  ;;  %6799 = vmatprep.mubr.bf16.mxu0 %v5966_v30  ;;  %v4188_v22 = vshll.u32 %v5938_v54, 16  ;;  %v4651_v57 = vrot.slane %v8363_v63, 5  ;;  %v6005_v40 = vrot.slane %v5989_v26, 9  ;;  %v4655_v60 = vrot.slane %v8327_v33, 5  ;;  %v9297_v16 = vld [vmem:[#allocation4_spill] sm:$0xff]  ;;  %v9299_v52 = vld [vmem:[#allocation6_spill] sm:$0xff] }
 0x106   : > { %6575 = vmatprep.mubr.bf16.mxu1 %v5582_v7  ;;  %6828 = vmatpush3.bf16.msra.mxu0 %v7250_v31  ;;  %v4159_v18 = vsel %vm7452_vm2, %v8715_v1, %v8717_v4  ;;  %v8749_v5 = vrot.slane %v4174_v0, 4  ;;  %v8753_v61 = vsel %vm7698_vm5, %v6004_v15, %v4648_v55  ;;  %v4650_v32 = vrot.slane %v4648_v55, 4  ;;  %v9300_v4 = vld [vmem:[#allocation7_spill] sm:$0xff] }
 0x107   : > { %6829 = vmatprep.subr.bf16.mxu0 %v7253_v2  ;;  %v4194_v31 = vshll.u32 %v8739_v51, 16  ;;  %v8759_v63 = vsel %vm7698_vm5, %v6005_v40, %v4655_v60  ;;  %v4657_v33 = vrot.slane %v4655_v60, 4  ;;  %v4658_v3 = vrot.slane %v9296_v39, 5  ;;  %v8790_v26 = vld [vmem:[%s7420_s20 + $0xc8] sm:$0x1]  ;;  %v7249_v40 = vld [vmem:[%s7420_s20 + $0x18] sm:$0xff]  }
 0x108   : > { %v8765_v45 = vsel %vm7698_vm5, %v4650_v32, %v4651_v57  ;;  %v6006_v53 = vrot.slane %v5990_v14, 9  ;;  %v4662_v46 = vrot.slane %v9297_v16, 5  ;;  %v4665_v30 = vrot.slane %v9298_v29, 5  ;;  %v7251_v39 = vld [vmem:[%s7420_s20 + $0x24] sm:$0xff]  }
 0x109   : > { %v6036_v8 = vcombine.low %v8753_v61, %v8765_v45  ;;  %v8776_v20 = vsel %vm7698_vm5, %v4657_v33, %v4658_v3  ;;  %v6007_v7 = vrot.slane %v5991_v28, 9  ;;  %v4672_v0 = vrot.slane %v9300_v4, 5  ;;  %v9302_v28 = vld [vmem:[#allocation11_spill] sm:$0xff]  ;;  %v5697_v61 = vld [vmem:[%s7420_s20 + $0x90] sm:$0xf] }
 0x10a   : > { %6830 = vmatpush3.bf16.msra.mxu0 %v7253_v2  ;;  %v4669_v2 = vrot.slane %v9299_v52, 5  ;;  %v6037_v54 = vcombine.low %v8759_v63, %v8776_v20  ;;  %v8783_v41 = vsel %vm7698_vm5, %v6006_v53, %v4662_v46  ;;  %v4664_v1 = vrot.slane %v4662_v46, 4  ;;  %v9303_v53 = vld [vmem:[#allocation2_spill] sm:$0xff]  ;;  %v7265_v45 = vld [vmem:[%s7420_s20 + $0xa8] sm:$0xff]  }
 0x10b   : > { %6831 = vmatprep.subr.bf16.mxu0 %v7256_v6  ;;  %v8792_v44 = vrot.slane %v4185_v23, 4  ;;  %v8805_v36 = vcombine.low %v4125_v47, %v4135_v34  ;;  %v4167_v62 = vor.u32 %v8726_v19, %v8724_v59  ;;  %v5992_v23 = vld [vmem:[%s7420_s20 + $0x78] sm:$0xe]  ;;  %v8817_v57 = vrot.slane %v4180_v12, 5  ;;  %v5941_v12 = vld [vmem:[%s7420_s20 + $0xcc] sm:$0xf] }
 0x10c   : > { %6800 = vmatmul.mubr.bf16.gmra.mrb[12].mxu0 %v5967_v24  ;;  %v8794_v24 = vrot.slane %v4188_v22, 5  ;;  %v8798_v15 = vsel %vm7698_vm5, %v6007_v7, %v4669_v2  ;;  %v4671_v55 = vrot.slane %v4669_v2, 4  ;;  %v8815_v22 = vcombine.low %v4149_v38, %v4159_v18  ;;  %v5691_v47 = vld [vmem:[%s7420_s20 + $0x78] sm:$0xf]  ;;  %v9301_v18 = vld [vmem:[#allocation8_spill] sm:$0xff] }
 0x10d   : > { %6576 = vmatmul.mubr.bf16.gmra.mrb[28].mxu1 %v5583_v48  ;;  %6803 = vmatprep.mubr.bf16.mxu0 %v5968_v42  ;;  %v4198_v48 = vshrl.u32 %v8739_v51, 16  ;;  %v8812_v42 = vsel %vm7698_vm5, %v4664_v1, %v4665_v30  ;;  %v4177_v34 = vor.u32 %v8749_v5, %v8728_v49  ;;  %v8828_v59 = vrot.slane %v4194_v31, 5  ;;  %v8842_v31 = vld [vmem:[%s7420_s20 + $0xd0] sm:$0xf]  ;;  %v9304_v1 = vld [vmem:[#allocation9_spill] sm:$0xff] }
 0x10e   : > { %6595 = vmatprep.mubr.bf16.mxu1 %v7248_v13  ;;  %6832 = vmatpush3.bf16.msra.mxu0 %v7256_v6  ;;  %v6038_v17 = vcombine.low %v8783_v41, %v8812_v42  ;;  %v8823_v43 = vsel %vm7698_vm5, %v4671_v55, %v4672_v0  ;;  %v4204_v19 = vshll.u32 %v8790_v26, 16  ;;  %v5993_v6 = vld [vmem:[%s7420_s20 + $0x84] sm:$0xe]  ;;  %v4191_v60 = vor.u32 %v8794_v24, %v8792_v44  ;;  %v9305_v24 = vld [vmem:[#allocation12_spill] sm:$0xff]  ;;  %v7329_v63 = vld [vmem:[%s7420_s20 + $0x8c] sm:$0x1] }
 0x10f   : > { %6833 = vmatprep.subr.bf16.mxu0 %v7259_v56  ;;  %v6039_v38 = vcombine.low %v8798_v15, %v8823_v43  ;;  %v6008_v14 = vrot.slane %v5992_v23, 9  ;;  %v4676_v32 = vrot.slane %v9301_v18, 5  ;;  %v4679_v33 = vrot.slane %v9302_v28, 5 }
 0x110   : > { %v4200_v5 = vrot.slane %v4198_v48, 4  ;;  %v2426_v3 = vshrl.u32 %v5691_v47, 16  ;;  %v2429_v13 = vshll.u32 %v5691_v47, 16  ;;  %v2448_v16 = vsel %vm7452_vm2, %v8627_v50, %v9303_v53 }
 0x111   : > { %v4209_v46 = vshrl.u32 %v5941_v12, 16  ;;  %v8850_v29 = vsel %vm7698_vm5, %v6008_v14, %v4676_v32  ;;  %v4678_v30 = vrot.slane %v4676_v32, 4  ;;  %v6009_v7 = vrot.slane %v5993_v6, 9  ;;  %v7309_v6 = vld [vmem:[%s9240_s1 + $0x108] sm:$0xff]  }
 0x112   : > { %6834 = vmatpush3.bf16.msra.mxu0 %v7259_v56  ;;  %v4212_v52 = vshll.u32 %v5941_v12, 16  ;;  %v2428_v2 = vrot.slane %v2426_v3, 4  ;;  %v2431_v56 = vrot.slane %v2429_v13, 5  ;;  %v4683_v4 = vrot.slane %v9304_v1, 5  ;;  %v5994_v12 = vld [vmem:[%s7420_s20 + $0x90] sm:$0xe] }
 0x113   : > { %v4218_v50 = vshll.u32 %v8842_v31, 16  ;;  %v4222_v0 = vshrl.u32 %v8842_v31, 16  ;;  %v8859_v44 = vsel %vm7698_vm5, %v4678_v30, %v4679_v33  ;;  %v4686_v55 = vrot.slane %v9305_v24, 5  ;;  %v7252_v3 = vld [vmem:[%s7420_s20 + $0x30] sm:$0xff]  }
 0x114   : > { %6804 = vmatmul.mubr.bf16.gmra.mrb[16].mxu0 %v8697_v58  ;;  %v9306_v58 = vld [vmem:[#allocation15_spill] sm:$0xff]  ;;  %v4201_v48 = vor.u32 %v4200_v5, %v8828_v59  ;;  %v2432_v23 = vor.u32 %v2431_v56, %v2428_v2  ;;  %v4685_v47 = vrot.slane %v4683_v4, 4  ;;  %v4178_v14 = vrot.slane %v4177_v34, 4  ;;  %v8880_v13 = vld [vmem:[%s7420_s20 + $0xd4] sm:$0x1]  ;;  %v9307_v2 = vld [vmem:[#allocation10_spill] sm:$0xff] }
 0x115   : > { %6596 = vmatmul.mubr.bf16.vlgmr.msra.gmra.mrb[0].mxu1 %v7249_v40  ;;  %6807 = vmatprep.mubr.bf16.mxu0 %v8699_v35  ;;  %v6040_v35 = vcombine.low %v8850_v29, %v8859_v44  ;;  %v4168_v40 = vrot.slane %v4167_v62, 4  ;;  %v4206_v18 = vrot.slane %v4204_v19, 5  ;;  %v8872_v32 = vsel %vm7698_vm5, %v6009_v7, %v4683_v4  ;;  %v7254_v19 = vld [vmem:[%s7420_s20 + $0x3c] sm:$0xff]   ;;  %v7310_v1 = vld [vmem:[%s9240_s1 + $0x110] sm:$0xff]  }
 0x116   : > { %6875 = vmatpush3.bf16.msra.mxu1 %v9306_v58  ;;  %6599 = vmatprep.mubr.bf16.mxu1 %v7251_v39  ;;  %v4211_v28 = vrot.slane %v4209_v46, 4  ;;  %v4214_v33 = vrot.slane %v4212_v52, 5  ;;  %v2433_v39 = vrot.slane %v2432_v23, 4  ;;  %v8876_v5 = vsel %vm7698_vm5, %v4685_v47, %v4686_v55  ;;  %v7311_v47 = vld [vmem:[%s7420_s20 + $0x1c] sm:$0xf] }
 0x117   : > { %6868 = vmatprep.subr.bf16.mxu1 %v7309_v6  ;;  %v8882_v53 = vrot.slane %v4218_v50, 5  ;;  %v4224_v30 = vrot.slane %v4222_v0, 4  ;;  %v6041_v62 = vcombine.low %v8872_v32, %v8876_v5  ;;  %v6010_v34 = vrot.slane %v5994_v12, 9 }
 0x118   : > { %v4192_v7 = vrot.slane %v4191_v60, 4  ;;  %v4202_v46 = vrot.slane %v4201_v48, 4  ;;  %v2438_v52 = vsel %vm7452_vm2, %v2433_v39, %v8028_v11  ;;  %v4690_v56 = vrot.slane %v9307_v2, 5  ;;  %v9308_v11 = vld [vmem:[#allocation14_spill] sm:$0xff]  ;;  %v7255_v39 = vld [vmem:[%s7420_s20 + $0x48] sm:$0xff]  }
 0x119   : > { %v4173_v4 = vsel %vm7452_vm2, %v4168_v40, %v8728_v49  ;;  %v4183_v60 = vsel %vm7452_vm2, %v4178_v14, %v8817_v57  ;;  %v8900_v50 = vcombine.low %v2438_v52, %v2448_v16  ;;  %v4693_v0 = vrot.slane %v9308_v11, 5  ;;  %v5984_v57 = vld [vmem:[%s7420_s20 + $0x18] sm:$0xe]  ;;  %v5995_v16 = vld [vmem:[%s7420_s20 + $0x9c] sm:$0xe] }
 0x11a   : > { %6876 = vmatpush3.bf16.msra.mxu1 %v7309_v6  ;;  %v4215_v24 = vor.u32 %v4214_v33, %v4211_v28  ;;  %v4228_v55 = vshll.u32 %v8880_v13, 16  ;;  %v8907_v58 = vsel %vm7698_vm5, %v6010_v34, %v4690_v56  ;;  %v4692_v48 = vrot.slane %v4690_v56, 4  ;;  %v7312_v40 = vld [vmem:[%s9240_s1 + $0x118] sm:$0xff]   ;;  %v7313_v2 = vld [vmem:[%s7420_s20 + $0x20] sm:$0x1] }
 0x11b   : > { %6869 = vmatprep.subr.bf16.mxu1 %v7310_v1  ;;  %v4225_v49 = vor.u32 %v4224_v30, %v8882_v53  ;;  %v4207_v23 = vsel %vm7452_vm2, %v4202_v46, %v4206_v18  ;;  %v4620_v12 = vrot.slane %v7311_v47, 5  ;;  %v5973_v6 = vcombine.low %v4173_v4, %v4183_v60  ;;  %v9309_v34 = vld [vmem:[#allocation13_spill] sm:$0xff]  ;;  %v5996_v11 = vld [vmem:[%s7420_s20 + $0xa8] sm:$0xe] }
 0x11c   : > { %6808 = vmatmul.mubr.bf16.gmra.mrb[20].mxu0 %v8805_v36  ;;  %v4197_v36 = vsel %vm7452_vm2, %v4192_v7, %v8828_v59  ;;  %v4216_v14 = vrot.slane %v4215_v24, 4  ;;  %v4230_v28 = vrot.slane %v4228_v55, 5  ;;  %v6000_v18 = vrot.slane %v5984_v57, 9  ;;  %v7257_v46 = vld [vmem:[%s7420_s20 + $0x54] sm:$0xff]   ;;  %v5985_v55 = vld [vmem:[%s7420_s20 + $0x24] sm:$0xe] }
 0x11d   : > { %6600 = vmatmul.mubr.bf16.gmra.mrb[4].mxu1 %v7252_v3  ;;  %6811 = vmatprep.mubr.bf16.mxu0 %v8815_v22  ;;  %v8921_v22 = vsel %vm7698_vm5, %v4692_v48, %v4693_v0  ;;  %v6011_v33 = vrot.slane %v5995_v16, 9  ;;  %v5974_v3 = vcombine.low %v4197_v36, %v4207_v23  ;;  %v4226_v30 = vrot.slane %v4225_v49, 4  ;;  %v7315_v48 = vld [vmem:[%s7420_s20 + $0x28] sm:$0xf]  ;;  %v7316_v36 = vld [vmem:[%s7420_s20 + $0x34] sm:$0xf] }
 0x11e   : > { %6603 = vmatprep.mubr.bf16.mxu1 %v7254_v19  ;;  %6877 = vmatpush3.bf16.msra.mxu1 %v7310_v1  ;;  %v6042_v59 = vcombine.low %v8907_v58, %v8921_v22  ;;  %v4697_v19 = vrot.slane %v9309_v34, 5  ;;  %v4700_v7 = vrot.slane %v8610_v25, 5  ;;  %v4622_v52 = vrot.slane %v4620_v12, 4  ;;  %v7314_v1 = vld [vmem:[%s9240_s1 + $0x120] sm:$0xff]  }
 0x11f   : > { %6870 = vmatprep.subr.bf16.mxu1 %v7312_v40  ;;  %v4623_v56 = vrot.slane %v7313_v2, 5  ;;  %v4621_v25 = vsel %vm7698_vm5, %v6000_v18, %v4620_v12  ;;  %v4221_v0 = vsel %vm7452_vm2, %v4216_v14, %v8882_v53  ;;  %v4231_v24 = vsel %vm7452_vm2, %v4226_v30, %v4230_v28  ;;  %v5986_v12 = vld [vmem:[%s7420_s20 + $0x30] sm:$0xe]  ;;  %v7258_v30 = vld [vmem:[%s7420_s20 + $0x60] sm:$0xff]  }
 0x120   : > { %v8938_v4 = vsel %vm7698_vm5, %v6011_v33, %v4697_v19  ;;  %v4699_v60 = vrot.slane %v4697_v19, 4  ;;  %v4627_v49 = vrot.slane %v7315_v48, 5  ;;  %v4634_v23 = vrot.slane %v7316_v36, 5  ;;  %v7318_v33 = vld [vmem:[%s7420_s20 + $0x2c] sm:$0x1] }
 0x121   : > { %v4624_v16 = vsel %vm7698_vm5, %v4622_v52, %v4623_v56  ;;  %v6012_v47 = vrot.slane %v5996_v11, 9  ;;  %v5975_v28 = vcombine.low %v4221_v0, %v4231_v24  ;;  %v6001_v18 = vrot.slane %v5985_v55, 9  ;;  %v7260_v52 = vld [vmem:[%s7420_s20 + $0x6c] sm:$0xff]   ;;  %v5997_v11 = vld [vmem:[%s7420_s20 + $0xb4] sm:$0xe] }
 0x122   : > { %6878 = vmatpush3.bf16.msra.mxu1 %v7312_v40  ;;  %v8952_v57 = vsel %vm7698_vm5, %v4699_v60, %v4700_v7  ;;  %v9310_v40 = vld [vmem:[#allocation16_spill] sm:$0xff]  ;;  %v6032_v34 = vcombine.low %v4621_v25, %v4624_v16  ;;  %v4629_v19 = vrot.slane %v4627_v49, 4  ;;  %v6002_v2 = vrot.slane %v5986_v12, 9  ;;  %v5987_v0 = vld [vmem:[%s7420_s20 + $0x3c] sm:$0xe] }
 0x123   : > { %6871 = vmatprep.subr.bf16.mxu1 %v7314_v1  ;;  %v6043_v53 = vcombine.low %v8938_v4, %v8952_v57  ;;  %v4704_v14 = vrot.slane %v9310_v40, 5  ;;  %v4636_v56 = vrot.slane %v4634_v23, 4  ;;  %v7320_v24 = vld [vmem:[%s7420_s20 + $0x40] sm:$0xf]  ;;  %v4628_v48 = vsel %vm7698_vm5, %v6001_v18, %v4627_v49  ;;  %v7322_v18 = vld [vmem:[%s7420_s20 + $0x44] sm:$0x1] }
 0x124   : > { %6812 = vmatmul.mubr.bf16.gmra.mrb[24].mxu0 %v5973_v6  ;;  %v7317_v6 = vld [vmem:[%s9240_s1 + $0x128] sm:$0xff]   ;;  %v4641_v55 = vrot.slane %v7320_v24, 5  ;;  %v4711_v12 = vrot.slane %v8657_v10, 5  ;;  %v4635_v49 = vsel %vm7698_vm5, %v6002_v2, %v4634_v23  ;;  %v7323_v10 = vld [vmem:[%s9240_s1 + $0x138] sm:$0xff]   ;;  %v5998_v23 = vld [vmem:[%s7420_s20 + $0xc0] sm:$0xe] }
 0x125   : > { %6604 = vmatmul.mubr.bf16.gmra.mrb[8].mxu1 %v7255_v39  ;;  %6815 = vmatprep.mubr.bf16.mxu0 %v5974_v3  ;;  %v4630_v39 = vrot.slane %v7318_v33, 5  ;;  %v4707_v3 = vrot.slane %v8645_v21, 5  ;;  %v8969_v7 = vsel %vm7698_vm5, %v6012_v47, %v4704_v14  ;;  %v7321_v21 = vld [vmem:[%s9240_s1 + $0x130] sm:$0xff]   ;;  %v6013_v47 = vrot.slane %v5997_v11, 9 }
 0x126   : > { %6607 = vmatprep.mubr.bf16.mxu1 %v7257_v46  ;;  %6879 = vmatpush3.bf16.msra.mxu1 %v7314_v1  ;;  %v4706_v46 = vrot.slane %v4704_v14, 4  ;;  %v7319_v1 = vld [vmem:[%s7420_s20 + $0x38] sm:$0x1]  ;;  %v6003_v14 = vrot.slane %v5987_v0, 9  ;;  %v4644_v33 = vrot.slane %v7322_v18, 5  ;;  %v4718_v11 = vrot.slane %v8739_v51, 5 }
 0x127   : > { %6872 = vmatprep.subr.bf16.mxu1 %v7317_v6  ;;  %v4637_v60 = vrot.slane %v7319_v1, 5  ;;  %v4631_v36 = vsel %vm7698_vm5, %v4629_v19, %v4630_v39  ;;  %v4713_v39 = vrot.slane %v4711_v12, 4  ;;  %v5688_v19 = vld [vmem:[%s7420_s20 + $0x6c] sm:$0xf]  ;;  %v7263_v18 = vld [vmem:[%s7420_s20 + $0x90] sm:$0xff]   ;;  %v2469_v20 = vshll.u32 %v7329_v63, 16 }
 0x128   : > { %v8981_v25 = vsel %vm7698_vm5, %v4706_v46, %v4707_v3  ;;  %v6033_v3 = vcombine.low %v4628_v48, %v4631_v36  ;;  %v4642_v1 = vsel %vm7698_vm5, %v6003_v14, %v4641_v55  ;;  %v2402_v0 = vshrl.u32 %v5688_v19, 16  ;;  %v5999_v51 = vld [vmem:[%s7420_s20 + $0xcc] sm:$0xe] }
 0x129   : > { %v6044_v16 = vcombine.low %v8969_v7, %v8981_v25  ;;  %v4638_v40 = vsel %vm7698_vm5, %v4636_v56, %v4637_v60  ;;  %v6014_v56 = vrot.slane %v5998_v23, 9  ;;  %v2405_v24 = vshll.u32 %v5688_v19, 16 }
 0x12a   : > { %6880 = vmatpush3.bf16.msra.mxu1 %v7317_v6  ;;  %v4714_v6 = vrot.slane %v8678_v27, 5  ;;  %v9001_v27 = vsel %vm7698_vm5, %v6013_v47, %v4711_v12  ;;  %v4721_v36 = vrot.slane %v8790_v26, 5  ;;  %v4720_v12 = vrot.slane %v4718_v11, 4 }
 0x12b   : > { %6873 = vmatprep.subr.bf16.mxu1 %v7321_v21  ;;  %v2407_v26 = vrot.slane %v2405_v24, 5  ;;  %v4728_v23 = vrot.slane %v8880_v13, 5 }
 0x12c   : > { %6816 = vmatmul.mubr.bf16.gmra.mrb[28].mxu0 %v5975_v28  ;;  %v4643_v28 = vrot.slane %v4641_v55, 4  ;;  %v9008_v46 = vsel %vm7698_vm5, %v4713_v39, %v4714_v6  ;;  %v9022_v55 = vsel %vm7698_vm5, %v6014_v56, %v4718_v11  ;;  %v4725_v39 = vrot.slane %v8842_v31, 5  ;;  %v7325_v56 = vld [vmem:[%s7420_s20 + $0x74] sm:$0x1] }
 0x12d   : > { %6608 = vmatmul.mubr.bf16.gmra.mrb[12].mxu1 %v7258_v30  ;;  %6835 = vmatprep.mubr.bf16.mxu0 %v6032_v34  ;;  %v7261_v30 = vld [vmem:[%s7420_s20 + $0x78] sm:$0xff]   ;;  %v6034_v34 = vcombine.low %v4635_v49, %v4638_v40  ;;  %v6045_v2 = vcombine.low %v9001_v27, %v9008_v46  ;;  %v9027_v49 = vsel %vm7698_vm5, %v4720_v12, %v4721_v36  ;;  %v2404_v40 = vrot.slane %v2402_v0, 4  ;;  %v7326_v0 = vld [vmem:[%s7420_s20 + $0x88] sm:$0xf] }
 0x12e   : > { %6611 = vmatprep.mubr.bf16.mxu1 %v7260_v52  ;;  %6881 = vmatpush3.bf16.msra.mxu1 %v7321_v21  ;;  %v7262_v52 = vld [vmem:[%s7420_s20 + $0x84] sm:$0xff]   ;;  %v4645_v60 = vsel %vm7698_vm5, %v4643_v28, %v4644_v33  ;;  %v7324_v21 = vld [vmem:[%s7420_s20 + $0x70] sm:$0xf]  ;;  %v6046_v28 = vcombine.low %v9022_v55, %v9027_v49  ;;  %v4727_v19 = vrot.slane %v4725_v39, 4  ;;  %v2459_v24 = vshll.u32 %v7326_v0, 16 }
 0x12f   : > { %6874 = vmatprep.subr.bf16.mxu1 %v7323_v10  ;;  %v2411_v48 = vshll.u32 %v7324_v21, 16  ;;  %v2415_v47 = vshrl.u32 %v7324_v21, 16  ;;  %v6035_v6 = vcombine.low %v4642_v1, %v4645_v60  ;;  %v2421_v1 = vshll.u32 %v7325_v56, 16 }
 0x130   : > { %v9049_v11 = vsel %vm7698_vm5, %v4727_v19, %v4728_v23  ;;  %v2463_v21 = vshrl.u32 %v7326_v0, 16  ;;  %v7328_v19 = vld [vmem:[%s7420_s20 + $0xa0] sm:$0xf] }
 0x131   : > { %v9029_v14 = vrot.slane %v2411_v48, 5  ;;  %v2417_v33 = vrot.slane %v2415_v47, 4  ;;  %v2511_v56 = vshrl.u32 %v7328_v19, 16 }
 0x132   : > { %6882 = vmatpush3.bf16.msra.mxu1 %v7323_v10  ;;  %v6015_v10 = vrot.slane %v5999_v51, 9 }
 0x133   : > { %v2418_v31 = vor.u32 %v2417_v33, %v9029_v14  ;;  %v2477_v33 = vshll.u32 %v5697_v61, 16 }
 0x134   : > { %6836 = vmatmul.mubr.bf16.vlgmr.msra.gmra.mrb[0].mxu0 %v6033_v3  ;;  %v7264_v3 = vld [vmem:[%s7420_s20 + $0x9c] sm:$0xff]  }
 0x135   : > { %6612 = vmatmul.mubr.bf16.gmra.mrb[16].mxu1 %v7261_v30  ;;  %6839 = vmatprep.mubr.bf16.mxu0 %v6034_v34  ;;  %v5694_v30 = vld [vmem:[%s7420_s20 + $0x84] sm:$0xf]  ;;  %v9040_v34 = vsel %vm7698_vm5, %v6015_v10, %v4725_v39  ;;  %v2419_v47 = vrot.slane %v2418_v31, 4  ;;  %v7327_v10 = vld [vmem:[%s7420_s20 + $0x94] sm:$0xf]  ;;  %v2479_v0 = vrot.slane %v2477_v33, 5 }
 0x136   : > { %6615 = vmatprep.mubr.bf16.mxu1 %v7262_v52  ;;  %v2408_v52 = vor.u32 %v2407_v26, %v2404_v40  ;;  %v2450_v13 = vshrl.u32 %v5694_v30, 16  ;;  %v2453_v60 = vshll.u32 %v5694_v30, 16  ;;  %v6047_v48 = vcombine.low %v9040_v34, %v9049_v11 }
 0x137   : > { %v9058_v40 = vrot.slane %v2459_v24, 5  ;;  %v2465_v26 = vrot.slane %v2463_v21, 4  ;;  %v2483_v39 = vshll.u32 %v7327_v10, 16  ;;  %v2487_v23 = vshrl.u32 %v7327_v10, 16  ;;  %v7331_v10 = vld [vmem:[%s7420_s20 + $0xa4] sm:$0x1] }
 0x138   : > { %v2409_v36 = vrot.slane %v2408_v52, 4  ;;  %v2452_v12 = vrot.slane %v2450_v13, 4  ;;  %v2455_v51 = vrot.slane %v2453_v60, 5  ;;  %v2507_v52 = vshll.u32 %v7328_v19, 16  ;;  %v7332_v19 = vld [vmem:[%s7420_s20 + $0xac] sm:$0xf] }
 0x139   : > { %v2466_v13 = vor.u32 %v2465_v26, %v9058_v40  ;;  %v9075_v41 = vrot.slane %v2483_v39, 5  ;;  %v2489_v42 = vrot.slane %v2487_v23, 4  ;;  %v2513_v21 = vrot.slane %v2511_v56, 4  ;;  %v5706_v23 = vld [vmem:[%s7420_s20 + $0xb4] sm:$0xf] }
 0x13a   : > { %v2517_v39 = vshll.u32 %v7331_v10, 16  ;;  %v2535_v15 = vshrl.u32 %v7332_v19, 16  ;;  %v2549_v63 = vshll.u32 %v5706_v23, 16 }
 0x13b   : > { %v2490_v26 = vor.u32 %v2489_v42, %v9075_v41 }
 0x13c   : > { %6840 = vmatmul.mubr.bf16.gmra.mrb[4].mxu0 %v6035_v6  ;;  %v5700_v6 = vld [vmem:[%s7420_s20 + $0x9c] sm:$0xf] }
 0x13d   : > { %6616 = vmatmul.mubr.bf16.gmra.mrb[20].mxu1 %v7263_v18  ;;  %6843 = vmatprep.mubr.bf16.mxu0 %v6036_v8  ;;  %v2423_v8 = vrot.slane %v2421_v1, 5  ;;  %v2474_v18 = vshrl.u32 %v5697_v61, 16  ;;  %v2501_v30 = vshll.u32 %v5700_v6, 16  ;;  %v2414_v1 = vsel %vm7452_vm2, %v2409_v36, %v9029_v14  ;;  %v7267_v61 = vld [vmem:[%s7420_s20 + $0xc0] sm:$0xff]  }
 0x13e   : > { %6619 = vmatprep.mubr.bf16.mxu1 %v7264_v3  ;;  %v2498_v3 = vshrl.u32 %v5700_v6, 16  ;;  %v9077_v14 = vrot.slane %v2507_v52, 5  ;;  %v2531_v52 = vshll.u32 %v7332_v19, 16 }
 0x13f   : > { %v2424_v31 = vsel %vm7452_vm2, %v2419_v47, %v2423_v8  ;;  %v2476_v60 = vrot.slane %v2474_v18, 4  ;;  %v2503_v24 = vrot.slane %v2501_v30, 5  ;;  %v2471_v8 = vrot.slane %v2469_v20, 5  ;;  %v7333_v20 = vld [vmem:[%s7420_s20 + $0xb8] sm:$0xf] }
 0x140   : > { %v2467_v47 = vrot.slane %v2466_v13, 4  ;;  %v2514_v33 = vor.u32 %v2513_v21, %v9077_v14  ;;  %v2555_v29 = vshll.u32 %v7333_v20, 16  ;;  %v2559_v44 = vshrl.u32 %v7333_v20, 16 }
 0x142   : > { %v2515_v13 = vrot.slane %v2514_v33, 4 }
 0x144   : > { %6844 = vmatmul.mubr.bf16.gmra.mrb[8].mxu0 %v6037_v54  ;;  %v2456_v54 = vor.u32 %v2455_v51, %v2452_v12  ;;  %v2480_v12 = vor.u32 %v2479_v0, %v2476_v60  ;;  %v7330_v51 = vld [vmem:[%s7420_s20 + $0x98] sm:$0x1]  ;;  %v2519_v60 = vrot.slane %v2517_v39, 5 }
 0x145   : > { %6620 = vmatmul.mubr.bf16.gmra.mrb[24].mxu1 %v7265_v45  ;;  %6847 = vmatprep.mubr.bf16.mxu0 %v6038_v17  ;;  %v2500_v17 = vrot.slane %v2498_v3, 4  ;;  %v5736_v45 = vcombine.low %v2414_v1, %v2424_v31  ;;  %v2493_v6 = vshll.u32 %v7330_v51, 16  ;;  %v2546_v31 = vshrl.u32 %v5706_v23, 16 }
 0x146   : > { %6623 = vmatprep.mubr.bf16.mxu1 %v7266_v9  ;;  %v2457_v36 = vrot.slane %v2456_v54, 4  ;;  %v5703_v9 = vld [vmem:[%s7420_s20 + $0xa8] sm:$0xf]  ;;  %v2481_v56 = vrot.slane %v2480_v12, 4  ;;  %v2520_v32 = vsel %vm7452_vm2, %v2515_v13, %v2519_v60 }
 0x147   : > { %v2504_v18 = vor.u32 %v2503_v24, %v2500_v17  ;;  %v2522_v3 = vshrl.u32 %v5703_v9, 16  ;;  %v2525_v30 = vshll.u32 %v5703_v9, 16  ;;  %v2495_v1 = vrot.slane %v2493_v6, 5 }
 0x148   : > { %v2462_v43 = vsel %vm7452_vm2, %v2457_v36, %v9058_v40  ;;  %v2533_v17 = vrot.slane %v2531_v52, 5  ;;  %v2537_v24 = vrot.slane %v2535_v15, 4  ;;  %v2548_v21 = vrot.slane %v2546_v31, 4  ;;  %v5709_v36 = vld [vmem:[%s7420_s20 + $0xc0] sm:$0xf] }
 0x149   : > { %v2505_v54 = vrot.slane %v2504_v18, 4  ;;  %v2524_v0 = vrot.slane %v2522_v3, 4  ;;  %v2527_v42 = vrot.slane %v2525_v30, 5  ;;  %v2570_v9 = vshrl.u32 %v5709_v36, 16  ;;  %v7335_v18 = vld [vmem:[%s7420_s20 + $0xc4] sm:$0xf] }
 0x14a   : > { %v2579_v33 = vshll.u32 %v7335_v18, 16 }
 0x14b   : > { %v2510_v51 = vsel %vm7452_vm2, %v2505_v54, %v9077_v14  ;;  %v2528_v5 = vor.u32 %v2527_v42, %v2524_v0  ;;  %v2583_v14 = vshrl.u32 %v7335_v18, 16  ;;  %v2572_v19 = vrot.slane %v2570_v9, 4 }
 0x14c   : > { %6848 = vmatmul.mubr.bf16.gmra.mrb[12].mxu0 %v6039_v38  ;;  %v2472_v38 = vsel %vm7452_vm2, %v2467_v47, %v2471_v8  ;;  %v2561_v8 = vrot.slane %v2559_v44, 4  ;;  %v2486_v47 = vsel %vm7452_vm2, %v2481_v56, %v9075_v41  ;;  %v7334_v41 = vld [vmem:[%s7420_s20 + $0xb0] sm:$0x1]  ;;  %v5740_v58 = vcombine.low %v2510_v51, %v2520_v32  ;;  %v7337_v44 = vld [vmem:[%s7420_s20 + $0xc8] sm:$0x1] }
 0x14d   : > { %6624 = vmatmul.mubr.bf16.gmra.mrb[28].mxu1 %v7267_v61  ;;  %6851 = vmatprep.mubr.bf16.mxu0 %v6040_v35  ;;  %v2491_v35 = vrot.slane %v2490_v26, 4  ;;  %v5738_v40 = vcombine.low %v2462_v43, %v2472_v38  ;;  %v2551_v61 = vrot.slane %v2549_v63, 5  ;;  %v2541_v6 = vshll.u32 %v7334_v41, 16 }
 0x14e   : > { %6659 = vmatprep.mubr.bf16.mxu1 %v5736_v45  ;;  %v2557_v45 = vrot.slane %v2555_v29, 5  ;;  %v2573_v26 = vshll.u32 %v5709_v36, 16  ;;  %v2529_v22 = vrot.slane %v2528_v5, 4  ;;  %v2581_v15 = vrot.slane %v2579_v33, 5  ;;  %v9165_v36 = vld [vmem:[%s9241_s2] ss:$0 sm:$0xff] }
 0x14f   : > { %v2496_v12 = vsel %vm7452_vm2, %v2491_v35, %v2495_v1  ;;  %v2552_v10 = vor.u32 %v2551_v61, %v2548_v21  ;;  %v2543_v30 = vrot.slane %v2541_v6, 5  ;;  %v2585_v43 = vrot.slane %v2583_v14, 4 }
 0x150   : > { %v2562_v39 = vor.u32 %v2561_v8, %v2557_v45  ;;  %v5739_v3 = vcombine.low %v2486_v47, %v2496_v12  ;;  %v2575_v52 = vrot.slane %v2573_v26, 5  ;;  %v2534_v31 = vsel %vm7452_vm2, %v2529_v22, %v2533_v17 }
 0x151   : > { %v2553_v38 = vrot.slane %v2552_v10, 4  ;;  %v2586_v29 = vor.u32 %v2585_v43, %v2581_v15  ;;  %v2589_v35 = vshll.u32 %v7337_v44, 16 }
 0x152   : > { %v2563_v56 = vrot.slane %v2562_v39, 4  ;;  %v2576_v20 = vor.u32 %v2575_v52, %v2572_v19 }
 0x153   : > { %v2558_v4 = vsel %vm7452_vm2, %v2553_v38, %v2557_v45  ;;  %v2591_v54 = vrot.slane %v2589_v35, 5 }
 0x154   : > { %6852 = vmatmul.mubr.bf16.gmra.mrb[16].mxu0 %v6041_v62  ;;  %v2538_v62 = vor.u32 %v2537_v24, %v2533_v17  ;;  %v2577_v25 = vrot.slane %v2576_v20, 4 }
 0x155   : > { %6660 = vmatmul.mubr.bf16.vlgmr.msra.gmra.mrb[16].mxu1 %v8900_v50  ;;  %6855 = vmatprep.mubr.bf16.mxu0 %v6042_v59  ;;  %v7336_v50 = vld [vmem:[%s7420_s20 + $0xbc] sm:$0x1] }
 0x156   : > { %6663 = vmatprep.mubr.bf16.mxu1 %v5738_v40  ;;  %v2565_v23 = vshll.u32 %v7336_v50, 16  ;;  %v2539_v59 = vrot.slane %v2538_v62, 4  ;;  %v2582_v13 = vsel %vm7452_vm2, %v2577_v25, %v2581_v15 }
 0x158   : > { %v2567_v1 = vrot.slane %v2565_v23, 5  ;;  %v2544_v63 = vsel %vm7452_vm2, %v2539_v59, %v2543_v30 }
 0x15a   : > { %v2568_v57 = vsel %vm7452_vm2, %v2563_v56, %v2567_v1 }
 0x15b   : > { %v5742_v7 = vcombine.low %v2558_v4, %v2568_v57 }
 0x15c   : > { %6856 = vmatmul.mubr.bf16.gmra.mrb[20].mxu0 %v6043_v53  ;;  %v5741_v53 = vcombine.low %v2534_v31, %v2544_v63 }
 0x15d   : > { %6664 = vmatmul.mubr.bf16.gmra.mrb[20].mxu1 %v5739_v3  ;;  %6859 = vmatprep.mubr.bf16.mxu0 %v6044_v16  ;;  %v2587_v16 = vrot.slane %v2586_v29, 4 }
 0x15e   : > { %6667 = vmatprep.mubr.bf16.mxu1 %v5740_v58 }
 0x15f   : > { %v2592_v60 = vsel %vm7452_vm2, %v2587_v16, %v2591_v54 }
 0x160   : > { %v5743_v0 = vcombine.low %v2582_v13, %v2592_v60 }
 0x164   : > { %6860 = vmatmul.mubr.bf16.gmra.mrb[24].mxu0 %v6045_v2 }
 0x165   : > { %6668 = vmatmul.mubr.bf16.gmra.mrb[24].mxu1 %v5741_v53  ;;  %6863 = vmatprep.mubr.bf16.mxu0 %v6046_v28 }
 0x166   : > { %6671 = vmatprep.mubr.bf16.mxu1 %v5742_v7 }
 0x16c   : > { %6864 = vmatmul.mubr.bf16.gmra.mrb[28].mxu0 %v6047_v48 }
 0x16d   : > { %6672 = vmatmul.mubr.bf16.gmra.mrb[28].mxu1 %v5743_v0 }
 0x1e8   : > { %v6597_v27 = vpop.f32.mrb[0].mxu1 }
 0x1e9   : > { %v2002_v46 = vpop.f32.mrb[1].mxu1 }
 0x1ea   : > { %v6598_v2 = vpop.f32.mrb[2].mxu1 }
 0x1eb   : > { %v2005_v42 = vpop.f32.mrb[3].mxu1 }
 0x1f0   : > { %v6601_v17 = vpop.f32.mrb[4].mxu1 }
 0x1f1   : > { %v2018_v55 = vpop.f32.mrb[5].mxu1 }
 0x1f2   : > { %v6602_v49 = vpop.f32.mrb[6].mxu1 }
 0x1f3   : > { %v2021_v28 = vpop.f32.mrb[7].mxu1 }
 0x1f8   : > { %v6605_v24 = vpop.f32.mrb[8].mxu1 }
 0x1f9   : > { %v9148_v40 = vpop.f32.mrb[9].mxu1 }
 0x1fa   : > { %v9150_v37 = vpop.f32.mrb[10].mxu1 }
 0x1fb   : > { %v9152_v21 = vpop.f32.mrb[11].mxu1 }
 0x200   : > { %v9154_v61 = vpop.f32.mrb[12].mxu1 }
 0x201   : > { %v9156_v34 = vpop.f32.mrb[13].mxu1 }
 0x202   : > { %v9158_v11 = vpop.f32.mrb[14].mxu1 }
 0x203   : > { %v9160_v48 = vpop.f32.mrb[15].mxu1 }
 0x207   : > { %v6837_v45 = vpop.f32.mrb[0].mxu0 }
 0x208   : > { %v6883_v8 = vadd.f32 %v6837_v45, %v6597_v27  ;;  %v4893_v47 = vpop.f32.mrb[1].mxu0 }
 0x209   : > { %v6884_v12 = vadd.f32 %v4893_v47, %v2002_v46  ;;  %v6838_v51 = vpop.f32.mrb[2].mxu0 }
 0x20a   : > { %v6885_v32 = vadd.f32 %v6838_v51, %v6598_v2  ;;  %v4896_v5 = vpop.f32.mrb[3].mxu0  ;;  %v5061_v6 = vadd.f32 %v6883_v8, %v9165_v36 }
 0x20b   : > { %v5059_v62 = vadd.f32 %v6884_v12, %v9165_v36  ;;  %v6886_v41 = vadd.f32 %v4896_v5, %v2005_v42 }
 0x20c   : > { %v5062_v9 = vadd.f32 %v6885_v32, %v9165_v36  ;;  %v5291_v58 = vmul.f32 %v5061_v6, %v5061_v6 }
 0x20d   : > { %v5060_v26 = vadd.f32 %v6886_v41, %v9165_v36  ;;  %v5289_v33 = vmul.f32 %v5059_v62, %v5059_v62 }
 0x20e   : > { %v6132_v18 = vpack.c.bf16 %v5062_v9, %v5061_v6  ;;  %v5292_v52 = vmul.f32 %v5062_v9, %v5062_v9 }
 0x20f   : > { %v6127_v14 = vpack.c.bf16 %v5060_v26, %v5059_v62  ;;  %v5251_v10 = vadd.f32 %v5060_v26, %v5059_v62  ;;  %v5290_v39 = vmul.f32 %v5060_v26, %v5060_v26  ;;  %v6841_v50 = vpop.f32.mrb[4].mxu0 }
 0x210   : > { %6204 = vst [vmem:[%s9174_s8 + $0x8] sm:$0xff] %v6132_v18   ;;  %v6887_v23 = vadd.f32 %v6841_v50, %v6601_v17  ;;  %v4909_v3 = vpop.f32.mrb[5].mxu0 }
 0x211   : > { %6128 = vst [vmem:[%s9174_s8] sm:$0xff] %v6127_v14   ;;  %v5252_v22 = vadd.f32 %v5251_v10, %v5061_v6  ;;  %v5321_v59 = vadd.f32 %v5290_v39, %v5289_v33  ;;  %v6888_v30 = vadd.f32 %v4909_v3, %v2018_v55  ;;  %v6842_v19 = vpop.f32.mrb[6].mxu0 }
 0x212   : > { %v6889_v15 = vadd.f32 %v6842_v19, %v6602_v49  ;;  %v4912_v43 = vpop.f32.mrb[7].mxu0  ;;  %v5065_v63 = vadd.f32 %v6887_v23, %v9165_v36 }
 0x213   : > { %v5322_v38 = vadd.f32 %v5321_v59, %v5291_v58  ;;  %v5063_v56 = vadd.f32 %v6888_v30, %v9165_v36  ;;  %v5253_v1 = vadd.f32 %v5252_v22, %v5062_v9  ;;  %v6890_v31 = vadd.f32 %v4912_v43, %v2021_v28 }
 0x214   : > { %v5066_v20 = vadd.f32 %v6889_v15, %v9165_v36  ;;  %v5295_v0 = vmul.f32 %v5065_v63, %v5065_v63 }
 0x215   : > { %v5254_v29 = vadd.f32 %v5253_v1, %v5063_v56  ;;  %v5293_v44 = vmul.f32 %v5063_v56, %v5063_v56  ;;  %v5323_v35 = vadd.f32 %v5322_v38, %v5292_v52  ;;  %v5064_v4 = vadd.f32 %v6890_v31, %v9165_v36 }
 0x216   : > { %v6142_v57 = vpack.c.bf16 %v5066_v20, %v5065_v63  ;;  %v5296_v17 = vmul.f32 %v5066_v20, %v5066_v20 }
 0x217   : > { %v5324_v53 = vadd.f32 %v5323_v35, %v5293_v44  ;;  %v6137_v7 = vpack.c.bf16 %v5064_v4, %v5063_v56  ;;  %v5255_v25 = vadd.f32 %v5254_v29, %v5064_v4  ;;  %v5294_v16 = vmul.f32 %v5064_v4, %v5064_v4  ;;  %v6845_v54 = vpop.f32.mrb[8].mxu0 }
 0x218   : > { %6206 = vst [vmem:[%s9174_s8 + $0x18] sm:$0xff] %v6142_v57   ;;  %v6891_v13 = vadd.f32 %v6845_v54, %v6605_v24  ;;  %v4925_v60 = vpop.f32.mrb[9].mxu0 }
 0x219   : > { %6205 = vst [vmem:[%s9174_s8 + $0x10] sm:$0xff] %v6137_v7   ;;  %v5256_v27 = vadd.f32 %v5255_v25, %v5065_v63  ;;  %v5325_v46 = vadd.f32 %v5324_v53, %v5294_v16  ;;  %v6892_v2 = vadd.f32 %v4925_v60, %v9148_v40  ;;  %v6846_v42 = vpop.f32.mrb[10].mxu0 }
 0x21a   : > { %v6893_v55 = vadd.f32 %v6846_v42, %v9150_v37  ;;  %v4928_v49 = vpop.f32.mrb[11].mxu0  ;;  %v5069_v24 = vadd.f32 %v6891_v13, %v9165_v36 }
 0x21b   : > { %v5326_v28 = vadd.f32 %v5325_v46, %v5295_v0  ;;  %v5067_v45 = vadd.f32 %v6892_v2, %v9165_v36  ;;  %v5257_v8 = vadd.f32 %v5256_v27, %v5066_v20  ;;  %v6894_v47 = vadd.f32 %v4928_v49, %v9152_v21 }
 0x21c   : > { %v5070_v12 = vadd.f32 %v6893_v55, %v9165_v36  ;;  %v5299_v33 = vmul.f32 %v5069_v24, %v5069_v24 }
 0x21d   : > { %v5258_v51 = vadd.f32 %v5257_v8, %v5067_v45  ;;  %v5297_v32 = vmul.f32 %v5067_v45, %v5067_v45  ;;  %v5327_v40 = vadd.f32 %v5326_v28, %v5296_v17  ;;  %v5068_v5 = vadd.f32 %v6894_v47, %v9165_v36 }
 0x21e   : > { %v6152_v62 = vpack.c.bf16 %v5070_v12, %v5069_v24  ;;  %v5300_v23 = vmul.f32 %v5070_v12, %v5070_v12 }
 0x21f   : > { %v5328_v37 = vadd.f32 %v5327_v40, %v5297_v32  ;;  %v6147_v41 = vpack.c.bf16 %v5068_v5, %v5067_v45  ;;  %v5259_v6 = vadd.f32 %v5258_v51, %v5068_v5  ;;  %v5298_v9 = vmul.f32 %v5068_v5, %v5068_v5  ;;  %v6849_v26 = vpop.f32.mrb[12].mxu0 }
 0x220   : > { %6208 = vst [vmem:[%s9174_s8 + $0x28] sm:$0xff] %v6152_v62   ;;  %v6895_v18 = vadd.f32 %v6849_v26, %v9154_v61  ;;  %v4941_v21 = vpop.f32.mrb[13].mxu0 }
 0x221   : > { %6207 = vst [vmem:[%s9174_s8 + $0x20] sm:$0xff] %v6147_v41   ;;  %v5260_v14 = vadd.f32 %v5259_v6, %v5069_v24  ;;  %v5329_v10 = vadd.f32 %v5328_v37, %v5298_v9  ;;  %v6896_v39 = vadd.f32 %v4941_v21, %v9156_v34  ;;  %v6850_v50 = vpop.f32.mrb[14].mxu0 }
 0x222   : > { %v6897_v3 = vadd.f32 %v6850_v50, %v9158_v11  ;;  %v4944_v58 = vpop.f32.mrb[15].mxu0  ;;  %v5073_v61 = vadd.f32 %v6895_v18, %v9165_v36 }
 0x223   : > { %v5330_v22 = vadd.f32 %v5329_v10, %v5299_v33  ;;  %v5071_v59 = vadd.f32 %v6896_v39, %v9165_v36  ;;  %v5261_v30 = vadd.f32 %v5260_v14, %v5070_v12  ;;  %v6898_v19 = vadd.f32 %v4944_v58, %v9160_v48 }
 0x224   : > { %v5074_v52 = vadd.f32 %v6897_v3, %v9165_v36  ;;  %v5303_v48 = vmul.f32 %v5073_v61, %v5073_v61 }
 0x225   : > { %v5262_v15 = vadd.f32 %v5261_v30, %v5071_v59  ;;  %v5301_v43 = vmul.f32 %v5071_v59, %v5071_v59  ;;  %v5331_v34 = vadd.f32 %v5330_v22, %v5300_v23  ;;  %v5072_v38 = vadd.f32 %v6898_v19, %v9165_v36 }
 0x226   : > { %v6162_v56 = vpack.c.bf16 %v5074_v52, %v5073_v61  ;;  %v5304_v13 = vmul.f32 %v5074_v52, %v5074_v52 }
 0x227   : > { %v5332_v11 = vadd.f32 %v5331_v34, %v5301_v43  ;;  %v6157_v1 = vpack.c.bf16 %v5072_v38, %v5071_v59  ;;  %v5263_v31 = vadd.f32 %v5262_v15, %v5072_v38  ;;  %v5302_v63 = vmul.f32 %v5072_v38, %v5072_v38  ;;  %v6853_v20 = vpop.f32.mrb[16].mxu0 }
 0x228   : > { %6210 = vst [vmem:[%s9174_s8 + $0x38] sm:$0xff] %v6162_v56   ;;  %v6661_v29 = vpop.f32.mrb[16].mxu1  ;;  %v4957_v44 = vpop.f32.mrb[17].mxu0 }
 0x229   : > { %6209 = vst [vmem:[%s9174_s8 + $0x30] sm:$0xff] %v6157_v1   ;;  %v5264_v35 = vadd.f32 %v5263_v31, %v5073_v61  ;;  %v5333_v4 = vadd.f32 %v5332_v11, %v5302_v63  ;;  %v6899_v57 = vadd.f32 %v6853_v20, %v6661_v29  ;;  %v2820_v53 = vpop.f32.mrb[17].mxu1  ;;  %v6854_v7 = vpop.f32.mrb[18].mxu0 }
 0x22a   : > { %v6900_v25 = vadd.f32 %v4957_v44, %v2820_v53  ;;  %v6662_v16 = vpop.f32.mrb[18].mxu1  ;;  %v4960_v54 = vpop.f32.mrb[19].mxu0 }
 0x22b   : > { %v5334_v60 = vadd.f32 %v5333_v4, %v5303_v48  ;;  %v5265_v0 = vadd.f32 %v5264_v35, %v5074_v52  ;;  %v6901_v27 = vadd.f32 %v6854_v7, %v6662_v16  ;;  %v2823_v46 = vpop.f32.mrb[19].mxu1  ;;  %v5077_v17 = vadd.f32 %v6899_v57, %v9165_v36 }
 0x22c   : > { %v5075_v2 = vadd.f32 %v6900_v25, %v9165_v36  ;;  %v6902_v42 = vadd.f32 %v4960_v54, %v2823_v46 }
 0x22d   : > { %v5335_v55 = vadd.f32 %v5334_v60, %v5304_v13  ;;  %v5078_v49 = vadd.f32 %v6901_v27, %v9165_v36  ;;  %v5307_v9 = vmul.f32 %v5077_v17, %v5077_v17 }
 0x22e   : > { %v5266_v28 = vadd.f32 %v5265_v0, %v5075_v2  ;;  %v5305_v45 = vmul.f32 %v5075_v2, %v5075_v2  ;;  %v5076_v8 = vadd.f32 %v6902_v42, %v9165_v36 }
 0x22f   : > { %v6172_v47 = vpack.c.bf16 %v5078_v49, %v5077_v17  ;;  %v6857_v24 = vpop.f32.mrb[20].mxu0  ;;  %v5308_v10 = vmul.f32 %v5078_v49, %v5078_v49 }
 0x230   : > { %v5336_v12 = vadd.f32 %v5335_v55, %v5305_v45  ;;  %v6167_v51 = vpack.c.bf16 %v5076_v8, %v5075_v2  ;;  %v5267_v32 = vadd.f32 %v5266_v28, %v5076_v8  ;;  %v5306_v40 = vmul.f32 %v5076_v8, %v5076_v8  ;;  %v6665_v5 = vpop.f32.mrb[20].mxu1  ;;  %v4973_v62 = vpop.f32.mrb[21].mxu0 }
 0x231   : > { %6212 = vst [vmem:[%s9174_s8 + $0x48] sm:$0xff] %v6172_v47   ;;  %v6903_v37 = vadd.f32 %v6857_v24, %v6665_v5  ;;  %v2836_v41 = vpop.f32.mrb[21].mxu1  ;;  %v6858_v6 = vpop.f32.mrb[22].mxu0 }
 0x232   : > { %6211 = vst [vmem:[%s9174_s8 + $0x40] sm:$0xff] %v6167_v51   ;;  %v5268_v26 = vadd.f32 %v5267_v32, %v5077_v17  ;;  %v5337_v18 = vadd.f32 %v5336_v12, %v5306_v40  ;;  %v6904_v21 = vadd.f32 %v4973_v62, %v2836_v41  ;;  %v6666_v33 = vpop.f32.mrb[22].mxu1  ;;  %v4976_v14 = vpop.f32.mrb[23].mxu0 }
 0x233   : > { %v6905_v39 = vadd.f32 %v6858_v6, %v6666_v33  ;;  %v2839_v50 = vpop.f32.mrb[23].mxu1  ;;  %v5081_v59 = vadd.f32 %v6903_v37, %v9165_v36 }
 0x234   : > { %v5338_v23 = vadd.f32 %v5337_v18, %v5307_v9  ;;  %v5079_v3 = vadd.f32 %v6904_v21, %v9165_v36  ;;  %v5269_v58 = vadd.f32 %v5268_v26, %v5078_v49  ;;  %v6906_v22 = vadd.f32 %v4976_v14, %v2839_v50 }
 0x235   : > { %v5082_v30 = vadd.f32 %v6905_v39, %v9165_v36  ;;  %v5311_v48 = vmul.f32 %v5081_v59, %v5081_v59 }
 0x236   : > { %v5270_v19 = vadd.f32 %v5269_v58, %v5079_v3  ;;  %v5309_v61 = vmul.f32 %v5079_v3, %v5079_v3  ;;  %v5339_v52 = vadd.f32 %v5338_v23, %v5308_v10  ;;  %v5080_v15 = vadd.f32 %v6906_v22, %v9165_v36 }
 0x237   : > { %v6182_v43 = vpack.c.bf16 %v5082_v30, %v5081_v59  ;;  %v6861_v34 = vpop.f32.mrb[24].mxu0  ;;  %v5312_v25 = vmul.f32 %v5082_v30, %v5082_v30 }
 0x238   : > { %v5340_v38 = vadd.f32 %v5339_v52, %v5309_v61  ;;  %v6177_v56 = vpack.c.bf16 %v5080_v15, %v5079_v3  ;;  %v5271_v11 = vadd.f32 %v5270_v19, %v5080_v15  ;;  %v5310_v1 = vmul.f32 %v5080_v15, %v5080_v15  ;;  %v6669_v31 = vpop.f32.mrb[24].mxu1  ;;  %v4989_v63 = vpop.f32.mrb[25].mxu0 }
 0x239   : > { %6214 = vst [vmem:[%s9174_s8 + $0x58] sm:$0xff] %v6182_v43   ;;  %v6907_v20 = vadd.f32 %v6861_v34, %v6669_v31  ;;  %v2852_v29 = vpop.f32.mrb[25].mxu1  ;;  %v6862_v44 = vpop.f32.mrb[26].mxu0 }
 0x23a   : > { %6213 = vst [vmem:[%s9174_s8 + $0x50] sm:$0xff] %v6177_v56   ;;  %v5272_v35 = vadd.f32 %v5271_v11, %v5081_v59  ;;  %v5341_v4 = vadd.f32 %v5340_v38, %v5310_v1  ;;  %v6908_v57 = vadd.f32 %v4989_v63, %v2852_v29  ;;  %v6670_v53 = vpop.f32.mrb[26].mxu1  ;;  %v4992_v7 = vpop.f32.mrb[27].mxu0 }
 0x23b   : > { %v6909_v16 = vadd.f32 %v6862_v44, %v6670_v53  ;;  %v2855_v54 = vpop.f32.mrb[27].mxu1  ;;  %v5085_v46 = vadd.f32 %v6907_v20, %v9165_v36 }
 0x23c   : > { %v5342_v13 = vadd.f32 %v5341_v4, %v5311_v48  ;;  %v5083_v60 = vadd.f32 %v6908_v57, %v9165_v36  ;;  %v5273_v0 = vadd.f32 %v5272_v35, %v5082_v30  ;;  %v6910_v27 = vadd.f32 %v4992_v7, %v2855_v54 }
 0x23d   : > { %v5086_v2 = vadd.f32 %v6909_v16, %v9165_v36  ;;  %v5315_v37 = vmul.f32 %v5085_v46, %v5085_v46 }
 0x23e   : > { %v5274_v42 = vadd.f32 %v5273_v0, %v5083_v60  ;;  %v5313_v17 = vmul.f32 %v5083_v60, %v5083_v60  ;;  %v5343_v55 = vadd.f32 %v5342_v13, %v5312_v25  ;;  %v5084_v49 = vadd.f32 %v6910_v27, %v9165_v36 }
 0x23f   : > { %v6192_v28 = vpack.c.bf16 %v5086_v2, %v5085_v46  ;;  %v6865_v45 = vpop.f32.mrb[28].mxu0  ;;  %v5316_v21 = vmul.f32 %v5086_v2, %v5086_v2 }
 0x240   : > { %v5344_v8 = vadd.f32 %v5343_v55, %v5313_v17  ;;  %v6187_v47 = vpack.c.bf16 %v5084_v49, %v5083_v60  ;;  %v5275_v24 = vadd.f32 %v5274_v42, %v5084_v49  ;;  %v5314_v12 = vmul.f32 %v5084_v49, %v5084_v49  ;;  %v6673_v51 = vpop.f32.mrb[28].mxu1  ;;  %v5005_v32 = vpop.f32.mrb[29].mxu0 }
 0x241   : > { %6216 = vst [vmem:[%s9174_s8 + $0x68] sm:$0xff] %v6192_v28   ;;  %v6911_v40 = vadd.f32 %v6865_v45, %v6673_v51  ;;  %v2868_v5 = vpop.f32.mrb[29].mxu1  ;;  %v6866_v62 = vpop.f32.mrb[30].mxu0 }
 0x242   : > { %6215 = vst [vmem:[%s9174_s8 + $0x60] sm:$0xff] %v6187_v47   ;;  %v5276_v41 = vadd.f32 %v5275_v24, %v5085_v46  ;;  %v5345_v6 = vadd.f32 %v5344_v8, %v5314_v12  ;;  %v6912_v9 = vadd.f32 %v5005_v32, %v2868_v5  ;;  %v6674_v26 = vpop.f32.mrb[30].mxu1  ;;  %v5008_v18 = vpop.f32.mrb[31].mxu0 }
 0x243   : > { %v6913_v33 = vadd.f32 %v6866_v62, %v6674_v26  ;;  %v2871_v14 = vpop.f32.mrb[31].mxu1  ;;  %v5089_v3 = vadd.f32 %v6911_v40, %v9165_v36 }
 0x244   : > { %v5346_v10 = vadd.f32 %v5345_v6, %v5315_v37  ;;  %v5087_v39 = vadd.f32 %v6912_v9, %v9165_v36  ;;  %v5277_v50 = vadd.f32 %v5276_v41, %v5086_v2  ;;  %v6914_v23 = vadd.f32 %v5008_v18, %v2871_v14 }
 0x245   : > { %v5090_v58 = vadd.f32 %v6913_v33, %v9165_v36  ;;  %v5319_v38 = vmul.f32 %v5089_v3, %v5089_v3 }
 0x246   : > { %v5278_v22 = vadd.f32 %v5277_v50, %v5087_v39  ;;  %v5317_v59 = vmul.f32 %v5087_v39, %v5087_v39  ;;  %v5347_v30 = vadd.f32 %v5346_v10, %v5316_v21  ;;  %v5088_v19 = vadd.f32 %v6914_v23, %v9165_v36 }
 0x247   : > { %v6202_v61 = vpack.c.bf16 %v5090_v58, %v5089_v3  ;;  %v5320_v1 = vmul.f32 %v5090_v58, %v5090_v58 }
 0x248   : > { %v5348_v52 = vadd.f32 %v5347_v30, %v5317_v59  ;;  %v6197_v15 = vpack.c.bf16 %v5088_v19, %v5087_v39  ;;  %v5279_v43 = vadd.f32 %v5278_v22, %v5088_v19  ;;  %v5318_v34 = vmul.f32 %v5088_v19, %v5088_v19 }
 0x249   : > { %6218 = vst [vmem:[%s9174_s8 + $0x78] sm:$0xff] %v6202_v61  }
 0x24a   : > { %6217 = vst [vmem:[%s9174_s8 + $0x70] sm:$0xff] %v6197_v15   ;;  %v5280_v56 = vadd.f32 %v5279_v43, %v5089_v3  ;;  %v5349_v11 = vadd.f32 %v5348_v52, %v5318_v34 }
 0x24c   : > { %v5281_v31 = vadd.f32 %v5280_v56, %v5090_v58  ;;  %v5350_v63 = vadd.f32 %v5349_v11, %v5319_v38 }
 0x24e   : > { %v5282_v20 = vrot.slane %v5281_v31, 4  ;;  %v5351_v29 = vadd.f32 %v5350_v63, %v5320_v1 }
 0x250   : > { %v5283_v44 = vadd.f32 %v5282_v20, %v5281_v31  ;;  %v5352_v48 = vrot.slane %v5351_v29, 4 }
 0x252   : > { %v5284_v36 = vrot.slane %v5283_v44, 2  ;;  %v5353_v35 = vadd.f32 %v5352_v48, %v5351_v29 }
 0x254   : > { %v5285_v4 = vadd.f32 %v5284_v36, %v5283_v44  ;;  %v5354_v57 = vrot.slane %v5353_v35, 2 }
 0x256   : > { %v5286_v53 = vrot.slane %v5285_v4, 1  ;;  %v5355_v7 = vadd.f32 %v5354_v57, %v5353_v35 }
 0x258   : > { %v5287_v25 = vadd.f32 %v5286_v53, %v5285_v4  ;;  %v5356_v16 = vrot.slane %v5355_v7, 1 }
 0x25a   : > { %5288 = vst [vmem:[%s238_s11] sm:$0x1] %v5287_v25  ;;  %v5357_v54 = vadd.f32 %v5356_v16, %v5355_v7 }
 0x25c   : > { %5358 = vst [vmem:[%s241_s14] sm:$0x1] %v5357_v54 }
 0x25d PF: > { %s16_s18 = sadd.s32 1, %s7344_s18  }
 0x25e   : > { %p13_p4 = scmp.ge.s32.totalorder %s16_s18, 4  }
 0x260   :  { %15 = sbr.rel (!%p13_p4) target bundleno = 1 (0x1), region = 96 }

// kernel: conv_block_forward.4
= control target key start
LH: loop header
LB: loop body
LE: loop exit
PB: predicated region body
PF: predicated region fallthrough
CT: control target
= control target key end

     0   :  { %s8785_s27 = smov 0   ;;  %s11027_s0 = inlined_call_operand.vmem [shape: bf16[2,18,18,128], index: 0, kind: input, shape index: {}]   ;;  %s11028_s1 = inlined_call_operand.vmem [shape: f32[1,128], index: 1, kind: input, shape index: {}]   ;;  %s11029_s2 = inlined_call_operand.vmem [shape: f32[1,128], index: 2, kind: input, shape index: {}]   ;;  %s11030_s3 = inlined_call_operand.vmem [shape: f32[2,1,128], index: 3, kind: input, shape index: {}]   ;;  %s11031_s4 = inlined_call_operand.vmem [shape: bf16[3,3,128,128], index: 4, kind: input, shape index: {}]   ;;  %s11032_s5 = inlined_call_operand.vmem [shape: f32[1,128], index: 5, kind: input, shape index: {}]   ;;  %s11033_s6 = inlined_call_operand.vmem [shape: bf16[2,256,128], index: 6, kind: output, shape index: {0}]   ;;  %s11034_s7 = inlined_call_operand.vmem [shape: f32[2,1,128], index: 7, kind: output, shape index: {1}]   ;;  %s11035_s8 = inlined_call_operand.vmem [shape: f32[2,1,128], index: 8, kind: output, shape index: {2}]  }
   0x1 LB: > { %s6601_s28 = sadd.s32 4294967295, %s8737_s27   ;;  %p6605_p0 = scmp.ge.s32.totalorder %s8737_s27, 1  ;;  %s8737_s27 = sphi %s8785_s27, %s19_s27  }
   0x2   : > { %p275_p1 = scmp.lt.s32.totalorder %s8737_s27, 3 }
   0x4   : > { %p276_p2 = pnand %p6605_p0, %p275_p1 }
   0x6   : > { %279 = sbr.rel (%p276_p2) target bundleno = 756 (0x2f4), region = 44 }
   0xd   : > { %v8341_v0 = vld [vmem:[%s11031_s4 + $0x40] sm:$0xff]   ;;  %v8739_v2 = vmov 0.0|0.0   ;;  %v8343_v5 = vld [vmem:[%s11031_s4 + $0x48] sm:$0xff]   ;;  %v8345_v7 = vld [vmem:[%s11031_s4 + $0x50] sm:$0xff]   ;;  %p318_p3 = scmp.lt.s32.totalorder %s6601_s28, 1  ;;  %v1007_v13 = vlaneseq  ;;  %vm2465_vm5 = vcmask 1042432  }
   0xe   : > { %v8342_v1 = vld [vmem:[%s11031_s4 + $0x100] sm:$0xff]   ;;  %v6666_v3 = vcombine.low %v8739_v2, %v8739_v2  ;;  %v6667_v4 = vcombine.high %v8739_v2, %v8739_v2  ;;  %7627 = vmatprep.subr.bf16.mxu1 %v8341_v0  ;;  %v8344_v6 = vld [vmem:[%s11031_s4 + $0x108] sm:$0xff]   ;;  %v8346_v8 = vld [vmem:[%s11031_s4 + $0x110] sm:$0xff]   ;;  %vm1435_vm0 = vsmask.f32 3328  ;;  %vm2466_vm6 = vcmask 1046532  }
   0xf   : > { %7819 = vmatprep.subr.bf16.mxu0 %v8342_v1  ;;  %7628 = vmatpush3.bf16.msra.mxu1 %v8341_v0  ;;  %v8347_v9 = vld [vmem:[%s11031_s4 + $0x58] sm:$0xff]   ;;  %s11128_s28 = smov (!%p318_p3, %s6601_s28), 1  ;;  %v8349_v11 = vld [vmem:[%s11031_s4 + $0x60] sm:$0xff]   ;;  %v8351_v14 = vld [vmem:[%s11031_s4 + $0x68] sm:$0xff]   ;;  %v8841_v21 = vshrl.u32 %v1007_v13, 7 }
  0x10   : > { %1317 = vst [vmem:[#allocation2] sm:$0xf] %v6666_v3  ;;  %1318 = vst [vmem:[#allocation2 + $0x4] sm:$0xf] %v6667_v4  ;;  %7820 = vmatpush3.bf16.msra.mxu0 %v8342_v1  ;;  %7629 = vmatprep.subr.bf16.mxu1 %v8343_v5  ;;  %v8348_v10 = vld [vmem:[%s11031_s4 + $0x118] sm:$0xff]   ;;  %v8350_v12 = vld [vmem:[%s11031_s4 + $0x120] sm:$0xff]   ;;  %s9002_s13 = scalar_lea.vmem %s11030_s3, %s11128_s28  ;;  %s333_s21 = scalar_lea.vmem %s11034_s7, %s11128_s28 }
  0x11   : > { %1319 = vst [vmem:[#allocation2 + $0x8] sm:$0x1] %v6666_v3  ;;  %1368 = vst [vmem:[#allocation2 + $0xcc] sm:$0xf] %v6666_v3  ;;  %7821 = vmatprep.subr.bf16.mxu0 %v8344_v6  ;;  %s8331_s29 = smul.u32 216, %s11128_s28  ;;  %v8352_v18 = vld [vmem:[%s11031_s4 + $0x128] sm:$0xff]   ;;  %s336_s24 = scalar_lea.vmem %s11035_s8, %s11128_s28 }
  0x12   : > { %1369 = vst [vmem:[#allocation2 + $0xd0] sm:$0xf] %v6667_v4  ;;  %1370 = vst [vmem:[#allocation2 + $0xd4] sm:$0x1] %v6666_v3  ;;  %v8353_v22 = vld [vmem:[%s11031_s4 + $0x70] sm:$0xff]   ;;  %v8868_v42 = vadd.s32 16, %v8841_v21 }
  0x13   : > { %7630 = vmatpush3.bf16.msra.mxu1 %v8343_v5  ;;  %s8839_s14 = scalar_lea.vmem %s11027_s0, %s8331_s29  ;;  %vm1436_vm1 = vsmask.f32 7440  ;;  %v8849_v28 = vld [vmem:[%s11028_s1] ss:$0 sm:$0xff]  ;;  %v8354_v29 = vld [vmem:[%s11031_s4 + $0x130] sm:$0xff]   ;;  %v8355_v49 = vld [vmem:[%s11031_s4 + $0x78] sm:$0xff]  }
  0x14   : > { %7822 = vmatpush3.bf16.msra.mxu0 %v8344_v6  ;;  %7631 = vmatprep.subr.bf16.mxu1 %v8345_v7  ;;  %v344_v32 = vld [vmem:[%s8839_s14 + $0xc] sm:$0xff]   ;;  %v346_v33 = vld [vmem:[%s8839_s14 + $0x14] sm:$0x1]  ;;  %v8859_v35 = vld [vmem:[%s11029_s2] ss:$0 sm:$0xff]  ;;  %vm1011_vm3 = vcmp.ge.s32.totalorder %v8841_v21, 1 }
  0x15   : > { %7823 = vmatprep.subr.bf16.mxu0 %v8346_v8  ;;  %v398_v36 = vunpack.c.l.bf16 %v344_v32  ;;  %v399_v37 = vunpack.c.h.bf16 %v344_v32  ;;  %v400_v38 = vunpack.c.l.bf16 %v346_v33  ;;  %vm8863_vm2 = vmor %vm1435_vm0, %vm1436_vm1  ;;  %v7380_v47 = vld [vmem:[%s8839_s14 + $0x18] sm:$0xff]   ;;  %v349_v48 = vld [vmem:[%s8839_s14 + $0x20] sm:$0x1]  ;;  %vm1022_vm4 = vcmp.le.s32.totalorder %v8868_v42, 16 }
  0x16   : > { %v8356_v50 = vld [vmem:[%s11031_s4 + $0x138] sm:$0xff]   ;;  %v7230_v52 = vunpack.c.l.bf16 %v7380_v47  ;;  %v7231_v53 = vunpack.c.h.bf16 %v7380_v47  ;;  %v403_v54 = vunpack.c.l.bf16 %v349_v48  ;;  %v350_v59 = vld [vmem:[%s8839_s14 + $0x24] sm:$0xff]   ;;  %v352_v0 = vld [vmem:[%s8839_s14 + $0x2c] sm:$0x1] }
  0x17   : > { %7632 = vmatpush3.bf16.msra.mxu1 %v8345_v7  ;;  %v1371_v15 = vld [vmem:[#allocation2] sm:$0xf]  ;;  %v1372_v16 = vld [vmem:[#allocation2 + $0x4] sm:$0xf]  ;;  %v458_v44 = vmul.f32 %v8849_v28, %v398_v36  ;;  %v459_v45 = vmul.f32 %v8849_v28, %v399_v37  ;;  %v460_v46 = vmul.f32 %v8849_v28, %v400_v38  ;;  %v406_v13 = vunpack.c.l.bf16 %v352_v0  ;;  %v7382_v36 = vld [vmem:[%s8839_s14 + $0x48] sm:$0xff]  }
  0x18   : > { %7824 = vmatpush3.bf16.msra.mxu0 %v8346_v8  ;;  %7633 = vmatprep.subr.bf16.mxu1 %v8347_v9  ;;  %v1419_v17 = vld [vmem:[#allocation2 + $0x8] sm:$0x1]  ;;  %v1439_v19 = vshrl.u32 %v1371_v15, 16  ;;  %v1442_v20 = vshll.u32 %v1371_v15, 16  ;;  %v1448_v23 = vshll.u32 %v1372_v16, 16  ;;  %v1452_v24 = vshrl.u32 %v1372_v16, 16  ;;  %vm9376_vm7 = vmor %vm2465_vm5, %vm2466_vm6 }
  0x19   : > { %7825 = vmatprep.subr.bf16.mxu0 %v8348_v10  ;;  %v1458_v25 = vshll.u32 %v1419_v17, 16  ;;  %v8884_v56 = vadd.f32 %v8859_v35, %v458_v44  ;;  %v8887_v57 = vadd.f32 %v8859_v35, %v459_v45  ;;  %v8890_v58 = vadd.f32 %v8859_v35, %v460_v46  ;;  %v8905_v5 = vld [vmem:[%s11031_s4] sm:$0xff]   ;;  %v355_v15 = vld [vmem:[%s8839_s14 + $0x38] sm:$0x1]  ;;  %v8407_v21 = vld [vmem:[%s11031_s4 + $0xb0] sm:$0xff]  }
  0x1a   : > { %v1441_v26 = vrot.slane %v1439_v19, 4  ;;  %v1444_v27 = vrot.slane %v1442_v20, 5  ;;  %v1450_v30 = vrot.slane %v1448_v23, 5  ;;  %v1454_v31 = vrot.slane %v1452_v24, 4  ;;  %v8910_v6 = vld [vmem:[%s11031_s4 + $0x140] sm:$0xff]  }
  0x1b   : > { %7634 = vmatpush3.bf16.msra.mxu1 %v8347_v9  ;;  %v1460_v41 = vrot.slane %v1458_v25, 5  ;;  %v461_v61 = vmul.f32 %v7230_v52, %v8849_v28  ;;  %v462_v62 = vmul.f32 %v7231_v53, %v8849_v28  ;;  %v463_v63 = vmul.f32 %v8849_v28, %v403_v54 }
  0x1c   : > { %7826 = vmatpush3.bf16.msra.mxu0 %v8348_v10  ;;  %7635 = vmatprep.subr.bf16.mxu1 %v8349_v11  ;;  %v1445_v34 = vor.u32 %v1444_v27, %v1441_v26  ;;  %v1455_v40 = vor.u32 %v1454_v31, %v1450_v30  ;;  %v6614_v2 = vmul.f32 -1.442695, %v8884_v56  ;;  %v6615_v3 = vmul.f32 -1.442695, %v8887_v57  ;;  %v356_v26 = vld [vmem:[%s8839_s14 + $0x3c] sm:$0xff]  }
  0x1d   : > { %7827 = vmatprep.subr.bf16.mxu0 %v8350_v12  ;;  %v6616_v4 = vmul.f32 -1.442695, %v8890_v58  ;;  %v8913_v7 = vadd.f32 %v8859_v35, %v461_v61  ;;  %v8916_v8 = vadd.f32 %v8859_v35, %v462_v62  ;;  %v8919_v9 = vadd.f32 %v8859_v35, %v463_v63  ;;  %v358_v31 = vld [vmem:[%s8839_s14 + $0x44] sm:$0x1] }
  0x1e   : > { %v1446_v43 = vrot.slane %v1445_v34, 4  ;;  %v1456_v51 = vrot.slane %v1455_v40, 4  ;;  %v404_v10 = vunpack.c.l.bf16 %v350_v59  ;;  %8461 = vpow2.f32 %v6614_v2 }
  0x1f   : > { %7636 = vmatpush3.bf16.msra.mxu1 %v8349_v11  ;;  %v7381_v11 = vld [vmem:[%s8839_s14 + $0x30] sm:$0xff]   ;;  %8463 = vpow2.f32 %v6615_v3  ;;  %v6617_v16 = vmul.f32 -1.442695, %v8913_v7  ;;  %v6618_v17 = vmul.f32 -1.442695, %v8916_v8  ;;  %v409_v24 = vunpack.c.l.bf16 %v355_v15 }
  0x20   : > { %7828 = vmatpush3.bf16.msra.mxu0 %v8350_v12  ;;  %7637 = vmatprep.subr.bf16.mxu1 %v8351_v14  ;;  %v1451_v55 = vsel %vm8863_vm2, %v1446_v43, %v1450_v30  ;;  %v1461_v60 = vsel %vm8863_vm2, %v1456_v51, %v1460_v41  ;;  %v405_v12 = vunpack.c.h.bf16 %v350_v59  ;;  %8465 = vpow2.f32 %v6616_v4  ;;  %v364_v15 = vld [vmem:[%s8839_s14 + $0x5c] sm:$0x1] }
  0x21   : > { %7829 = vmatprep.subr.bf16.mxu0 %v8352_v18  ;;  %v6736_v1 = vcombine.low %v1451_v55, %v1461_v60  ;;  %v464_v19 = vmul.f32 %v8849_v28, %v404_v10  ;;  %8467 = vpow2.f32 %v6617_v16  ;;  %v7235_v23 = vunpack.c.h.bf16 %v7381_v11 }
  0x22   : > { %v465_v20 = vmul.f32 %v8849_v28, %v405_v12  ;;  %8469 = vpow2.f32 %v6618_v17  ;;  %v469_v33 = vmul.f32 %v8849_v28, %v409_v24  ;;  %v410_v41 = vunpack.c.l.bf16 %v356_v26 }
  0x23   : > { %7638 = vmatpush3.bf16.msra.mxu1 %v8351_v14  ;;  %7643 = vmatprep.mubr.bf16.mxu1 %v6736_v1  ;;  %v7234_v14 = vunpack.c.l.bf16 %v7381_v11  ;;  %v8934_v27 = vadd.f32 %v8859_v35, %v464_v19  ;;  %v468_v32 = vmul.f32 %v7235_v23, %v8849_v28  ;;  %v411_v46 = vunpack.c.h.bf16 %v356_v26 }
  0x24   : > { %7830 = vmatpush3.bf16.msra.mxu0 %v8352_v18  ;;  %7639 = vmatprep.subr.bf16.mxu1 %v8353_v22  ;;  %v6619_v18 = vmul.f32 -1.442695, %v8919_v9  ;;  %v8956_v44 = vadd.f32 %v8859_v35, %v469_v33  ;;  %v412_v47 = vunpack.c.l.bf16 %v358_v31  ;;  %v470_v48 = vmul.f32 %v8849_v28, %v410_v41 }
  0x25   : > { %7831 = vmatprep.subr.bf16.mxu0 %v8354_v29  ;;  %v467_v25 = vmul.f32 %v7234_v14, %v8849_v28  ;;  %v6620_v37 = vmul.f32 -1.442695, %v8934_v27  ;;  %v8953_v43 = vadd.f32 %v8859_v35, %v468_v32  ;;  %v471_v53 = vmul.f32 %v8849_v28, %v411_v46  ;;  %v362_v14 = vld [vmem:[%s8839_s14 + $0x54] sm:$0xff]  }
  0x26   : > { %8471 = vpow2.f32 %v6619_v18  ;;  %v6625_v52 = vmul.f32 -1.442695, %v8956_v44  ;;  %v472_v55 = vmul.f32 %v8849_v28, %v412_v47  ;;  %v8966_v59 = vadd.f32 %v8859_v35, %v470_v48 }
  0x27   : > { %7640 = vmatpush3.bf16.msra.mxu1 %v8353_v22  ;;  %v466_v22 = vmul.f32 %v8849_v28, %v406_v13  ;;  %v8946_v34 = vadd.f32 %v8859_v35, %v467_v25  ;;  %8473 = vpow2.f32 %v6620_v37  ;;  %v6624_v51 = vmul.f32 -1.442695, %v8953_v43  ;;  %v7383_v37 = vld [vmem:[%s8839_s14 + $0x60] sm:$0xff]  }
  0x28   : > { %7832 = vmatpush3.bf16.msra.mxu0 %v8354_v29  ;;  %7641 = vmatprep.subr.bf16.mxu1 %v8355_v49  ;;  %v8937_v29 = vadd.f32 %v8859_v35, %v465_v20  ;;  %v8462_v54 = vpop.eup %8461  ;;  %v7239_v60 = vunpack.c.h.bf16 %v7382_v36  ;;  %v8969_v63 = vadd.f32 %v8859_v35, %v471_v53  ;;  %v8972_v3 = vadd.f32 %v8859_v35, %v472_v55  ;;  %v367_v55 = vld [vmem:[%s8839_s14 + $0x68] sm:$0x1] }
  0x29   : > { %7833 = vmatprep.subr.bf16.mxu0 %v8356_v50  ;;  %v8940_v30 = vadd.f32 %v8859_v35, %v466_v22  ;;  %v6623_v45 = vmul.f32 -1.442695, %v8946_v34  ;;  %v8464_v61 = vpop.eup %8463  ;;  %v734_v62 = vadd.f32 1.0, %v8462_v54  ;;  %v6626_v4 = vmul.f32 -1.442695, %v8966_v59 }
  0x2a   : > { %v6621_v38 = vmul.f32 -1.442695, %v8937_v29  ;;  %v8466_v1 = vpop.eup %8465  ;;  %v735_v2 = vadd.f32 1.0, %v8464_v61  ;;  %v8976_v12 = vmul.f32 -1.442695, %v8969_v63  ;;  %v474_v19 = vmul.f32 %v7239_v60, %v8849_v28 }
  0x2b   : > { %7642 = vmatpush3.bf16.msra.mxu1 %v8355_v49  ;;  %v6622_v40 = vmul.f32 -1.442695, %v8940_v30  ;;  %v7238_v49 = vunpack.c.l.bf16 %v7382_v36  ;;  %v8468_v10 = vpop.eup %8467  ;;  %v736_v11 = vadd.f32 1.0, %v8466_v1  ;;  %v8982_v18 = vmul.f32 -1.442695, %v8972_v3 }
  0x2c   : > { %7834 = vmatpush3.bf16.msra.mxu0 %v8356_v50  ;;  %7675 = vmatprep.subr.bf16.mxu1 %v8905_v5  ;;  %v361_v50 = vld [vmem:[%s8839_s14 + $0x50] sm:$0x1]  ;;  %8475 = vpow2.f32 %v6621_v38  ;;  %v8470_v16 = vpop.eup %8469  ;;  %v737_v17 = vadd.f32 1.0, %v8468_v10  ;;  %v8990_v26 = vadd.f32 %v8859_v35, %v474_v19  ;;  %v416_v31 = vunpack.c.l.bf16 %v362_v14  ;;  %v9019_v61 = vld [vmem:[%s9002_s13] ss:$0 sm:$0xff] }
  0x2d   : > { %7867 = vmatprep.subr.bf16.mxu0 %v8910_v6  ;;  %8477 = vpow2.f32 %v6622_v40  ;;  %v415_v0 = vunpack.c.l.bf16 %v361_v50  ;;  %v473_v13 = vmul.f32 %v7238_v49, %v8849_v28  ;;  %v738_v22 = vadd.f32 1.0, %v8470_v16 }
  0x2e   : > { %8479 = vpow2.f32 %v6623_v45  ;;  %v417_v36 = vunpack.c.h.bf16 %v362_v14  ;;  %v9005_v40 = vmul.f32 -1.442695, %v8990_v26  ;;  %v418_v41 = vunpack.c.l.bf16 %v364_v15 }
  0x2f   : > { %8481 = vpow2.f32 %v6624_v51  ;;  %v475_v23 = vmul.f32 %v8849_v28, %v415_v0  ;;  %v8987_v24 = vadd.f32 %v8859_v35, %v473_v13  ;;  %v476_v45 = vmul.f32 %v8849_v28, %v416_v31 }
  0x30   : > { %8483 = vrcp.f32 %v734_v62  ;;  %v8472_v20 = vpop.eup %8471  ;;  %v477_v49 = vmul.f32 %v8849_v28, %v417_v36  ;;  %v478_v53 = vmul.f32 %v8849_v28, %v418_v41  ;;  %v7242_v0 = vunpack.c.l.bf16 %v7383_v37 }
  0x31   : > { %8485 = vrcp.f32 %v735_v2  ;;  %v739_v25 = vadd.f32 1.0, %v8472_v20  ;;  %v8994_v32 = vadd.f32 %v8859_v35, %v475_v23  ;;  %v6629_v33 = vmul.f32 -1.442695, %v8987_v24  ;;  %v8474_v38 = vpop.eup %8473 }
  0x32   : > { %8487 = vrcp.f32 %v736_v11  ;;  %v740_v47 = vadd.f32 1.0, %v8474_v38  ;;  %v9015_v54 = vadd.f32 %v8859_v35, %v476_v45  ;;  %v7243_v15 = vunpack.c.h.bf16 %v7383_v37 }
  0x33   : > { %8489 = vrcp.f32 %v737_v17  ;;  %v9010_v48 = vmul.f32 -1.442695, %v8994_v32  ;;  %v421_v20 = vunpack.c.l.bf16 %v367_v55 }
  0x34   : > { %8491 = vrcp.f32 %v738_v22  ;;  %v9028_v10 = vmul.f32 -1.442695, %v9015_v54  ;;  %v480_v31 = vmul.f32 %v7243_v15, %v8849_v28 }
  0x35   : > { %8493 = vrcp.f32 %v739_v25  ;;  %v479_v25 = vmul.f32 %v7242_v0, %v8849_v28 }
  0x36   : > { %v8476_v46 = vpop.eup %8475  ;;  %8495 = vpow2.f32 %v6625_v52  ;;  %v9022_v52 = vadd.f32 %v8859_v35, %v477_v49 }
  0x37   : > { %v8478_v50 = vpop.eup %8477  ;;  %v741_v51 = vadd.f32 1.0, %v8476_v46  ;;  %8497 = vpow2.f32 %v6626_v4  ;;  %v9025_v4 = vadd.f32 %v8859_v35, %v478_v53 }
  0x38   : > { %v8480_v60 = vpop.eup %8479  ;;  %v742_v62 = vadd.f32 1.0, %v8478_v50  ;;  %8499 = vrcp.f32 %v740_v47  ;;  %v9031_v14 = vmul.f32 -1.442695, %v9022_v52 }
  0x39   : > { %v8482_v1 = vpop.eup %8481  ;;  %8501 = vrcp.f32 %v741_v51  ;;  %v743_v2 = vadd.f32 1.0, %v8480_v60  ;;  %v9035_v19 = vmul.f32 -1.442695, %v9025_v4 }
  0x3a   : > { %v8484_v11 = vpop.eup %8483  ;;  %8503 = vrcp.f32 %v742_v62  ;;  %v744_v13 = vadd.f32 1.0, %v8482_v1 }
  0x3b   : > { %v8486_v16 = vpop.eup %8485  ;;  %v896_v17 = vmul.f32 %v8484_v11, %v8884_v56  ;;  %8505 = vrcp.f32 %v743_v2  ;;  %v481_v56 = vmul.f32 %v8849_v28, %v421_v20 }
  0x3c   : > { %v8488_v22 = vpop.eup %8487  ;;  %v897_v23 = vmul.f32 %v8486_v16, %v8887_v57  ;;  %8507 = vrcp.f32 %v744_v13  ;;  %v9048_v57 = vadd.f32 %v8859_v35, %v479_v25 }
  0x3d   : > { %v8490_v36 = vpop.eup %8489  ;;  %v898_v38 = vmul.f32 %v8488_v22, %v8890_v58  ;;  %v956_v37 = vadd.f32 %v9019_v61, %v896_v17  ;;  %8509 = vpow2.f32 %v8976_v12  ;;  %v9068_v17 = vadd.f32 %v8859_v35, %v480_v31 }
  0x3e   : > { %v8492_v41 = vpop.eup %8491  ;;  %v957_v45 = vadd.f32 %v9019_v61, %v897_v23  ;;  %v899_v46 = vmul.f32 %v8490_v36, %v8913_v7  ;;  %8511 = vpow2.f32 %v8982_v18  ;;  %11053 = vst [vmem:[#allocation3_spill] sm:$0xff] %v9048_v57  ;;  %v9076_v36 = vld [vmem:[%s8839_s14 + $0x6c] sm:$0xff]   ;;  %v9082_v31 = vmul.f32 -1.442695, %v9048_v57 }
  0x3f   : > { %v8494_v47 = vpop.eup %8493  ;;  %v958_v49 = vadd.f32 %v9019_v61, %v898_v38  ;;  %v1032_v58 = vsel %vm1011_vm3, %v956_v37, 0.0  ;;  %v900_v12 = vmul.f32 %v8492_v41, %v8916_v8  ;;  %8513 = vpow2.f32 %v6629_v33 }
  0x40   : > { %v8496_v28 = vpop.eup %8495  ;;  %v7148_v50 = vpack.c.bf16 %v1032_v58, %v1032_v58  ;;  %v7149_v51 = vpack.c.bf16 %v957_v45, %v957_v45  ;;  %v901_v53 = vmul.f32 %v8494_v47, %v8919_v9  ;;  %v959_v7 = vadd.f32 %v9019_v61, %v899_v46 }
  0x41   : > { %v8498_v18 = vpop.eup %8497  ;;  %v1034_v55 = vsel %vm1022_vm4, %v958_v49, 0.0  ;;  %v960_v60 = vadd.f32 %v9019_v61, %v900_v12  ;;  %v745_v62 = vadd.f32 1.0, %v8496_v28  ;;  %8515 = vpow2.f32 %v9005_v40 }
  0x42   : > { %v8500_v0 = vpop.eup %8499  ;;  %v7150_v1 = vpack.c.bf16 %v1034_v55, %v1034_v55  ;;  %1320 = vst [vmem:[#allocation2 + $0xc] sm:$0xf] %v7148_v50  ;;  %1321 = vst [vmem:[#allocation2 + $0x10] sm:$0xf] %v7149_v51  ;;  %v961_v8 = vadd.f32 %v9019_v61, %v901_v53  ;;  %v1035_v9 = vsel %vm1011_vm3, %v959_v7, 0.0  ;;  %v746_v33 = vadd.f32 1.0, %v8498_v18 }
  0x43   : > { %v8502_v2 = vpop.eup %8501  ;;  %v7263_v11 = vpack.c.bf16 %v960_v60, %v1035_v9  ;;  %v902_v13 = vmul.f32 %v8500_v0, %v8934_v27  ;;  %8517 = vrcp.f32 %v745_v62  ;;  %v9073_v27 = vadd.f32 %v8859_v35, %v481_v56 }
  0x44   : > { %v8504_v15 = vpop.eup %8503  ;;  %1322 = vst [vmem:[#allocation2 + $0x14] sm:$0x1] %v7150_v1  ;;  %v1037_v40 = vsel %vm1022_vm4, %v961_v8, 0.0  ;;  %v903_v16 = vmul.f32 %v8502_v2, %v8937_v29  ;;  %8519 = vrcp.f32 %v746_v33 }
  0x45   : > { %v8506_v20 = vpop.eup %8505  ;;  %v7153_v22 = vpack.c.bf16 %v1037_v40, %v1037_v40  ;;  %7388 = vst [vmem:[#allocation2 + $0x18] sm:$0xff] %v7263_v11   ;;  %v904_v23 = vmul.f32 %v8504_v15, %v8940_v30  ;;  %v962_v25 = vadd.f32 %v9019_v61, %v902_v13  ;;  %8521 = vpow2.f32 %v9010_v48 }
  0x46   : > { %v8508_v38 = vpop.eup %8507  ;;  %v963_v37 = vadd.f32 %v9019_v61, %v903_v16  ;;  %v905_v29 = vmul.f32 %v8506_v20, %v8946_v34  ;;  %8523 = vpow2.f32 %v9028_v10 }
  0x47   : > { %v8510_v41 = vpop.eup %8509  ;;  %1325 = vst [vmem:[#allocation2 + $0x20] sm:$0x1] %v7153_v22  ;;  %v9085_v30 = vadd.f32 %v9019_v61, %v904_v23  ;;  %v1038_v35 = vsel %vm1011_vm3, %v962_v25, 0.0  ;;  %v906_v56 = vmul.f32 %v8508_v38, %v8953_v43  ;;  %8525 = vpow2.f32 %v9031_v14  ;;  %v9105_v14 = vld [vmem:[%s8839_s14 + $0x74] sm:$0x1] }
  0x48   : > { %v9091_v45 = vpop.eup %8511  ;;  %v7154_v34 = vpack.c.bf16 %v1038_v35, %v1038_v35  ;;  %v7155_v46 = vpack.c.bf16 %v963_v37, %v963_v37  ;;  %v747_v48 = vadd.f32 1.0, %v8510_v41  ;;  %v9097_v28 = vadd.f32 %v9019_v61, %v905_v29 }
  0x49   : > { %v9094_v47 = vpop.eup %8513  ;;  %v1373_v49 = vld [vmem:[#allocation2 + $0xc] sm:$0xf]  ;;  %v1374_v58 = vld [vmem:[#allocation2 + $0x10] sm:$0xf]  ;;  %v9100_v43 = vadd.f32 %v9019_v61, %v906_v56  ;;  %8527 = vpow2.f32 %v9035_v19 }
  0x4a   : > { %v3289_v12 = vld [vmem:[#allocation2 + $0xc] sm:$0xf]  ;;  %v1463_v50 = vshrl.u32 %v1373_v49, 16  ;;  %v1466_v51 = vshll.u32 %v1373_v49, 16  ;;  %v1472_v53 = vshll.u32 %v1374_v58, 16  ;;  %v1476_v7 = vshrl.u32 %v1374_v58, 16 }
  0x4b   : > { %1326 = vst [vmem:[#allocation2 + $0x24] sm:$0xf] %v7154_v34  ;;  %1327 = vst [vmem:[#allocation2 + $0x28] sm:$0xf] %v7155_v46  ;;  %v9107_v18 = vpop.eup %8515  ;;  %v1420_v55 = vld [vmem:[#allocation2 + $0x14] sm:$0x1]  ;;  %8529 = vrcp.f32 %v747_v48 }
  0x4c   : > { %v9109_v60 = vld [vmem:[#allocation2 + $0x10] sm:$0xf]  ;;  %v3338_v62 = vshrl.u32 %v3289_v12, 16  ;;  %v3341_v0 = vshll.u32 %v3289_v12, 16  ;;  %v1465_v1 = vrot.slane %v1463_v50, 4  ;;  %v1468_v8 = vrot.slane %v1466_v51, 5 }
  0x4d   : > { %v1474_v9 = vrot.slane %v1472_v53, 5  ;;  %v1478_v33 = vrot.slane %v1476_v7, 4  ;;  %v9112_v2 = vld [vmem:[#allocation2 + $0x14] sm:$0x1]  ;;  %v9114_v11 = vpop.eup %8517  ;;  %v1482_v13 = vshll.u32 %v1420_v55, 16  ;;  %v3347_v25 = vshll.u32 %v9109_v60, 16 }
  0x4e   : > { %v3340_v15 = vrot.slane %v3338_v62, 4  ;;  %v3343_v40 = vrot.slane %v3341_v0, 5  ;;  %v9117_v20 = vpop.eup %8519  ;;  %v1469_v22 = vor.u32 %v1468_v8, %v1465_v1  ;;  %v3351_v38 = vshrl.u32 %v9109_v60, 16  ;;  %v3292_v37 = vld [vmem:[#allocation2 + $0x18] sm:$0xf] }
  0x4f   : > { %v1479_v23 = vor.u32 %v1478_v33, %v1474_v9  ;;  %v1484_v29 = vrot.slane %v1482_v13, 5  ;;  %v3357_v35 = vshll.u32 %v9112_v2, 16  ;;  %v9123_v34 = vld [vmem:[#allocation2 + $0x1c] sm:$0xf]  ;;  %v9125_v46 = vpop.eup %8521  ;;  %v3349_v58 = vrot.slane %v3347_v25, 5 }
  0x50   : > { %v3344_v41 = vor.u32 %v3343_v40, %v3340_v15  ;;  %11054 = vst [vmem:[#allocation4_spill] sm:$0xff] %v9123_v34  ;;  %v1470_v48 = vrot.slane %v1469_v22, 4  ;;  %v3353_v12 = vrot.slane %v3351_v38, 4  ;;  %v9127_v50 = vpop.eup %8523  ;;  %v9129_v7 = vld [vmem:[#allocation2 + $0x20] sm:$0x1]  ;;  %v3362_v55 = vshrl.u32 %v3292_v37, 16 }
  0x51   : > { %v1480_v49 = vrot.slane %v1479_v23, 4  ;;  %v3359_v53 = vrot.slane %v3357_v35, 5  ;;  %v3365_v62 = vshll.u32 %v3292_v37, 16  ;;  %v9131_v0 = vpop.eup %8525  ;;  %v3371_v13 = vshll.u32 %v9123_v34, 16  ;;  %v1375_v15 = vld [vmem:[#allocation2 + $0x18] sm:$0xf] }
  0x52   : > { %v3345_v51 = vrot.slane %v3344_v41, 4  ;;  %v1475_v1 = vsel %vm8863_vm2, %v1470_v48, %v1474_v9  ;;  %v3354_v33 = vor.u32 %v3353_v12, %v3349_v58  ;;  %v3364_v25 = vrot.slane %v3362_v55, 4  ;;  %v1376_v37 = vld [vmem:[#allocation2 + $0x1c] sm:$0xf]  ;;  %v8360_v9 = vld [vmem:[%s11031_s4 + $0x8] sm:$0xff]  }
  0x53   : > { %v1485_v8 = vsel %vm8863_vm2, %v1480_v49, %v1484_v29  ;;  %v9138_v40 = vpop.eup %8527  ;;  %v3367_v38 = vrot.slane %v3365_v62, 5  ;;  %v3373_v35 = vrot.slane %v3371_v13, 5  ;;  %v3375_v29 = vshrl.u32 %v9123_v34, 16  ;;  %v1421_v49 = vld [vmem:[#allocation2 + $0x20] sm:$0x1] }
  0x54   : > { %v6737_v22 = vcombine.low %v1475_v1, %v1485_v8  ;;  %v3350_v23 = vsel %vm8863_vm2, %v3345_v51, %v3349_v58  ;;  %v3355_v41 = vrot.slane %v3354_v33, 4  ;;  %v3381_v48 = vshll.u32 %v9129_v7, 16  ;;  %v1377_v62 = vld [vmem:[#allocation2 + $0x24] sm:$0xf]  ;;  %v8363_v51 = vld [vmem:[%s11031_s4 + $0x10] sm:$0xff]  }
  0x55   : > { %v9147_v12 = vpop.eup %8529  ;;  %v3368_v1 = vor.u32 %v3367_v38, %v3364_v25  ;;  %v11036_v58 = vrot.slane %v9123_v34, 5  ;;  %v1487_v55 = vshrl.u32 %v1375_v15, 16  ;;  %v3377_v33 = vrot.slane %v3375_v29, 4  ;;  %v1378_v38 = vld [vmem:[#allocation2 + $0x28] sm:$0xf] }
  0x56   : > { %7644 = vmatmul.mubr.bf16.vlgmr.msra.gmra.mrb[0].mxu1 %v6737_v22  ;;  %v3360_v8 = vsel %vm8863_vm2, %v3355_v41, %v3359_v53  ;;  %v3383_v13 = vrot.slane %v3381_v48, 5  ;;  %v1490_v56 = vshll.u32 %v1375_v15, 16  ;;  %v1496_v41 = vshll.u32 %v1376_v37, 16  ;;  %v3295_v29 = vld [vmem:[#allocation2 + $0x24] sm:$0xf] }
  0x57   : > { %7676 = vmatpush3.bf16.msra.mxu1 %v8905_v5  ;;  %v6896_v16 = vcombine.low %v3350_v23, %v3360_v8  ;;  %v3369_v19 = vrot.slane %v3368_v1, 4  ;;  %v9156_v22 = vrot.slane %v11036_v58, 4  ;;  %v1489_v25 = vrot.slane %v1487_v55, 4  ;;  %v9166_v34 = vld [vmem:[#allocation2 + $0x28] sm:$0xf] }
  0x58   : > { %7677 = vmatprep.subr.bf16.mxu1 %v8360_v9  ;;  %v3378_v10 = vor.u32 %v3377_v33, %v3373_v35  ;;  %v1492_v53 = vrot.slane %v1490_v56, 5  ;;  %v1500_v5 = vshrl.u32 %v1376_v37, 16  ;;  %v1506_v23 = vshll.u32 %v1421_v49, 16 }
  0x59   : > { %7835 = vmatprep.mubr.bf16.mxu0 %v6896_v16  ;;  %v3374_v15 = vsel %vm8863_vm2, %v3369_v19, %v3373_v35  ;;  %v1040_v48 = vsel %vm1022_vm4, %v9085_v30, 0.0  ;;  %v1511_v1 = vshrl.u32 %v1377_v62, 16  ;;  %v1498_v58 = vrot.slane %v1496_v41, 5  ;;  %v8366_v19 = vld [vmem:[%s11031_s4 + $0x18] sm:$0xff]  }
  0x5a   : > { %v3379_v55 = vrot.slane %v3378_v10, 4  ;;  %v1493_v8 = vor.u32 %v1492_v53, %v1489_v25  ;;  %v1502_v57 = vrot.slane %v1500_v5, 4  ;;  %v1508_v56 = vrot.slane %v1506_v23, 5 }
  0x5b   : > { %7678 = vmatpush3.bf16.msra.mxu1 %v8360_v9  ;;  %v7156_v37 = vpack.c.bf16 %v1040_v48, %v1040_v48  ;;  %v1513_v33 = vrot.slane %v1511_v1, 4  ;;  %v1514_v16 = vshll.u32 %v1377_v62, 16  ;;  %v1520_v49 = vshll.u32 %v1378_v38, 16  ;;  %v8359_v9 = vld [vmem:[%s11031_s4 + $0x148] sm:$0xff]  }
  0x5c   : > { %7679 = vmatprep.subr.bf16.mxu1 %v8363_v51  ;;  %v3384_v30 = vsel %vm8863_vm2, %v3379_v55, %v3383_v13  ;;  %v1494_v35 = vrot.slane %v1493_v8, 4  ;;  %v1503_v10 = vor.u32 %v1502_v57, %v1498_v58  ;;  %v1524_v41 = vshrl.u32 %v1378_v38, 16  ;;  %v8369_v38 = vld [vmem:[%s11031_s4 + $0x20] sm:$0xff]  }
  0x5d   : > { %v6897_v25 = vcombine.low %v3374_v15, %v3384_v30  ;;  %1328 = vst [vmem:[#allocation2 + $0x2c] sm:$0x1] %v7156_v37  ;;  %v1516_v53 = vrot.slane %v1514_v16, 5  ;;  %v3386_v62 = vshrl.u32 %v3295_v29, 16  ;;  %v9178_v48 = vrot.slane %v1520_v49, 5 }
  0x5e   : > { %v1499_v5 = vsel %vm8863_vm2, %v1494_v35, %v1498_v58  ;;  %v1504_v23 = vrot.slane %v1503_v10, 4  ;;  %v3389_v1 = vshll.u32 %v3295_v29, 16  ;;  %v1526_v13 = vrot.slane %v1524_v41, 4  ;;  %v8361_v35 = vld [vmem:[%s11031_s4 + $0x150] sm:$0xff]  }
  0x5f   : > { %7680 = vmatpush3.bf16.msra.mxu1 %v8363_v51  ;;  %7836 = vmatmul.mubr.bf16.vlgmr.msra.gmra.mrb[0].mxu0 %v6897_v25  ;;  %v1517_v57 = vor.u32 %v1516_v53, %v1513_v33  ;;  %v3388_v15 = vrot.slane %v3386_v62, 4  ;;  %v3395_v55 = vshll.u32 %v9166_v34, 16  ;;  %v3399_v29 = vshrl.u32 %v9166_v34, 16  ;;  %v9205_v53 = vld [vmem:[%s11031_s4 + $0x158] sm:$0xff]  }
  0x60   : > { %7681 = vmatprep.subr.bf16.mxu1 %v8366_v19  ;;  %7868 = vmatpush3.bf16.msra.mxu0 %v8910_v6  ;;  %v1509_v58 = vsel %vm8863_vm2, %v1504_v23, %v1508_v56  ;;  %v3391_v8 = vrot.slane %v3389_v1, 5  ;;  %v907_v51 = vmul.f32 %v9114_v11, %v8956_v44  ;;  %v1527_v16 = vor.u32 %v1526_v13, %v9178_v48 }
  0x61   : > { %7869 = vmatprep.subr.bf16.mxu0 %v8359_v9  ;;  %v6738_v37 = vcombine.low %v1499_v5, %v1509_v58  ;;  %v1518_v33 = vrot.slane %v1517_v57, 4  ;;  %v3397_v30 = vrot.slane %v3395_v55, 5  ;;  %v3401_v10 = vrot.slane %v3399_v29, 4 }
  0x62   : > { %v3392_v6 = vor.u32 %v3391_v8, %v3388_v15  ;;  %v967_v56 = vadd.f32 %v9019_v61, %v907_v51  ;;  %v1041_v49 = vsel %vm1011_vm3, %v9097_v28, 0.0  ;;  %v1528_v11 = vrot.slane %v1527_v16, 4  ;;  %v8371_v8 = vld [vmem:[%s11031_s4 + $0x28] sm:$0xff]  }
  0x63   : > { %7682 = vmatpush3.bf16.msra.mxu1 %v8366_v19  ;;  %7647 = vmatprep.mubr.bf16.mxu1 %v6738_v37  ;;  %v1523_v44 = vsel %vm8863_vm2, %v1518_v33, %v9178_v48  ;;  %v7268_v25 = vpack.c.bf16 %v9100_v43, %v1041_v49  ;;  %v748_v41 = vadd.f32 1.0, %v9091_v45  ;;  %v3402_v5 = vor.u32 %v3401_v10, %v3397_v30  ;;  %v8365_v49 = vld [vmem:[%s11031_s4 + $0x168] sm:$0xff]  }
  0x64   : > { %7683 = vmatprep.subr.bf16.mxu1 %v8369_v38  ;;  %7870 = vmatpush3.bf16.msra.mxu0 %v8359_v9  ;;  %v1422_v62 = vld [vmem:[#allocation2 + $0x2c] sm:$0x1]  ;;  %v3393_v19 = vrot.slane %v3392_v6, 4  ;;  %v1043_v23 = vsel %vm1022_vm4, %v967_v56, 0.0  ;;  %v908_v43 = vmul.f32 %v9117_v20, %v8966_v59  ;;  %v909_v13 = vmul.f32 %v9147_v12, %v8969_v63  ;;  %v8364_v12 = vld [vmem:[%s11031_s4 + $0x160] sm:$0xff]  }
  0x65   : > { %v9208_v28 = vld [vmem:[#allocation2 + $0x2c] sm:$0x1]  ;;  %v1530_v48 = vshll.u32 %v1422_v62, 16  ;;  %7871 = vmatprep.subr.bf16.mxu0 %v8361_v35  ;;  %v7159_v57 = vpack.c.bf16 %v1043_v23, %v1043_v23  ;;  %7389 = vst [vmem:[#allocation2 + $0x30] sm:$0xff] %v7268_v25   ;;  %8531 = vrcp.f32 %v748_v41  ;;  %v3403_v9 = vrot.slane %v3402_v5, 4 }
  0x66   : > { %v3405_v1 = vshll.u32 %v9208_v28, 16  ;;  %v3398_v45 = vsel %vm8863_vm2, %v3393_v19, %v3397_v30  ;;  %v968_v15 = vadd.f32 %v9019_v61, %v908_v43  ;;  %v749_v59 = vadd.f32 1.0, %v9094_v47 }
  0x67   : > { %7684 = vmatpush3.bf16.msra.mxu1 %v8369_v38  ;;  %v1532_v55 = vrot.slane %v1530_v48, 5  ;;  %1331 = vst [vmem:[#allocation2 + $0x38] sm:$0x1] %v7159_v57  ;;  %v750_v20 = vadd.f32 1.0, %v9107_v18  ;;  %v969_v29 = vadd.f32 %v9019_v61, %v909_v13  ;;  %v751_v38 = vadd.f32 1.0, %v9125_v46 }
  0x68   : > { %v3407_v58 = vrot.slane %v3405_v1, 5  ;;  %7872 = vmatpush3.bf16.msra.mxu0 %v8361_v35  ;;  %v1044_v63 = vsel %vm1011_vm3, %v968_v15, 0.0  ;;  %v752_v47 = vadd.f32 1.0, %v9127_v50  ;;  %8533 = vrcp.f32 %v749_v59  ;;  %7685 = vmatprep.subr.bf16.mxu1 %v8371_v8 }
  0x69   : > { %v1533_v18 = vsel %vm8863_vm2, %v1528_v11, %v1532_v55  ;;  %7873 = vmatprep.subr.bf16.mxu0 %v9205_v53  ;;  %v7160_v37 = vpack.c.bf16 %v1044_v63, %v1044_v63  ;;  %v7161_v30 = vpack.c.bf16 %v969_v29, %v969_v29  ;;  %8535 = vrcp.f32 %v750_v20 }
  0x6a   : > { %v3408_v51 = vsel %vm8863_vm2, %v3403_v9, %v3407_v58  ;;  %v6739_v33 = vcombine.low %v1523_v44, %v1533_v18  ;;  %8537 = vrcp.f32 %v751_v38  ;;  %v753_v46 = vadd.f32 1.0, %v9131_v0  ;;  %v9253_v0 = vld [vmem:[%s11028_s1] ss:$0 sm:$0xff] }
  0x6b   : > { %v6898_v16 = vcombine.low %v3398_v45, %v3408_v51  ;;  %7686 = vmatpush3.bf16.msra.mxu1 %v8371_v8  ;;  %1332 = vst [vmem:[#allocation2 + $0x3c] sm:$0xf] %v7160_v37  ;;  %v9240_v50 = vadd.f32 1.0, %v9138_v40  ;;  %v9243_v35 = vmul.f32 -1.442695, %v9068_v17  ;;  %8539 = vrcp.f32 %v752_v47 }
  0x6c   : > { %7648 = vmatmul.mubr.bf16.gmra.mrb[4].mxu1 %v6739_v33  ;;  %v3298_v6 = vld [vmem:[#allocation2 + $0x30] sm:$0xf]  ;;  %v9245_v10 = vld [vmem:[#allocation2 + $0x34] sm:$0xf]  ;;  %1333 = vst [vmem:[#allocation2 + $0x40] sm:$0xf] %v7161_v30  ;;  %v11055_v40 = vunpack.c.l.bf16 %v9076_v36  ;;  %v11056_v11 = vunpack.c.h.bf16 %v9076_v36  ;;  %v11057_v41 = vunpack.c.l.bf16 %v9105_v14  ;;  %7874 = vmatpush3.bf16.msra.mxu0 %v9205_v53  ;;  %8541 = vrcp.f32 %v753_v46 }
  0x6d   : > { %7839 = vmatprep.mubr.bf16.mxu0 %v6898_v16  ;;  %v1379_v56 = vld [vmem:[#allocation2 + $0x30] sm:$0xf]  ;;  %v3410_v19 = vshrl.u32 %v3298_v6, 16  ;;  %v3413_v5 = vshll.u32 %v3298_v6, 16  ;;  %v3419_v23 = vshll.u32 %v9245_v10, 16  ;;  %v3423_v43 = vshrl.u32 %v9245_v10, 16  ;;  %7875 = vmatprep.subr.bf16.mxu0 %v8364_v12 }
  0x6e   : > { %v482_v44 = vmul.f32 %v9253_v0, %v11055_v40  ;;  %v9261_v25 = vmul.f32 %v9253_v0, %v11056_v11  ;;  %v9266_v62 = vmul.f32 %v9253_v0, %v11057_v41  ;;  %v1380_v48 = vld [vmem:[#allocation2 + $0x34] sm:$0xf]  ;;  %v9271_v1 = vld [vmem:[#allocation2 + $0x38] sm:$0x1]  ;;  %v1535_v57 = vshrl.u32 %v1379_v56, 16 }
  0x6f   : > { %v1423_v36 = vld [vmem:[#allocation2 + $0x38] sm:$0x1]  ;;  %v1538_v45 = vshll.u32 %v1379_v56, 16  ;;  %v9276_v14 = vld [vmem:[%s11029_s2] ss:$0 sm:$0xff]  ;;  %v8532_v13 = vpop.eup %8531  ;;  %v3412_v15 = vrot.slane %v3410_v19, 4  ;;  %8543 = vrcp.f32 %v9240_v50 }
  0x70   : > { %v9279_v9 = vadd.f32 %v9276_v14, %v482_v44  ;;  %v3415_v55 = vrot.slane %v3413_v5, 5  ;;  %v3421_v53 = vrot.slane %v3419_v23, 5  ;;  %v3425_v58 = vrot.slane %v3423_v43, 4  ;;  %7876 = vmatpush3.bf16.msra.mxu0 %v8364_v12  ;;  %v8367_v46 = vld [vmem:[%s11031_s4 + $0x170] sm:$0xff]  }
  0x71   : > { %v3429_v59 = vshll.u32 %v9271_v1, 16  ;;  %v1537_v20 = vrot.slane %v1535_v57, 4  ;;  %v1540_v8 = vrot.slane %v1538_v45, 5  ;;  %v1544_v29 = vshll.u32 %v1380_v48, 16  ;;  %7877 = vmatprep.subr.bf16.mxu0 %v8365_v49 }
  0x72   : > { %v3416_v63 = vor.u32 %v3415_v55, %v3412_v15  ;;  %v3426_v38 = vor.u32 %v3425_v58, %v3421_v53  ;;  %v1548_v47 = vshrl.u32 %v1380_v48, 16  ;;  %v1554_v18 = vshll.u32 %v1423_v36, 16  ;;  %v1381_v30 = vld [vmem:[#allocation2 + $0x3c] sm:$0xf]  ;;  %v8534_v6 = vpop.eup %8533 }
  0x73   : > { %v3431_v51 = vrot.slane %v3429_v59, 5  ;;  %v1541_v37 = vor.u32 %v1540_v8, %v1537_v20  ;;  %v1546_v33 = vrot.slane %v1544_v29, 5  ;;  %v910_v16 = vmul.f32 %v8532_v13, %v8972_v3  ;;  %v1382_v41 = vld [vmem:[#allocation2 + $0x40] sm:$0xf]  ;;  %v3301_v19 = vld [vmem:[#allocation2 + $0x3c] sm:$0xf]  ;;  %v8536_v5 = vpop.eup %8535 }
  0x74   : > { %v3417_v56 = vrot.slane %v3416_v63, 4  ;;  %v3427_v40 = vrot.slane %v3426_v38, 4  ;;  %v1550_v44 = vrot.slane %v1548_v47, 4  ;;  %v1556_v11 = vrot.slane %v1554_v18, 5  ;;  %v9287_v3 = vld [vmem:[#allocation2 + $0x40] sm:$0xf]  ;;  %v8538_v36 = vpop.eup %8537  ;;  %7878 = vmatpush3.bf16.msra.mxu0 %v8365_v49 }
  0x75   : > { %v1542_v12 = vrot.slane %v1541_v37, 4  ;;  %v970_v23 = vadd.f32 %v9019_v61, %v910_v16  ;;  %v1559_v43 = vshrl.u32 %v1381_v30, 16  ;;  %v1562_v48 = vshll.u32 %v1381_v30, 16  ;;  %v8540_v55 = vpop.eup %8539  ;;  %7879 = vmatprep.subr.bf16.mxu0 %v8367_v46 }
  0x76   : > { %v3422_v57 = vsel %vm8863_vm2, %v3417_v56, %v3421_v53  ;;  %v3432_v45 = vsel %vm8863_vm2, %v3427_v40, %v3431_v51  ;;  %v1551_v13 = vor.u32 %v1550_v44, %v1546_v33  ;;  %v1568_v15 = vshll.u32 %v1382_v41, 16  ;;  %v8368_v53 = vld [vmem:[%s11031_s4 + $0x178] sm:$0xff]   ;;  %v8542_v49 = vpop.eup %8541 }
  0x77   : > { %v6899_v58 = vcombine.low %v3422_v57, %v3432_v45  ;;  %v1547_v59 = vsel %vm8863_vm2, %v1542_v12, %v1546_v33  ;;  %v1046_v20 = vsel %vm1022_vm4, %v970_v23, 0.0  ;;  %v1561_v8 = vrot.slane %v1559_v43, 4 }
  0x78   : > { %v1552_v29 = vrot.slane %v1551_v13, 4  ;;  %v7162_v63 = vpack.c.bf16 %v1046_v20, %v1046_v20  ;;  %v1564_v38 = vrot.slane %v1562_v48, 5  ;;  %v9300_v47 = vrot.slane %v1568_v15, 5  ;;  %7880 = vmatpush3.bf16.msra.mxu0 %v8367_v46  ;;  %v8373_v13 = vld [vmem:[%s11031_s4 + $0x30] sm:$0xff]  }
  0x79   : > { %7840 = vmatmul.mubr.bf16.gmra.mrb[4].mxu0 %v6899_v58  ;;  %v1572_v18 = vshrl.u32 %v1382_v41, 16  ;;  %v3434_v51 = vshrl.u32 %v3301_v19, 16  ;;  %v3437_v37 = vshll.u32 %v3301_v19, 16  ;;  %v3443_v33 = vshll.u32 %v9287_v3, 16  ;;  %7881 = vmatprep.subr.bf16.mxu0 %v8368_v53  ;;  %v9310_v41 = vld [vmem:[%s11031_s4 + $0x180] sm:$0xff]  }
  0x7a   : > { %v1557_v16 = vsel %vm8863_vm2, %v1552_v29, %v1556_v11  ;;  %1334 = vst [vmem:[#allocation2 + $0x44] sm:$0x1] %v7162_v63  ;;  %v1565_v30 = vor.u32 %v1564_v38, %v1561_v8  ;;  %v3447_v56 = vshrl.u32 %v9287_v3, 16  ;;  %v911_v40 = vmul.f32 %v8534_v6, %v8987_v24  ;;  %7687 = vmatprep.subr.bf16.mxu1 %v8373_v13 }
  0x7b   : > { %v6740_v44 = vcombine.low %v1547_v59, %v1557_v16  ;;  %v1574_v12 = vrot.slane %v1572_v18, 4  ;;  %v3436_v23 = vrot.slane %v3434_v51, 4  ;;  %v3439_v43 = vrot.slane %v3437_v37, 5  ;;  %7688 = vmatpush3.bf16.msra.mxu1 %v8373_v13 }
  0x7c   : > { %v1566_v19 = vrot.slane %v1565_v30, 4  ;;  %v3445_v48 = vrot.slane %v3443_v33, 5  ;;  %v3449_v11 = vrot.slane %v3447_v56, 4  ;;  %v912_v57 = vmul.f32 %v8536_v5, %v8990_v26  ;;  %7882 = vmatpush3.bf16.msra.mxu0 %v8368_v53 }
  0x7d   : > { %7651 = vmatprep.mubr.bf16.mxu1 %v6740_v44  ;;  %v1575_v45 = vor.u32 %v1574_v12, %v9300_v47  ;;  %v3440_v24 = vor.u32 %v3439_v43, %v3436_v23  ;;  %v913_v46 = vmul.f32 %v8538_v36, %v8994_v32  ;;  %v971_v6 = vadd.f32 %v9019_v61, %v911_v40  ;;  %v9354_v40 = vld [vmem:[%s8839_s14 + $0x78] sm:$0xff]  }
  0x7e   : > { %v1571_v15 = vsel %vm8863_vm2, %v1566_v19, %v9300_v47  ;;  %v3450_v58 = vor.u32 %v3449_v11, %v3445_v48  ;;  %v972_v59 = vadd.f32 %v9019_v61, %v912_v57  ;;  %7915 = vmatprep.subr.bf16.mxu0 %v9310_v41  ;;  %v914_v29 = vmul.f32 %v8540_v55, %v9015_v54  ;;  %v8544_v11 = vpop.eup %8543 }
  0x7f   : > { %v1576_v26 = vrot.slane %v1575_v45, 4  ;;  %v3441_v5 = vrot.slane %v3440_v24, 4  ;;  %v973_v32 = vadd.f32 %v9019_v61, %v913_v46  ;;  %v1047_v36 = vsel %vm1011_vm3, %v971_v6, 0.0 }
  0x80   : > { %v3451_v20 = vrot.slane %v3450_v58, 4  ;;  %v7273_v8 = vpack.c.bf16 %v972_v59, %v1047_v36  ;;  %v915_v63 = vmul.f32 %v8542_v49, %v9022_v52  ;;  %8545 = vpow2.f32 %v9082_v31 }
  0x81   : > { %v1424_v38 = vld [vmem:[#allocation2 + $0x44] sm:$0x1]  ;;  %v3446_v53 = vsel %vm8863_vm2, %v3441_v5, %v3445_v48  ;;  %v1049_v47 = vsel %vm1022_vm4, %v973_v32, 0.0  ;;  %v9339_v18 = vadd.f32 %v9276_v14, %v9261_v25  ;;  %v974_v49 = vadd.f32 %v9019_v61, %v914_v29  ;;  %v4043_v25 = vld [vmem:[#allocation2 + $0xc] sm:$0xe] }
  0x82   : > { %v9330_v50 = vld [vmem:[#allocation2 + $0x44] sm:$0x1]  ;;  %v1578_v54 = vshll.u32 %v1424_v38, 16  ;;  %v7165_v55 = vpack.c.bf16 %v1049_v47, %v1049_v47  ;;  %7390 = vst [vmem:[#allocation2 + $0x48] sm:$0xff] %v7273_v8   ;;  %v975_v51 = vadd.f32 %v9019_v61, %v915_v63  ;;  %8547 = vpow2.f32 %v9243_v35  ;;  %v9357_v61 = vld [vmem:[%s8839_s14 + $0x80] sm:$0x1] }
  0x83   : > { %v3453_v52 = vshll.u32 %v9330_v50, 16  ;;  %v6637_v37 = vmul.f32 -1.442695, %v9073_v27  ;;  %v9348_v31 = vadd.f32 %v9276_v14, %v9266_v62  ;;  %v1050_v30 = vsel %vm1011_vm3, %v974_v49, 0.0  ;;  %v9383_v47 = vld [vmem:[%s9002_s13] ss:$0 sm:$0xff] }
  0x84   : > { %v1580_v33 = vrot.slane %v1578_v54, 5  ;;  %1337 = vst [vmem:[#allocation2 + $0x50] sm:$0x1] %v7165_v55  ;;  %v6638_v56 = vmul.f32 -1.442695, %v9279_v9  ;;  %v7166_v35 = vpack.c.bf16 %v1050_v30, %v1050_v30  ;;  %v7167_v44 = vpack.c.bf16 %v975_v51, %v975_v51 }
  0x85   : > { %v3455_v16 = vrot.slane %v3453_v52, 5  ;;  %8549 = vpow2.f32 %v6637_v37  ;;  %v6639_v12 = vmul.f32 -1.442695, %v9339_v18  ;;  %v6640_v43 = vmul.f32 -1.442695, %v9348_v31 }
  0x86   : > { %v1581_v62 = vsel %vm8863_vm2, %v1576_v26, %v1580_v33  ;;  %8551 = vpow2.f32 %v6638_v56  ;;  %1338 = vst [vmem:[#allocation2 + $0x54] sm:$0xf] %v7166_v35  ;;  %1339 = vst [vmem:[#allocation2 + $0x58] sm:$0xf] %v7167_v44  ;;  %v6920_v57 = vrot.slane %v4043_v25, 9  ;;  %v4109_v45 = vrot.slane %v9109_v60, 5 }
  0x87   : > { %v3456_v23 = vsel %vm8863_vm2, %v3451_v20, %v3455_v16  ;;  %v6741_v19 = vcombine.low %v1571_v15, %v1581_v62  ;;  %8553 = vpow2.f32 %v6639_v12  ;;  %v916_v13 = vmul.f32 %v8544_v11, %v9025_v4 }
  0x88   : > { %v6900_v48 = vcombine.low %v3446_v53, %v3456_v23  ;;  %8555 = vpow2.f32 %v6640_v43  ;;  %v7246_v15 = vunpack.c.l.bf16 %v9354_v40  ;;  %v9390_v52 = vsel %vm9376_vm7, %v6920_v57, %v4109_v45 }
  0x89   : > { %7652 = vmatmul.mubr.bf16.gmra.mrb[8].mxu1 %v6741_v19  ;;  %v3304_v24 = vld [vmem:[#allocation2 + $0x48] sm:$0xf]  ;;  %v9366_v46 = vld [vmem:[#allocation2 + $0x4c] sm:$0xf]  ;;  %v976_v54 = vadd.f32 %v9383_v47, %v916_v13 }
  0x8a   : > { %7843 = vmatprep.mubr.bf16.mxu0 %v6900_v48  ;;  %v1383_v6 = vld [vmem:[#allocation2 + $0x48] sm:$0xf]  ;;  %v3458_v26 = vshrl.u32 %v3304_v24, 16  ;;  %v3461_v5 = vshll.u32 %v3304_v24, 16  ;;  %v3467_v32 = vshll.u32 %v9366_v46, 16  ;;  %v3471_v36 = vshrl.u32 %v9366_v46, 16  ;;  %v8546_v4 = vpop.eup %8545 }
  0x8b   : > { %v1384_v20 = vld [vmem:[#allocation2 + $0x4c] sm:$0xf]  ;;  %v9380_v29 = vld [vmem:[#allocation2 + $0x50] sm:$0x1]  ;;  %v1583_v38 = vshrl.u32 %v1383_v6, 16  ;;  %v1586_v53 = vshll.u32 %v1383_v6, 16 }
  0x8c   : > { %v1425_v63 = vld [vmem:[#allocation2 + $0x50] sm:$0x1]  ;;  %v3460_v55 = vrot.slane %v3458_v26, 4  ;;  %v3463_v49 = vrot.slane %v3461_v5, 5  ;;  %v3469_v51 = vrot.slane %v3467_v32, 5  ;;  %v3473_v37 = vrot.slane %v3471_v36, 4  ;;  %v8548_v25 = vpop.eup %8547 }
  0x8d   : > { %v3477_v33 = vshll.u32 %v9380_v29, 16  ;;  %v1585_v16 = vrot.slane %v1583_v38, 4  ;;  %v1588_v30 = vrot.slane %v1586_v53, 5  ;;  %v1592_v56 = vshll.u32 %v1384_v20, 16  ;;  %v1385_v23 = vld [vmem:[#allocation2 + $0x54] sm:$0xf] }
  0x8e   : > { %v3464_v35 = vor.u32 %v3463_v49, %v3460_v55  ;;  %v3474_v44 = vor.u32 %v3473_v37, %v3469_v51  ;;  %v1596_v12 = vshrl.u32 %v1384_v20, 16  ;;  %v1602_v62 = vshll.u32 %v1425_v63, 16  ;;  %v1386_v24 = vld [vmem:[#allocation2 + $0x58] sm:$0xf]  ;;  %v3307_v36 = vld [vmem:[#allocation2 + $0x54] sm:$0xf] }
  0x8f   : > { %v8550_v43 = vpop.eup %8549  ;;  %v3479_v19 = vrot.slane %v3477_v33, 5  ;;  %v1589_v48 = vor.u32 %v1588_v30, %v1585_v16  ;;  %v1594_v11 = vrot.slane %v1592_v56, 5  ;;  %v1052_v57 = vsel %vm1022_vm4, %v976_v54, 0.0  ;;  %v9395_v49 = vld [vmem:[#allocation2 + $0x58] sm:$0xf] }
  0x90   : > { %v8552_v6 = vpop.eup %8551  ;;  %v3465_v13 = vrot.slane %v3464_v35, 4  ;;  %v3475_v26 = vrot.slane %v3474_v44, 4  ;;  %v1598_v5 = vrot.slane %v1596_v12, 4  ;;  %v1604_v32 = vrot.slane %v1602_v62, 5  ;;  %11060 = vst [vmem:[#allocation5_spill] sm:$0xff] %v9395_v49 }
  0x91   : > { %v8554_v38 = vpop.eup %8553  ;;  %v1590_v53 = vrot.slane %v1589_v48, 4  ;;  %v7168_v55 = vpack.c.bf16 %v1052_v57, %v1052_v57  ;;  %v1607_v20 = vshrl.u32 %v1385_v23, 16  ;;  %v1610_v63 = vshll.u32 %v1385_v23, 16 }
  0x92   : > { %v8556_v37 = vpop.eup %8555  ;;  %v3470_v33 = vsel %vm8863_vm2, %v3465_v13, %v3469_v51  ;;  %v3480_v54 = vsel %vm8863_vm2, %v3475_v26, %v3479_v19  ;;  %v1599_v16 = vor.u32 %v1598_v5, %v1594_v11  ;;  %v1616_v30 = vshll.u32 %v1386_v24, 16 }
  0x93   : > { %v6901_v56 = vcombine.low %v3470_v33, %v3480_v54  ;;  %v1595_v35 = vsel %vm8863_vm2, %v1590_v53, %v1594_v11  ;;  %1340 = vst [vmem:[#allocation2 + $0x5c] sm:$0x1] %v7168_v55  ;;  %v1609_v44 = vrot.slane %v1607_v20, 4  ;;  %v1612_v12 = vrot.slane %v1610_v63, 5 }
  0x94   : > { %v1600_v62 = vrot.slane %v1599_v16, 4  ;;  %v1618_v23 = vrot.slane %v1616_v30, 5  ;;  %v1620_v48 = vshrl.u32 %v1386_v24, 16  ;;  %v3482_v57 = vshrl.u32 %v3307_v36, 16 }
  0x95   : > { %7844 = vmatmul.mubr.bf16.gmra.mrb[8].mxu0 %v6901_v56  ;;  %v1613_v59 = vor.u32 %v1612_v12, %v1609_v44  ;;  %v3485_v58 = vshll.u32 %v3307_v36, 16  ;;  %v3491_v51 = vshll.u32 %v9395_v49, 16  ;;  %v3495_v19 = vshrl.u32 %v9395_v49, 16  ;;  %v4044_v44 = vld [vmem:[#allocation2 + $0x18] sm:$0xe] }
  0x96   : > { %v1605_v13 = vsel %vm8863_vm2, %v1600_v62, %v1604_v32  ;;  %v1622_v26 = vrot.slane %v1620_v48, 4  ;;  %v3484_v5 = vrot.slane %v3482_v57, 4  ;;  %v755_v11 = vadd.f32 1.0, %v8546_v4 }
  0x97   : > { %v6742_v53 = vcombine.low %v1595_v35, %v1605_v13  ;;  %v1614_v55 = vrot.slane %v1613_v59, 4  ;;  %v3487_v20 = vrot.slane %v3485_v58, 5  ;;  %v3493_v63 = vrot.slane %v3491_v51, 5 }
  0x98   : > { %v1623_v33 = vor.u32 %v1622_v26, %v1618_v23  ;;  %v3497_v24 = vrot.slane %v3495_v19, 4  ;;  %v756_v54 = vadd.f32 1.0, %v8548_v25  ;;  %v757_v16 = vadd.f32 1.0, %v8550_v43  ;;  %v8375_v26 = vld [vmem:[%s11031_s4 + $0x38] sm:$0xff]  }
  0x99   : > { %7655 = vmatprep.mubr.bf16.mxu1 %v6742_v53  ;;  %v1619_v36 = vsel %vm8863_vm2, %v1614_v55, %v1618_v23  ;;  %v3488_v30 = vor.u32 %v3487_v20, %v3484_v5  ;;  %8557 = vrcp.f32 %v755_v11  ;;  %v758_v56 = vadd.f32 1.0, %v8552_v6  ;;  %v9443_v53 = vld [vmem:[#allocation2 + $0x24] sm:$0xe]  ;;  %7689 = vmatprep.subr.bf16.mxu1 %v8375_v26 }
  0x9a   : > { %v1426_v32 = vld [vmem:[#allocation2 + $0x5c] sm:$0x1]  ;;  %v1624_v12 = vrot.slane %v1623_v33, 4  ;;  %v3498_v4 = vor.u32 %v3497_v24, %v3493_v63  ;;  %8559 = vrcp.f32 %v756_v54  ;;  %v759_v58 = vadd.f32 1.0, %v8554_v38  ;;  %7690 = vmatpush3.bf16.msra.mxu1 %v8375_v26 }
  0x9b   : > { %v9409_v62 = vld [vmem:[#allocation2 + $0x5c] sm:$0x1]  ;;  %v1626_v59 = vshll.u32 %v1426_v32, 16  ;;  %v3489_v35 = vrot.slane %v3488_v30, 4  ;;  %8561 = vrcp.f32 %v757_v16  ;;  %v760_v48 = vadd.f32 1.0, %v8556_v37 }
  0x9c   : > { %11061 = vst [vmem:[#allocation6_spill] sm:$0xff] %v9409_v62  ;;  %v3501_v25 = vshll.u32 %v9409_v62, 16  ;;  %v3499_v43 = vrot.slane %v3498_v4, 4  ;;  %8563 = vrcp.f32 %v758_v56  ;;  %v4111_v6 = vrot.slane %v4109_v45, 4  ;;  %v374_v45 = vld [vmem:[%s8839_s14 + $0x84] sm:$0xff]  }
  0x9d   : > { %v1628_v23 = vrot.slane %v1626_v59, 5  ;;  %v3494_v57 = vsel %vm8863_vm2, %v3489_v35, %v3493_v63  ;;  %8565 = vrcp.f32 %v759_v58  ;;  %v11062_v38 = vrot.slane %v9112_v2, 5  ;;  %v11064_v63 = vld [vmem:[#allocation4_spill] sm:$0xff] }
  0x9e   : > { %v3503_v51 = vrot.slane %v3501_v25, 5  ;;  %8567 = vrcp.f32 %v760_v48  ;;  %v6921_v13 = vrot.slane %v4044_v44, 9  ;;  %v11063_v37 = vrot.slane %v9129_v7, 5  ;;  %v11068_v48 = vld [vmem:[#allocation3_spill] sm:$0xff] }
  0x9f   : > { %v9420_v19 = vsel %vm9376_vm7, %v4111_v6, %v11062_v38  ;;  %v1629_v2 = vsel %vm8863_vm2, %v1624_v12, %v1628_v23  ;;  %v485_v7 = vmul.f32 %v9253_v0, %v7246_v15  ;;  %v11065_v33 = vrot.slane %v11064_v63, 5 }
  0xa0   : > { %v9427_v60 = vsel %vm9376_vm7, %v9156_v22, %v11063_v37  ;;  %v3504_v5 = vsel %vm8863_vm2, %v3499_v43, %v3503_v51  ;;  %v376_v22 = vld [vmem:[%s8839_s14 + $0x8c] sm:$0x1]  ;;  %v6743_v55 = vcombine.low %v1619_v36, %v1629_v2  ;;  %v11066_v54 = vunpack.c.h.bf16 %v9354_v40 }
  0xa1   : > { %v6902_v20 = vcombine.low %v3494_v57, %v3504_v5  ;;  %v9449_v24 = vsel %vm9376_vm7, %v6921_v13, %v11065_v33  ;;  %v11067_v15 = vunpack.c.l.bf16 %v9357_v61  ;;  %v9460_v36 = vadd.f32 %v9276_v14, %v485_v7  ;;  %v8379_v7 = vld [vmem:[%s11031_s4 + $0x80] sm:$0xff]  }
  0xa2   : > { %v486_v16 = vmul.f32 %v9253_v0, %v11066_v54  ;;  %v428_v44 = vunpack.c.l.bf16 %v374_v45  ;;  %7656 = vmatmul.mubr.bf16.gmra.mrb[12].mxu1 %v6743_v55  ;;  %v429_v40 = vunpack.c.h.bf16 %v374_v45  ;;  %v430_v12 = vunpack.c.l.bf16 %v376_v22  ;;  %7723 = vmatprep.subr.bf16.mxu1 %v8379_v7 }
  0xa3   : > { %v487_v56 = vmul.f32 %v9253_v0, %v11067_v15  ;;  %7847 = vmatprep.mubr.bf16.mxu0 %v6902_v20  ;;  %v6922_v4 = vrot.slane %v9443_v53, 9  ;;  %v8558_v58 = vpop.eup %8557  ;;  %v6641_v61 = vmul.f32 -1.442695, %v9460_v36  ;;  %v4123_v25 = vrot.slane %v9166_v34, 5 }
  0xa4   : > { %v9463_v32 = vadd.f32 %v9276_v14, %v486_v16  ;;  %v488_v35 = vmul.f32 %v9253_v0, %v428_v44  ;;  %v8560_v43 = vpop.eup %8559  ;;  %v917_v6 = vmul.f32 %v8558_v58, %v11068_v48  ;;  %v489_v57 = vmul.f32 %v9253_v0, %v429_v40 }
  0xa5   : > { %v9467_v59 = vadd.f32 %v9276_v14, %v487_v56  ;;  %v490_v51 = vmul.f32 %v9253_v0, %v430_v12  ;;  %v8562_v38 = vpop.eup %8561  ;;  %v918_v13 = vmul.f32 %v8560_v43, %v9068_v17  ;;  %8569 = vpow2.f32 %v6641_v61  ;;  %v4046_v12 = vld [vmem:[#allocation2 + $0x30] sm:$0xe] }
  0xa6   : > { %v6642_v23 = vmul.f32 -1.442695, %v9463_v32  ;;  %v9479_v45 = vadd.f32 %v9276_v14, %v488_v35  ;;  %v8564_v26 = vpop.eup %8563  ;;  %v919_v34 = vmul.f32 %v8562_v38, %v9073_v27  ;;  %v977_v2 = vadd.f32 %v9383_v47, %v917_v6  ;;  %v7385_v35 = vld [vmem:[%s8839_s14 + $0x90] sm:$0xff]  }
  0xa7   : > { %v6643_v37 = vmul.f32 -1.442695, %v9467_v59  ;;  %v9484_v5 = vadd.f32 %v9276_v14, %v489_v57  ;;  %v8566_v17 = vpop.eup %8565  ;;  %v978_v22 = vadd.f32 %v9383_v47, %v918_v13  ;;  %v920_v53 = vmul.f32 %v8564_v26, %v9279_v9  ;;  %v9516_v57 = vld [vmem:[%s8839_s14 + $0x9c] sm:$0xff]  }
  0xa8   : > { %8571 = vpow2.f32 %v6642_v23  ;;  %v9492_v55 = vadd.f32 %v9276_v14, %v490_v51  ;;  %v8568_v27 = vpop.eup %8567  ;;  %v979_v20 = vadd.f32 %v9383_v47, %v919_v34  ;;  %v1053_v63 = vsel %vm1011_vm3, %v977_v2, 0.0  ;;  %v379_v23 = vld [vmem:[%s8839_s14 + $0x98] sm:$0x1] }
  0xa9   : > { %8573 = vpow2.f32 %v6643_v37  ;;  %v921_v33 = vmul.f32 %v8566_v17, %v9339_v18  ;;  %v6644_v54 = vmul.f32 -1.442695, %v9479_v45  ;;  %v7278_v16 = vpack.c.bf16 %v978_v22, %v1053_v63 }
  0xaa   : > { %v922_v15 = vmul.f32 %v8568_v27, %v9348_v31  ;;  %v980_v9 = vadd.f32 %v9383_v47, %v920_v53  ;;  %v6645_v56 = vmul.f32 -1.442695, %v9484_v5  ;;  %v1055_v44 = vsel %vm1022_vm4, %v979_v20, 0.0  ;;  %v9528_v27 = vld [vmem:[%s8839_s14 + $0xa4] sm:$0x1] }
  0xab   : > { %v981_v40 = vadd.f32 %v9383_v47, %v921_v33  ;;  %8575 = vpow2.f32 %v6644_v54  ;;  %v6646_v18 = vmul.f32 -1.442695, %v9492_v55  ;;  %v7171_v58 = vpack.c.bf16 %v1055_v44, %v1055_v44  ;;  %7391 = vst [vmem:[#allocation2 + $0x60] sm:$0xff] %v7278_v16  }
  0xac   : > { %v982_v61 = vadd.f32 %v9383_v47, %v922_v15  ;;  %v1056_v31 = vsel %vm1011_vm3, %v980_v9, 0.0  ;;  %8577 = vpow2.f32 %v6645_v56  ;;  %v9512_v6 = vsel %vm9376_vm7, %v6922_v4, %v4123_v25 }
  0xad   : > { %v7172_v43 = vpack.c.bf16 %v1056_v31, %v1056_v31  ;;  %v7173_v48 = vpack.c.bf16 %v981_v40, %v981_v40  ;;  %8579 = vpow2.f32 %v6646_v18  ;;  %1343 = vst [vmem:[#allocation2 + $0x68] sm:$0x1] %v7171_v58  ;;  %v4125_v38 = vrot.slane %v4123_v25, 4 }
  0xae   : > { %v1058_v51 = vsel %vm1022_vm4, %v982_v61, 0.0  ;;  %v4126_v13 = vrot.slane %v9208_v28, 5  ;;  %v6923_v37 = vrot.slane %v4046_v12, 9  ;;  %v4130_v34 = vrot.slane %v9245_v10, 5 }
  0xaf   : > { %v7174_v26 = vpack.c.bf16 %v1058_v51, %v1058_v51  ;;  %1344 = vst [vmem:[#allocation2 + $0x6c] sm:$0xf] %v7172_v43  ;;  %1345 = vst [vmem:[#allocation2 + $0x70] sm:$0xf] %v7173_v48  ;;  %v4133_v4 = vrot.slane %v9271_v1, 5  ;;  %v7250_v2 = vunpack.c.l.bf16 %v7385_v35  ;;  %v8570_v7 = vpop.eup %8569  ;;  %v7251_v22 = vunpack.c.h.bf16 %v7385_v35 }
  0xb0   : > { %v9525_v17 = vsel %vm9376_vm7, %v4125_v38, %v4126_v13  ;;  %v433_v53 = vunpack.c.l.bf16 %v379_v23  ;;  %v761_v20 = vadd.f32 1.0, %v8570_v7  ;;  %v9535_v1 = vsel %vm9376_vm7, %v6923_v37, %v4130_v34 }
  0xb1   : > { %1346 = vst [vmem:[#allocation2 + $0x74] sm:$0x1] %v7174_v26  ;;  %v4132_v63 = vrot.slane %v4130_v34, 4  ;;  %v9540_v16 = vmul.f32 %v9253_v0, %v7250_v2  ;;  %v9543_v15 = vmul.f32 %v9253_v0, %v7251_v22 }
  0xb2   : > { %v8572_v25 = vpop.eup %8571  ;;  %v9546_v9 = vmul.f32 %v9253_v0, %v433_v53  ;;  %v3310_v56 = vld [vmem:[#allocation2 + $0x60] sm:$0xf]  ;;  %v9548_v44 = vld [vmem:[#allocation2 + $0x64] sm:$0xf]  ;;  %8581 = vrcp.f32 %v761_v20 }
  0xb3   : > { %v9537_v33 = vpop.eup %8573  ;;  %v762_v54 = vadd.f32 1.0, %v8572_v25  ;;  %11069 = vst [vmem:[#allocation4_spill] sm:$0xff] %v9548_v44  ;;  %v1387_v40 = vld [vmem:[#allocation2 + $0x60] sm:$0xf]  ;;  %v9552_v18 = vsel %vm9376_vm7, %v4132_v63, %v4133_v4  ;;  %v3506_v61 = vshrl.u32 %v3310_v56, 16  ;;  %v3509_v31 = vshll.u32 %v3310_v56, 16 }
  0xb4   : > { %v3515_v35 = vshll.u32 %v9548_v44, 16  ;;  %v3519_v0 = vshrl.u32 %v9548_v44, 16  ;;  %v1388_v43 = vld [vmem:[#allocation2 + $0x64] sm:$0xf]  ;;  %v9558_v23 = vld [vmem:[#allocation2 + $0x68] sm:$0x1] }
  0xb5   : > { %v8576_v48 = vpop.eup %8575  ;;  %11070 = vst [vmem:[#allocation3_spill] sm:$0xff] %v9558_v23  ;;  %v1427_v51 = vld [vmem:[#allocation2 + $0x68] sm:$0x1]  ;;  %v1631_v38 = vshrl.u32 %v1387_v40, 16  ;;  %v1634_v13 = vshll.u32 %v1387_v40, 16  ;;  %8583 = vrcp.f32 %v762_v54  ;;  %v3508_v34 = vrot.slane %v3506_v61, 4 }
  0xb6   : > { %v8578_v26 = vpop.eup %8577  ;;  %v3511_v4 = vrot.slane %v3509_v31, 5  ;;  %v3517_v2 = vrot.slane %v3515_v35, 5  ;;  %v3521_v7 = vrot.slane %v3519_v0, 4  ;;  %v1389_v22 = vld [vmem:[#allocation2 + $0x6c] sm:$0xf]  ;;  %v3525_v25 = vshll.u32 %v9558_v23, 16 }
  0xb7   : > { %v8580_v53 = vpop.eup %8579  ;;  %v1633_v20 = vrot.slane %v1631_v38, 4  ;;  %v1636_v63 = vrot.slane %v1634_v13, 5  ;;  %v1640_v56 = vshll.u32 %v1388_v43, 16  ;;  %v1644_v58 = vshrl.u32 %v1388_v43, 16  ;;  %v1390_v54 = vld [vmem:[#allocation2 + $0x70] sm:$0xf] }
  0xb8   : > { %v3512_v10 = vor.u32 %v3511_v4, %v3508_v34  ;;  %v3522_v30 = vor.u32 %v3521_v7, %v3517_v2  ;;  %v1650_v40 = vshll.u32 %v1427_v51, 16  ;;  %v3527_v12 = vrot.slane %v3525_v25, 5  ;;  %v1428_v62 = vld [vmem:[#allocation2 + $0x74] sm:$0x1] }
  0xb9   : > { %v1637_v28 = vor.u32 %v1636_v63, %v1633_v20  ;;  %v1642_v37 = vrot.slane %v1640_v56, 5  ;;  %v1655_v11 = vshrl.u32 %v1389_v22, 16  ;;  %v1646_v35 = vrot.slane %v1644_v58, 4 }
  0xba   : > { %v3513_v61 = vrot.slane %v3512_v10, 4  ;;  %v3523_v31 = vrot.slane %v3522_v30, 4  ;;  %v1652_v0 = vrot.slane %v1650_v40, 5  ;;  %v1658_v23 = vshll.u32 %v1389_v22, 16 }
  0xbb   : > { %v1638_v44 = vrot.slane %v1637_v28, 4  ;;  %v1657_v49 = vrot.slane %v1655_v11, 4  ;;  %v1664_v38 = vshll.u32 %v1390_v54, 16  ;;  %v1647_v51 = vor.u32 %v1646_v35, %v1642_v37 }
  0xbc   : > { %v3518_v13 = vsel %vm8863_vm2, %v3513_v61, %v3517_v2  ;;  %v3528_v43 = vsel %vm8863_vm2, %v3523_v31, %v3527_v12  ;;  %v1668_v34 = vshrl.u32 %v1390_v54, 16  ;;  %v8582_v4 = vpop.eup %8581  ;;  %v1660_v10 = vrot.slane %v1658_v23, 5  ;;  %v4047_v31 = vld [vmem:[#allocation2 + $0x3c] sm:$0xe] }
  0xbd   : > { %v6903_v7 = vcombine.low %v3518_v13, %v3528_v43  ;;  %v1643_v30 = vsel %vm8863_vm2, %v1638_v44, %v1642_v37  ;;  %v1666_v58 = vrot.slane %v1664_v38, 5  ;;  %v1648_v28 = vrot.slane %v1647_v51, 4  ;;  %v8372_v38 = vld [vmem:[%s11031_s4 + $0x188] sm:$0xff]   ;;  %v9604_v43 = vld [vmem:[%s11028_s1] ss:$0 sm:$0xff] }
  0xbe   : > { %v1670_v25 = vrot.slane %v1668_v34, 4  ;;  %v1674_v11 = vshll.u32 %v1428_v62, 16  ;;  %v763_v22 = vadd.f32 1.0, %v9537_v33  ;;  %v1661_v2 = vor.u32 %v1660_v10, %v1657_v49 }
  0xbf   : > { %v8584_v20 = vpop.eup %8583  ;;  %7848 = vmatmul.mubr.bf16.gmra.mrb[12].mxu0 %v6903_v7  ;;  %v923_v63 = vmul.f32 %v8582_v4, %v9460_v36  ;;  %v764_v12 = vadd.f32 1.0, %v8576_v48  ;;  %v765_v56 = vadd.f32 1.0, %v8578_v26  ;;  %v1653_v40 = vsel %vm8863_vm2, %v1648_v28, %v1652_v0 }
  0xc0   : > { %v1671_v54 = vor.u32 %v1670_v25, %v1666_v58  ;;  %v1676_v61 = vrot.slane %v1674_v11, 5  ;;  %v11071_v44 = vcombine.low %v9390_v52, %v9420_v19  ;;  %8585 = vrcp.f32 %v763_v22  ;;  %v4048_v25 = vld [vmem:[#allocation2 + $0x48] sm:$0xe] }
  0xc1   : > { %v6744_v62 = vcombine.low %v1643_v30, %v1653_v40  ;;  %v1662_v23 = vrot.slane %v1661_v2, 4  ;;  %v924_v33 = vmul.f32 %v8584_v20, %v9463_v32  ;;  %v983_v49 = vadd.f32 %v9383_v47, %v923_v63 }
  0xc2   : > { %7883 = vmatprep.mubr.bf16.mxu0 %v11071_v44  ;;  %v1672_v37 = vrot.slane %v1671_v54, 4  ;;  %v766_v36 = vadd.f32 1.0, %v8580_v53  ;;  %8587 = vrcp.f32 %v764_v12  ;;  %v9580_v48 = vadd.f32 %v9276_v14, %v9540_v16  ;;  %v9657_v44 = vld [vmem:[%s8839_s14 + $0xb0] sm:$0x1] }
  0xc3   : > { %7659 = vmatprep.mubr.bf16.mxu1 %v6744_v62  ;;  %v1667_v26 = vsel %vm8863_vm2, %v1662_v23, %v1666_v58  ;;  %v984_v52 = vadd.f32 %v9383_v47, %v924_v33  ;;  %v1059_v19 = vsel %vm1011_vm3, %v983_v49, 0.0  ;;  %8589 = vrcp.f32 %v765_v56  ;;  %v9623_v58 = vld [vmem:[%s11029_s2] ss:$0 sm:$0xff] }
  0xc4   : > { %v1677_v32 = vsel %vm8863_vm2, %v1672_v37, %v1676_v61  ;;  %8591 = vrcp.f32 %v766_v36  ;;  %v9591_v53 = vadd.f32 %v9276_v14, %v9543_v15  ;;  %v9595_v16 = vadd.f32 %v9276_v14, %v9546_v9  ;;  %v8376_v36 = vld [vmem:[%s11031_s4 + $0x198] sm:$0xff]  }
  0xc5   : > { %v6745_v35 = vcombine.low %v1667_v26, %v1677_v32  ;;  %v7283_v0 = vpack.c.bf16 %v984_v52, %v1059_v19  ;;  %v6647_v13 = vmul.f32 -1.442695, %v9580_v48  ;;  %v11072_v15 = vunpack.c.l.bf16 %v9516_v57 }
  0xc6   : > { %v6648_v14 = vmul.f32 -1.442695, %v9591_v53  ;;  %v6649_v9 = vmul.f32 -1.442695, %v9595_v16  ;;  %v11073_v34 = vunpack.c.h.bf16 %v9516_v57  ;;  %v11074_v7 = vunpack.c.l.bf16 %v9528_v27 }
  0xc7   : > { %v494_v51 = vmul.f32 %v9604_v43, %v11072_v15  ;;  %7660 = vmatmul.mubr.bf16.gmra.mrb[16].mxu1 %v6745_v35  ;;  %v11075_v10 = vcombine.low %v9449_v24, %v9427_v60  ;;  %7392 = vst [vmem:[#allocation2 + $0x78] sm:$0xff] %v7283_v0   ;;  %8593 = vpow2.f32 %v6647_v13  ;;  %v6924_v28 = vrot.slane %v4047_v31, 9 }
  0xc8   : > { %v495_v4 = vmul.f32 %v9604_v43, %v11073_v34  ;;  %v496_v30 = vmul.f32 %v9604_v43, %v11074_v7  ;;  %v4137_v27 = vrot.slane %v9287_v3, 5  ;;  %v11076_v60 = vcombine.low %v9512_v6, %v9525_v17  ;;  %v8374_v6 = vld [vmem:[%s11031_s4 + $0x190] sm:$0xff]   ;;  %v9647_v17 = vld [vmem:[%s8839_s14 + $0xa8] sm:$0xff]  }
  0xc9   : > { %7884 = vmatmul.mubr.bf16.vlgmr.msra.gmra.mrb[0].mxu0 %v11075_v10  ;;  %v9626_v57 = vadd.f32 %v9623_v58, %v494_v51  ;;  %8595 = vpow2.f32 %v6648_v14  ;;  %v4140_v22 = vrot.slane %v9330_v50, 5  ;;  %v6925_v12 = vrot.slane %v4048_v25, 9 }
  0xca   : > { %7916 = vmatpush3.bf16.msra.mxu0 %v9310_v41  ;;  %7887 = vmatprep.mubr.bf16.mxu0 %v11076_v60  ;;  %v9634_v24 = vadd.f32 %v9623_v58, %v495_v4  ;;  %v9637_v11 = vadd.f32 %v9623_v58, %v496_v30  ;;  %8597 = vpow2.f32 %v6649_v9  ;;  %v4138_v41 = vsel %vm9376_vm7, %v6924_v28, %v4137_v27  ;;  %v8586_v2 = vpop.eup %8585 }
  0xcb   : > { %7917 = vmatprep.subr.bf16.mxu0 %v8372_v38  ;;  %v6650_v3 = vmul.f32 -1.442695, %v9626_v57  ;;  %v4139_v20 = vrot.slane %v4137_v27, 4  ;;  %v4144_v56 = vrot.slane %v9366_v46, 5  ;;  %v925_v40 = vmul.f32 %v8586_v2, %v9467_v59 }
  0xcc   : > { %v6651_v63 = vmul.f32 -1.442695, %v9634_v24  ;;  %v6652_v50 = vmul.f32 -1.442695, %v9637_v11  ;;  %v4147_v61 = vrot.slane %v9380_v29, 5  ;;  %v8588_v62 = vpop.eup %8587  ;;  %v7254_v29 = vunpack.c.l.bf16 %v9647_v17 }
  0xcd   : > { %8599 = vpow2.f32 %v6650_v3  ;;  %v4141_v54 = vsel %vm9376_vm7, %v4139_v20, %v4140_v22  ;;  %v9661_v33 = vsel %vm9376_vm7, %v6925_v12, %v4144_v56  ;;  %v4146_v49 = vrot.slane %v4144_v56, 4  ;;  %v8590_v46 = vpop.eup %8589 }
  0xce   : > { %7918 = vmatpush3.bf16.msra.mxu0 %v8372_v38  ;;  %8601 = vpow2.f32 %v6651_v63  ;;  %v6956_v23 = vcombine.low %v4138_v41, %v4141_v54  ;;  %v985_v59 = vadd.f32 %v9383_v47, %v925_v40  ;;  %v926_v37 = vmul.f32 %v8588_v62, %v9479_v45  ;;  %v8592_v26 = vpop.eup %8591  ;;  %v1391_v52 = vld [vmem:[#allocation2 + $0x78] sm:$0xf]  ;;  %v1392_v19 = vld [vmem:[#allocation2 + $0x7c] sm:$0xf]  ;;  %v8384_v54 = vld [vmem:[%s11031_s4 + $0x1a8] sm:$0xff]  }
  0xcf   : > { %8603 = vpow2.f32 %v6652_v50  ;;  %7919 = vmatprep.subr.bf16.mxu0 %v8374_v6  ;;  %v927_v32 = vmul.f32 %v8590_v46, %v9484_v5  ;;  %v4148_v31 = vsel %vm9376_vm7, %v4146_v49, %v4147_v61  ;;  %v7255_v35 = vunpack.c.h.bf16 %v9647_v17  ;;  %v386_v40 = vld [vmem:[%s8839_s14 + $0xb4] sm:$0xff]  }
  0xd0   : > { %v439_v45 = vunpack.c.l.bf16 %v9657_v44  ;;  %v1061_v0 = vsel %vm1022_vm4, %v985_v59, 0.0  ;;  %v1679_v38 = vshrl.u32 %v1391_v52, 16  ;;  %v1682_v13 = vshll.u32 %v1391_v52, 16 }
  0xd1   : > { %v1688_v15 = vshll.u32 %v1392_v19, 16  ;;  %v11077_v51 = vcombine.low %v9535_v1, %v9552_v18  ;;  %v7177_v14 = vpack.c.bf16 %v1061_v0, %v1061_v0  ;;  %v1692_v9 = vshrl.u32 %v1392_v19, 16  ;;  %v8594_v4 = vpop.eup %8593  ;;  %v8380_v1 = vld [vmem:[%s11031_s4 + $0x1a0] sm:$0xff]  }
  0xd2   : > { %v928_v5 = vmul.f32 %v8592_v26, %v9492_v55  ;;  %v986_v34 = vadd.f32 %v9383_v47, %v926_v37  ;;  %7920 = vmatpush3.bf16.msra.mxu0 %v8374_v6  ;;  %v1681_v7 = vrot.slane %v1679_v38, 4  ;;  %v1684_v30 = vrot.slane %v1682_v13, 5 }
  0xd3   : > { %7888 = vmatmul.mubr.bf16.gmra.mrb[4].mxu0 %v11077_v51  ;;  %v9681_v10 = vrot.slane %v1688_v15, 5  ;;  %v987_v28 = vadd.f32 %v9383_v47, %v927_v32  ;;  %7921 = vmatprep.subr.bf16.mxu0 %v8376_v36  ;;  %v8596_v18 = vpop.eup %8595  ;;  %1349 = vst [vmem:[#allocation2 + $0x80] sm:$0x1] %v7177_v14  ;;  %v1694_v27 = vrot.slane %v1692_v9, 4  ;;  %v767_v60 = vadd.f32 1.0, %v8594_v4 }
  0xd4   : > { %7891 = vmatprep.mubr.bf16.mxu0 %v6956_v23  ;;  %v988_v55 = vadd.f32 %v9383_v47, %v928_v5  ;;  %v1062_v25 = vsel %vm1011_vm3, %v986_v34, 0.0  ;;  %v8598_v22 = vpop.eup %8597  ;;  %v1685_v3 = vor.u32 %v1684_v30, %v1681_v7  ;;  %v768_v6 = vadd.f32 1.0, %v8596_v18 }
  0xd5   : > { %v7178_v41 = vpack.c.bf16 %v1062_v25, %v1062_v25  ;;  %v7179_v20 = vpack.c.bf16 %v987_v28, %v987_v28  ;;  %v1695_v17 = vor.u32 %v1694_v27, %v9681_v10  ;;  %v769_v63 = vadd.f32 1.0, %v8598_v22 }
  0xd6   : > { %v1064_v2 = vsel %vm1022_vm4, %v988_v55, 0.0  ;;  %8605 = vrcp.f32 %v767_v60  ;;  %7922 = vmatpush3.bf16.msra.mxu0 %v8376_v36  ;;  %v6957_v56 = vcombine.low %v9661_v33, %v4148_v31  ;;  %v1686_v44 = vrot.slane %v1685_v3, 4  ;;  %v388_v36 = vld [vmem:[%s8839_s14 + $0xbc] sm:$0x1] }
  0xd7   : > { %v8600_v50 = vpop.eup %8599  ;;  %v7180_v12 = vpack.c.bf16 %v1064_v2, %v1064_v2  ;;  %1350 = vst [vmem:[#allocation2 + $0x84] sm:$0xf] %v7178_v41  ;;  %1351 = vst [vmem:[#allocation2 + $0x88] sm:$0xf] %v7179_v20  ;;  %8607 = vrcp.f32 %v768_v6  ;;  %7923 = vmatprep.subr.bf16.mxu0 %v8380_v1  ;;  %v497_v23 = vmul.f32 %v9604_v43, %v7254_v29  ;;  %v1696_v46 = vrot.slane %v1695_v17, 4 }
  0xd8   : > { %v8602_v61 = vpop.eup %8601  ;;  %8609 = vrcp.f32 %v769_v63  ;;  %v770_v62 = vadd.f32 1.0, %v8600_v50  ;;  %v498_v33 = vmul.f32 %v9604_v43, %v7255_v35  ;;  %v499_v37 = vmul.f32 %v9604_v43, %v439_v45  ;;  %v8388_v35 = vld [vmem:[%s11031_s4 + $0x1b0] sm:$0xff]  }
  0xd9   : > { %v8604_v49 = vpop.eup %8603  ;;  %1352 = vst [vmem:[#allocation2 + $0x8c] sm:$0x1] %v7180_v12  ;;  %v771_v59 = vadd.f32 1.0, %v8602_v61  ;;  %v9703_v52 = vadd.f32 %v9623_v58, %v497_v23  ;;  %v440_v19 = vunpack.c.l.bf16 %v386_v40  ;;  %v441_v0 = vunpack.c.h.bf16 %v386_v40 }
  0xda   : > { %v772_v26 = vadd.f32 1.0, %v8604_v49  ;;  %8611 = vrcp.f32 %v770_v62  ;;  %7924 = vmatpush3.bf16.msra.mxu0 %v8380_v1  ;;  %v1429_v32 = vld [vmem:[#allocation2 + $0x80] sm:$0x1]  ;;  %v9706_v29 = vadd.f32 %v9623_v58, %v498_v33  ;;  %v9709_v31 = vadd.f32 %v9623_v58, %v499_v37 }
  0xdb   : > { %7892 = vmatmul.mubr.bf16.gmra.mrb[8].mxu0 %v6957_v56  ;;  %8613 = vrcp.f32 %v771_v59  ;;  %7925 = vmatprep.subr.bf16.mxu0 %v8384_v54  ;;  %v1698_v45 = vshll.u32 %v1429_v32, 16  ;;  %v6653_v38 = vmul.f32 -1.442695, %v9703_v52  ;;  %v442_v13 = vunpack.c.l.bf16 %v388_v36 }
  0xdc   : > { %8615 = vrcp.f32 %v772_v26  ;;  %v6654_v15 = vmul.f32 -1.442695, %v9706_v29  ;;  %v6655_v51 = vmul.f32 -1.442695, %v9709_v31  ;;  %v500_v14 = vmul.f32 %v9604_v43, %v440_v19 }
  0xdd   : > { %v501_v9 = vmul.f32 %v9604_v43, %v441_v0  ;;  %v1691_v5 = vsel %vm8863_vm2, %v1686_v44, %v9681_v10  ;;  %v1700_v34 = vrot.slane %v1698_v45, 5  ;;  %8617 = vpow2.f32 %v6653_v38  ;;  %v8392_v10 = vld [vmem:[%s11031_s4 + $0x1b8] sm:$0xff]  }
  0xde   : > { %v9722_v4 = vld [vmem:[#allocation2 + $0x84] sm:$0xf]  ;;  %v9724_v7 = vld [vmem:[#allocation2 + $0x88] sm:$0xf]  ;;  %v502_v30 = vmul.f32 %v9604_v43, %v442_v13  ;;  %7926 = vmatpush3.bf16.msra.mxu0 %v8384_v54  ;;  %8619 = vpow2.f32 %v6654_v15  ;;  %v9737_v22 = vadd.f32 %v9623_v58, %v500_v14  ;;  %v4049_v13 = vld [vmem:[#allocation2 + $0x54] sm:$0xe] }
  0xdf   : > { %v1703_v28 = vshrl.u32 %v9722_v4, 16  ;;  %v1706_v1 = vshll.u32 %v9722_v4, 16  ;;  %v1712_v18 = vshll.u32 %v9724_v7, 16  ;;  %v1716_v27 = vshrl.u32 %v9724_v7, 16  ;;  %7927 = vmatprep.subr.bf16.mxu0 %v8388_v35  ;;  %v9747_v54 = vld [vmem:[%s11031_s4 + $0x1c0] sm:$0xff]  }
  0xe0   : > { %v8606_v55 = vpop.eup %8605  ;;  %v1701_v25 = vsel %vm8863_vm2, %v1696_v46, %v1700_v34  ;;  %v1430_v60 = vld [vmem:[#allocation2 + $0x8c] sm:$0x1]  ;;  %v9740_v3 = vadd.f32 %v9623_v58, %v501_v9  ;;  %8621 = vpow2.f32 %v6655_v51  ;;  %v9751_v62 = vadd.f32 %v9623_v58, %v502_v30  ;;  %v9771_v14 = vld [vmem:[%s9002_s13] ss:$0 sm:$0xff] }
  0xe1   : > { %v8608_v41 = vpop.eup %8607  ;;  %v6746_v20 = vcombine.low %v1691_v5, %v1701_v25  ;;  %v1705_v6 = vrot.slane %v1703_v28, 4  ;;  %v1708_v17 = vrot.slane %v1706_v1, 5  ;;  %v1714_v2 = vrot.slane %v1712_v18, 5 }
  0xe2   : > { %v8610_v63 = vpop.eup %8609  ;;  %v1718_v50 = vrot.slane %v1716_v27, 4  ;;  %v1722_v12 = vshll.u32 %v1430_v60, 16  ;;  %v929_v56 = vmul.f32 %v8606_v55, %v9580_v48  ;;  %v930_v40 = vmul.f32 %v8608_v41, %v9591_v53  ;;  %7928 = vmatpush3.bf16.msra.mxu0 %v8388_v35  ;;  %v4050_v55 = vld [vmem:[#allocation2 + $0x60] sm:$0xe] }
  0xe3   : > { %7663 = vmatprep.mubr.bf16.mxu1 %v6746_v20  ;;  %v1709_v61 = vor.u32 %v1708_v17, %v1705_v6  ;;  %v931_v44 = vmul.f32 %v8610_v63, %v9595_v16  ;;  %7929 = vmatprep.subr.bf16.mxu0 %v8392_v10  ;;  %v6656_v16 = vmul.f32 -1.442695, %v9737_v22  ;;  %v6657_v35 = vmul.f32 -1.442695, %v9740_v3  ;;  %v11078_v6 = vld [vmem:[#allocation5_spill] sm:$0xff] }
  0xe4   : > { %v8612_v23 = vpop.eup %8611  ;;  %v1719_v49 = vor.u32 %v1718_v50, %v1714_v2  ;;  %v1724_v48 = vrot.slane %v1722_v12, 5  ;;  %v989_v53 = vadd.f32 %v9383_v47, %v929_v56  ;;  %v990_v46 = vadd.f32 %v9383_v47, %v930_v40  ;;  %v4051_v50 = vld [vmem:[#allocation2 + $0x6c] sm:$0xe]  ;;  %v11080_v40 = vld [vmem:[#allocation4_spill] sm:$0xff] }
  0xe5   : > { %v8614_v59 = vpop.eup %8613  ;;  %v1710_v33 = vrot.slane %v1709_v61, 4  ;;  %v991_v37 = vadd.f32 %v9383_v47, %v931_v44  ;;  %v932_v36 = vmul.f32 %v8612_v23, %v9626_v57  ;;  %8623 = vpow2.f32 %v6656_v16  ;;  %v9784_v44 = vld [vmem:[#allocation2 + $0x70] sm:$0xf]  ;;  %v9786_v23 = vld [vmem:[#allocation2 + $0x74] sm:$0x1] }
  0xe6   : > { %v8616_v26 = vpop.eup %8615  ;;  %v1720_v19 = vrot.slane %v1719_v49, 4  ;;  %v1065_v32 = vsel %vm1011_vm3, %v989_v53, 0.0  ;;  %v933_v0 = vmul.f32 %v8614_v59, %v9634_v24  ;;  %7930 = vmatpush3.bf16.msra.mxu0 %v8392_v10  ;;  %v6658_v27 = vmul.f32 -1.442695, %v9751_v62  ;;  %v11081_v53 = vld [vmem:[#allocation3_spill] sm:$0xff] }
  0xe7   : > { %v1715_v45 = vsel %vm8863_vm2, %v1710_v33, %v1714_v2  ;;  %v1067_v47 = vsel %vm1022_vm4, %v991_v37, 0.0  ;;  %v7288_v57 = vpack.c.bf16 %v990_v46, %v1065_v32  ;;  %v934_v38 = vmul.f32 %v8616_v26, %v9637_v11  ;;  %7963 = vmatprep.subr.bf16.mxu0 %v9747_v54  ;;  %v8618_v15 = vpop.eup %8617  ;;  %v11079_v2 = vld [vmem:[#allocation6_spill] sm:$0xff] }
  0xe8   : > { %v1725_v51 = vsel %vm8863_vm2, %v1720_v19, %v1724_v48  ;;  %v7183_v24 = vpack.c.bf16 %v1067_v47, %v1067_v47  ;;  %v992_v9 = vadd.f32 %v9771_v14, %v932_v36  ;;  %v993_v5 = vadd.f32 %v9771_v14, %v933_v0  ;;  %v8620_v11 = vpop.eup %8619 }
  0xe9   : > { %v6747_v34 = vcombine.low %v1715_v45, %v1725_v51  ;;  %7393 = vst [vmem:[#allocation2 + $0x90] sm:$0xff] %v7288_v57   ;;  %v994_v30 = vadd.f32 %v9771_v14, %v934_v38  ;;  %v773_v28 = vadd.f32 1.0, %v8618_v15  ;;  %v6926_v10 = vrot.slane %v4049_v13, 9 }
  0xea   : > { %1355 = vst [vmem:[#allocation2 + $0x98] sm:$0x1] %v7183_v24  ;;  %v1068_v1 = vsel %vm1011_vm3, %v992_v9, 0.0  ;;  %v7185_v18 = vpack.c.bf16 %v993_v5, %v993_v5  ;;  %v774_v41 = vadd.f32 1.0, %v8620_v11  ;;  %v4151_v17 = vrot.slane %v11078_v6, 5  ;;  %v8622_v12 = vpop.eup %8621 }
  0xeb   : > { %7664 = vmatmul.mubr.bf16.gmra.mrb[20].mxu1 %v6747_v34  ;;  %v1070_v25 = vsel %vm1022_vm4, %v994_v30, 0.0  ;;  %v7184_v60 = vpack.c.bf16 %v1068_v1, %v1068_v1  ;;  %8625 = vrcp.f32 %v773_v28  ;;  %v4154_v63 = vrot.slane %v11079_v2, 5 }
  0xec   : > { %v7186_v20 = vpack.c.bf16 %v1070_v25, %v1070_v25  ;;  %1357 = vst [vmem:[#allocation2 + $0xa0] sm:$0xf] %v7185_v18  ;;  %8627 = vpow2.f32 %v6657_v35  ;;  %v6927_v56 = vrot.slane %v4050_v55, 9  ;;  %v4158_v61 = vrot.slane %v11080_v40, 5 }
  0xed   : > { %1356 = vst [vmem:[#allocation2 + $0x9c] sm:$0xf] %v7184_v60  ;;  %8629 = vrcp.f32 %v774_v41  ;;  %v775_v49 = vadd.f32 1.0, %v8622_v12  ;;  %v4153_v48 = vrot.slane %v4151_v17, 4  ;;  %v4161_v46 = vrot.slane %v11081_v53, 5 }
  0xee   : > { %1358 = vst [vmem:[#allocation2 + $0xa4] sm:$0x1] %v7186_v20  ;;  %8631 = vpow2.f32 %v6658_v27  ;;  %v4152_v59 = vsel %vm9376_vm7, %v6926_v10, %v4151_v17  ;;  %v9793_v33 = vsel %vm9376_vm7, %v6927_v56, %v4158_v61  ;;  %v4160_v37 = vrot.slane %v4158_v61, 4 }
  0xef   : > { %v6928_v36 = vrot.slane %v4051_v50, 9  ;;  %8633 = vrcp.f32 %v775_v49  ;;  %v4155_v19 = vsel %vm9376_vm7, %v4153_v48, %v4154_v63  ;;  %v4165_v32 = vrot.slane %v9784_v44, 5  ;;  %v8624_v9 = vpop.eup %8623 }
  0xf0   : > { %v9795_v16 = vld [vmem:[#allocation2 + $0x90] sm:$0xf]  ;;  %v9797_v26 = vld [vmem:[#allocation2 + $0x94] sm:$0xf]  ;;  %v4168_v0 = vrot.slane %v9786_v23, 5  ;;  %v6958_v15 = vcombine.low %v4152_v59, %v4155_v19  ;;  %v4162_v51 = vsel %vm9376_vm7, %v4160_v37, %v4161_v46  ;;  %v776_v55 = vadd.f32 1.0, %v8624_v9 }
  0xf1   : > { %v1431_v35 = vld [vmem:[#allocation2 + $0x98] sm:$0x1]  ;;  %v1727_v45 = vshrl.u32 %v9795_v16, 16  ;;  %v1730_v47 = vshll.u32 %v9795_v16, 16  ;;  %v1736_v57 = vshll.u32 %v9797_v26, 16  ;;  %v1740_v38 = vshrl.u32 %v9797_v26, 16 }
  0xf2   : > { %v1746_v13 = vshll.u32 %v1431_v35, 16  ;;  %v9813_v24 = vsel %vm9376_vm7, %v6928_v36, %v4165_v32  ;;  %7895 = vmatprep.mubr.bf16.mxu0 %v6958_v15  ;;  %8635 = vrcp.f32 %v776_v55  ;;  %v3323_v23 = vld [vmem:[#allocation2 + $0x94] sm:$0xf] }
  0xf3   : > { %v1729_v5 = vrot.slane %v1727_v45, 4  ;;  %v1732_v34 = vrot.slane %v1730_v47, 5  ;;  %v1738_v30 = vrot.slane %v1736_v57, 5  ;;  %v1742_v28 = vrot.slane %v1740_v38, 4  ;;  %v9815_v11 = vld [vmem:[#allocation2 + $0xa0] sm:$0xf] }
  0xf4   : > { %v1748_v1 = vrot.slane %v1746_v13, 5  ;;  %v9817_v18 = vld [vmem:[#allocation2 + $0x9c] sm:$0xf]  ;;  %v1760_v27 = vshll.u32 %v9815_v11, 16  ;;  %v1764_v10 = vshrl.u32 %v9815_v11, 16 }
  0xf5   : > { %v8626_v25 = vpop.eup %8625  ;;  %v1733_v60 = vor.u32 %v1732_v34, %v1729_v5  ;;  %v1743_v41 = vor.u32 %v1742_v28, %v1738_v30  ;;  %v1432_v20 = vld [vmem:[#allocation2 + $0xa4] sm:$0x1]  ;;  %v1751_v6 = vshrl.u32 %v9817_v18, 16  ;;  %v1754_v17 = vshll.u32 %v9817_v18, 16 }
  0xf6   : > { %v8628_v2 = vpop.eup %8627  ;;  %v1762_v63 = vrot.slane %v1760_v27, 5  ;;  %v1766_v50 = vrot.slane %v1764_v10, 4  ;;  %v1770_v12 = vshll.u32 %v1432_v20, 16  ;;  %v935_v56 = vmul.f32 %v8626_v25, %v9703_v52  ;;  %v9837_v27 = vld [vmem:[#allocation2 + $0x7c] sm:$0xf] }
  0xf7   : > { %v8630_v40 = vpop.eup %8629  ;;  %v1734_v61 = vrot.slane %v1733_v60, 4  ;;  %v1744_v49 = vrot.slane %v1743_v41, 4  ;;  %v1753_v48 = vrot.slane %v1751_v6, 4  ;;  %v1756_v53 = vrot.slane %v1754_v17, 5  ;;  %v4052_v10 = vld [vmem:[#allocation2 + $0x78] sm:$0xe] }
  0xf8   : > { %v8632_v46 = vpop.eup %8631  ;;  %v1767_v59 = vor.u32 %v1766_v50, %v1762_v63  ;;  %v1772_v37 = vrot.slane %v1770_v12, 5  ;;  %v936_v36 = vmul.f32 %v8630_v40, %v9706_v29  ;;  %v995_v19 = vadd.f32 %v9771_v14, %v935_v56  ;;  %v9844_v41 = vld [vmem:[#allocation2 + $0x80] sm:$0x1]  ;;  %v4053_v20 = vld [vmem:[#allocation2 + $0x84] sm:$0xe] }
  0xf9   : > { %v1739_v35 = vsel %vm8863_vm2, %v1734_v61, %v1738_v30  ;;  %v1749_v45 = vsel %vm8863_vm2, %v1744_v49, %v1748_v1  ;;  %v1757_v47 = vor.u32 %v1756_v53, %v1753_v48  ;;  %v777_v52 = vadd.f32 1.0, %v8628_v2  ;;  %v8634_v57 = vpop.eup %8633  ;;  %v3320_v2 = vld [vmem:[#allocation2 + $0x88] sm:$0xf]  ;;  %v4054_v50 = vld [vmem:[#allocation2 + $0x90] sm:$0xe] }
  0xfa   : > { %v6748_v38 = vcombine.low %v1739_v35, %v1749_v45  ;;  %v1768_v13 = vrot.slane %v1767_v59, 4  ;;  %v996_v15 = vadd.f32 %v9771_v14, %v936_v36  ;;  %v1071_v9 = vsel %vm1011_vm3, %v995_v19, 0.0  ;;  %v3324_v61 = vld [vmem:[#allocation2 + $0x98] sm:$0x1] }
  0xfb   : > { %v1758_v5 = vrot.slane %v1757_v47, 4  ;;  %v937_v29 = vmul.f32 %v8634_v57, %v9709_v31  ;;  %v778_v34 = vadd.f32 1.0, %v8632_v46  ;;  %8637 = vrcp.f32 %v777_v52 }
  0xfc   : > { %7667 = vmatprep.mubr.bf16.mxu1 %v6748_v38  ;;  %v1773_v30 = vsel %vm8863_vm2, %v1768_v13, %v1772_v37  ;;  %v7293_v28 = vpack.c.bf16 %v996_v15, %v1071_v9  ;;  %v6959_v1 = vcombine.low %v9793_v33, %v4162_v51  ;;  %v4167_v31 = vrot.slane %v4165_v32, 4  ;;  %v8636_v37 = vpop.eup %8635 }
  0xfd   : > { %v1763_v25 = vsel %vm8863_vm2, %v1758_v5, %v1762_v63  ;;  %v997_v60 = vadd.f32 %v9771_v14, %v937_v29  ;;  %8639 = vrcp.f32 %v778_v34  ;;  %v6929_v6 = vrot.slane %v4052_v10, 9  ;;  %v3321_v63 = vld [vmem:[#allocation2 + $0x8c] sm:$0x1] }
  0xfe   : > { %v6749_v55 = vcombine.low %v1763_v25, %v1773_v30  ;;  %7394 = vst [vmem:[#allocation2 + $0xa8] sm:$0xff] %v7293_v28   ;;  %7896 = vmatmul.mubr.bf16.gmra.mrb[12].mxu0 %v6959_v1  ;;  %v4169_v51 = vsel %vm9376_vm7, %v4167_v31, %v4168_v0  ;;  %v4172_v17 = vrot.slane %v9837_v27, 5  ;;  %v4175_v40 = vrot.slane %v9844_v41, 5 }
  0xff   : > { %v1073_v33 = vsel %vm1022_vm4, %v997_v60, 0.0  ;;  %v6960_v32 = vcombine.low %v9813_v24, %v4169_v51  ;;  %v6930_v0 = vrot.slane %v4053_v20, 9  ;;  %v4179_v48 = vrot.slane %v3320_v2, 5  ;;  %v4055_v60 = vld [vmem:[#allocation2 + $0x9c] sm:$0xe] }
 0x100   : > { %7668 = vmatmul.mubr.bf16.gmra.mrb[24].mxu1 %v6749_v55  ;;  %v7189_v44 = vpack.c.bf16 %v1073_v33, %v1073_v33  ;;  %v4173_v12 = vsel %vm9376_vm7, %v6929_v6, %v4172_v17  ;;  %v4174_v56 = vrot.slane %v4172_v17, 4  ;;  %v4182_v53 = vrot.slane %v3321_v63, 5 }
 0x101   : > { %7899 = vmatprep.mubr.bf16.mxu0 %v6960_v32  ;;  %v6931_v24 = vrot.slane %v4054_v50, 9  ;;  %v4186_v59 = vrot.slane %v3323_v23, 5  ;;  %v4180_v35 = vsel %vm9376_vm7, %v6930_v0, %v4179_v48  ;;  %v4181_v45 = vrot.slane %v4179_v48, 4  ;;  %v3327_v32 = vld [vmem:[#allocation2 + $0xa4] sm:$0x1] }
 0x102   : > { %1361 = vst [vmem:[#allocation2 + $0xb0] sm:$0x1] %v7189_v44  ;;  %v4176_v49 = vsel %vm9376_vm7, %v4174_v56, %v4175_v40  ;;  %v4189_v47 = vrot.slane %v3324_v61, 5  ;;  %v938_v5 = vmul.f32 %v8636_v37, %v9737_v22  ;;  %v3326_v44 = vld [vmem:[#allocation2 + $0xa0] sm:$0xf] }
 0x103   : > { %v6961_v46 = vcombine.low %v4173_v12, %v4176_v49  ;;  %v4183_v34 = vsel %vm9376_vm7, %v4181_v45, %v4182_v53  ;;  %v4187_v30 = vsel %vm9376_vm7, %v6931_v24, %v4186_v59  ;;  %v4188_v17 = vrot.slane %v4186_v59, 4 }
 0x104   : > { %v998_v20 = vadd.f32 %v9771_v14, %v938_v5  ;;  %v6962_v33 = vcombine.low %v4180_v35, %v4183_v34  ;;  %v6932_v12 = vrot.slane %v4055_v60, 9  ;;  %v4193_v53 = vrot.slane %v3326_v44, 5 }
 0x105   : > { %v9859_v36 = vld [vmem:[#allocation2 + $0xa8] sm:$0xf]  ;;  %v9861_v19 = vld [vmem:[#allocation2 + $0xac] sm:$0xf]  ;;  %v8638_v52 = vpop.eup %8637  ;;  %v4190_v48 = vsel %vm9376_vm7, %v4188_v17, %v4189_v47  ;;  %v4196_v24 = vrot.slane %v3327_v32, 5 }
 0x106   : > { %v1775_v57 = vshrl.u32 %v9859_v36, 16  ;;  %v1778_v38 = vshll.u32 %v9859_v36, 16  ;;  %v1784_v13 = vshll.u32 %v9861_v19, 16  ;;  %v1788_v15 = vshrl.u32 %v9861_v19, 16  ;;  %7900 = vmatmul.mubr.bf16.gmra.mrb[16].mxu0 %v6961_v46  ;;  %v4056_v61 = vld [vmem:[#allocation2 + $0xa8] sm:$0xe] }
 0x107   : > { %v8640_v9 = vpop.eup %8639  ;;  %v939_v29 = vmul.f32 %v8638_v52, %v9740_v3  ;;  %v1074_v63 = vsel %vm1011_vm3, %v998_v20, 0.0  ;;  %7903 = vmatprep.mubr.bf16.mxu0 %v6962_v33  ;;  %v6963_v45 = vcombine.low %v4187_v30, %v4190_v48  ;;  %v7387_v52 = vld [vmem:[%s8839_s14 + $0xc0] sm:$0xff]   ;;  %v6933_v47 = vrot.slane %v4056_v61, 9 }
 0x108   : > { %v1777_v28 = vrot.slane %v1775_v57, 4  ;;  %v1780_v1 = vrot.slane %v1778_v38, 5  ;;  %v1786_v10 = vrot.slane %v1784_v13, 5  ;;  %v1790_v25 = vrot.slane %v1788_v15, 4  ;;  %v391_v57 = vld [vmem:[%s8839_s14 + $0xc8] sm:$0x1] }
 0x109   : > { %v1433_v31 = vld [vmem:[#allocation2 + $0xb0] sm:$0x1]  ;;  %v940_v55 = vmul.f32 %v8640_v9, %v9751_v62  ;;  %v999_v22 = vadd.f32 %v9771_v14, %v939_v29  ;;  %v3329_v62 = vld [vmem:[#allocation2 + $0xac] sm:$0xf]  ;;  %v7190_v0 = vpack.c.bf16 %v1074_v63, %v1074_v63  ;;  %v4194_v13 = vsel %vm9376_vm7, %v6932_v12, %v4193_v53  ;;  %s7147_s14 = sshll.u32 %s11128_s28, 7 }
 0x10a   : > { %v1781_v3 = vor.u32 %v1780_v1, %v1777_v28  ;;  %v1791_v51 = vor.u32 %v1790_v25, %v1786_v10  ;;  %v1794_v6 = vshll.u32 %v1433_v31, 16  ;;  %v3330_v46 = vld [vmem:[#allocation2 + $0xb0] sm:$0x1]  ;;  %v4195_v15 = vrot.slane %v4193_v53, 4  ;;  %s10962_s18 = scalar_lea.vmem %s11033_s6, %s7147_s14 }
 0x10b   : > { %v1000_v2 = vadd.f32 %v9771_v14, %v940_v55  ;;  %v7191_v50 = vpack.c.bf16 %v999_v22, %v999_v22  ;;  %1362 = vst [vmem:[#allocation2 + $0xb4] sm:$0xf] %v7190_v0  ;;  %v4200_v9 = vrot.slane %v3329_v62, 5  ;;  %v4203_v5 = vrot.slane %v3330_v46, 5 }
 0x10c   : > { %v1782_v56 = vrot.slane %v1781_v3, 4  ;;  %v1792_v40 = vrot.slane %v1791_v51, 4  ;;  %v1796_v23 = vrot.slane %v1794_v6, 5  ;;  %v4197_v29 = vsel %vm9376_vm7, %v4195_v15, %v4196_v24 }
 0x10d   : > { %v1076_v49 = vsel %vm1022_vm4, %v1000_v2, 0.0  ;;  %1363 = vst [vmem:[#allocation2 + $0xb8] sm:$0xf] %v7191_v50  ;;  %v7258_v34 = vunpack.c.l.bf16 %v7387_v52  ;;  %v7259_v28 = vunpack.c.h.bf16 %v7387_v52  ;;  %v445_v1 = vunpack.c.l.bf16 %v391_v57 }
 0x10e   : > { %v1787_v59 = vsel %vm8863_vm2, %v1782_v56, %v1786_v10  ;;  %v1797_v37 = vsel %vm8863_vm2, %v1792_v40, %v1796_v23  ;;  %v7192_v35 = vpack.c.bf16 %v1076_v49, %v1076_v49  ;;  %7904 = vmatmul.mubr.bf16.gmra.mrb[20].mxu0 %v6963_v45  ;;  %v6964_v30 = vcombine.low %v4194_v13, %v4197_v29  ;;  %v9933_v29 = vld [vmem:[#allocation2 + $0x4] sm:$0xf] }
 0x10f   : > { %v6750_v38 = vcombine.low %v1787_v59, %v1797_v37  ;;  %v4201_v10 = vsel %vm9376_vm7, %v6933_v47, %v4200_v9  ;;  %v4202_v25 = vrot.slane %v4200_v9, 4  ;;  %v503_v60 = vmul.f32 %v9604_v43, %v7258_v34 }
 0x110   : > { %1364 = vst [vmem:[#allocation2 + $0xbc] sm:$0x1] %v7192_v35  ;;  %v504_v31 = vmul.f32 %v9604_v43, %v7259_v28  ;;  %v505_v55 = vmul.f32 %v9604_v43, %v445_v1  ;;  %7907 = vmatprep.mubr.bf16.mxu0 %v6964_v30  ;;  %v8661_v30 = vld [vmem:[#allocation2 + $0xc] sm:$0xf] }
 0x111   : > { %7671 = vmatprep.mubr.bf16.mxu1 %v6750_v38  ;;  %v4204_v22 = vsel %vm9376_vm7, %v4202_v25, %v4203_v5  ;;  %v9909_v32 = vadd.f32 %v9623_v58, %v503_v60  ;;  %v8659_v5 = vld [vmem:[#allocation2] sm:$0xf] }
 0x112   : > { %v9904_v3 = vld [vmem:[#allocation2 + $0xb4] sm:$0xf]  ;;  %v6965_v17 = vcombine.low %v4201_v10, %v4204_v22  ;;  %v9916_v23 = vadd.f32 %v9623_v58, %v504_v31  ;;  %v9919_v0 = vadd.f32 %v9623_v58, %v505_v55  ;;  %v6760_v34 = vcombine.low %v8659_v5, %v9933_v29  ;;  %v9936_v10 = vld [vmem:[#allocation2 + $0x10] sm:$0xf]  ;;  %v8663_v31 = vld [vmem:[#allocation2 + $0x18] sm:$0xf] }
 0x113   : > { %v4057_v44 = vld [vmem:[#allocation2 + $0xb4] sm:$0xe]  ;;  %v1799_v43 = vshrl.u32 %v9904_v3, 16  ;;  %v1802_v2 = vshll.u32 %v9904_v3, 16  ;;  %v6659_v37 = vmul.f32 -1.442695, %v9909_v32  ;;  %v6761_v25 = vcombine.low %v8661_v30, %v9936_v10 }
 0x114   : > { %v9900_v20 = vld [vmem:[#allocation2 + $0xb8] sm:$0xf]  ;;  %v6934_v63 = vrot.slane %v4057_v44, 9  ;;  %v6660_v52 = vmul.f32 -1.442695, %v9916_v23 }
 0x115   : > { %v3332_v33 = vld [vmem:[#allocation2 + $0xb8] sm:$0xf]  ;;  %v1808_v51 = vshll.u32 %v9900_v20, 16  ;;  %v1812_v6 = vshrl.u32 %v9900_v20, 16  ;;  %v1801_v61 = vrot.slane %v1799_v43, 4  ;;  %v1804_v49 = vrot.slane %v1802_v2, 5 }
 0x116   : > { %v4207_v50 = vrot.slane %v3332_v33, 5  ;;  %7908 = vmatmul.mubr.bf16.gmra.mrb[24].mxu0 %v6965_v17  ;;  %v6661_v58 = vmul.f32 -1.442695, %v9919_v0  ;;  %8641 = vpow2.f32 %v6659_v37  ;;  %v9939_v55 = vld [vmem:[#allocation2 + $0x1c] sm:$0xf]  ;;  %v8665_v43 = vld [vmem:[%s11031_s4 + $0x80] sm:$0xff]  }
 0x117   : > { %v9913_v12 = vld [vmem:[#allocation2 + $0xbc] sm:$0x1]  ;;  %v1810_v62 = vrot.slane %v1808_v51, 5  ;;  %v1814_v56 = vrot.slane %v1812_v6, 4  ;;  %v1805_v35 = vor.u32 %v1804_v49, %v1801_v61  ;;  %8643 = vpow2.f32 %v6660_v52  ;;  %v8383_v6 = vld [vmem:[%s11031_s4 + $0x88] sm:$0xff]   ;;  %v8387_v2 = vld [vmem:[%s11031_s4 + $0x90] sm:$0xff]  }
 0x118   : > { %v3333_v40 = vld [vmem:[#allocation2 + $0xbc] sm:$0x1]  ;;  %v1818_v48 = vshll.u32 %v9913_v12, 16  ;;  %v4208_v53 = vsel %vm9376_vm7, %v6934_v63, %v4207_v50  ;;  %v4209_v46 = vrot.slane %v4207_v50, 4  ;;  %8645 = vpow2.f32 %v6661_v58  ;;  %v8666_v63 = vld [vmem:[#allocation2 + $0x24] sm:$0xf] }
 0x119   : > { %v1815_v24 = vor.u32 %v1814_v56, %v1810_v62  ;;  %v4210_v59 = vrot.slane %v3333_v40, 5  ;;  %v1806_v13 = vrot.slane %v1805_v35, 4  ;;  %v6762_v22 = vcombine.low %v8663_v31, %v9939_v55  ;;  %v9951_v50 = vld [vmem:[#allocation2 + $0x28] sm:$0xf]  ;;  %v8668_v56 = vld [vmem:[#allocation2 + $0x30] sm:$0xf] }
 0x11a   : > { %v1820_v45 = vrot.slane %v1818_v48, 5  ;;  %v9954_v40 = vld [vmem:[#allocation2 + $0x34] sm:$0xf]  ;;  %v8391_v49 = vld [vmem:[%s11031_s4 + $0x98] sm:$0xff]   ;;  %v8676_v30 = vld [vmem:[#allocation2 + $0x60] sm:$0xf] }
 0x11b   : > { %v1816_v57 = vrot.slane %v1815_v24, 4  ;;  %v4211_v38 = vsel %vm9376_vm7, %v4209_v46, %v4210_v59  ;;  %v1811_v9 = vsel %vm8863_vm2, %v1806_v13, %v1810_v62  ;;  %v6763_v62 = vcombine.low %v8666_v63, %v9951_v50  ;;  %v8395_v46 = vld [vmem:[%s11031_s4 + $0xa0] sm:$0xff]   ;;  %v8670_v35 = vld [vmem:[#allocation2 + $0x3c] sm:$0xf]  ;;  %v9970_v13 = vld [vmem:[#allocation2 + $0x4c] sm:$0xf] }
 0x11c   : > { %v6966_v15 = vcombine.low %v4208_v53, %v4211_v38  ;;  %v6764_v61 = vcombine.low %v8668_v56, %v9954_v40  ;;  %v8672_v38 = vld [vmem:[#allocation2 + $0x48] sm:$0xf]  ;;  %v8413_v31 = vld [vmem:[%s11031_s4 + $0xb8] sm:$0xff]  }
 0x11d   : > { %v1821_v47 = vsel %vm8863_vm2, %v1816_v57, %v1820_v45  ;;  %v9965_v45 = vld [vmem:[#allocation2 + $0x40] sm:$0xf] }
 0x11e   : > { %7911 = vmatprep.mubr.bf16.mxu0 %v6966_v15  ;;  %v6751_v28 = vcombine.low %v1811_v9, %v1821_v47  ;;  %v6765_v52 = vcombine.low %v8670_v35, %v9965_v45  ;;  %v10013_v35 = vld [vmem:[#allocation2 + $0x7c] sm:$0xf] }
 0x120   : > { %7672 = vmatmul.mubr.bf16.gmra.mrb[28].mxu1 %v6751_v28  ;;  %v8642_v1 = vpop.eup %8641  ;;  %v9985_v28 = vld [vmem:[#allocation2 + $0x58] sm:$0xf] }
 0x121   : > { %7691 = vmatprep.mubr.bf16.mxu1 %v6760_v34  ;;  %v8644_v60 = vpop.eup %8643  ;;  %v779_v33 = vadd.f32 1.0, %v8642_v1 }
 0x122   : > { %v8646_v51 = vpop.eup %8645  ;;  %v780_v17 = vadd.f32 1.0, %v8644_v60  ;;  %v3563_v60 = vshll.u32 %v9837_v27, 16 }
 0x123   : > { %v781_v44 = vadd.f32 1.0, %v8646_v51  ;;  %8647 = vrcp.f32 %v779_v33  ;;  %v2417_v33 = vld [vmem:[#allocation2] sm:$0xe] }
 0x124   : > { %8649 = vrcp.f32 %v780_v17  ;;  %v2418_v17 = vld [vmem:[#allocation2 + $0xc] sm:$0xe]  ;;  %v9997_v63 = vrot.slane %v3563_v60, 5  ;;  %v2421_v60 = vld [vmem:[#allocation2 + $0x30] sm:$0xe] }
 0x125   : > { %8651 = vrcp.f32 %v781_v44 }
 0x128   : > { %7692 = vmatmul.mubr.bf16.vlgmr.msra.gmra.mrb[0].mxu1 %v6761_v25  ;;  %v9988_v25 = vld [vmem:[#allocation2 + $0x64] sm:$0xf] }
 0x129   : > { %7724 = vmatpush3.bf16.msra.mxu1 %v8665_v43  ;;  %7695 = vmatprep.mubr.bf16.mxu1 %v6762_v22  ;;  %v6768_v42 = vcombine.low %v8676_v30, %v9988_v25  ;;  %v3567_v22 = vshrl.u32 %v9837_v27, 16  ;;  %v10004_v27 = vld [vmem:[%s11031_s4 + $0xc0] sm:$0xff]  }
 0x12a   : > { %7725 = vmatprep.subr.bf16.mxu1 %v8383_v6 }
 0x12d   : > { %7726 = vmatpush3.bf16.msra.mxu1 %v8383_v6  ;;  %v8648_v48 = vpop.eup %8647 }
 0x12e   : > { %7727 = vmatprep.subr.bf16.mxu1 %v8387_v2  ;;  %v8650_v53 = vpop.eup %8649  ;;  %v941_v24 = vmul.f32 %v8648_v48, %v9909_v32  ;;  %v6766_v32 = vcombine.low %v8672_v38, %v9970_v13  ;;  %v8396_v38 = vld [vmem:[#allocation2 + $0x18] sm:$0xff]  }
 0x12f   : > { %v8652_v59 = vpop.eup %8651  ;;  %v942_v37 = vmul.f32 %v8650_v53, %v9916_v23 }
 0x130   : > { %7696 = vmatmul.mubr.bf16.gmra.mrb[4].mxu1 %v6763_v62  ;;  %v943_v58 = vmul.f32 %v8652_v59, %v9919_v0  ;;  %v1001_v57 = vadd.f32 %v9771_v14, %v941_v24  ;;  %v8401_v0 = vld [vmem:[%s11031_s4 + $0xa8] sm:$0xff]   ;;  %v3573_v62 = vshll.u32 %v9844_v41, 16  ;;  %v10010_v41 = vld [vmem:[#allocation2 + $0x70] sm:$0xf] }
 0x131   : > { %7699 = vmatprep.mubr.bf16.mxu1 %v6764_v61  ;;  %7728 = vmatpush3.bf16.msra.mxu1 %v8387_v2  ;;  %v1002_v15 = vadd.f32 %v9771_v14, %v942_v37  ;;  %v2470_v2 = vrot.slane %v9933_v29, 5  ;;  %v2477_v61 = vrot.slane %v9936_v10, 5  ;;  %v8678_v24 = vld [vmem:[#allocation2 + $0x8] sm:$0x1]  ;;  %v8679_v59 = vld [vmem:[#allocation2 + $0x6c] sm:$0xf] }
 0x132   : > { %7729 = vmatprep.subr.bf16.mxu1 %v8391_v49  ;;  %v1003_v47 = vadd.f32 %v9771_v14, %v943_v58  ;;  %v1077_v23 = vsel %vm1011_vm3, %v1001_v57, 0.0  ;;  %v8674_v14 = vld [vmem:[#allocation2 + $0x54] sm:$0xf]  ;;  %v6769_v37 = vcombine.low %v8679_v59, %v10010_v41  ;;  %v8681_v10 = vld [vmem:[#allocation2 + $0x78] sm:$0xf]  ;;  %v6784_v58 = vrot.slane %v2417_v33, 9 }
 0x133   : > { %v7298_v9 = vpack.c.bf16 %v1002_v15, %v1077_v23  ;;  %v6767_v1 = vcombine.low %v8674_v14, %v9985_v28  ;;  %v6785_v15 = vrot.slane %v2418_v17, 9  ;;  %v2484_v23 = vrot.slane %v9939_v55, 5  ;;  %v8684_v33 = vld [vmem:[#allocation2 + $0x20] sm:$0x1]  ;;  %v8685_v17 = vld [vmem:[#allocation2 + $0x2c] sm:$0x1] }
 0x134   : > { %v1079_v5 = vsel %vm1022_vm4, %v1003_v47, 0.0  ;;  %v2419_v47 = vld [vmem:[#allocation2 + $0x18] sm:$0xe]  ;;  %v2491_v14 = vrot.slane %v9951_v50, 5  ;;  %v10023_v30 = vrot.slane %v3573_v62, 5  ;;  %v2498_v55 = vrot.slane %v9954_v40, 5 }
 0x135   : > { %7730 = vmatpush3.bf16.msra.mxu1 %v8391_v49  ;;  %v7195_v34 = vpack.c.bf16 %v1079_v5, %v1079_v5  ;;  %7395 = vst [vmem:[#allocation2 + $0xc0] sm:$0xff] %v7298_v9   ;;  %v10006_v49 = vrot.slane %v3567_v22, 4  ;;  %v10032_v22 = vsel %vm9376_vm7, %v6784_v58, %v2470_v2  ;;  %v6786_v50 = vrot.slane %v2419_v47, 9  ;;  %v8403_v47 = vld [vmem:[%s11031_s4 + $0x1c8] sm:$0xff]  }
 0x136   : > { %7731 = vmatprep.subr.bf16.mxu1 %v8395_v46  ;;  %11082 = vst [vmem:[#allocation5_spill] sm:$0xff] %v10023_v30  ;;  %v2486_v40 = vrot.slane %v2484_v23, 4  ;;  %v2500_v62 = vrot.slane %v2498_v55, 4 }
 0x137   : > { %1367 = vst [vmem:[#allocation2 + $0xc8] sm:$0x1] %v7195_v34  ;;  %v2479_v34 = vrot.slane %v2477_v61, 4 }
 0x138   : > { %7700 = vmatmul.mubr.bf16.gmra.mrb[8].mxu1 %v6765_v52  ;;  %v6770_v52 = vcombine.low %v8681_v10, %v10013_v35  ;;  %v4928_v10 = vld [vmem:[#allocation2 + $0x18] sm:$0xf] }
 0x139   : > { %7703 = vmatprep.mubr.bf16.mxu1 %v6766_v32  ;;  %7732 = vmatpush3.bf16.msra.mxu1 %v8395_v46  ;;  %v2473_v46 = vrot.slane %v8678_v24, 5  ;;  %v2472_v32 = vrot.slane %v2470_v2, 4  ;;  %v6773_v2 = vcombine.low %v9817_v18, %v9815_v11  ;;  %v6774_v24 = vcombine.low %v9859_v36, %v9861_v19  ;;  %v8419_v11 = vld [vmem:[%s11031_s4 + $0x1e0] sm:$0xff]  }
 0x13a   : > { %7733 = vmatprep.subr.bf16.mxu1 %v8401_v0 }
 0x13c   : > { %v3335_v51 = vld [vmem:[#allocation2 + $0xc4] sm:$0xf]  ;;  %v4058_v6 = vld [vmem:[#allocation2 + $0xc0] sm:$0xe] }
 0x13d   : > { %7734 = vmatpush3.bf16.msra.mxu1 %v8401_v0  ;;  %v6935_v44 = vrot.slane %v4058_v6, 9  ;;  %v4214_v43 = vrot.slane %v3335_v51, 5  ;;  %v8683_v0 = vld [vmem:[#allocation2 + $0x14] sm:$0x1]  ;;  %v2487_v51 = vrot.slane %v8684_v33, 5 }
 0x13e   : > { %7735 = vmatprep.subr.bf16.mxu1 %v8407_v21  ;;  %v3336_v56 = vld [vmem:[#allocation2 + $0xc8] sm:$0x1]  ;;  %v2480_v9 = vrot.slane %v8683_v0, 5 }
 0x13f   : > { %v4215_v48 = vsel %vm9376_vm7, %v6935_v44, %v4214_v43  ;;  %v4216_v53 = vrot.slane %v4214_v43, 4  ;;  %v4217_v29 = vrot.slane %v3336_v56, 5  ;;  %v2494_v44 = vrot.slane %v8685_v17, 5  ;;  %v8686_v56 = vld [vmem:[#allocation2 + $0x38] sm:$0x1] }
 0x140   : > { %7704 = vmatmul.mubr.bf16.gmra.mrb[12].mxu1 %v6767_v1  ;;  %v6788_v43 = vrot.slane %v2421_v60, 9  ;;  %v4977_v60 = vshrl.u32 %v4928_v10, 16  ;;  %v8408_v1 = vld [vmem:[#allocation2 + $0x48] sm:$0xff]  }
 0x141   : > { %7707 = vmatprep.mubr.bf16.mxu1 %v6768_v42  ;;  %7736 = vmatpush3.bf16.msra.mxu1 %v8407_v21  ;;  %v4218_v57 = vsel %vm9376_vm7, %v4216_v53, %v4217_v29  ;;  %v2420_v21 = vld [vmem:[#allocation2 + $0x24] sm:$0xe]  ;;  %v6771_v42 = vcombine.low %v9722_v4, %v9724_v7  ;;  %v10036_v4 = vsel %vm9376_vm7, %v2472_v32, %v2473_v46  ;;  %v2422_v53 = vld [vmem:[#allocation2 + $0x3c] sm:$0xe]  ;;  %v2512_v32 = vrot.slane %v9970_v13, 5 }
 0x142   : > { %7737 = vmatprep.subr.bf16.mxu1 %v8413_v31  ;;  %v6967_v5 = vcombine.low %v4215_v48, %v4218_v57  ;;  %v10040_v7 = vsel %vm9376_vm7, %v6785_v15, %v2477_v61  ;;  %v6787_v6 = vrot.slane %v2420_v21, 9  ;;  %v2501_v48 = vrot.slane %v8686_v56, 5  ;;  %v8398_v29 = vld [vmem:[#allocation2 + $0x24] sm:$0xff]   ;;  %v4929_v15 = vld [vmem:[#allocation2 + $0x1c] sm:$0xf] }
 0x143   : > { %v2505_v61 = vrot.slane %v9965_v45, 5  ;;  %v6775_v46 = vcombine.low %v9904_v3, %v9900_v20  ;;  %v10063_v45 = vsel %vm9376_vm7, %v2486_v40, %v2487_v51  ;;  %v10079_v0 = vsel %vm9376_vm7, %v6788_v43, %v2498_v55 }
 0x144   : > { %7912 = vmatmul.mubr.bf16.gmra.mrb[28].mxu0 %v6967_v5  ;;  %v10067_v57 = vsel %vm9376_vm7, %v6787_v6, %v2491_v14  ;;  %v8687_v5 = vld [vmem:[#allocation2 + $0x44] sm:$0x1]  ;;  %v10083_v21 = vsel %vm9376_vm7, %v2500_v62, %v2501_v48  ;;  %v4986_v40 = vshll.u32 %v4929_v15, 16  ;;  %v4990_v55 = vshrl.u32 %v4929_v15, 16  ;;  %v8409_v6 = vld [vmem:[%s11031_s4 + $0x1d0] sm:$0xff]   ;;  %v8404_v15 = vld [vmem:[#allocation2 + $0x3c] sm:$0xff]  }
 0x145   : > { %7738 = vmatpush3.bf16.msra.mxu1 %v8413_v31  ;;  %v6772_v31 = vcombine.low %v9795_v16, %v9797_v26  ;;  %7931 = vmatprep.mubr.bf16.mxu0 %v8396_v38  ;;  %v10044_v16 = vsel %vm9376_vm7, %v2479_v34, %v2480_v9  ;;  %v2493_v26 = vrot.slane %v2491_v14, 4  ;;  %v2423_v38 = vld [vmem:[#allocation2 + $0x48] sm:$0xe]  ;;  %v6789_v9 = vrot.slane %v2422_v53, 9  ;;  %v2424_v14 = vld [vmem:[#allocation2 + $0x54] sm:$0xe] }
 0x146   : > { %7771 = vmatprep.subr.bf16.mxu1 %v10004_v27  ;;  %v2508_v34 = vrot.slane %v8687_v5, 5  ;;  %v2507_v13 = vrot.slane %v2505_v61, 4  ;;  %v6790_v51 = vrot.slane %v2423_v38, 9  ;;  %v2514_v17 = vrot.slane %v2512_v32, 4  ;;  %v2425_v48 = vld [vmem:[#allocation2 + $0x60] sm:$0xe] }
 0x147   : > { %v6791_v56 = vrot.slane %v2424_v14, 9  ;;  %v2526_v53 = vrot.slane %v9988_v25, 5  ;;  %v10110_v14 = vrot.slane %v4986_v40, 5  ;;  %v4992_v25 = vrot.slane %v4990_v55, 4  ;;  %v4932_v62 = vld [vmem:[#allocation2 + $0x28] sm:$0xf] }
 0x148   : > { %7708 = vmatmul.mubr.bf16.gmra.mrb[16].mxu1 %v6769_v37  ;;  %v10057_v37 = vsel %vm9376_vm7, %v6786_v50, %v2484_v23  ;;  %v10075_v23 = vsel %vm9376_vm7, %v2493_v26, %v2494_v44  ;;  %v4980_v50 = vshll.u32 %v4928_v10, 16  ;;  %v8688_v44 = vld [vmem:[#allocation2 + $0x50] sm:$0x1]  ;;  %v10103_v10 = vsel %vm9376_vm7, %v2507_v13, %v2508_v34  ;;  %v8691_v55 = vld [vmem:[#allocation2 + $0x74] sm:$0x1] }
 0x149   : > { %7711 = vmatprep.mubr.bf16.mxu1 %v6770_v52  ;;  %v8402_v52 = vld [vmem:[#allocation2 + $0x30] sm:$0xff]   ;;  %v2515_v43 = vrot.slane %v8688_v44, 5  ;;  %v10108_v5 = vsel %vm9376_vm7, %v6790_v51, %v2512_v32  ;;  %v4931_v44 = vld [vmem:[#allocation2 + $0x24] sm:$0xf]  ;;  %v6792_v13 = vrot.slane %v2425_v48, 9  ;;  %v8415_v32 = vld [vmem:[%s11031_s4 + $0x1d8] sm:$0xff]   ;;  %v4993_v58 = vor.u32 %v4992_v25, %v10110_v14 }
 0x14a   : > { %v4982_v38 = vrot.slane %v4980_v50, 5  ;;  %v5001_v48 = vshrl.u32 %v4931_v44, 16  ;;  %v5004_v33 = vshll.u32 %v4931_v44, 16 }
 0x14b   : > { %v10114_v34 = vsel %vm9376_vm7, %v2514_v17, %v2515_v43  ;;  %v4934_v17 = vld [vmem:[#allocation2 + $0x30] sm:$0xf] }
 0x14c   : > { %7932 = vmatmul.mubr.bf16.vlgmr.msra.gmra.mrb[0].mxu0 %v8398_v29  ;;  %v2426_v29 = vld [vmem:[#allocation2 + $0x6c] sm:$0xe]  ;;  %v5003_v19 = vrot.slane %v5001_v48, 4 }
 0x14d   : > { %7964 = vmatpush3.bf16.msra.mxu0 %v9747_v54  ;;  %7935 = vmatprep.mubr.bf16.mxu0 %v8402_v52  ;;  %v10098_v54 = vsel %vm9376_vm7, %v6789_v9, %v2505_v61  ;;  %v4930_v52 = vld [vmem:[#allocation2 + $0x20] sm:$0x1]  ;;  %v8689_v61 = vld [vmem:[#allocation2 + $0x5c] sm:$0x1]  ;;  %v6793_v40 = vrot.slane %v2426_v29, 9 }
 0x14e   : > { %7965 = vmatprep.subr.bf16.mxu0 %v8403_v47  ;;  %v2522_v9 = vrot.slane %v8689_v61, 5  ;;  %v2536_v61 = vrot.slane %v8691_v55, 5  ;;  %v4996_v59 = vshll.u32 %v4930_v52, 16  ;;  %v8414_v52 = vld [vmem:[#allocation2 + $0x60] sm:$0xff]  }
 0x150   : > { %7712 = vmatmul.mubr.bf16.gmra.mrb[20].mxu1 %v6771_v42  ;;  %v2519_v42 = vrot.slane %v9985_v28, 5  ;;  %v2533_v28 = vrot.slane %v10010_v41, 5  ;;  %v4998_v25 = vrot.slane %v4996_v59, 5 }
 0x151   : > { %7715 = vmatprep.mubr.bf16.mxu1 %v6772_v31  ;;  %v4979_v31 = vrot.slane %v4977_v60, 4  ;;  %7966 = vmatpush3.bf16.msra.mxu0 %v8403_v47  ;;  %v8690_v60 = vld [vmem:[#allocation2 + $0x68] sm:$0x1]  ;;  %v2528_v47 = vrot.slane %v2526_v53, 4 }
 0x152   : > { %v2521_v41 = vrot.slane %v2519_v42, 4  ;;  %v2529_v50 = vrot.slane %v8690_v60, 5  ;;  %7967 = vmatprep.subr.bf16.mxu0 %v8409_v6  ;;  %v10121_v51 = vsel %vm9376_vm7, %v6791_v56, %v2519_v42  ;;  %v2535_v43 = vrot.slane %v2533_v28, 4  ;;  %v4935_v60 = vld [vmem:[#allocation2 + $0x34] sm:$0xf] }
 0x153   : > { %v4983_v26 = vor.u32 %v4982_v38, %v4979_v31  ;;  %v5010_v42 = vshll.u32 %v4932_v62, 16  ;;  %v5014_v56 = vshrl.u32 %v4932_v62, 16  ;;  %v10133_v31 = vsel %vm9376_vm7, %v6792_v13, %v2526_v53  ;;  %v8410_v53 = vld [vmem:[#allocation2 + $0x54] sm:$0xff]  }
 0x154   : > { %7936 = vmatmul.mubr.bf16.gmra.mrb[4].mxu0 %v8404_v15  ;;  %v10129_v29 = vsel %vm9376_vm7, %v2521_v41, %v2522_v9  ;;  %v5025_v38 = vshrl.u32 %v4934_v17, 16  ;;  %v5028_v15 = vshll.u32 %v4934_v17, 16  ;;  %v10143_v18 = vsel %vm9376_vm7, %v2528_v47, %v2529_v50  ;;  %v4933_v50 = vld [vmem:[#allocation2 + $0x2c] sm:$0x1]  ;;  %v10159_v47 = vld [vmem:[#allocation2 + $0x78] sm:$0xe] }
 0x155   : > { %7939 = vmatprep.mubr.bf16.mxu0 %v8408_v1  ;;  %7968 = vmatpush3.bf16.msra.mxu0 %v8409_v6  ;;  %v10147_v1 = vsel %vm9376_vm7, %v6793_v40, %v2533_v28  ;;  %v5038_v6 = vshrl.u32 %v4935_v60, 16  ;;  %v10151_v62 = vsel %vm9376_vm7, %v2535_v43, %v2536_v61  ;;  %v4984_v36 = vrot.slane %v4983_v26, 4  ;;  %v4937_v61 = vld [vmem:[#allocation2 + $0x3c] sm:$0xf]  ;;  %v8423_v17 = vld [vmem:[%s11031_s4 + $0x1e8] sm:$0xff]  }
 0x156   : > { %7969 = vmatprep.subr.bf16.mxu0 %v8415_v32  ;;  %v4994_v9 = vrot.slane %v4993_v58, 4  ;;  %v10153_v44 = vrot.slane %v5010_v42, 5  ;;  %v5016_v41 = vrot.slane %v5014_v56, 4  ;;  %v5027_v26 = vrot.slane %v5025_v38, 4  ;;  %v4938_v56 = vld [vmem:[#allocation2 + $0x40] sm:$0xf] }
 0x157   : > { %v5030_v40 = vrot.slane %v5028_v15, 5  ;;  %v5040_v55 = vrot.slane %v5038_v6, 4  ;;  %v4989_v48 = vsel %vm8863_vm2, %v4984_v36, %v10110_v14  ;;  %v2540_v42 = vrot.slane %v10013_v35, 5  ;;  %v2428_v35 = vld [vmem:[#allocation2 + $0x84] sm:$0xe]  ;;  %v8418_v43 = vld [vmem:[#allocation2 + $0x78] sm:$0xff]  }
 0x158   : > { %7716 = vmatmul.mubr.bf16.gmra.mrb[24].mxu1 %v6773_v2  ;;  %v5034_v2 = vshll.u32 %v4935_v60, 16  ;;  %v4999_v38 = vsel %vm8863_vm2, %v4994_v9, %v4998_v25  ;;  %v5017_v15 = vor.u32 %v5016_v41, %v10153_v44  ;;  %v6794_v6 = vrot.slane %v10159_v47, 9  ;;  %v8692_v36 = vld [vmem:[#allocation2 + $0x88] sm:$0xf] }
 0x159   : > { %7719 = vmatprep.mubr.bf16.mxu1 %v6774_v24  ;;  %v5006_v24 = vrot.slane %v5004_v33, 5  ;;  %7970 = vmatpush3.bf16.msra.mxu0 %v8415_v32  ;;  %v4936_v33 = vld [vmem:[#allocation2 + $0x38] sm:$0x1]  ;;  %v11083_v14 = vcombine.low %v10032_v22, %v10036_v4  ;;  %v5049_v3 = vshrl.u32 %v4937_v61, 16  ;;  %v5052_v9 = vshll.u32 %v4937_v61, 16  ;;  %v8427_v22 = vld [vmem:[%s11031_s4 + $0x1f0] sm:$0xff]  }
 0x15a   : > { %7971 = vmatprep.subr.bf16.mxu0 %v8419_v11  ;;  %v10165_v32 = vrot.slane %v5034_v2, 5  ;;  %v5020_v2 = vshll.u32 %v4933_v50, 16  ;;  %v5058_v25 = vshll.u32 %v4938_v56, 16  ;;  %v5062_v41 = vshrl.u32 %v4938_v56, 16  ;;  %v8416_v50 = vld [vmem:[#allocation2 + $0x6c] sm:$0xff]  }
 0x15b   : > { %v5007_v60 = vor.u32 %v5006_v24, %v5003_v19  ;;  %v2547_v19 = vrot.slane %v8692_v36, 5  ;;  %v5031_v24 = vor.u32 %v5030_v40, %v5027_v26  ;;  %v10190_v4 = vcombine.low %v4989_v48, %v4999_v38  ;;  %v8693_v26 = vld [vmem:[#allocation2 + $0x80] sm:$0x1]  ;;  %v8694_v56 = vld [vmem:[#allocation2 + $0x8c] sm:$0x1] }
 0x15c   : > { %7940 = vmatmul.mubr.bf16.gmra.mrb[8].mxu0 %v8410_v53  ;;  %v5044_v53 = vshll.u32 %v4936_v33, 16  ;;  %v2542_v47 = vrot.slane %v2540_v42, 4  ;;  %v2543_v40 = vrot.slane %v8693_v26, 5  ;;  %v5018_v33 = vrot.slane %v5017_v15, 4  ;;  %v4939_v36 = vld [vmem:[#allocation2 + $0x44] sm:$0x1] }
 0x15d   : > { %7943 = vmatprep.mubr.bf16.mxu0 %v8414_v52  ;;  %7972 = vmatpush3.bf16.msra.mxu0 %v8419_v11  ;;  %11084 = vst [vmem:[#allocation6_spill] sm:$0xff] %v10190_v4  ;;  %v5008_v52 = vrot.slane %v5007_v60, 4  ;;  %v8421_v11 = vld [vmem:[%s11031_s4 + $0xc8] sm:$0xff]   ;;  %v6795_v61 = vrot.slane %v2428_v35, 9  ;;  %v2549_v59 = vrot.slane %v2547_v19, 4  ;;  %v5032_v58 = vrot.slane %v5031_v24, 4 }
 0x15e   : > { %7973 = vmatprep.subr.bf16.mxu0 %v8423_v17  ;;  %v5046_v13 = vrot.slane %v5044_v53, 5  ;;  %v5051_v28 = vrot.slane %v5049_v3, 4  ;;  %v4940_v48 = vld [vmem:[#allocation2 + $0x48] sm:$0xf]  ;;  %v5054_v38 = vrot.slane %v5052_v9, 5  ;;  %v10195_v30 = vrot.slane %v5058_v25, 5 }
 0x15f   : > { %v5064_v26 = vrot.slane %v5062_v41, 4  ;;  %v2429_v4 = vld [vmem:[#allocation2 + $0x90] sm:$0xe]  ;;  %v5013_v15 = vsel %vm8863_vm2, %v5008_v52, %v10153_v44  ;;  %v10206_v35 = vsel %vm9376_vm7, %v2542_v47, %v2543_v40  ;;  %v2430_v53 = vld [vmem:[#allocation2 + $0x9c] sm:$0xe]  ;;  %v11085_v3 = vcombine.low %v10040_v7, %v10044_v16 }
 0x160   : > { %7720 = vmatmul.mubr.bf16.gmra.mrb[28].mxu1 %v6775_v46  ;;  %v5041_v46 = vor.u32 %v5040_v55, %v10165_v32  ;;  %v5022_v55 = vrot.slane %v5020_v2, 5  ;;  %v10202_v2 = vsel %vm9376_vm7, %v6794_v6, %v2540_v42  ;;  %v8431_v44 = vld [vmem:[%s11031_s4 + $0x1f8] sm:$0xff]   ;;  %v10218_v6 = vsel %vm9376_vm7, %v6795_v61, %v2547_v19  ;;  %v8697_v40 = vld [vmem:[#allocation2 + $0xa0] sm:$0xf] }
 0x161   : > { %7739 = vmatprep.mubr.bf16.mxu1 %v11083_v14  ;;  %v2550_v14 = vrot.slane %v8694_v56, 5  ;;  %7974 = vmatpush3.bf16.msra.mxu0 %v8423_v17  ;;  %v8695_v17 = vld [vmem:[#allocation2 + $0x94] sm:$0xf]  ;;  %11086 = vst [vmem:[#allocation4_spill] sm:$0xff] %v10218_v6  ;;  %v5073_v9 = vshrl.u32 %v4940_v48, 16  ;;  %v5076_v25 = vshll.u32 %v4940_v48, 16  ;;  %v5037_v16 = vsel %vm8863_vm2, %v5032_v58, %v10165_v32 }
 0x162   : > { %v5042_v60 = vrot.slane %v5041_v46, 4  ;;  %7975 = vmatprep.subr.bf16.mxu0 %v8427_v22  ;;  %v2554_v24 = vrot.slane %v8695_v17, 5  ;;  %v5023_v42 = vsel %vm8863_vm2, %v5018_v33, %v5022_v55  ;;  %v10220_v46 = vld [vmem:[#allocation2 + $0x4c] sm:$0xf]  ;;  %v5068_v41 = vshll.u32 %v4939_v36, 16  ;;  %v8422_v55 = vld [vmem:[#allocation2 + $0x90] sm:$0xff]  }
 0x163   : > { %v10225_v7 = vsel %vm9376_vm7, %v2549_v59, %v2550_v14  ;;  %v11088_v19 = vcombine.low %v10057_v37, %v10063_v45  ;;  %v5055_v59 = vor.u32 %v5054_v38, %v5051_v28  ;;  %v5065_v52 = vor.u32 %v5064_v26, %v10195_v30  ;;  %v8696_v32 = vld [vmem:[#allocation2 + $0x98] sm:$0x1]  ;;  %v8420_v45 = vld [vmem:[#allocation2 + $0x84] sm:$0xff]   ;;  %v4943_v26 = vld [vmem:[#allocation2 + $0x54] sm:$0xf] }
 0x164   : > { %7944 = vmatmul.mubr.bf16.gmra.mrb[12].mxu0 %v8416_v50  ;;  %11087 = vst [vmem:[#allocation3_spill] sm:$0xff] %v10225_v7  ;;  %v6796_v50 = vrot.slane %v2429_v4, 9  ;;  %v6797_v47 = vrot.slane %v2430_v53, 9  ;;  %v2556_v58 = vrot.slane %v2554_v24, 4  ;;  %v2557_v4 = vrot.slane %v8696_v32, 5  ;;  %v10243_v61 = vld [vmem:[%s11031_s4 + $0x200] sm:$0xff]  }
 0x165   : > { %7947 = vmatprep.mubr.bf16.mxu0 %v8418_v43  ;;  %v8425_v43 = vld [vmem:[%s11031_s4 + $0xd0] sm:$0xff]   ;;  %7976 = vmatpush3.bf16.msra.mxu0 %v8427_v22  ;;  %v2561_v33 = vrot.slane %v8697_v40, 5  ;;  %v5082_v37 = vshll.u32 %v10220_v46, 16  ;;  %11089 = vst [vmem:[#allocation7_spill] sm:$0xff] %v10243_v61  ;;  %v10245_v28 = vcombine.low %v5013_v15, %v5023_v42  ;;  %v5075_v22 = vrot.slane %v5073_v9, 4  ;;  %v8429_v9 = vld [vmem:[%s11031_s4 + $0xd8] sm:$0xff]  }
 0x166   : > { %7977 = vmatprep.subr.bf16.mxu0 %v8431_v44  ;;  %v5078_v56 = vrot.slane %v5076_v25, 5  ;;  %v10253_v48 = vrot.slane %v5068_v41, 5  ;;  %v5086_v38 = vshrl.u32 %v10220_v46, 16  ;;  %v10258_v15 = vrot.slane %v5055_v59, 4  ;;  %v4946_v42 = vld [vmem:[#allocation2 + $0x60] sm:$0xf] }
 0x167   : > { %11090 = vst [vmem:[#allocation8_spill] sm:$0xff] %v10245_v28  ;;  %v10260_v17 = vrot.slane %v5065_v52, 4  ;;  %v10268_v53 = vsel %vm9376_vm7, %v6797_v47, %v2561_v33  ;;  %v10277_v25 = vsel %vm9376_vm7, %v2556_v58, %v2557_v4  ;;  %v8698_v41 = vld [vmem:[#allocation2 + $0xa4] sm:$0x1]  ;;  %v5100_v47 = vshll.u32 %v4943_v26, 16  ;;  %v8426_v14 = vld [vmem:[#allocation2 + $0xa8] sm:$0xff]  }
 0x168   : > { %7740 = vmatmul.mubr.bf16.vlgmr.msra.gmra.mrb[0].mxu1 %v11085_v3  ;;  %v10270_v3 = vld [vmem:[#allocation2 + $0x58] sm:$0xf]  ;;  %11093 = vst [vmem:[#allocation11_spill] sm:$0xff] %v10277_v25  ;;  %v5079_v59 = vor.u32 %v5078_v56, %v5075_v22  ;;  %v10287_v32 = vld [vmem:[#allocation2 + $0x64] sm:$0xf]  ;;  %v11096_v58 = vcombine.low %v10079_v0, %v10083_v21  ;;  %v10292_v4 = vrot.slane %v5086_v38, 4 }
 0x169   : > { %7772 = vmatpush3.bf16.msra.mxu1 %v10004_v27  ;;  %7743 = vmatprep.mubr.bf16.mxu1 %v11088_v19  ;;  %v5047_v27 = vsel %vm8863_vm2, %v5042_v60, %v5046_v13  ;;  %v10255_v60 = vld [vmem:[#allocation2 + $0x50] sm:$0x1]  ;;  %v10281_v19 = vld [vmem:[#allocation2 + $0x5c] sm:$0x1]  ;;  %11095 = vst [vmem:[#allocation12_spill] sm:$0xff] %v10287_v32  ;;  %v5106_v40 = vshll.u32 %v10270_v3, 16 }
 0x16a   : > { %7773 = vmatprep.subr.bf16.mxu1 %v8421_v11  ;;  %v10251_v36 = vcombine.low %v5037_v16, %v5047_v27  ;;  %7978 = vmatpush3.bf16.msra.mxu0 %v8431_v44  ;;  %v2563_v16 = vrot.slane %v2561_v33, 4  ;;  %v11094_v27 = vcombine.low %v10067_v57, %v10075_v23  ;;  %v5092_v52 = vshll.u32 %v10255_v60, 16  ;;  %v2431_v23 = vld [vmem:[#allocation2 + $0xa8] sm:$0xe]  ;;  %v10327_v25 = vld [vmem:[#allocation2 + $0x68] sm:$0x1] }
 0x16b   : > { %v5097_v44 = vshrl.u32 %v4943_v26, 16  ;;  %v5110_v33 = vshrl.u32 %v10270_v3, 16  ;;  %v5121_v57 = vshrl.u32 %v4946_v42, 16  ;;  %8011 = vmatprep.subr.bf16.mxu0 %v10243_v61  ;;  %v5116_v22 = vshll.u32 %v10281_v19, 16  ;;  %v10317_v26 = vld [vmem:[#allocation2 + $0x70] sm:$0xf] }
 0x16c   : > { %11091 = vst [vmem:[#allocation9_spill] sm:$0xff] %v10251_v36  ;;  %7948 = vmatmul.mubr.bf16.gmra.mrb[16].mxu0 %v8420_v45  ;;  %v4949_v45 = vld [vmem:[#allocation2 + $0x6c] sm:$0xf]  ;;  %v5130_v56 = vshll.u32 %v10287_v32, 16  ;;  %v5134_v38 = vshrl.u32 %v10287_v32, 16  ;;  %11097 = vst [vmem:[#allocation13_spill] sm:$0xff] %v10317_v26 }
 0x16d   : > { %7774 = vmatpush3.bf16.msra.mxu1 %v8421_v11  ;;  %v10264_v11 = vsel %vm9376_vm7, %v6796_v50, %v2554_v24  ;;  %v2564_v24 = vrot.slane %v8698_v41, 5  ;;  %v10279_v50 = vrot.slane %v5082_v37, 5  ;;  %7951 = vmatprep.mubr.bf16.mxu0 %v8422_v55  ;;  %v5124_v37 = vshll.u32 %v4946_v42, 16  ;;  %v8424_v41 = vld [vmem:[#allocation2 + $0x9c] sm:$0xff]   ;;  %11098 = vst [vmem:[#allocation14_spill] sm:$0xff] %v10327_v25 }
 0x16e   : > { %7775 = vmatprep.subr.bf16.mxu1 %v8425_v43  ;;  %11092 = vst [vmem:[#allocation10_spill] sm:$0xff] %v10264_v11  ;;  %v10319_v42 = vrot.slane %v5079_v59, 4  ;;  %v5102_v21 = vrot.slane %v5100_v47, 5  ;;  %v5112_v13 = vrot.slane %v5110_v33, 4  ;;  %v5123_v0 = vrot.slane %v5121_v57, 4 }
 0x16f   : > { %v10312_v55 = vsel %vm9376_vm7, %v2563_v16, %v2564_v24  ;;  %v5089_v16 = vor.u32 %v10292_v4, %v10279_v50  ;;  %v10325_v24 = vrot.slane %v5106_v40, 5  ;;  %v5126_v11 = vrot.slane %v5124_v37, 5  ;;  %v8699_v61 = vld [vmem:[#allocation2 + $0xac] sm:$0xf]  ;;  %v4952_v7 = vld [vmem:[#allocation2 + $0x78] sm:$0xf] }
 0x170   : > { %7744 = vmatmul.mubr.bf16.gmra.mrb[4].mxu1 %v11094_v27  ;;  %v10321_v27 = vrot.slane %v5092_v52, 5  ;;  %v5145_v36 = vshrl.u32 %v4949_v45, 16  ;;  %v5148_v59 = vshll.u32 %v4949_v45, 16  ;;  %v5154_v52 = vshll.u32 %v10317_v26, 16 }
 0x171   : > { %7747 = vmatprep.mubr.bf16.mxu1 %v11096_v58  ;;  %7776 = vmatpush3.bf16.msra.mxu1 %v8425_v43  ;;  %v8433_v43 = vld [vmem:[%s11031_s4 + $0xe0] sm:$0xff]   ;;  %v5099_v58 = vrot.slane %v5097_v44, 4  ;;  %v8435_v44 = vld [vmem:[%s11031_s4 + $0xe8] sm:$0xff]   ;;  %v10333_v47 = vrot.slane %v5116_v22, 5  ;;  %v10335_v4 = vrot.slane %v5130_v56, 5  ;;  %v5136_v40 = vrot.slane %v5134_v38, 4 }
 0x172   : > { %7777 = vmatprep.subr.bf16.mxu1 %v8429_v9  ;;  %v5158_v33 = vshrl.u32 %v10317_v26, 16  ;;  %v6798_v45 = vrot.slane %v2431_v23, 9  ;;  %v2568_v22 = vrot.slane %v8699_v61, 5  ;;  %v11100_v56 = vcombine.low %v10108_v5, %v10114_v34  ;;  %v8437_v5 = vld [vmem:[%s11031_s4 + $0xf0] sm:$0xff]  }
 0x173   : > { %v5103_v37 = vor.u32 %v5102_v21, %v5099_v58  ;;  %v5113_v38 = vor.u32 %v5112_v13, %v10325_v24  ;;  %v5140_v6 = vshll.u32 %v10327_v25, 16  ;;  %v5127_v21 = vor.u32 %v5126_v11, %v5123_v0  ;;  %v10357_v13 = vld [vmem:[#allocation2 + $0x74] sm:$0x1] }
 0x174   : > { %7952 = vmatmul.mubr.bf16.gmra.mrb[20].mxu0 %v8424_v41  ;;  %v8700_v41 = vld [vmem:[#allocation2 + $0xb0] sm:$0x1]  ;;  %v5147_v23 = vrot.slane %v5145_v36, 4  ;;  %v5150_v58 = vrot.slane %v5148_v59, 5  ;;  %v10351_v61 = vrot.slane %v5154_v52, 5  ;;  %v5137_v34 = vor.u32 %v5136_v40, %v10335_v4  ;;  %v8430_v59 = vld [vmem:[#allocation2 + $0xc0] sm:$0xff]  }
 0x175   : > { %7778 = vmatpush3.bf16.msra.mxu1 %v8429_v9  ;;  %v11099_v9 = vcombine.low %v10098_v54, %v10103_v10  ;;  %7955 = vmatprep.mubr.bf16.mxu0 %v8426_v14  ;;  %v2571_v54 = vrot.slane %v8700_v41, 5  ;;  %v2432_v10 = vld [vmem:[#allocation2 + $0xb4] sm:$0xe]  ;;  %v5160_v14 = vrot.slane %v5158_v33, 4  ;;  %v5090_v57 = vrot.slane %v5089_v16, 4 }
 0x176   : > { %7779 = vmatprep.subr.bf16.mxu1 %v8433_v43  ;;  %v8428_v41 = vld [vmem:[#allocation2 + $0xb4] sm:$0xff]   ;;  %v10361_v36 = vsel %vm9376_vm7, %v6798_v45, %v2568_v22  ;;  %v2570_v11 = vrot.slane %v2568_v22, 4  ;;  %v6799_v0 = vrot.slane %v2432_v10, 9  ;;  %v5104_v52 = vrot.slane %v5103_v37, 4 }
 0x177   : > { %v5114_v28 = vrot.slane %v5113_v38, 4  ;;  %v2578_v40 = vrot.slane %v9913_v12, 5  ;;  %v5128_v33 = vrot.slane %v5127_v21, 4  ;;  %v5142_v25 = vrot.slane %v5140_v6, 5  ;;  %v8439_v45 = vld [vmem:[%s11031_s4 + $0xf8] sm:$0xff]  }
 0x178   : > { %7748 = vmatmul.mubr.bf16.gmra.mrb[8].mxu1 %v11099_v9  ;;  %v2575_v9 = vrot.slane %v9900_v20, 5  ;;  %v5172_v20 = vshll.u32 %v4952_v7, 16  ;;  %v5164_v16 = vshll.u32 %v10357_v13, 16  ;;  %v5138_v22 = vrot.slane %v5137_v34, 4  ;;  %v10381_v38 = vld [vmem:[#allocation2 + $0x80] sm:$0x1] }
 0x179   : > { %7751 = vmatprep.mubr.bf16.mxu1 %v11100_v56  ;;  %7780 = vmatpush3.bf16.msra.mxu1 %v8433_v43  ;;  %v5169_v56 = vshrl.u32 %v4952_v7, 16  ;;  %v10363_v43 = vld [vmem:[#allocation2 + $0x7c] sm:$0xf]  ;;  %v5151_v7 = vor.u32 %v5150_v58, %v5147_v23  ;;  %v5161_v10 = vor.u32 %v5160_v14, %v10351_v61  ;;  %v11101_v12 = vcombine.low %v10121_v51, %v10129_v29 }
 0x17a   : > { %7781 = vmatprep.subr.bf16.mxu1 %v8435_v44  ;;  %v2577_v26 = vrot.slane %v2575_v9, 4  ;;  %v5174_v37 = vrot.slane %v5172_v20, 5  ;;  %v5095_v6 = vsel %vm8863_vm2, %v5090_v57, %v10321_v27  ;;  %v5178_v21 = vshll.u32 %v10363_v43, 16 }
 0x17b   : > { %v5171_v32 = vrot.slane %v5169_v56, 4  ;;  %v5182_v23 = vshrl.u32 %v10363_v43, 16  ;;  %v11102_v58 = vor.u32 %v10006_v49, %v9997_v63  ;;  %v11103_v51 = vcombine.low %v10133_v31, %v10143_v18  ;;  %v4955_v49 = vld [vmem:[#allocation2 + $0x84] sm:$0xf]  ;;  %v10413_v56 = vld [vmem:[#allocation2 + $0x88] sm:$0xf] }
 0x17c   : > { %7956 = vmatmul.mubr.bf16.gmra.mrb[24].mxu0 %v8428_v41  ;;  %v5109_v29 = vsel %vm8863_vm2, %v5104_v52, %v10325_v24  ;;  %v5119_v27 = vsel %vm8863_vm2, %v5114_v28, %v10333_v47  ;;  %v10401_v57 = vsel %vm9376_vm7, %v6799_v0, %v2575_v9  ;;  %v5133_v31 = vsel %vm8863_vm2, %v5128_v33, %v10335_v4 }
 0x17d   : > { %7782 = vmatpush3.bf16.msra.mxu1 %v8435_v44  ;;  %v10379_v44 = vsel %vm9376_vm7, %v2570_v11, %v2571_v54  ;;  %v10388_v34 = vrot.slane %v11102_v58, 4  ;;  %7959 = vmatprep.mubr.bf16.mxu0 %v8430_v59  ;;  %v10405_v54 = vsel %vm9376_vm7, %v2577_v26, %v2578_v40  ;;  %v5152_v18 = vrot.slane %v5151_v7, 4  ;;  %v5687_v7 = vld [vmem:[#allocation2 + $0x54] sm:$0xe] }
 0x17e   : > { %7783 = vmatprep.subr.bf16.mxu1 %v8437_v5  ;;  %v5166_v24 = vrot.slane %v5164_v16, 5  ;;  %v5143_v28 = vsel %vm8863_vm2, %v5138_v22, %v5142_v25  ;;  %v5162_v47 = vrot.slane %v5161_v10, 4  ;;  %v5175_v14 = vor.u32 %v5174_v37, %v5171_v32  ;;  %v10455_v16 = vld [vmem:[%s11031_s4 + $0x100] sm:$0xff]   ;;  %v10462_v10 = vld [vmem:[#allocation2 + $0x8c] sm:$0x1]  ;;  %v11108_v58 = vld [vmem:[#allocation6_spill] sm:$0xff] }
 0x17f   : > { %v5188_v9 = vshll.u32 %v10381_v38, 16  ;;  %v11104_v26 = vsel %vm8863_vm2, %v10260_v17, %v10253_v48  ;;  %v11105_v4 = vsel %vm8863_vm2, %v10258_v15, %v10195_v30  ;;  %v10427_v25 = vrot.slane %v5178_v21, 5  ;;  %v5686_v15 = vld [vmem:[#allocation2 + $0x48] sm:$0xe] }
 0x180   : > { %7752 = vmatmul.mubr.bf16.gmra.mrb[12].mxu1 %v11101_v12  ;;  %v10425_v20 = vcombine.low %v11105_v4, %v11104_v26  ;;  %v5184_v32 = vrot.slane %v5182_v23, 4  ;;  %v5193_v41 = vshrl.u32 %v4955_v49, 16  ;;  %v6829_v11 = vcombine.low %v10268_v53, %v10312_v55  ;;  %v5688_v23 = vld [vmem:[#allocation2 + $0x60] sm:$0xe] }
 0x181   : > { %7755 = vmatprep.mubr.bf16.mxu1 %v11103_v51  ;;  %7784 = vmatpush3.bf16.msra.mxu1 %v8437_v5  ;;  %v8432_v5 = vld [vmem:[#allocation2 + $0xcc] sm:$0xff]   ;;  %v11106_v0 = vsel %vm8863_vm2, %v10319_v42, %v10279_v50  ;;  %v6830_v17 = vcombine.low %v10361_v36, %v10379_v44  ;;  %v5196_v30 = vshll.u32 %v4955_v49, 16  ;;  %v10440_v59 = vcombine.low %v5109_v29, %v5119_v27  ;;  %v8443_v53 = vld [vmem:[%s11031_s4 + $0x220] sm:$0xff]  }
 0x182   : > { %7785 = vmatprep.subr.bf16.mxu1 %v8439_v45  ;;  %v10436_v48 = vcombine.low %v11106_v0, %v5095_v6  ;;  %v6831_v52 = vcombine.low %v10401_v57, %v10405_v54  ;;  %v10444_v40 = vcombine.low %v5133_v31, %v5143_v28  ;;  %v5202_v33 = vshll.u32 %v10413_v56, 16  ;;  %v5689_v28 = vld [vmem:[#allocation2 + $0x6c] sm:$0xe]  ;;  %v4967_v54 = vld [vmem:[#allocation2 + $0xb4] sm:$0xf] }
 0x183   : > { %v5157_v50 = vsel %vm8863_vm2, %v5152_v18, %v10351_v61  ;;  %v5167_v42 = vsel %vm8863_vm2, %v5162_v47, %v5166_v24  ;;  %v10458_v22 = vrot.slane %v5175_v14, 4  ;;  %v11107_v61 = vcombine.low %v10147_v1, %v10151_v62 }
 0x184   : > { %7960 = vmatmul.mubr.bf16.gmra.mrb[28].mxu0 %v8432_v5  ;;  %v5185_v37 = vor.u32 %v5184_v32, %v10427_v25  ;;  %v10468_v12 = vrot.slane %v5193_v41, 4  ;;  %v5206_v6 = vshrl.u32 %v10413_v56, 16  ;;  %v7060_v21 = vrot.slane %v5686_v15, 9  ;;  %v11110_v5 = vld [vmem:[#allocation12_spill] sm:$0xff]  ;;  %v11111_v41 = vld [vmem:[#allocation14_spill] sm:$0xff] }
 0x185   : > { %7786 = vmatpush3.bf16.msra.mxu1 %v8439_v45  ;;  %v10460_v45 = vrot.slane %v5188_v9, 5  ;;  %7979 = vmatprep.mubr.bf16.mxu0 %v11108_v58  ;;  %v11109_v51 = vcombine.low %v10202_v2, %v10206_v35  ;;  %v5198_v29 = vrot.slane %v5196_v30, 5  ;;  %v5776_v27 = vrot.slane %v10220_v46, 5  ;;  %v11113_v58 = vld [vmem:[#allocation8_spill] sm:$0xff] }
 0x186   : > { %8059 = vmatprep.subr.bf16.mxu1 %v10455_v16  ;;  %v5779_v1 = vrot.slane %v10255_v60, 5  ;;  %v7061_v62 = vrot.slane %v5687_v7, 9  ;;  %v10477_v49 = vcombine.low %v5157_v50, %v5167_v42  ;;  %v10479_v31 = vrot.slane %v5202_v33, 5 }
 0x187   : > { %v5212_v18 = vshll.u32 %v10462_v10, 16  ;;  %v5783_v24 = vrot.slane %v10270_v3, 5  ;;  %v10485_v47 = vsel %vm9376_vm7, %v7060_v21, %v5776_v27  ;;  %v5778_v2 = vrot.slane %v5776_v27, 4  ;;  %v4958_v3 = vld [vmem:[#allocation2 + $0x90] sm:$0xf]  ;;  %v11115_v27 = vld [vmem:[#allocation3_spill] sm:$0xff] }
 0x188   : > { %7756 = vmatmul.mubr.bf16.gmra.mrb[16].mxu1 %v11107_v61  ;;  %v5786_v35 = vrot.slane %v10281_v19, 5  ;;  %v7062_v46 = vrot.slane %v5688_v23, 9  ;;  %v10488_v14 = vrot.slane %v5206_v6, 4  ;;  %v5790_v26 = vrot.slane %v11110_v5, 5  ;;  %v8436_v19 = vld [vmem:[%s11031_s4 + $0x208] sm:$0xff]   ;;  %v11120_v5 = vld [vmem:[#allocation11_spill] sm:$0xff] }
 0x189   : > { %7759 = vmatprep.mubr.bf16.mxu1 %v11109_v51  ;;  %v10492_v60 = vsel %vm9376_vm7, %v7061_v62, %v5783_v24  ;;  %v5785_v9 = vrot.slane %v5783_v24, 4  ;;  %v5186_v4 = vrot.slane %v5185_v37, 4  ;;  %v10497_v32 = vsel %vm9376_vm7, %v5778_v2, %v5779_v1  ;;  %v10517_v61 = vld [vmem:[#allocation2 + $0x94] sm:$0xf]  ;;  %v11112_v6 = vld [vmem:[#allocation13_spill] sm:$0xff]  ;;  %v11114_v51 = vld [vmem:[#allocation4_spill] sm:$0xff] }
 0x18a   : > { %v5793_v0 = vrot.slane %v11111_v41, 5  ;;  %v7063_v30 = vrot.slane %v5689_v28, 9  ;;  %v7092_v15 = vcombine.low %v10485_v47, %v10497_v32  ;;  %v10511_v7 = vsel %vm9376_vm7, %v7062_v46, %v5790_v26  ;;  %v3316_v28 = vld [vmem:[#allocation2 + $0x78] sm:$0xf]  ;;  %v8438_v41 = vld [vmem:[%s11031_s4 + $0x210] sm:$0xff]  }
 0x18b   : > { %v10507_v33 = vsel %vm9376_vm7, %v5785_v9, %v5786_v35  ;;  %v5792_v50 = vrot.slane %v5790_v26, 4  ;;  %v5181_v42 = vsel %vm8863_vm2, %v10458_v22, %v10427_v25  ;;  %v5797_v21 = vrot.slane %v11112_v6, 5  ;;  %v11117_v2 = vld [vmem:[#allocation7_spill] sm:$0xff]  ;;  %v11118_v35 = vld [vmem:[#allocation9_spill] sm:$0xff]  ;;  %v11119_v9 = vld [vmem:[#allocation10_spill] sm:$0xff] }
 0x18c   : > { %v7093_v37 = vcombine.low %v10492_v60, %v10507_v33  ;;  %v5800_v23 = vrot.slane %v10357_v13, 5  ;;  %7980 = vmatmul.mubr.bf16.vlgmr.msra.gmra.mrb[0].mxu0 %v11113_v58  ;;  %v11116_v1 = vcombine.low %v11114_v51, %v11115_v27  ;;  %v5199_v62 = vor.u32 %v5198_v29, %v10468_v12  ;;  %v10538_v46 = vld [vmem:[#allocation2 + $0x98] sm:$0x1]  ;;  %v5690_v6 = vld [vmem:[#allocation2 + $0x78] sm:$0xe]  ;;  %v11122_v27 = vld [vmem:[#allocation5_spill] sm:$0xff] }
 0x18d   : > { %v10528_v24 = vrot.slane %v5212_v18, 5  ;;  %v5217_v25 = vshrl.u32 %v4958_v3, 16  ;;  %v10532_v22 = vsel %vm9376_vm7, %v5792_v50, %v5793_v0  ;;  %8012 = vmatpush3.bf16.msra.mxu0 %v11117_v2  ;;  %7983 = vmatprep.mubr.bf16.mxu0 %v11118_v35  ;;  %v5209_v13 = vor.u32 %v10488_v14, %v10479_v31  ;;  %v5691_v2 = vld [vmem:[#allocation2 + $0x84] sm:$0xe] }
 0x18e   : > { %v7094_v12 = vcombine.low %v10511_v7, %v10532_v22  ;;  %v10544_v29 = vsel %vm9376_vm7, %v7063_v30, %v5797_v21  ;;  %v5799_v18 = vrot.slane %v5797_v21, 4  ;;  %8013 = vmatprep.subr.bf16.mxu0 %v8436_v19  ;;  %v11121_v26 = vcombine.low %v11119_v9, %v11120_v5 }
 0x18f   : > { %v5191_v14 = vsel %vm8863_vm2, %v5186_v4, %v10460_v45  ;;  %v5220_v0 = vshll.u32 %v4958_v3, 16  ;;  %v5226_v50 = vshll.u32 %v10517_v61, 16  ;;  %v5230_v30 = vshrl.u32 %v10517_v61, 16 }
 0x190   : > { %7760 = vmatmul.mubr.bf16.gmra.mrb[20].mxu1 %v11116_v1  ;;  %v10559_v21 = vsel %vm9376_vm7, %v5799_v18, %v5800_v23  ;;  %v3554_v58 = vshrl.u32 %v3316_v28, 16  ;;  %v3557_v51 = vshll.u32 %v3316_v28, 16  ;;  %v3576_v1 = vsel %vm8863_vm2, %v10388_v34, %v11122_v27  ;;  %v4961_v23 = vld [vmem:[#allocation2 + $0x9c] sm:$0xf] }
 0x191   : > { %7763 = vmatprep.mubr.bf16.mxu1 %v11121_v26  ;;  %v10565_v35 = vrot.slane %v5199_v62, 4  ;;  %v10567_v45 = vrot.slane %v5217_v25, 4  ;;  %v5236_v4 = vshll.u32 %v10538_v46, 16  ;;  %8014 = vmatpush3.bf16.msra.mxu0 %v8436_v19  ;;  %v7064_v28 = vrot.slane %v5690_v6, 9  ;;  %v8440_v34 = vld [vmem:[%s11031_s4 + $0x218] sm:$0xff]  }
 0x192   : > { %v3556_v18 = vrot.slane %v3554_v58, 4  ;;  %v3559_v9 = vrot.slane %v3557_v51, 5  ;;  %v5804_v5 = vrot.slane %v10363_v43, 5  ;;  %8015 = vmatprep.subr.bf16.mxu0 %v8438_v41  ;;  %v10576_v62 = vcombine.low %v5181_v42, %v5191_v14  ;;  %v10578_v26 = vld [vmem:[#allocation2 + $0xa0] sm:$0xf] }
 0x193   : > { %v5222_v25 = vrot.slane %v5220_v0, 5  ;;  %v5807_v27 = vrot.slane %v10381_v38, 5  ;;  %v7065_v3 = vrot.slane %v5691_v2, 9  ;;  %v5811_v43 = vrot.slane %v10413_v56, 5  ;;  %v4964_v38 = vld [vmem:[#allocation2 + $0xa8] sm:$0xf] }
 0x194   : > { %v3560_v19 = vor.u32 %v3559_v9, %v3556_v18  ;;  %v10583_v58 = vsel %vm9376_vm7, %v7064_v28, %v5804_v5  ;;  %v5806_v6 = vrot.slane %v5804_v5, 4  ;;  %7984 = vmatmul.mubr.bf16.gmra.mrb[4].mxu0 %v10425_v20  ;;  %v10590_v42 = vrot.slane %v5226_v50, 5  ;;  %v8441_v28 = vld [vmem:[#allocation2 + $0xc] sm:$0xff]  }
 0x195   : > { %v5232_v14 = vrot.slane %v5230_v30, 4  ;;  %v5241_v0 = vshrl.u32 %v4961_v23, 16  ;;  %v5814_v51 = vrot.slane %v10462_v10, 5  ;;  %7987 = vmatprep.mubr.bf16.mxu0 %v10436_v48  ;;  %8016 = vmatpush3.bf16.msra.mxu0 %v8438_v41  ;;  %v5244_v2 = vshll.u32 %v4961_v23, 16 }
 0x196   : > { %v5250_v18 = vshll.u32 %v10578_v26, 16  ;;  %v3561_v56 = vrot.slane %v3560_v19, 4  ;;  %v10597_v20 = vsel %vm9376_vm7, %v5806_v6, %v5807_v27  ;;  %8017 = vmatprep.subr.bf16.mxu0 %v8440_v34  ;;  %v5254_v55 = vshrl.u32 %v10578_v26, 16  ;;  %v10631_v27 = vld [vmem:[#allocation2 + $0xa4] sm:$0x1] }
 0x197   : > { %v7096_v48 = vcombine.low %v10583_v58, %v10597_v20  ;;  %v10612_v10 = vsel %vm9376_vm7, %v7065_v3, %v5811_v43  ;;  %v5813_v41 = vrot.slane %v5811_v43, 4  ;;  %v10614_v50 = vrot.slane %v5209_v13, 4  ;;  %v5692_v13 = vld [vmem:[#allocation2 + $0x90] sm:$0xe] }
 0x198   : > { %7764 = vmatmul.mubr.bf16.gmra.mrb[24].mxu1 %v6829_v11  ;;  %v10606_v11 = vld [vmem:[#allocation2 + $0xac] sm:$0xf]  ;;  %v5265_v36 = vshrl.u32 %v4964_v38, 16  ;;  %v5268_v44 = vshll.u32 %v4964_v38, 16  ;;  %v5205_v30 = vsel %vm8863_vm2, %v10565_v35, %v10479_v31  ;;  %v5223_v23 = vor.u32 %v5222_v25, %v10567_v45  ;;  %v10644_v38 = vld [vmem:[#allocation2 + $0xb0] sm:$0x1] }
 0x199   : > { %7767 = vmatprep.mubr.bf16.mxu1 %v6830_v17  ;;  %v3566_v17 = vsel %vm8863_vm2, %v3561_v56, %v9997_v63  ;;  %v10628_v3 = vsel %vm9376_vm7, %v5813_v41, %v5814_v51  ;;  %8018 = vmatpush3.bf16.msra.mxu0 %v8440_v34  ;;  %v5233_v5 = vor.u32 %v5232_v14, %v10590_v42  ;;  %v5274_v63 = vshll.u32 %v10606_v11, 16 }
 0x19a   : > { %v10624_v9 = vcombine.low %v3566_v17, %v3576_v1  ;;  %v5278_v19 = vshrl.u32 %v10606_v11, 16  ;;  %v7097_v45 = vcombine.low %v10612_v10, %v10628_v3  ;;  %8019 = vmatprep.subr.bf16.mxu0 %v8443_v53  ;;  %v8446_v1 = vld [vmem:[%s11031_s4 + $0x228] sm:$0xff]   ;;  %v5243_v25 = vrot.slane %v5241_v0, 4 }
 0x19b   : > { %v5246_v6 = vrot.slane %v5244_v2, 5  ;;  %v10640_v34 = vrot.slane %v5250_v18, 5  ;;  %v5256_v43 = vrot.slane %v5254_v55, 4  ;;  %v10642_v14 = vrot.slane %v5236_v4, 5  ;;  %v5693_v55 = vld [vmem:[#allocation2 + $0x9c] sm:$0xe] }
 0x19c   : > { %v5267_v51 = vrot.slane %v5265_v36, 4  ;;  %v5270_v56 = vrot.slane %v5268_v44, 5  ;;  %v7066_v41 = vrot.slane %v5692_v13, 9  ;;  %7988 = vmatmul.mubr.bf16.gmra.mrb[8].mxu0 %v10440_v59  ;;  %v5215_v0 = vsel %vm8863_vm2, %v10614_v50, %v10528_v24 }
 0x19d   : > { %v10654_v2 = vrot.slane %v5223_v23, 4  ;;  %v5260_v4 = vshll.u32 %v10631_v27, 16  ;;  %v5818_v18 = vrot.slane %v10517_v61, 5  ;;  %7991 = vmatprep.mubr.bf16.mxu0 %v10444_v40  ;;  %v5234_v59 = vrot.slane %v5233_v5, 4  ;;  %8020 = vmatpush3.bf16.msra.mxu0 %v8443_v53  ;;  %v8449_v23 = vld [vmem:[%s11031_s4 + $0x230] sm:$0xff]   ;;  %v8442_v53 = vld [vmem:[#allocation2 + $0x18] sm:$0xff]  }
 0x19e   : > { %v10659_v36 = vrot.slane %v5274_v63, 5  ;;  %v5280_v57 = vrot.slane %v5278_v19, 4  ;;  %v5247_v44 = vor.u32 %v5246_v6, %v5243_v25  ;;  %v5257_v24 = vor.u32 %v5256_v43, %v10640_v34  ;;  %8021 = vmatprep.subr.bf16.mxu0 %v8446_v1 }
 0x19f   : > { %v10665_v50 = vsel %vm9376_vm7, %v7066_v41, %v5818_v18  ;;  %v5820_v61 = vrot.slane %v5818_v18, 4  ;;  %v5271_v17 = vor.u32 %v5270_v56, %v5267_v51  ;;  %v5284_v40 = vshll.u32 %v10644_v38, 16  ;;  %v8444_v56 = vld [vmem:[#allocation2 + $0x24] sm:$0xff]  }
 0x1a0   : > { %7768 = vmatmul.mubr.bf16.gmra.mrb[28].mxu1 %v6831_v52  ;;  %v5821_v52 = vrot.slane %v10538_v46, 5  ;;  %v7067_v13 = vrot.slane %v5693_v55, 9  ;;  %v5825_v46 = vrot.slane %v10578_v26, 5  ;;  %v5289_v5 = vshrl.u32 %v4967_v54, 16 }
 0x1a1   : > { %7787 = vmatprep.mubr.bf16.mxu1 %v8441_v28  ;;  %v10672_v28 = vld [vmem:[#allocation2 + $0xb8] sm:$0xf]  ;;  %v5292_v63 = vshll.u32 %v4967_v54, 16  ;;  %v5828_v25 = vrot.slane %v10631_v27, 5  ;;  %v5281_v6 = vor.u32 %v5280_v57, %v10659_v36  ;;  %v5229_v41 = vsel %vm8863_vm2, %v10654_v2, %v10590_v42  ;;  %8022 = vmatpush3.bf16.msra.mxu0 %v8446_v1  ;;  %v4970_v57 = vld [vmem:[#allocation2 + $0xc0] sm:$0xf] }
 0x1a2   : > { %v10676_v19 = vsel %vm9376_vm7, %v5820_v61, %v5821_v52  ;;  %v10684_v51 = vsel %vm9376_vm7, %v7067_v13, %v5825_v46  ;;  %v5827_v26 = vrot.slane %v5825_v46, 4  ;;  %v5239_v27 = vsel %vm8863_vm2, %v5234_v59, %v10642_v14  ;;  %8023 = vmatprep.subr.bf16.mxu0 %v8449_v23  ;;  %v10701_v13 = vld [vmem:[#allocation2 + $0xc4] sm:$0xf]  ;;  %v10730_v46 = vld [vmem:[#allocation2 + $0xbc] sm:$0x1] }
 0x1a3   : > { %v7098_v43 = vcombine.low %v10665_v50, %v10676_v19  ;;  %v10693_v18 = vrot.slane %v5247_v44, 4  ;;  %v10695_v55 = vrot.slane %v5260_v4, 5  ;;  %v10697_v54 = vrot.slane %v5257_v24, 4  ;;  %v8452_v4 = vld [vmem:[%s11031_s4 + $0x238] sm:$0xff]   ;;  %v5694_v44 = vld [vmem:[#allocation2 + $0xa8] sm:$0xe] }
 0x1a4   : > { %v5298_v52 = vshll.u32 %v10672_v28, 16  ;;  %v5302_v61 = vshrl.u32 %v10672_v28, 16  ;;  %v10705_v42 = vsel %vm9376_vm7, %v5827_v26, %v5828_v25  ;;  %7992 = vmatmul.mubr.bf16.gmra.mrb[12].mxu0 %v10477_v49  ;;  %v10708_v14 = vrot.slane %v5271_v17, 4  ;;  %v5695_v25 = vld [vmem:[#allocation2 + $0xb4] sm:$0xe] }
 0x1a5   : > { %v10710_v1 = vrot.slane %v5289_v5, 4  ;;  %v10712_v2 = vrot.slane %v5292_v63, 5  ;;  %7995 = vmatprep.mubr.bf16.mxu0 %v10576_v62  ;;  %v7041_v49 = vcombine.low %v5205_v30, %v5215_v0  ;;  %v10726_v24 = vrot.slane %v5281_v6, 4  ;;  %v8702_v62 = vld [vmem:[%s11031_s4 + $0x108] sm:$0xff]   ;;  %8024 = vmatpush3.bf16.msra.mxu0 %v8449_v23  ;;  %v8445_v6 = vld [vmem:[#allocation2 + $0x30] sm:$0xff]  }
 0x1a6   : > { %v10728_v17 = vrot.slane %v5284_v40, 5  ;;  %v5316_v5 = vshll.u32 %v4970_v57, 16  ;;  %v5322_v63 = vshll.u32 %v10701_v13, 16  ;;  %v5326_v31 = vshrl.u32 %v10701_v13, 16  ;;  %8025 = vmatprep.subr.bf16.mxu0 %v8452_v4  ;;  %v4973_v23 = vld [vmem:[#allocation2 + $0xcc] sm:$0xf] }
 0x1a7   : > { %v5253_v35 = vsel %vm8863_vm2, %v10693_v18, %v10640_v34  ;;  %v10741_v30 = vrot.slane %v5298_v52, 5  ;;  %v5304_v0 = vrot.slane %v5302_v61, 4  ;;  %v7068_v40 = vrot.slane %v5694_v44, 9  ;;  %v8703_v52 = vld [vmem:[%s11031_s4 + $0x110] sm:$0xff]  }
 0x1a8   : > { %7788 = vmatmul.mubr.bf16.vlgmr.msra.gmra.mrb[0].mxu1 %v8442_v53  ;;  %v5313_v53 = vshrl.u32 %v4970_v57, 16  ;;  %v5263_v26 = vsel %vm8863_vm2, %v10697_v54, %v10695_v55  ;;  %v5295_v34 = vor.u32 %v10712_v2, %v10710_v1  ;;  %v5287_v18 = vsel %vm8863_vm2, %v10726_v24, %v10728_v17  ;;  %v10758_v57 = vld [vmem:[#allocation2 + $0xd0] sm:$0xf]  ;;  %v10768_v24 = vld [vmem:[#allocation2 + $0xc8] sm:$0x1] }
 0x1a9   : > { %8067 = vmatpush3.bf16.msra.mxu1 %v10455_v16  ;;  %7791 = vmatprep.mubr.bf16.mxu1 %v8444_v56  ;;  %v7042_v16 = vcombine.low %v5229_v41, %v5239_v27  ;;  %v5277_v56 = vsel %vm8863_vm2, %v10708_v14, %v10659_v36  ;;  %v5308_v41 = vshll.u32 %v10730_v46, 16  ;;  %v8447_v27 = vld [vmem:[#allocation2 + $0x3c] sm:$0xff]   ;;  %v5832_v54 = vrot.slane %v10606_v11, 5 }
 0x1aa   : > { %8060 = vmatprep.subr.bf16.mxu1 %v8702_v62  ;;  %v5315_v55 = vrot.slane %v5313_v53, 4  ;;  %v5835_v36 = vrot.slane %v10644_v38, 5  ;;  %v5318_v61 = vrot.slane %v5316_v5, 5  ;;  %v10765_v14 = vrot.slane %v5322_v63, 5  ;;  %8026 = vmatpush3.bf16.msra.mxu0 %v8452_v4 }
 0x1ab   : > { %v5328_v1 = vrot.slane %v5326_v31, 4  ;;  %v7069_v2 = vrot.slane %v5695_v25, 9  ;;  %v5305_v44 = vor.u32 %v5304_v0, %v10741_v30  ;;  %v10772_v11 = vsel %vm9376_vm7, %v7068_v40, %v5832_v54 }
 0x1ac   : > { %v5834_v38 = vrot.slane %v5832_v54, 4  ;;  %v5839_v17 = vrot.slane %v10672_v28, 5  ;;  %7996 = vmatmul.mubr.bf16.gmra.mrb[16].mxu0 %v7041_v49  ;;  %v5337_v53 = vshrl.u32 %v4973_v23, 16  ;;  %v5346_v5 = vshll.u32 %v10758_v57, 16  ;;  %v8448_v54 = vld [vmem:[#allocation2 + $0x48] sm:$0xff]  }
 0x1ad   : > { %8068 = vmatpush3.bf16.msra.mxu1 %v8702_v62  ;;  %v5340_v62 = vshll.u32 %v4973_v23, 16  ;;  %v5842_v63 = vrot.slane %v10730_v46, 5  ;;  %7999 = vmatprep.mubr.bf16.mxu0 %v7042_v16  ;;  %v5350_v31 = vshrl.u32 %v10758_v57, 16  ;;  %v5319_v49 = vor.u32 %v5318_v61, %v5315_v55  ;;  %v8704_v23 = vld [vmem:[%s11031_s4 + $0x118] sm:$0xff]  }
 0x1ae   : > { %8061 = vmatprep.subr.bf16.mxu1 %v8703_v52  ;;  %v10780_v4 = vsel %vm9376_vm7, %v5834_v38, %v5835_v36  ;;  %v10784_v0 = vsel %vm9376_vm7, %v7069_v2, %v5839_v17  ;;  %v5841_v28 = vrot.slane %v5839_v17, 4  ;;  %v5329_v40 = vor.u32 %v5328_v1, %v10765_v14  ;;  %v8450_v61 = vld [vmem:[#allocation2 + $0x54] sm:$0xff]  }
 0x1af   : > { %v5332_v25 = vshll.u32 %v10768_v24, 16  ;;  %v7043_v16 = vcombine.low %v5253_v35, %v5263_v26  ;;  %v7044_v55 = vcombine.low %v5277_v56, %v5287_v18  ;;  %v5296_v36 = vrot.slane %v5295_v34, 4  ;;  %v4975_v2 = vld [vmem:[#allocation2 + $0xd4] sm:$0x1]  ;;  %v8705_v56 = vld [vmem:[%s11031_s4 + $0x120] sm:$0xff]  }
 0x1b0   : > { %7792 = vmatmul.mubr.bf16.gmra.mrb[4].mxu1 %v8445_v6  ;;  %v5310_v6 = vrot.slane %v5308_v41, 5  ;;  %v5339_v35 = vrot.slane %v5337_v53, 4  ;;  %v5342_v26 = vrot.slane %v5340_v62, 5  ;;  %v10799_v41 = vrot.slane %v5346_v5, 5  ;;  %v5697_v34 = vld [vmem:[#allocation2 + $0xcc] sm:$0xe] }
 0x1b1   : > { %7795 = vmatprep.mubr.bf16.mxu1 %v8447_v27  ;;  %8069 = vmatpush3.bf16.msra.mxu1 %v8703_v52  ;;  %v10795_v27 = vsel %vm9376_vm7, %v5841_v28, %v5842_v63  ;;  %v5306_v52 = vrot.slane %v5305_v44, 4  ;;  %v5352_v38 = vrot.slane %v5350_v31, 4  ;;  %v5320_v17 = vrot.slane %v5319_v49, 4  ;;  %v5682_v28 = vld [vmem:[#allocation2 + $0x18] sm:$0xe] }
 0x1b2   : > { %8062 = vmatprep.subr.bf16.mxu1 %v8704_v23  ;;  %v7101_v1 = vcombine.low %v10784_v0, %v10795_v27  ;;  %v5330_v46 = vrot.slane %v5329_v40, 4  ;;  %v5334_v59 = vrot.slane %v5332_v25, 5  ;;  %v5301_v18 = vsel %vm8863_vm2, %v5296_v36, %v10741_v30  ;;  %v8706_v49 = vld [vmem:[#allocation2 + $0x1c] sm:$0xf]  ;;  %v8707_v25 = vld [vmem:[%s11031_s4 + $0x128] sm:$0xff]  }
 0x1b3   : > { %v5356_v44 = vshll.u32 %v4975_v2, 16  ;;  %v5311_v53 = vsel %vm8863_vm2, %v5306_v52, %v5310_v6  ;;  %v5343_v62 = vor.u32 %v5342_v26, %v5339_v35  ;;  %v5353_v5 = vor.u32 %v5352_v38, %v10799_v41  ;;  %v8708_v35 = vld [vmem:[#allocation2 + $0x20] sm:$0x1] }
 0x1b4   : > { %8000 = vmatmul.mubr.bf16.gmra.mrb[20].mxu0 %v7043_v16  ;;  %v5325_v63 = vsel %vm8863_vm2, %v5320_v17, %v10765_v14  ;;  %v5335_v31 = vsel %vm8863_vm2, %v5330_v46, %v5334_v59  ;;  %v5748_v40 = vrot.slane %v8706_v49, 5  ;;  %v7071_v30 = vrot.slane %v5697_v34, 9  ;;  %v8453_v59 = vld [vmem:[#allocation2 + $0x6c] sm:$0xff]  }
 0x1b5   : > { %8070 = vmatpush3.bf16.msra.mxu1 %v8704_v23  ;;  %8003 = vmatprep.mubr.bf16.mxu0 %v7044_v55  ;;  %v5853_v16 = vrot.slane %v10758_v57, 5  ;;  %v7045_v6 = vcombine.low %v5301_v18, %v5311_v53  ;;  %v8451_v23 = vld [vmem:[#allocation2 + $0x60] sm:$0xff]   ;;  %v5856_v55 = vrot.slane %v4975_v2, 5  ;;  %v7046_v14 = vcombine.low %v5325_v63, %v5335_v31  ;;  %v8709_v57 = vld [vmem:[%s11031_s4 + $0x130] sm:$0xff]  }
 0x1b6   : > { %8063 = vmatprep.subr.bf16.mxu1 %v8705_v56  ;;  %v5344_v36 = vrot.slane %v5343_v62, 4  ;;  %v5354_v52 = vrot.slane %v5353_v5, 4  ;;  %v7056_v46 = vrot.slane %v5682_v28, 9  ;;  %v5751_v26 = vrot.slane %v8708_v35, 5  ;;  %v5683_v18 = vld [vmem:[#allocation2 + $0x24] sm:$0xe] }
 0x1b7   : > { %v10821_v38 = vsel %vm9376_vm7, %v7071_v30, %v5853_v16  ;;  %v5855_v17 = vrot.slane %v5853_v16, 4  ;;  %v5684_v31 = vld [vmem:[#allocation2 + $0x30] sm:$0xe]  ;;  %v8711_v28 = vld [vmem:[#allocation2 + $0x34] sm:$0xf]  ;;  %v8454_v16 = vld [vmem:[#allocation2 + $0x78] sm:$0xff]  }
 0x1b8   : > { %7796 = vmatmul.mubr.bf16.gmra.mrb[8].mxu1 %v8448_v54  ;;  %v5358_v54 = vrot.slane %v5356_v44, 5  ;;  %v8710_v44 = vld [vmem:[#allocation2 + $0x28] sm:$0xf]  ;;  %v5749_v5 = vsel %vm9376_vm7, %v7056_v46, %v5748_v40  ;;  %v5762_v49 = vrot.slane %v8711_v28, 5  ;;  %v3313_v30 = vld [vmem:[#allocation2 + $0x6c] sm:$0xf] }
 0x1b9   : > { %7799 = vmatprep.mubr.bf16.mxu1 %v8450_v61  ;;  %8071 = vmatpush3.bf16.msra.mxu1 %v8705_v56  ;;  %v5750_v61 = vrot.slane %v5748_v40, 4  ;;  %v10828_v2 = vsel %vm9376_vm7, %v5855_v17, %v5856_v55  ;;  %v5349_v56 = vsel %vm8863_vm2, %v5344_v36, %v10799_v41  ;;  %v5755_v53 = vrot.slane %v8710_v44, 5  ;;  %v8712_v41 = vld [vmem:[%s11031_s4 + $0x138] sm:$0xff]   ;;  %v8713_v55 = vld [vmem:[#allocation2 + $0x2c] sm:$0x1] }
 0x1ba   : > { %8064 = vmatprep.subr.bf16.mxu1 %v8707_v25  ;;  %v5359_v34 = vsel %vm8863_vm2, %v5354_v52, %v5358_v54  ;;  %v5758_v40 = vrot.slane %v8713_v55, 5  ;;  %v7058_v36 = vrot.slane %v5684_v31, 9  ;;  %v5764_v52 = vrot.slane %v5762_v49, 4  ;;  %v3328_v62 = vld [vmem:[#allocation2 + $0xa8] sm:$0xf] }
 0x1bb   : > { %v5752_v63 = vsel %vm9376_vm7, %v5750_v61, %v5751_v26  ;;  %v5757_v54 = vrot.slane %v5755_v53, 4  ;;  %v3530_v61 = vshrl.u32 %v3313_v30, 16  ;;  %v3533_v35 = vshll.u32 %v3313_v30, 16  ;;  %v8715_v26 = vld [vmem:[#allocation2 + $0x40] sm:$0xf] }
 0x1bc   : > { %8004 = vmatmul.mubr.bf16.gmra.mrb[24].mxu0 %v7045_v6  ;;  %v7057_v6 = vrot.slane %v5683_v18, 9  ;;  %v5769_v17 = vrot.slane %v8715_v26, 5 }
 0x1bd   : > { %8072 = vmatpush3.bf16.msra.mxu1 %v8707_v25  ;;  %8007 = vmatprep.mubr.bf16.mxu0 %v7046_v14  ;;  %v7047_v25 = vcombine.low %v5349_v56, %v5359_v34  ;;  %v8455_v14 = vld [vmem:[#allocation2 + $0x84] sm:$0xff]   ;;  %v8716_v56 = vld [vmem:[#allocation2 + $0x70] sm:$0xf]  ;;  %v3532_v28 = vrot.slane %v3530_v61, 4 }
 0x1be   : > { %8065 = vmatprep.subr.bf16.mxu1 %v8709_v57  ;;  %v3539_v34 = vshll.u32 %v8716_v56, 16  ;;  %v3543_v18 = vshrl.u32 %v8716_v56, 16  ;;  %v5756_v44 = vsel %vm9376_vm7, %v7057_v6, %v5755_v53  ;;  %v8457_v56 = vld [vmem:[#allocation2 + $0x9c] sm:$0xff]  }
 0x1c0   : > { %7800 = vmatmul.mubr.bf16.gmra.mrb[12].mxu1 %v8451_v23  ;;  %v7088_v23 = vcombine.low %v5749_v5, %v5752_v63  ;;  %v5759_v5 = vsel %vm9376_vm7, %v5757_v54, %v5758_v40  ;;  %v5763_v63 = vsel %vm9376_vm7, %v7058_v36, %v5762_v49  ;;  %v3541_v26 = vrot.slane %v3539_v34, 5  ;;  %v3319_v54 = vld [vmem:[#allocation2 + $0x84] sm:$0xf] }
 0x1c1   : > { %7803 = vmatprep.mubr.bf16.mxu1 %v8453_v59  ;;  %8073 = vmatpush3.bf16.msra.mxu1 %v8709_v57  ;;  %v8714_v59 = vld [vmem:[#allocation2 + $0x38] sm:$0x1]  ;;  %v5685_v57 = vld [vmem:[#allocation2 + $0x3c] sm:$0xe]  ;;  %v3545_v53 = vrot.slane %v3543_v18, 4  ;;  %v3578_v61 = vshrl.u32 %v3319_v54, 16 }
 0x1c2   : > { %8066 = vmatprep.subr.bf16.mxu1 %v8712_v41  ;;  %v5765_v46 = vrot.slane %v8714_v59, 5  ;;  %v7059_v30 = vrot.slane %v5685_v57, 9  ;;  %v8456_v59 = vld [vmem:[#allocation2 + $0x90] sm:$0xff]   ;;  %v8719_v57 = vld [vmem:[#allocation2 + $0x88] sm:$0xf] }
 0x1c3   : > { %v3546_v36 = vor.u32 %v3545_v53, %v3541_v26  ;;  %v3587_v34 = vshll.u32 %v8719_v57, 16  ;;  %v3591_v18 = vshrl.u32 %v8719_v57, 16 }
 0x1c4   : > { %8008 = vmatmul.mubr.bf16.gmra.mrb[28].mxu0 %v7047_v25  ;;  %v5766_v31 = vsel %vm9376_vm7, %v5764_v52, %v5765_v46  ;;  %v5771_v25 = vrot.slane %v5769_v17, 4  ;;  %v5770_v49 = vsel %vm9376_vm7, %v7059_v30, %v5769_v17  ;;  %v8718_v52 = vld [vmem:[#allocation2 + $0x74] sm:$0x1] }
 0x1c5   : > { %8074 = vmatpush3.bf16.msra.mxu1 %v8712_v41  ;;  %8027 = vmatprep.mubr.bf16.mxu0 %v7088_v23  ;;  %v3535_v41 = vrot.slane %v3533_v35, 5  ;;  %v7089_v23 = vcombine.low %v5756_v44, %v5759_v5  ;;  %v7090_v6 = vcombine.low %v5763_v63, %v5766_v31  ;;  %v3549_v46 = vshll.u32 %v8718_v52, 16  ;;  %v3322_v5 = vld [vmem:[#allocation2 + $0x90] sm:$0xf]  ;;  %v8458_v31 = vld [vmem:[#allocation2 + $0xa8] sm:$0xff]  }
 0x1c6   : > { %v3581_v35 = vshll.u32 %v3319_v54, 16  ;;  %v3547_v17 = vrot.slane %v3546_v36, 4  ;;  %v3605_v53 = vshll.u32 %v3322_v5, 16  ;;  %v8721_v36 = vld [vmem:[#allocation2 + $0x8c] sm:$0x1] }
 0x1c7   : > { %v3536_v40 = vor.u32 %v3535_v41, %v3532_v28  ;;  %v3551_v28 = vrot.slane %v3549_v46, 5  ;;  %v3580_v41 = vrot.slane %v3578_v61, 4  ;;  %v3597_v46 = vshll.u32 %v8721_v36, 16  ;;  %v8722_v61 = vld [vmem:[#allocation2 + $0xa0] sm:$0xf] }
 0x1c8   : > { %7804 = vmatmul.mubr.bf16.gmra.mrb[16].mxu1 %v8454_v16  ;;  %v8717_v16 = vld [vmem:[#allocation2 + $0x44] sm:$0x1]  ;;  %v3583_v30 = vrot.slane %v3581_v35, 5  ;;  %v3635_v35 = vshll.u32 %v8722_v61, 16  ;;  %v3639_v57 = vshrl.u32 %v8722_v61, 16 }
 0x1c9   : > { %7807 = vmatprep.mubr.bf16.mxu1 %v8455_v14  ;;  %v5772_v55 = vrot.slane %v8717_v16, 5  ;;  %v3537_v44 = vrot.slane %v3536_v40, 4  ;;  %v8459_v16 = vld [vmem:[#allocation2 + $0xb4] sm:$0xff]  }
 0x1ca   : > { %v10868_v36 = vrot.slane %v3635_v35, 5  ;;  %v3641_v61 = vrot.slane %v3639_v57, 4 }
 0x1cb   : > { %v5773_v14 = vsel %vm9376_vm7, %v5771_v25, %v5772_v55  ;;  %v3325_v25 = vld [vmem:[#allocation2 + $0x9c] sm:$0xf]  ;;  %v10856_v55 = vrot.slane %v3587_v34, 5 }
 0x1cc   : > { %8028 = vmatmul.mubr.bf16.vlgmr.msra.gmra.mrb[0].mxu0 %v7089_v23  ;;  %v7091_v63 = vcombine.low %v5770_v49, %v5773_v14  ;;  %v3593_v23 = vrot.slane %v3591_v18, 4  ;;  %v3626_v52 = vshrl.u32 %v3325_v25, 16  ;;  %v3629_v49 = vshll.u32 %v3325_v25, 16 }
 0x1cd   : > { %8031 = vmatprep.mubr.bf16.mxu0 %v7090_v6  ;;  %v3542_v6 = vsel %vm8863_vm2, %v3537_v44, %v3541_v26  ;;  %v3552_v14 = vsel %vm8863_vm2, %v3547_v17, %v3551_v28  ;;  %v3584_v26 = vor.u32 %v3583_v30, %v3580_v41  ;;  %v3607_v44 = vrot.slane %v3605_v53, 5  ;;  %v8460_v28 = vld [vmem:[#allocation2 + $0xc0] sm:$0xff]   ;;  %v8723_v41 = vld [vmem:[#allocation2 + $0x98] sm:$0x1] }
 0x1ce   : > { %v3594_v34 = vor.u32 %v3593_v23, %v10856_v55  ;;  %v3631_v17 = vrot.slane %v3629_v49, 5  ;;  %v6904_v25 = vcombine.low %v3542_v6, %v3552_v14  ;;  %v3621_v30 = vshll.u32 %v8723_v41, 16  ;;  %v8725_v49 = vld [vmem:[#allocation2 + $0xac] sm:$0xf] }
 0x1cf   : > { %v3585_v47 = vrot.slane %v3584_v26, 4  ;;  %v3642_v6 = vor.u32 %v3641_v61, %v10868_v36  ;;  %v3659_v14 = vshll.u32 %v8725_v49, 16 }
 0x1d0   : > { %7808 = vmatmul.mubr.bf16.gmra.mrb[20].mxu1 %v8456_v59  ;;  %v3602_v59 = vshrl.u32 %v3322_v5, 16  ;;  %v3595_v32 = vrot.slane %v3594_v34, 4 }
 0x1d1   : > { %7811 = vmatprep.mubr.bf16.mxu1 %v8457_v56  ;;  %v8720_v56 = vld [vmem:[#allocation2 + $0x94] sm:$0xf]  ;;  %v3590_v35 = vsel %vm8863_vm2, %v3585_v47, %v10856_v55  ;;  %v3643_v22 = vrot.slane %v3642_v6, 4  ;;  %v8728_v6 = vld [vmem:[#allocation2 + $0xc4] sm:$0xf] }
 0x1d2   : > { %v3611_v54 = vshll.u32 %v8720_v56, 16  ;;  %v3615_v40 = vshrl.u32 %v8720_v56, 16  ;;  %v3604_v18 = vrot.slane %v3602_v59, 4  ;;  %v3599_v56 = vrot.slane %v3597_v46, 5  ;;  %v8724_v59 = vld [vmem:[#allocation2 + $0xa4] sm:$0x1] }
 0x1d3   : > { %v3645_v53 = vshll.u32 %v8724_v59, 16  ;;  %v3663_v46 = vshrl.u32 %v8725_v49, 16 }
 0x1d4   : > { %8032 = vmatmul.mubr.bf16.gmra.mrb[4].mxu0 %v7091_v63  ;;  %v10866_v5 = vrot.slane %v3611_v54, 5  ;;  %v3617_v63 = vrot.slane %v3615_v40, 4  ;;  %v3650_v54 = vshrl.u32 %v3328_v62, 16  ;;  %v3331_v40 = vld [vmem:[#allocation2 + $0xb4] sm:$0xf]  ;;  %v3600_v60 = vsel %vm8863_vm2, %v3595_v32, %v3599_v56 }
 0x1d5   : > { %8035 = vmatprep.mubr.bf16.mxu0 %v7092_v15  ;;  %v3608_v15 = vor.u32 %v3607_v44, %v3604_v18  ;;  %v3674_v57 = vshrl.u32 %v3331_v40, 16  ;;  %v3677_v26 = vshll.u32 %v3331_v40, 16  ;;  %v3334_v32 = vld [vmem:[#allocation2 + $0xc0] sm:$0xf] }
 0x1d6   : > { %v3652_v7 = vrot.slane %v3650_v54, 4  ;;  %v8727_v54 = vld [vmem:[#allocation2 + $0xb0] sm:$0x1]  ;;  %v3698_v40 = vshrl.u32 %v3334_v32, 16 }
 0x1d7   : > { %v3609_v33 = vrot.slane %v3608_v15, 4  ;;  %v3676_v55 = vrot.slane %v3674_v57, 4  ;;  %v3679_v61 = vrot.slane %v3677_v26, 5 }
 0x1d8   : > { %7812 = vmatmul.mubr.bf16.gmra.mrb[24].mxu1 %v8458_v31  ;;  %v3628_v31 = vrot.slane %v3626_v52, 4  ;;  %v3653_v52 = vshll.u32 %v3328_v62, 16  ;;  %v8726_v62 = vld [vmem:[#allocation2 + $0xb8] sm:$0xf]  ;;  %v3700_v57 = vrot.slane %v3698_v40, 4 }
 0x1d9   : > { %7815 = vmatprep.mubr.bf16.mxu1 %v8459_v16  ;;  %v3618_v16 = vor.u32 %v3617_v63, %v10866_v5  ;;  %v3683_v34 = vshll.u32 %v8726_v62, 16  ;;  %v3687_v18 = vshrl.u32 %v8726_v62, 16  ;;  %v3614_v15 = vsel %vm8863_vm2, %v3609_v33, %v10866_v5 }
 0x1da   : > { %v3632_v23 = vor.u32 %v3631_v17, %v3628_v31  ;;  %v3647_v31 = vrot.slane %v3645_v53, 5  ;;  %v3661_v17 = vrot.slane %v3659_v14, 5  ;;  %v3669_v5 = vshll.u32 %v8727_v54, 16 }
 0x1db   : > { %v3619_v44 = vrot.slane %v3618_v16, 4  ;;  %v3685_v47 = vrot.slane %v3683_v34, 5  ;;  %v3689_v56 = vrot.slane %v3687_v18, 4  ;;  %v11123_v16 = vcombine.low %v10544_v29, %v10559_v21 }
 0x1dc   : > { %8036 = vmatmul.mubr.bf16.gmra.mrb[8].mxu0 %v7093_v37  ;;  %v3623_v37 = vrot.slane %v3621_v30, 5  ;;  %v3633_v63 = vrot.slane %v3632_v23, 4  ;;  %v3648_v23 = vsel %vm8863_vm2, %v3643_v22, %v3647_v31  ;;  %v3711_v29 = vshrl.u32 %v8728_v6, 16 }
 0x1dd   : > { %8039 = vmatprep.mubr.bf16.mxu0 %v7094_v12  ;;  %v3655_v12 = vrot.slane %v3653_v52, 5  ;;  %v3707_v52 = vshll.u32 %v8728_v6, 16  ;;  %v3680_v21 = vor.u32 %v3679_v61, %v3676_v55  ;;  %v3690_v49 = vor.u32 %v3689_v56, %v3685_v47  ;;  %v10953_v6 = vld [vmem:[%s11032_s5] ss:$0 sm:$0xff] }
 0x1de   : > { %v3624_v41 = vsel %vm8863_vm2, %v3619_v44, %v3623_v37  ;;  %v3638_v30 = vsel %vm8863_vm2, %v3633_v63, %v10868_v36  ;;  %v3701_v36 = vshll.u32 %v3334_v32, 16  ;;  %v3671_v37 = vrot.slane %v3669_v5, 5 }
 0x1df   : > { %v3656_v59 = vor.u32 %v3655_v12, %v3652_v7  ;;  %v3709_v62 = vrot.slane %v3707_v52, 5  ;;  %v3713_v58 = vrot.slane %v3711_v29, 4  ;;  %v3681_v20 = vrot.slane %v3680_v21, 4  ;;  %v8730_v7 = vld [vmem:[#allocation2 + $0xc8] sm:$0x1] }
 0x1e0   : > { %7816 = vmatmul.mubr.bf16.gmra.mrb[28].mxu1 %v8460_v28  ;;  %v3665_v28 = vrot.slane %v3663_v46, 4  ;;  %v6907_v46 = vcombine.low %v3614_v15, %v3624_v41  ;;  %v3703_v26 = vrot.slane %v3701_v36, 5  ;;  %v3717_v22 = vshll.u32 %v8730_v7, 16  ;;  %v5696_v12 = vld [vmem:[#allocation2 + $0xc0] sm:$0xe] }
 0x1e1   : > { %7851 = vmatprep.mubr.bf16.mxu1 %v6904_v25  ;;  %v6906_v25 = vcombine.low %v3590_v35, %v3600_v60  ;;  %v6908_v35 = vcombine.low %v3638_v30, %v3648_v23  ;;  %v3657_v60 = vrot.slane %v3656_v59, 4  ;;  %v3714_v31 = vor.u32 %v3713_v58, %v3709_v62 }
 0x1e2   : > { %v3666_v53 = vor.u32 %v3665_v28, %v3661_v17  ;;  %v3704_v63 = vor.u32 %v3703_v26, %v3700_v57  ;;  %v3686_v10 = vsel %vm8863_vm2, %v3681_v20, %v3685_v47  ;;  %v3719_v28 = vrot.slane %v3717_v22, 5 }
 0x1e3   : > { %v3662_v18 = vsel %vm8863_vm2, %v3657_v60, %v3661_v17  ;;  %v5849_v61 = vrot.slane %v10768_v24, 5  ;;  %v11124_v56 = vcombine.low %v10684_v51, %v10705_v42  ;;  %v11125_v47 = vcombine.low %v10772_v11, %v10780_v4 }
 0x1e4   : > { %8040 = vmatmul.mubr.bf16.gmra.mrb[12].mxu0 %v11123_v16  ;;  %v3667_v33 = vrot.slane %v3666_v53, 4  ;;  %v3705_v19 = vrot.slane %v3704_v63, 4  ;;  %v11126_v11 = vcombine.low %v10821_v38, %v10828_v2 }
 0x1e5   : > { %8043 = vmatprep.mubr.bf16.mxu0 %v7096_v48  ;;  %v3691_v48 = vrot.slane %v3690_v49, 4 }
 0x1e6   : > { %v3672_v44 = vsel %vm8863_vm2, %v3667_v33, %v3671_v37 }
 0x1e7   : > { %v6909_v17 = vcombine.low %v3662_v18, %v3672_v44 }
 0x1e8   : > { %7852 = vmatmul.mubr.bf16.vlgmr.msra.gmra.mrb[16].mxu1 %v10624_v9  ;;  %v8729_v9 = vld [vmem:[#allocation2 + $0xbc] sm:$0x1] }
 0x1e9   : > { %7855 = vmatprep.mubr.bf16.mxu1 %v6906_v25  ;;  %v3693_v14 = vshll.u32 %v8729_v9, 16  ;;  %v7070_v25 = vrot.slane %v5696_v12, 9 }
 0x1eb   : > { %v3695_v34 = vrot.slane %v3693_v14, 5 }
 0x1ec   : > { %8044 = vmatmul.mubr.bf16.gmra.mrb[16].mxu0 %v7097_v45  ;;  %v5846_v45 = vrot.slane %v10701_v13, 5  ;;  %v3710_v13 = vsel %vm8863_vm2, %v3705_v19, %v3709_v62 }
 0x1ed   : > { %8047 = vmatprep.mubr.bf16.mxu0 %v7098_v43  ;;  %v3696_v3 = vsel %vm8863_vm2, %v3691_v48, %v3695_v34  ;;  %v3715_v43 = vrot.slane %v3714_v31, 4 }
 0x1ee   : > { %v6910_v50 = vcombine.low %v3686_v10, %v3696_v3  ;;  %v5848_v55 = vrot.slane %v5846_v45, 4  ;;  %v5847_v15 = vsel %vm9376_vm7, %v7070_v25, %v5846_v45 }
 0x1ef   : > { %v3720_v32 = vsel %vm8863_vm2, %v3715_v43, %v3719_v28 }
 0x1f0   : > { %7856 = vmatmul.mubr.bf16.gmra.mrb[20].mxu1 %v6907_v46  ;;  %v5850_v24 = vsel %vm9376_vm7, %v5848_v55, %v5849_v61  ;;  %v6911_v51 = vcombine.low %v3710_v13, %v3720_v32 }
 0x1f1   : > { %7859 = vmatprep.mubr.bf16.mxu1 %v6908_v35  ;;  %v7102_v42 = vcombine.low %v5847_v15, %v5850_v24 }
 0x1f4   : > { %8048 = vmatmul.mubr.bf16.gmra.mrb[20].mxu0 %v11124_v56 }
 0x1f5   : > { %8051 = vmatprep.mubr.bf16.mxu0 %v11125_v47 }
 0x1f8   : > { %7860 = vmatmul.mubr.bf16.gmra.mrb[24].mxu1 %v6909_v17 }
 0x1f9   : > { %7863 = vmatprep.mubr.bf16.mxu1 %v6910_v50 }
 0x1fc   : > { %8052 = vmatmul.mubr.bf16.gmra.mrb[24].mxu0 %v7101_v1 }
 0x1fd   : > { %8055 = vmatprep.mubr.bf16.mxu0 %v7102_v42 }
 0x200   : > { %7864 = vmatmul.mubr.bf16.gmra.mrb[28].mxu1 %v6911_v51 }
 0x204   : > { %8056 = vmatmul.mubr.bf16.gmra.mrb[28].mxu0 %v11126_v11 }
 0x27b   : > { %v7789_v39 = vpop.f32.mrb[0].mxu1 }
 0x27c   : > { %v3130_v4 = vpop.f32.mrb[1].mxu1 }
 0x27d   : > { %v7790_v41 = vpop.f32.mrb[2].mxu1 }
 0x27e   : > { %v3133_v30 = vpop.f32.mrb[3].mxu1 }
 0x283   : > { %v7793_v16 = vpop.f32.mrb[4].mxu1 }
 0x284   : > { %v3146_v23 = vpop.f32.mrb[5].mxu1 }
 0x285   : > { %v7794_v8 = vpop.f32.mrb[6].mxu1 }
 0x286   : > { %v3149_v59 = vpop.f32.mrb[7].mxu1 }
 0x28b   : > { %v7797_v53 = vpop.f32.mrb[8].mxu1 }
 0x28c   : > { %v10936_v54 = vpop.f32.mrb[9].mxu1 }
 0x28d   : > { %v10938_v0 = vpop.f32.mrb[10].mxu1 }
 0x28e   : > { %v10940_v27 = vpop.f32.mrb[11].mxu1 }
 0x293   : > { %v10942_v1 = vpop.f32.mrb[12].mxu1 }
 0x294   : > { %v10944_v38 = vpop.f32.mrb[13].mxu1 }
 0x295   : > { %v10946_v2 = vpop.f32.mrb[14].mxu1 }
 0x296   : > { %v10948_v5 = vpop.f32.mrb[15].mxu1 }
 0x29f   : > { %v8029_v40 = vpop.f32.mrb[0].mxu0 }
 0x2a0   : > { %v8075_v36 = vadd.f32 %v8029_v40, %v7789_v39  ;;  %v6021_v52 = vpop.f32.mrb[1].mxu0 }
 0x2a1   : > { %v8076_v29 = vadd.f32 %v6021_v52, %v3130_v4  ;;  %v8030_v21 = vpop.f32.mrb[2].mxu0 }
 0x2a2   : > { %v8077_v49 = vadd.f32 %v8030_v21, %v7790_v41  ;;  %v6024_v9 = vpop.f32.mrb[3].mxu0  ;;  %v6189_v35 = vadd.f32 %v8075_v36, %v10953_v6 }
 0x2a3   : > { %v6187_v14 = vadd.f32 %v8076_v29, %v10953_v6  ;;  %v8078_v46 = vadd.f32 %v6024_v9, %v3133_v30 }
 0x2a4   : > { %v6190_v60 = vadd.f32 %v8077_v49, %v10953_v6  ;;  %v6419_v18 = vmul.f32 %v6189_v35, %v6189_v35 }
 0x2a5   : > { %v6188_v33 = vadd.f32 %v8078_v46, %v10953_v6  ;;  %v6417_v57 = vmul.f32 %v6187_v14, %v6187_v14 }
 0x2a6   : > { %v7308_v37 = vpack.c.bf16 %v6190_v60, %v6189_v35  ;;  %v6420_v22 = vmul.f32 %v6190_v60, %v6190_v60 }
 0x2a7   : > { %v7303_v26 = vpack.c.bf16 %v6188_v33, %v6187_v14  ;;  %v6379_v62 = vadd.f32 %v6188_v33, %v6187_v14  ;;  %v6418_v58 = vmul.f32 %v6188_v33, %v6188_v33  ;;  %v8033_v20 = vpop.f32.mrb[4].mxu0 }
 0x2a8   : > { %7396 = vst [vmem:[%s10962_s18 + $0x8] sm:$0xff] %v7308_v37   ;;  %v8079_v48 = vadd.f32 %v8033_v20, %v7793_v16  ;;  %v6037_v34 = vpop.f32.mrb[5].mxu0 }
 0x2a9   : > { %7304 = vst [vmem:[%s10962_s18] sm:$0xff] %v7303_v26   ;;  %v6380_v44 = vadd.f32 %v6379_v62, %v6189_v35  ;;  %v6449_v63 = vadd.f32 %v6418_v58, %v6417_v57  ;;  %v8080_v31 = vadd.f32 %v6037_v34, %v3146_v23  ;;  %v8034_v7 = vpop.f32.mrb[6].mxu0 }
 0x2aa   : > { %v8081_v10 = vadd.f32 %v8034_v7, %v7794_v8  ;;  %v6040_v3 = vpop.f32.mrb[7].mxu0  ;;  %v6193_v19 = vadd.f32 %v8079_v48, %v10953_v6 }
 0x2ab   : > { %v6450_v45 = vadd.f32 %v6449_v63, %v6419_v18  ;;  %v6191_v12 = vadd.f32 %v8080_v31, %v10953_v6  ;;  %v6381_v17 = vadd.f32 %v6380_v44, %v6190_v60  ;;  %v8082_v50 = vadd.f32 %v6040_v3, %v3149_v59 }
 0x2ac   : > { %v6194_v43 = vadd.f32 %v8081_v10, %v10953_v6  ;;  %v6423_v11 = vmul.f32 %v6193_v19, %v6193_v19 }
 0x2ad   : > { %v6382_v28 = vadd.f32 %v6381_v17, %v6191_v12  ;;  %v6421_v25 = vmul.f32 %v6191_v12, %v6191_v12  ;;  %v6451_v55 = vadd.f32 %v6450_v45, %v6420_v22  ;;  %v6192_v61 = vadd.f32 %v8082_v50, %v10953_v6 }
 0x2ae   : > { %v7318_v56 = vpack.c.bf16 %v6194_v43, %v6193_v19  ;;  %v6424_v16 = vmul.f32 %v6194_v43, %v6194_v43 }
 0x2af   : > { %v6452_v47 = vadd.f32 %v6451_v55, %v6421_v25  ;;  %v7313_v13 = vpack.c.bf16 %v6192_v61, %v6191_v12  ;;  %v6383_v32 = vadd.f32 %v6382_v28, %v6192_v61  ;;  %v6422_v15 = vmul.f32 %v6192_v61, %v6192_v61  ;;  %v8037_v24 = vpop.f32.mrb[8].mxu0 }
 0x2b0   : > { %7398 = vst [vmem:[%s10962_s18 + $0x18] sm:$0xff] %v7318_v56   ;;  %v8083_v51 = vadd.f32 %v8037_v24, %v7797_v53  ;;  %v6053_v42 = vpop.f32.mrb[9].mxu0 }
 0x2b1   : > { %7397 = vst [vmem:[%s10962_s18 + $0x10] sm:$0xff] %v7313_v13   ;;  %v6384_v39 = vadd.f32 %v6383_v32, %v6193_v19  ;;  %v6453_v4 = vadd.f32 %v6452_v47, %v6422_v15  ;;  %v8084_v41 = vadd.f32 %v6053_v42, %v10936_v54  ;;  %v8038_v30 = vpop.f32.mrb[10].mxu0 }
 0x2b2   : > { %v8085_v23 = vadd.f32 %v8038_v30, %v10938_v0  ;;  %v6056_v8 = vpop.f32.mrb[11].mxu0  ;;  %v6197_v53 = vadd.f32 %v8083_v51, %v10953_v6 }
 0x2b3   : > { %v6454_v59 = vadd.f32 %v6453_v4, %v6423_v11  ;;  %v6195_v40 = vadd.f32 %v8084_v41, %v10953_v6  ;;  %v6385_v36 = vadd.f32 %v6384_v39, %v6194_v43  ;;  %v8086_v52 = vadd.f32 %v6056_v8, %v10940_v27 }
 0x2b4   : > { %v6198_v29 = vadd.f32 %v8085_v23, %v10953_v6  ;;  %v6427_v62 = vmul.f32 %v6197_v53, %v6197_v53 }
 0x2b5   : > { %v6386_v21 = vadd.f32 %v6385_v36, %v6195_v40  ;;  %v6425_v49 = vmul.f32 %v6195_v40, %v6195_v40  ;;  %v6455_v54 = vadd.f32 %v6454_v59, %v6424_v16  ;;  %v6196_v9 = vadd.f32 %v8086_v52, %v10953_v6 }
 0x2b6   : > { %v7328_v14 = vpack.c.bf16 %v6198_v29, %v6197_v53  ;;  %v6428_v44 = vmul.f32 %v6198_v29, %v6198_v29 }
 0x2b7   : > { %v6456_v0 = vadd.f32 %v6455_v54, %v6425_v49  ;;  %v7323_v46 = vpack.c.bf16 %v6196_v9, %v6195_v40  ;;  %v6387_v35 = vadd.f32 %v6386_v21, %v6196_v9  ;;  %v6426_v60 = vmul.f32 %v6196_v9, %v6196_v9  ;;  %v8041_v33 = vpop.f32.mrb[12].mxu0 }
 0x2b8   : > { %7400 = vst [vmem:[%s10962_s18 + $0x28] sm:$0xff] %v7328_v14   ;;  %v8087_v27 = vadd.f32 %v8041_v33, %v10942_v1  ;;  %v6069_v57 = vpop.f32.mrb[13].mxu0 }
 0x2b9   : > { %7399 = vst [vmem:[%s10962_s18 + $0x20] sm:$0xff] %v7323_v46   ;;  %v6388_v58 = vadd.f32 %v6387_v35, %v6197_v53  ;;  %v6457_v20 = vadd.f32 %v6456_v0, %v6426_v60  ;;  %v8088_v48 = vadd.f32 %v6069_v57, %v10944_v38  ;;  %v8042_v34 = vpop.f32.mrb[14].mxu0 }
 0x2ba   : > { %v8089_v63 = vadd.f32 %v8042_v34, %v10946_v2  ;;  %v6072_v31 = vpop.f32.mrb[15].mxu0  ;;  %v6201_v45 = vadd.f32 %v8087_v27, %v10953_v6 }
 0x2bb   : > { %v7853_v37 = vpop.f32.mrb[16].mxu1  ;;  %v6458_v22 = vadd.f32 %v6457_v20, %v6427_v62  ;;  %v6199_v10 = vadd.f32 %v8088_v48, %v10953_v6  ;;  %v6389_v1 = vadd.f32 %v6388_v58, %v6198_v29  ;;  %v8090_v3 = vadd.f32 %v6072_v31, %v10948_v5 }
 0x2bc   : > { %v3948_v26 = vpop.f32.mrb[17].mxu1  ;;  %v6202_v12 = vadd.f32 %v8089_v63, %v10953_v6  ;;  %v6431_v32 = vmul.f32 %v6201_v45, %v6201_v45 }
 0x2bd   : > { %v7854_v18 = vpop.f32.mrb[18].mxu1  ;;  %v6390_v17 = vadd.f32 %v6389_v1, %v6199_v10  ;;  %v6429_v38 = vmul.f32 %v6199_v10, %v6199_v10  ;;  %v6459_v50 = vadd.f32 %v6458_v22, %v6428_v44  ;;  %v6200_v19 = vadd.f32 %v8090_v3, %v10953_v6 }
 0x2be   : > { %v3951_v7 = vpop.f32.mrb[19].mxu1  ;;  %v7338_v2 = vpack.c.bf16 %v6202_v12, %v6201_v45  ;;  %v6432_v39 = vmul.f32 %v6202_v12, %v6202_v12 }
 0x2bf   : > { %v6460_v43 = vadd.f32 %v6459_v50, %v6429_v38  ;;  %v7333_v28 = vpack.c.bf16 %v6200_v19, %v6199_v10  ;;  %v6391_v25 = vadd.f32 %v6390_v17, %v6200_v19  ;;  %v6430_v55 = vmul.f32 %v6200_v19, %v6200_v19  ;;  %v8045_v61 = vpop.f32.mrb[16].mxu0 }
 0x2c0   : > { %7402 = vst [vmem:[%s10962_s18 + $0x38] sm:$0xff] %v7338_v2   ;;  %v8091_v47 = vadd.f32 %v8045_v61, %v7853_v37  ;;  %v6085_v5 = vpop.f32.mrb[17].mxu0 }
 0x2c1   : > { %7401 = vst [vmem:[%s10962_s18 + $0x30] sm:$0xff] %v7333_v28   ;;  %v6392_v15 = vadd.f32 %v6391_v25, %v6201_v45  ;;  %v6461_v24 = vadd.f32 %v6460_v43, %v6430_v55  ;;  %v8092_v51 = vadd.f32 %v6085_v5, %v3948_v26  ;;  %v8046_v42 = vpop.f32.mrb[18].mxu0 }
 0x2c2   : > { %v8093_v4 = vadd.f32 %v8046_v42, %v7854_v18  ;;  %v6088_v41 = vpop.f32.mrb[19].mxu0  ;;  %v6205_v40 = vadd.f32 %v8091_v47, %v10953_v6 }
 0x2c3   : > { %v7857_v56 = vpop.f32.mrb[20].mxu1  ;;  %v6462_v16 = vadd.f32 %v6461_v24, %v6431_v32  ;;  %v6203_v23 = vadd.f32 %v8092_v51, %v10953_v6  ;;  %v6393_v8 = vadd.f32 %v6392_v15, %v6202_v12  ;;  %v8094_v59 = vadd.f32 %v6088_v41, %v3951_v7 }
 0x2c4   : > { %v3964_v13 = vpop.f32.mrb[21].mxu1  ;;  %v6206_v36 = vadd.f32 %v8093_v4, %v10953_v6  ;;  %v6435_v27 = vmul.f32 %v6205_v40, %v6205_v40 }
 0x2c5   : > { %v7858_v11 = vpop.f32.mrb[22].mxu1  ;;  %v6394_v52 = vadd.f32 %v6393_v8, %v6203_v23  ;;  %v6433_v53 = vmul.f32 %v6203_v23, %v6203_v23  ;;  %v6463_v29 = vadd.f32 %v6462_v16, %v6432_v39  ;;  %v6204_v21 = vadd.f32 %v8094_v59, %v10953_v6 }
 0x2c6   : > { %v3967_v30 = vpop.f32.mrb[23].mxu1  ;;  %v7348_v49 = vpack.c.bf16 %v6206_v36, %v6205_v40  ;;  %v6436_v48 = vmul.f32 %v6206_v36, %v6206_v36 }
 0x2c7   : > { %v6464_v54 = vadd.f32 %v6463_v29, %v6433_v53  ;;  %v7343_v9 = vpack.c.bf16 %v6204_v21, %v6203_v23  ;;  %v6395_v14 = vadd.f32 %v6394_v52, %v6204_v21  ;;  %v6434_v0 = vmul.f32 %v6204_v21, %v6204_v21  ;;  %v8049_v46 = vpop.f32.mrb[20].mxu0 }
 0x2c8   : > { %7404 = vst [vmem:[%s10962_s18 + $0x48] sm:$0xff] %v7348_v49   ;;  %v8095_v60 = vadd.f32 %v8049_v46, %v7857_v56  ;;  %v6101_v33 = vpop.f32.mrb[21].mxu0 }
 0x2c9   : > { %7403 = vst [vmem:[%s10962_s18 + $0x40] sm:$0xff] %v7343_v9   ;;  %v6396_v57 = vadd.f32 %v6395_v14, %v6205_v40  ;;  %v6465_v26 = vadd.f32 %v6464_v54, %v6434_v0  ;;  %v8096_v62 = vadd.f32 %v6101_v33, %v3964_v13  ;;  %v8050_v58 = vpop.f32.mrb[22].mxu0 }
 0x2ca   : > { %v8097_v34 = vadd.f32 %v8050_v58, %v7858_v11  ;;  %v6104_v18 = vpop.f32.mrb[23].mxu0  ;;  %v6209_v10 = vadd.f32 %v8095_v60, %v10953_v6 }
 0x2cb   : > { %v7861_v35 = vpop.f32.mrb[24].mxu1  ;;  %v6466_v63 = vadd.f32 %v6465_v26, %v6435_v27  ;;  %v6207_v31 = vadd.f32 %v8096_v62, %v10953_v6  ;;  %v6397_v7 = vadd.f32 %v6396_v57, %v6206_v36  ;;  %v8098_v22 = vadd.f32 %v6104_v18, %v3967_v30 }
 0x2cc   : > { %v3980_v37 = vpop.f32.mrb[25].mxu1  ;;  %v6210_v1 = vadd.f32 %v8097_v34, %v10953_v6  ;;  %v6439_v47 = vmul.f32 %v6209_v10, %v6209_v10 }
 0x2cd   : > { %v7862_v20 = vpop.f32.mrb[26].mxu1  ;;  %v6398_v3 = vadd.f32 %v6397_v7, %v6207_v31  ;;  %v6437_v45 = vmul.f32 %v6207_v31, %v6207_v31  ;;  %v6467_v12 = vadd.f32 %v6466_v63, %v6436_v48  ;;  %v6208_v17 = vadd.f32 %v8098_v22, %v10953_v6 }
 0x2ce   : > { %v3983_v44 = vpop.f32.mrb[27].mxu1  ;;  %v7358_v38 = vpack.c.bf16 %v6210_v1, %v6209_v10  ;;  %v6440_v51 = vmul.f32 %v6210_v1, %v6210_v1 }
 0x2cf   : > { %v6468_v50 = vadd.f32 %v6467_v12, %v6437_v45  ;;  %v7353_v19 = vpack.c.bf16 %v6208_v17, %v6207_v31  ;;  %v6399_v2 = vadd.f32 %v6398_v3, %v6208_v17  ;;  %v6438_v43 = vmul.f32 %v6208_v17, %v6208_v17  ;;  %v8053_v28 = vpop.f32.mrb[24].mxu0 }
 0x2d0   : > { %7406 = vst [vmem:[%s10962_s18 + $0x58] sm:$0xff] %v7358_v38   ;;  %v8099_v55 = vadd.f32 %v8053_v28, %v7861_v35  ;;  %v6117_v61 = vpop.f32.mrb[25].mxu0 }
 0x2d1   : > { %7405 = vst [vmem:[%s10962_s18 + $0x50] sm:$0xff] %v7353_v19   ;;  %v6400_v5 = vadd.f32 %v6399_v2, %v6209_v10  ;;  %v6469_v13 = vadd.f32 %v6468_v50, %v6438_v43  ;;  %v8100_v32 = vadd.f32 %v6117_v61, %v3980_v37  ;;  %v8054_v15 = vpop.f32.mrb[26].mxu0 }
 0x2d2   : > { %v8101_v42 = vadd.f32 %v8054_v15, %v7862_v20  ;;  %v6120_v11 = vpop.f32.mrb[27].mxu0  ;;  %v6213_v23 = vadd.f32 %v8099_v55, %v10953_v6 }
 0x2d3   : > { %v7865_v25 = vpop.f32.mrb[28].mxu1  ;;  %v6470_v4 = vadd.f32 %v6469_v13, %v6439_v47  ;;  %v6211_v41 = vadd.f32 %v8100_v32, %v10953_v6  ;;  %v6401_v30 = vadd.f32 %v6400_v5, %v6210_v1  ;;  %v8102_v16 = vadd.f32 %v6120_v11, %v3983_v44 }
 0x2d4   : > { %v3996_v56 = vpop.f32.mrb[29].mxu1  ;;  %v6214_v8 = vadd.f32 %v8101_v42, %v10953_v6  ;;  %v6443_v46 = vmul.f32 %v6213_v23, %v6213_v23 }
 0x2d5   : > { %v7866_v24 = vpop.f32.mrb[30].mxu1  ;;  %v6402_v59 = vadd.f32 %v6401_v30, %v6211_v41  ;;  %v6441_v40 = vmul.f32 %v6211_v41, %v6211_v41  ;;  %v6471_v36 = vadd.f32 %v6470_v4, %v6440_v51  ;;  %v6212_v52 = vadd.f32 %v8102_v16, %v10953_v6 }
 0x2d6   : > { %v3999_v39 = vpop.f32.mrb[31].mxu1  ;;  %v7368_v53 = vpack.c.bf16 %v6214_v8, %v6213_v23  ;;  %v6444_v27 = vmul.f32 %v6214_v8, %v6214_v8 }
 0x2d7   : > { %v6472_v29 = vadd.f32 %v6471_v36, %v6441_v40  ;;  %v7363_v21 = vpack.c.bf16 %v6212_v52, %v6211_v41  ;;  %v6403_v49 = vadd.f32 %v6402_v59, %v6212_v52  ;;  %v6442_v54 = vmul.f32 %v6212_v52, %v6212_v52  ;;  %v8057_v9 = vpop.f32.mrb[28].mxu0 }
 0x2d8   : > { %7408 = vst [vmem:[%s10962_s18 + $0x68] sm:$0xff] %v7368_v53   ;;  %v8103_v14 = vadd.f32 %v8057_v9, %v7865_v25  ;;  %v6133_v0 = vpop.f32.mrb[29].mxu0 }
 0x2d9   : > { %7407 = vst [vmem:[%s10962_s18 + $0x60] sm:$0xff] %v7363_v21   ;;  %v6404_v35 = vadd.f32 %v6403_v49, %v6213_v23  ;;  %v6473_v60 = vadd.f32 %v6472_v29, %v6442_v54  ;;  %v8104_v33 = vadd.f32 %v6133_v0, %v3996_v56  ;;  %v8058_v37 = vpop.f32.mrb[30].mxu0 }
 0x2da   : > { %v8105_v57 = vadd.f32 %v8058_v37, %v7866_v24  ;;  %v6136_v26 = vpop.f32.mrb[31].mxu0  ;;  %v6217_v34 = vadd.f32 %v8103_v14, %v10953_v6 }
 0x2db   : > { %v6474_v62 = vadd.f32 %v6473_v60, %v6443_v46  ;;  %v6215_v58 = vadd.f32 %v8104_v33, %v10953_v6  ;;  %v6405_v20 = vadd.f32 %v6404_v35, %v6214_v8  ;;  %v8106_v48 = vadd.f32 %v6136_v26, %v3999_v39 }
 0x2dc   : > { %v6218_v18 = vadd.f32 %v8105_v57, %v10953_v6  ;;  %v6447_v12 = vmul.f32 %v6217_v34, %v6217_v34 }
 0x2dd   : > { %v6406_v44 = vadd.f32 %v6405_v20, %v6215_v58  ;;  %v6445_v63 = vmul.f32 %v6215_v58, %v6215_v58  ;;  %v6475_v31 = vadd.f32 %v6474_v62, %v6444_v27  ;;  %v6216_v7 = vadd.f32 %v8106_v48, %v10953_v6 }
 0x2de   : > { %v7378_v22 = vpack.c.bf16 %v6218_v18, %v6217_v34  ;;  %v6448_v50 = vmul.f32 %v6218_v18, %v6218_v18 }
 0x2df   : > { %v6476_v10 = vadd.f32 %v6475_v31, %v6445_v63  ;;  %v7373_v1 = vpack.c.bf16 %v6216_v7, %v6215_v58  ;;  %v6407_v3 = vadd.f32 %v6406_v44, %v6216_v7  ;;  %v6446_v45 = vmul.f32 %v6216_v7, %v6216_v7 }
 0x2e0   : > { %7410 = vst [vmem:[%s10962_s18 + $0x78] sm:$0xff] %v7378_v22  }
 0x2e1   : > { %7409 = vst [vmem:[%s10962_s18 + $0x70] sm:$0xff] %v7373_v1   ;;  %v6408_v17 = vadd.f32 %v6407_v3, %v6217_v34  ;;  %v6477_v38 = vadd.f32 %v6476_v10, %v6446_v45 }
 0x2e3   : > { %v6409_v19 = vadd.f32 %v6408_v17, %v6218_v18  ;;  %v6478_v2 = vadd.f32 %v6477_v38, %v6447_v12 }
 0x2e5   : > { %v6410_v43 = vrot.slane %v6409_v19, 4  ;;  %v6479_v28 = vadd.f32 %v6478_v2, %v6448_v50 }
 0x2e7   : > { %v6411_v25 = vadd.f32 %v6410_v43, %v6409_v19  ;;  %v6480_v55 = vrot.slane %v6479_v28, 4 }
 0x2e9   : > { %v6412_v6 = vrot.slane %v6411_v25, 2  ;;  %v6481_v61 = vadd.f32 %v6480_v55, %v6479_v28 }
 0x2eb   : > { %v6413_v56 = vadd.f32 %v6412_v6, %v6411_v25  ;;  %v6482_v47 = vrot.slane %v6481_v61, 2 }
 0x2ed   : > { %v6414_v5 = vrot.slane %v6413_v56, 1  ;;  %v6483_v13 = vadd.f32 %v6482_v47, %v6481_v61 }
 0x2ef   : > { %v6415_v32 = vadd.f32 %v6414_v5, %v6413_v56  ;;  %v6484_v15 = vrot.slane %v6483_v13, 1 }
 0x2f1   : > { %6416 = vst [vmem:[%s333_s21] sm:$0x1] %v6415_v32  ;;  %v6485_v24 = vadd.f32 %v6484_v15, %v6483_v13 }
 0x2f3   : > { %6486 = vst [vmem:[%s336_s24] sm:$0x1] %v6485_v24 }
 0x2f4 PF: > { %s19_s27 = sadd.s32 1, %s8737_s27  }
 0x2f5   : > { %p16_p4 = scmp.ge.s32.totalorder %s19_s27, 4  }
 0x2f7   :  { %18 = sbr.rel (!%p16_p4) target bundleno = 1 (0x1), region = 111 }

</bundles_post_ra>
